<compile_context>
chip_gen: v5e
topology: v5e:2x2
jax: 0.10.0
libtpu: 0.0.40
codegen_flags: <defaults>
</compile_context>

<pallas_src>
import functools

import numpy as np
import jax
import jax.numpy as jnp
from jax import lax
from jax.experimental import pallas as pl
from jax.experimental.pallas import tpu as pltpu

GT_PROB = 0.8
N_ITER = 10
COMPAT_G = 3.0     # Potts compat for the Gaussian (spatial) kernel
COMPAT_B = 10.0    # Potts compat for the bilateral kernel
SDIM_G = 5.0
SDIM_B = 20.0
SCHAN_B = 10.0
DPAD = 8           # bilateral feature-dim padding (5 -> 8)
BIG_ENERGY = 1e9   # energy for padded (non-existent) classes


def _softmax_cols(x):
    """Softmax over axis 0 (classes) of a (CPAD, N) array."""
    m = jnp.max(x, axis=0, keepdims=True)
    e = jnp.exp(x - m)
    return e / jnp.sum(e, axis=0, keepdims=True)


def _normalized_gauss(d2):
    """exp(-d2/2) with NORMALIZE_SYMMETRIC: D^{-1/2} K D^{-1/2}."""
    k = jnp.exp(-0.5 * d2)
    # K is symmetric, so column sums == row sums.  A (N,1)->(1,N) relayout of
    # the sum vector is not reliably lowered, so both orientations come from
    # two reductions over the VMEM-resident k (cheap at these N).
    nr = lax.rsqrt(jnp.sum(k, axis=1, keepdims=True) + 1e-20)   # (N, 1)
    nc = lax.rsqrt(jnp.sum(k, axis=0, keepdims=True) + 1e-20)   # (1, N)
    return nr * k * nc


def dense_crf_kernel(lbl_ref, fb_ref, sqb_row_ref, gc_ref, gr_ref,
                     out_ref, k_ref, *, num_class, cpad, p_energy, n_energy):
    """Single-invocation kernel: builds the merged compat-weighted normalized
    Gaussian kernel (bf16, cast once), runs 10 unrolled mean-field iterations
    with (CPAD,N)x(N,N) bf16 MXU matmuls / f32 accumulation, and emits the
    per-pixel argmax as a lane-dense (1, N) int32 row."""
    n = fb_ref.shape[0]

    # ---------- merged kernel matrix:  3*Kg_norm + 10*Kb_norm ----------
    # Spatial term: exact coordinate differences (no Gram matmul needed).
    dgx = gc_ref[:, 0:1] - gr_ref[0:1, :]                        # (N, N)
    dgy = gc_ref[:, 1:2] - gr_ref[1:2, :]
    kg = _normalized_gauss(dgx * dgx + dgy * dgy)

    # Bilateral term: Gram with HIGHEST precision (cancellation in d2 = 
    # |f_i|^2 + |f_j|^2 - 2 f_i.f_j matters); squared norms have none.
    fb = fb_ref[...]                                             # (N, DPAD)
    g = lax.dot_general(fb, fb, (((1,), (1,)), ((), ())),
                        preferred_element_type=jnp.float32,
                        precision=lax.Precision.HIGHEST)         # (N, N)
    sq_i = jnp.sum(fb * fb, axis=1, keepdims=True)               # (N, 1)
    sq_j = sqb_row_ref[...]                                      # (1, N)
    kb = _normalized_gauss(jnp.maximum(sq_i + sq_j - 2.0 * g, 0.0))

    # single cast to bf16 (no read-modify-write / double rounding)
    k_ref[...] = (COMPAT_G * kg + COMPAT_B * kb).astype(jnp.bfloat16)

    # ---------- unary from labels, built in-kernel:  (CPAD, N) ----------
    lbl = lbl_ref[...]                                           # (1, N) int32
    cls = lax.broadcasted_iota(jnp.int32, (cpad, n), 0)
    u = jnp.where(cls == lbl, jnp.float32(p_energy), jnp.float32(n_energy))
    u = jnp.where(cls >= num_class, jnp.float32(BIG_ENERGY), u)
    neg_u = -u

    # ---------- mean-field iterations (unrolled, Q loop-carried) ----------
    q0 = _softmax_cols(neg_u)                                    # expAndNormalize(-U)

    def body(_, q):
        # (CPAD, N) x (N, N): K is the full-width stationary MXU operand.
        m = jnp.dot(q.astype(jnp.bfloat16), k_ref[...],
                    preferred_element_type=jnp.float32)
        return _softmax_cols(neg_u + m)

    q = lax.fori_loop(0, N_ITER, body, q0, unroll=True)

    # ---------- argmax over classes (ties -> lowest index, as np.argmax) ----
    maxv = jnp.max(q, axis=0, keepdims=True)
    ids = lax.broadcasted_iota(jnp.int32, q.shape, 0)
    lbl_out = jnp.min(jnp.where(q == maxv, ids, cpad), axis=0, keepdims=True)
    out_ref[...] = lbl_out.astype(jnp.int32)                     # (1, N)


def dense_crf_pallas(img, labels, num_class):
    """img: (W, H, 3) float; labels: (W, H) int in [0, num_class).
    Returns (W, H) int32 label map — matches the module's return value."""
    W, H, _ = img.shape
    N = W * H
    cpad = max(8, ((num_class + 7) // 8) * 8)     # class dim is a sublane dim
    img = img.astype(jnp.float32)
    labels_row = labels.astype(jnp.int32).reshape(1, N)

    # unary_from_labels(labels, C, gt_prob=0.8, zero_unsure=False) energies
    p_energy = float(-np.log(GT_PROB))
    n_energy = float(-np.log((1.0 - GT_PROB) / (num_class - 1)))

    # --- create_pairwise_gaussian(sdims=(5,5)): scaled coords, both layouts --
    xs, ys = jnp.meshgrid(jnp.arange(W, dtype=jnp.float32),
                          jnp.arange(H, dtype=jnp.float32), indexing="ij")
    gx = (xs / SDIM_G).reshape(N)
    gy = (ys / SDIM_G).reshape(N)
    gc = jnp.stack([gx, gy], axis=1)                              # (N, 2)
    gr = jnp.stack([gx, gy], axis=0)                              # (2, N)

    # --- create_pairwise_bilateral(sdims=(20,20), schan=(10,)*3, chdim=2) ---
    fb = jnp.concatenate(
        [jnp.stack([xs / SDIM_B, ys / SDIM_B], axis=-1).reshape(N, 2),
         img.reshape(N, 3) / SCHAN_B], axis=1)                    # (N, 5)
    fb = jnp.pad(fb, ((0, 0), (0, DPAD - fb.shape[1])))           # (N, DPAD)
    sqb_row = jnp.sum(fb * fb, axis=1).reshape(1, N)              # (1, N)

    # --- generation-aware VMEM budget ---
    try:
        phys = pltpu.get_tpu_info().vmem_capacity_bytes
    except Exception:
        phys = 64 << 20                     # conservative (v7x) fallback
    vmem_cap = min(phys - (8 << 20), 100 << 20)
    f32_nn = N * N * 4
    need = (N * N * 2                       # bf16 merged-K scratch
            + 6 * f32_nn                    # live f32 (N,N) temps during build
            + 4 * cpad * N * 4              # U / Q / message working set
            + (N * DPAD + 8 * N) * 4        # small inputs + output
            + (2 << 20))                    # fixed overhead
    need = int(need * 1.25)
    if need > vmem_cap:
        # TODO(synk): streamed-K / row-blocked build path for large N.
        raise ValueError(
            f"dense_crf_pallas: N={N} needs ~{need >> 20} MiB VMEM but the "
            f"cap on this chip is {vmem_cap >> 20} MiB; tiled path required.")
    vmem_bytes = max(need, 4 << 20)

    out = pl.pallas_call(
        functools.partial(dense_crf_kernel, num_class=num_class, cpad=cpad,
                          p_energy=p_energy, n_energy=n_energy),
        out_shape=jax.ShapeDtypeStruct((1, N), jnp.int32),
        in_specs=[pl.BlockSpec(memory_space=pltpu.MemorySpace.VMEM)] * 5,
        out_specs=pl.BlockSpec(memory_space=pltpu.MemorySpace.VMEM),
        scratch_shapes=[pltpu.VMEM((N, N), jnp.bfloat16)],  # merged 3Kg+10Kb
        compiler_params=pltpu.CompilerParams(vmem_limit_bytes=vmem_bytes),
    )(labels_row, fb, sqb_row, gc, gr)
    return out.reshape(W, H)


def crf_reference(img, labels, num_class, n_iter=N_ITER):
    """Pure-numpy reference of the exact dense mean-field CRF."""
    W, H = labels.shape
    N = W * H
    n_e = -np.log((1.0 - GT_PROB) / (num_class - 1))
    p_e = -np.log(GT_PROB)
    U = np.full((num_class, N), n_e, dtype=np.float64)
    U[labels.reshape(-1), np.arange(N)] = p_e
    xs, ys = np.meshgrid(np.arange(W), np.arange(H), indexing="ij")
    fg = np.stack([xs / SDIM_G, ys / SDIM_G], 0).reshape(2, -1)
    fb = np.concatenate([np.stack([xs / SDIM_B, ys / SDIM_B], 0),
                         np.moveaxis(img, 2, 0) / SCHAN_B], 0).reshape(5, -1)

    def knorm(f):
        d2 = ((f[:, :, None] - f[:, None, :]) ** 2).sum(0)
        k = np.exp(-0.5 * d2)
        n = 1.0 / np.sqrt(k.sum(1) + 1e-20)
        return n[:, None] * k * n[None, :]

    Kg, Kb = knorm(fg), knorm(fb)

    def sm(x):
        m = x.max(0, keepdims=True)
        e = np.exp(x - m)
        return e / e.sum(0, keepdims=True)

    Q = sm(-U)
    for _ in range(n_iter):
        Q = sm(-U + COMPAT_G * (Q @ Kg) + COMPAT_B * (Q @ Kb))
    return np.argmax(Q, axis=0).reshape(W, H).astype(np.int32)


if __name__ == "__main__":
    key = jax.random.PRNGKey(0)
    k_img, k_lbl = jax.random.split(key)
    W, H, C = 16, 16, 4
    img = jax.random.uniform(k_img, (W, H, 3), minval=0.0, maxval=255.0,
                             dtype=jnp.float32)
    labels = jax.random.randint(k_lbl, (W, H), 0, C, dtype=jnp.int32)

    out = dense_crf_pallas(img, labels, C)
    out = jax.block_until_ready(out)

    ref = crf_reference(np.asarray(img), np.asarray(labels), C)
    agree = float(np.mean(np.asarray(out) == ref))
    assert out.shape == (W, H) and out.dtype == jnp.int32
    # bf16 message passing can flip isolated near-tie pixels vs. the f64
    # reference; anything >= 0.97 agreement means the CRF dynamics match.
    assert agree >= 0.97, f"label agreement with reference too low: {agree}"
    print("KERNEL_OK")
</pallas_src>

<mosaic_0001>
module attributes {stable_mosaic.version = 11 : i64} {
  func.func @dense_crf_kernel(%arg0: memref<1x256xi32, #tpu.memory_space<vmem>>, %arg1: memref<256x8xf32, #tpu.memory_space<vmem>>, %arg2: memref<1x256xf32, #tpu.memory_space<vmem>>, %arg3: memref<256x2xf32, #tpu.memory_space<vmem>>, %arg4: memref<2x256xf32, #tpu.memory_space<vmem>>, %arg5: memref<1x256xi32, #tpu.memory_space<vmem>>, %arg6: memref<256x256xbf16, #tpu.memory_space<vmem>>) attributes {dimension_semantics = [], scalar_prefetch = 0 : i64, scratch_operands = 1 : i64, tpu.core_type = #tpu.core_type<tc>} {
    %c0 = arith.constant 0 : index
    %c0_0 = arith.constant 0 : index
    %0 = vector.load %arg3[%c0, %c0_0] : memref<256x2xf32, #tpu.memory_space<vmem>>, vector<256x1xf32>
    %c0_1 = arith.constant 0 : index
    %c0_2 = arith.constant 0 : index
    %1 = vector.load %arg4[%c0_1, %c0_2] : memref<2x256xf32, #tpu.memory_space<vmem>>, vector<1x256xf32>
    %2 = vector.broadcast %0 : vector<256x1xf32> to vector<256x256xf32>
    %3 = vector.broadcast %1 : vector<1x256xf32> to vector<256x256xf32>
    %4 = arith.subf %2, %3 : vector<256x256xf32>
    %c0_3 = arith.constant 0 : index
    %c1 = arith.constant 1 : index
    %5 = vector.load %arg3[%c0_3, %c1] : memref<256x2xf32, #tpu.memory_space<vmem>>, vector<256x1xf32>
    %c1_4 = arith.constant 1 : index
    %c0_5 = arith.constant 0 : index
    %6 = vector.load %arg4[%c1_4, %c0_5] : memref<2x256xf32, #tpu.memory_space<vmem>>, vector<1x256xf32>
    %7 = vector.broadcast %5 : vector<256x1xf32> to vector<256x256xf32>
    %8 = vector.broadcast %6 : vector<1x256xf32> to vector<256x256xf32>
    %9 = arith.subf %7, %8 : vector<256x256xf32>
    %10 = arith.mulf %4, %4 : vector<256x256xf32>
    %11 = arith.mulf %9, %9 : vector<256x256xf32>
    %12 = arith.addf %10, %11 : vector<256x256xf32>
    %cst = arith.constant -5.000000e-01 : f32
    %13 = vector.broadcast %cst : f32 to vector<256x256xf32>
    %14 = arith.mulf %13, %12 : vector<256x256xf32>
    %15 = math.exp %14 : vector<256x256xf32>
    %cst_6 = arith.constant dense<0.000000e+00> : vector<256xf32>
    %16 = vector.multi_reduction <add>, %15, %cst_6 [1] : vector<256x256xf32> to vector<256xf32>
    %17 = vector.shape_cast %16 : vector<256xf32> to vector<256x1xf32>
    %cst_7 = arith.constant 9.99999968E-21 : f32
    %18 = vector.broadcast %cst_7 : f32 to vector<256x1xf32>
    %19 = arith.addf %17, %18 : vector<256x1xf32>
    %20 = math.rsqrt %19 : vector<256x1xf32>
    %cst_8 = arith.constant dense<0.000000e+00> : vector<256xf32>
    %21 = vector.multi_reduction <add>, %15, %cst_8 [0] : vector<256x256xf32> to vector<256xf32>
    %22 = vector.shape_cast %21 : vector<256xf32> to vector<1x256xf32>
    %cst_9 = arith.constant 9.99999968E-21 : f32
    %23 = vector.broadcast %cst_9 : f32 to vector<1x256xf32>
    %24 = arith.addf %22, %23 : vector<1x256xf32>
    %25 = math.rsqrt %24 : vector<1x256xf32>
    %26 = vector.broadcast %20 : vector<256x1xf32> to vector<256x256xf32>
    %27 = arith.mulf %26, %15 : vector<256x256xf32>
    %28 = vector.broadcast %25 : vector<1x256xf32> to vector<256x256xf32>
    %29 = arith.mulf %27, %28 : vector<256x256xf32>
    %c0_10 = arith.constant 0 : index
    %c0_11 = arith.constant 0 : index
    %30 = vector.load %arg1[%c0_10, %c0_11] : memref<256x8xf32, #tpu.memory_space<vmem>>, vector<256x8xf32>
    %cst_12 = arith.constant dense<0.000000e+00> : vector<256x256xf32>
    %31 = tpu.matmul %30, %30, %cst_12 {dimension_numbers = #tpu.dot_dimension_numbers<[1], [1], [0], [0], [0, 0, 1, 0], [], []>, precision = #tpu.contract_precision<fp32>} : vector<256x8xf32>, vector<256x8xf32>, vector<256x256xf32> -> vector<256x256xf32>
    %32 = arith.mulf %30, %30 : vector<256x8xf32>
    %cst_13 = arith.constant dense<0.000000e+00> : vector<256xf32>
    %33 = vector.multi_reduction <add>, %32, %cst_13 [1] : vector<256x8xf32> to vector<256xf32>
    %34 = vector.shape_cast %33 : vector<256xf32> to vector<256x1xf32>
    %c0_14 = arith.constant 0 : index
    %c0_15 = arith.constant 0 : index
    %35 = vector.load %arg2[%c0_14, %c0_15] : memref<1x256xf32, #tpu.memory_space<vmem>>, vector<1x256xf32>
    %36 = vector.broadcast %34 : vector<256x1xf32> to vector<256x256xf32>
    %37 = vector.broadcast %35 : vector<1x256xf32> to vector<256x256xf32>
    %38 = arith.addf %36, %37 : vector<256x256xf32>
    %cst_16 = arith.constant 2.000000e+00 : f32
    %39 = vector.broadcast %cst_16 : f32 to vector<256x256xf32>
    %40 = arith.mulf %39, %31 : vector<256x256xf32>
    %41 = arith.subf %38, %40 : vector<256x256xf32>
    %cst_17 = arith.constant 0.000000e+00 : f32
    %42 = vector.broadcast %cst_17 : f32 to vector<256x256xf32>
    %43 = arith.maximumf %41, %42 : vector<256x256xf32>
    %cst_18 = arith.constant -5.000000e-01 : f32
    %44 = vector.broadcast %cst_18 : f32 to vector<256x256xf32>
    %45 = arith.mulf %44, %43 : vector<256x256xf32>
    %46 = math.exp %45 : vector<256x256xf32>
    %cst_19 = arith.constant dense<0.000000e+00> : vector<256xf32>
    %47 = vector.multi_reduction <add>, %46, %cst_19 [1] : vector<256x256xf32> to vector<256xf32>
    %48 = vector.shape_cast %47 : vector<256xf32> to vector<256x1xf32>
    %cst_20 = arith.constant 9.99999968E-21 : f32
    %49 = vector.broadcast %cst_20 : f32 to vector<256x1xf32>
    %50 = arith.addf %48, %49 : vector<256x1xf32>
    %51 = math.rsqrt %50 : vector<256x1xf32>
    %cst_21 = arith.constant dense<0.000000e+00> : vector<256xf32>
    %52 = vector.multi_reduction <add>, %46, %cst_21 [0] : vector<256x256xf32> to vector<256xf32>
    %53 = vector.shape_cast %52 : vector<256xf32> to vector<1x256xf32>
    %cst_22 = arith.constant 9.99999968E-21 : f32
    %54 = vector.broadcast %cst_22 : f32 to vector<1x256xf32>
    %55 = arith.addf %53, %54 : vector<1x256xf32>
    %56 = math.rsqrt %55 : vector<1x256xf32>
    %57 = vector.broadcast %51 : vector<256x1xf32> to vector<256x256xf32>
    %58 = arith.mulf %57, %46 : vector<256x256xf32>
    %59 = vector.broadcast %56 : vector<1x256xf32> to vector<256x256xf32>
    %60 = arith.mulf %58, %59 : vector<256x256xf32>
    %cst_23 = arith.constant 3.000000e+00 : f32
    %61 = vector.broadcast %cst_23 : f32 to vector<256x256xf32>
    %62 = arith.mulf %61, %29 : vector<256x256xf32>
    %cst_24 = arith.constant 1.000000e+01 : f32
    %63 = vector.broadcast %cst_24 : f32 to vector<256x256xf32>
    %64 = arith.mulf %63, %60 : vector<256x256xf32>
    %65 = arith.addf %62, %64 : vector<256x256xf32>
    %66 = arith.truncf %65 : vector<256x256xf32> to vector<256x256xbf16>
    %c0_25 = arith.constant 0 : index
    %c0_26 = arith.constant 0 : index
    %67 = vector.load %arg6[%c0_25, %c0_26] : memref<256x256xbf16, #tpu.memory_space<vmem>>, vector<256x256xbf16>
    tpu.vector_store %arg6[%c0_25, %c0_26], %66 {strides = array<i32>} : memref<256x256xbf16, #tpu.memory_space<vmem>>, vector<256x256xbf16>,
    %c0_27 = arith.constant 0 : index
    %c0_28 = arith.constant 0 : index
    %68 = vector.load %arg0[%c0_27, %c0_28] : memref<1x256xi32, #tpu.memory_space<vmem>>, vector<1x256xi32>
    %69 = tpu.iota {dimensions = array<i32: 0>} : vector<8x256xi32>
    %70 = vector.broadcast %68 : vector<1x256xi32> to vector<8x256xi32>
    %71 = arith.cmpi eq, %69, %70 : vector<8x256xi32>
    %cst_29 = arith.constant 0.223143548 : f32
    %cst_30 = arith.constant 2.70805025 : f32
    %72 = vector.broadcast %cst_29 : f32 to vector<8x256xf32>
    %73 = vector.broadcast %cst_30 : f32 to vector<8x256xf32>
    %74 = arith.select %71, %72, %73 : vector<8x256xi1>, vector<8x256xf32>
    %c4_i32 = arith.constant 4 : i32
    %75 = vector.broadcast %c4_i32 : i32 to vector<8x256xi32>
    %76 = arith.cmpi sge, %69, %75 : vector<8x256xi32>
    %cst_31 = arith.constant 1.000000e+09 : f32
    %77 = vector.broadcast %cst_31 : f32 to vector<8x256xf32>
    %78 = arith.select %76, %77, %74 : vector<8x256xi1>, vector<8x256xf32>
    %cst_32 = arith.constant 0.000000e+00 : f32
    %79 = vector.broadcast %cst_32 : f32 to vector<8x256xf32>
    %80 = arith.subf %79, %78 : vector<8x256xf32>
    %cst_33 = arith.constant dense<0xFF800000> : vector<256xf32>
    %81 = vector.multi_reduction <maximumf>, %80, %cst_33 [0] : vector<8x256xf32> to vector<256xf32>
    %82 = vector.shape_cast %81 : vector<256xf32> to vector<1x256xf32>
    %83 = vector.broadcast %82 : vector<1x256xf32> to vector<8x256xf32>
    %84 = arith.subf %80, %83 : vector<8x256xf32>
    %85 = math.exp %84 : vector<8x256xf32>
    %cst_34 = arith.constant dense<0.000000e+00> : vector<256xf32>
    %86 = vector.multi_reduction <add>, %85, %cst_34 [0] : vector<8x256xf32> to vector<256xf32>
    %87 = vector.shape_cast %86 : vector<256xf32> to vector<1x256xf32>
    %88 = vector.broadcast %87 : vector<1x256xf32> to vector<8x256xf32>
    %89 = arith.divf %85, %88 : vector<8x256xf32>
    %c0_i32 = arith.constant 0 : i32
    %90 = arith.truncf %89 : vector<8x256xf32> to vector<8x256xbf16>
    %c0_35 = arith.constant 0 : index
    %c0_36 = arith.constant 0 : index
    %91 = vector.load %arg6[%c0_35, %c0_36] : memref<256x256xbf16, #tpu.memory_space<vmem>>, vector<256x256xbf16>
    %cst_37 = arith.constant dense<0.000000e+00> : vector<8x256xf32>
    %92 = tpu.matmul %90, %91, %cst_37 {dimension_numbers = #tpu.dot_dimension_numbers<[1], [0], [0], [1], [0, 0, 1, 1], [], []>} : vector<8x256xbf16>, vector<256x256xbf16>, vector<8x256xf32> -> vector<8x256xf32>
    %93 = arith.addf %80, %92 : vector<8x256xf32>
    %cst_38 = arith.constant dense<0xFF800000> : vector<256xf32>
    %94 = vector.multi_reduction <maximumf>, %93, %cst_38 [0] : vector<8x256xf32> to vector<256xf32>
    %95 = vector.shape_cast %94 : vector<256xf32> to vector<1x256xf32>
    %96 = vector.broadcast %95 : vector<1x256xf32> to vector<8x256xf32>
    %97 = arith.subf %93, %96 : vector<8x256xf32>
    %98 = math.exp %97 : vector<8x256xf32>
    %cst_39 = arith.constant dense<0.000000e+00> : vector<256xf32>
    %99 = vector.multi_reduction <add>, %98, %cst_39 [0] : vector<8x256xf32> to vector<256xf32>
    %100 = vector.shape_cast %99 : vector<256xf32> to vector<1x256xf32>
    %101 = vector.broadcast %100 : vector<1x256xf32> to vector<8x256xf32>
    %102 = arith.divf %98, %101 : vector<8x256xf32>
    %c1_i32 = arith.constant 1 : i32
    %103 = arith.truncf %102 : vector<8x256xf32> to vector<8x256xbf16>
    %c0_40 = arith.constant 0 : index
    %c0_41 = arith.constant 0 : index
    %104 = vector.load %arg6[%c0_40, %c0_41] : memref<256x256xbf16, #tpu.memory_space<vmem>>, vector<256x256xbf16>
    %cst_42 = arith.constant dense<0.000000e+00> : vector<8x256xf32>
    %105 = tpu.matmul %103, %104, %cst_42 {dimension_numbers = #tpu.dot_dimension_numbers<[1], [0], [0], [1], [0, 0, 1, 1], [], []>} : vector<8x256xbf16>, vector<256x256xbf16>, vector<8x256xf32> -> vector<8x256xf32>
    %106 = arith.addf %80, %105 : vector<8x256xf32>
    %cst_43 = arith.constant dense<0xFF800000> : vector<256xf32>
    %107 = vector.multi_reduction <maximumf>, %106, %cst_43 [0] : vector<8x256xf32> to vector<256xf32>
    %108 = vector.shape_cast %107 : vector<256xf32> to vector<1x256xf32>
    %109 = vector.broadcast %108 : vector<1x256xf32> to vector<8x256xf32>
    %110 = arith.subf %106, %109 : vector<8x256xf32>
    %111 = math.exp %110 : vector<8x256xf32>
    %cst_44 = arith.constant dense<0.000000e+00> : vector<256xf32>
    %112 = vector.multi_reduction <add>, %111, %cst_44 [0] : vector<8x256xf32> to vector<256xf32>
    %113 = vector.shape_cast %112 : vector<256xf32> to vector<1x256xf32>
    %114 = vector.broadcast %113 : vector<1x256xf32> to vector<8x256xf32>
    %115 = arith.divf %111, %114 : vector<8x256xf32>
    %c2_i32 = arith.constant 2 : i32
    %116 = arith.truncf %115 : vector<8x256xf32> to vector<8x256xbf16>
    %c0_45 = arith.constant 0 : index
    %c0_46 = arith.constant 0 : index
    %117 = vector.load %arg6[%c0_45, %c0_46] : memref<256x256xbf16, #tpu.memory_space<vmem>>, vector<256x256xbf16>
    %cst_47 = arith.constant dense<0.000000e+00> : vector<8x256xf32>
    %118 = tpu.matmul %116, %117, %cst_47 {dimension_numbers = #tpu.dot_dimension_numbers<[1], [0], [0], [1], [0, 0, 1, 1], [], []>} : vector<8x256xbf16>, vector<256x256xbf16>, vector<8x256xf32> -> vector<8x256xf32>
    %119 = arith.addf %80, %118 : vector<8x256xf32>
    %cst_48 = arith.constant dense<0xFF800000> : vector<256xf32>
    %120 = vector.multi_reduction <maximumf>, %119, %cst_48 [0] : vector<8x256xf32> to vector<256xf32>
    %121 = vector.shape_cast %120 : vector<256xf32> to vector<1x256xf32>
    %122 = vector.broadcast %121 : vector<1x256xf32> to vector<8x256xf32>
    %123 = arith.subf %119, %122 : vector<8x256xf32>
    %124 = math.exp %123 : vector<8x256xf32>
    %cst_49 = arith.constant dense<0.000000e+00> : vector<256xf32>
    %125 = vector.multi_reduction <add>, %124, %cst_49 [0] : vector<8x256xf32> to vector<256xf32>
    %126 = vector.shape_cast %125 : vector<256xf32> to vector<1x256xf32>
    %127 = vector.broadcast %126 : vector<1x256xf32> to vector<8x256xf32>
    %128 = arith.divf %124, %127 : vector<8x256xf32>
    %c3_i32 = arith.constant 3 : i32
    %129 = arith.truncf %128 : vector<8x256xf32> to vector<8x256xbf16>
    %c0_50 = arith.constant 0 : index
    %c0_51 = arith.constant 0 : index
    %130 = vector.load %arg6[%c0_50, %c0_51] : memref<256x256xbf16, #tpu.memory_space<vmem>>, vector<256x256xbf16>
    %cst_52 = arith.constant dense<0.000000e+00> : vector<8x256xf32>
    %131 = tpu.matmul %129, %130, %cst_52 {dimension_numbers = #tpu.dot_dimension_numbers<[1], [0], [0], [1], [0, 0, 1, 1], [], []>} : vector<8x256xbf16>, vector<256x256xbf16>, vector<8x256xf32> -> vector<8x256xf32>
    %132 = arith.addf %80, %131 : vector<8x256xf32>
    %cst_53 = arith.constant dense<0xFF800000> : vector<256xf32>
    %133 = vector.multi_reduction <maximumf>, %132, %cst_53 [0] : vector<8x256xf32> to vector<256xf32>
    %134 = vector.shape_cast %133 : vector<256xf32> to vector<1x256xf32>
    %135 = vector.broadcast %134 : vector<1x256xf32> to vector<8x256xf32>
    %136 = arith.subf %132, %135 : vector<8x256xf32>
    %137 = math.exp %136 : vector<8x256xf32>
    %cst_54 = arith.constant dense<0.000000e+00> : vector<256xf32>
    %138 = vector.multi_reduction <add>, %137, %cst_54 [0] : vector<8x256xf32> to vector<256xf32>
    %139 = vector.shape_cast %138 : vector<256xf32> to vector<1x256xf32>
    %140 = vector.broadcast %139 : vector<1x256xf32> to vector<8x256xf32>
    %141 = arith.divf %137, %140 : vector<8x256xf32>
    %c4_i32_55 = arith.constant 4 : i32
    %142 = arith.truncf %141 : vector<8x256xf32> to vector<8x256xbf16>
    %c0_56 = arith.constant 0 : index
    %c0_57 = arith.constant 0 : index
    %143 = vector.load %arg6[%c0_56, %c0_57] : memref<256x256xbf16, #tpu.memory_space<vmem>>, vector<256x256xbf16>
    %cst_58 = arith.constant dense<0.000000e+00> : vector<8x256xf32>
    %144 = tpu.matmul %142, %143, %cst_58 {dimension_numbers = #tpu.dot_dimension_numbers<[1], [0], [0], [1], [0, 0, 1, 1], [], []>} : vector<8x256xbf16>, vector<256x256xbf16>, vector<8x256xf32> -> vector<8x256xf32>
    %145 = arith.addf %80, %144 : vector<8x256xf32>
    %cst_59 = arith.constant dense<0xFF800000> : vector<256xf32>
    %146 = vector.multi_reduction <maximumf>, %145, %cst_59 [0] : vector<8x256xf32> to vector<256xf32>
    %147 = vector.shape_cast %146 : vector<256xf32> to vector<1x256xf32>
    %148 = vector.broadcast %147 : vector<1x256xf32> to vector<8x256xf32>
    %149 = arith.subf %145, %148 : vector<8x256xf32>
    %150 = math.exp %149 : vector<8x256xf32>
    %cst_60 = arith.constant dense<0.000000e+00> : vector<256xf32>
    %151 = vector.multi_reduction <add>, %150, %cst_60 [0] : vector<8x256xf32> to vector<256xf32>
    %152 = vector.shape_cast %151 : vector<256xf32> to vector<1x256xf32>
    %153 = vector.broadcast %152 : vector<1x256xf32> to vector<8x256xf32>
    %154 = arith.divf %150, %153 : vector<8x256xf32>
    %c5_i32 = arith.constant 5 : i32
    %155 = arith.truncf %154 : vector<8x256xf32> to vector<8x256xbf16>
    %c0_61 = arith.constant 0 : index
    %c0_62 = arith.constant 0 : index
    %156 = vector.load %arg6[%c0_61, %c0_62] : memref<256x256xbf16, #tpu.memory_space<vmem>>, vector<256x256xbf16>
    %cst_63 = arith.constant dense<0.000000e+00> : vector<8x256xf32>
    %157 = tpu.matmul %155, %156, %cst_63 {dimension_numbers = #tpu.dot_dimension_numbers<[1], [0], [0], [1], [0, 0, 1, 1], [], []>} : vector<8x256xbf16>, vector<256x256xbf16>, vector<8x256xf32> -> vector<8x256xf32>
    %158 = arith.addf %80, %157 : vector<8x256xf32>
    %cst_64 = arith.constant dense<0xFF800000> : vector<256xf32>
    %159 = vector.multi_reduction <maximumf>, %158, %cst_64 [0] : vector<8x256xf32> to vector<256xf32>
    %160 = vector.shape_cast %159 : vector<256xf32> to vector<1x256xf32>
    %161 = vector.broadcast %160 : vector<1x256xf32> to vector<8x256xf32>
    %162 = arith.subf %158, %161 : vector<8x256xf32>
    %163 = math.exp %162 : vector<8x256xf32>
    %cst_65 = arith.constant dense<0.000000e+00> : vector<256xf32>
    %164 = vector.multi_reduction <add>, %163, %cst_65 [0] : vector<8x256xf32> to vector<256xf32>
    %165 = vector.shape_cast %164 : vector<256xf32> to vector<1x256xf32>
    %166 = vector.broadcast %165 : vector<1x256xf32> to vector<8x256xf32>
    %167 = arith.divf %163, %166 : vector<8x256xf32>
    %c6_i32 = arith.constant 6 : i32
    %168 = arith.truncf %167 : vector<8x256xf32> to vector<8x256xbf16>
    %c0_66 = arith.constant 0 : index
    %c0_67 = arith.constant 0 : index
    %169 = vector.load %arg6[%c0_66, %c0_67] : memref<256x256xbf16, #tpu.memory_space<vmem>>, vector<256x256xbf16>
    %cst_68 = arith.constant dense<0.000000e+00> : vector<8x256xf32>
    %170 = tpu.matmul %168, %169, %cst_68 {dimension_numbers = #tpu.dot_dimension_numbers<[1], [0], [0], [1], [0, 0, 1, 1], [], []>} : vector<8x256xbf16>, vector<256x256xbf16>, vector<8x256xf32> -> vector<8x256xf32>
    %171 = arith.addf %80, %170 : vector<8x256xf32>
    %cst_69 = arith.constant dense<0xFF800000> : vector<256xf32>
    %172 = vector.multi_reduction <maximumf>, %171, %cst_69 [0] : vector<8x256xf32> to vector<256xf32>
    %173 = vector.shape_cast %172 : vector<256xf32> to vector<1x256xf32>
    %174 = vector.broadcast %173 : vector<1x256xf32> to vector<8x256xf32>
    %175 = arith.subf %171, %174 : vector<8x256xf32>
    %176 = math.exp %175 : vector<8x256xf32>
    %cst_70 = arith.constant dense<0.000000e+00> : vector<256xf32>
    %177 = vector.multi_reduction <add>, %176, %cst_70 [0] : vector<8x256xf32> to vector<256xf32>
    %178 = vector.shape_cast %177 : vector<256xf32> to vector<1x256xf32>
    %179 = vector.broadcast %178 : vector<1x256xf32> to vector<8x256xf32>
    %180 = arith.divf %176, %179 : vector<8x256xf32>
    %c7_i32 = arith.constant 7 : i32
    %181 = arith.truncf %180 : vector<8x256xf32> to vector<8x256xbf16>
    %c0_71 = arith.constant 0 : index
    %c0_72 = arith.constant 0 : index
    %182 = vector.load %arg6[%c0_71, %c0_72] : memref<256x256xbf16, #tpu.memory_space<vmem>>, vector<256x256xbf16>
    %cst_73 = arith.constant dense<0.000000e+00> : vector<8x256xf32>
    %183 = tpu.matmul %181, %182, %cst_73 {dimension_numbers = #tpu.dot_dimension_numbers<[1], [0], [0], [1], [0, 0, 1, 1], [], []>} : vector<8x256xbf16>, vector<256x256xbf16>, vector<8x256xf32> -> vector<8x256xf32>
    %184 = arith.addf %80, %183 : vector<8x256xf32>
    %cst_74 = arith.constant dense<0xFF800000> : vector<256xf32>
    %185 = vector.multi_reduction <maximumf>, %184, %cst_74 [0] : vector<8x256xf32> to vector<256xf32>
    %186 = vector.shape_cast %185 : vector<256xf32> to vector<1x256xf32>
    %187 = vector.broadcast %186 : vector<1x256xf32> to vector<8x256xf32>
    %188 = arith.subf %184, %187 : vector<8x256xf32>
    %189 = math.exp %188 : vector<8x256xf32>
    %cst_75 = arith.constant dense<0.000000e+00> : vector<256xf32>
    %190 = vector.multi_reduction <add>, %189, %cst_75 [0] : vector<8x256xf32> to vector<256xf32>
    %191 = vector.shape_cast %190 : vector<256xf32> to vector<1x256xf32>
    %192 = vector.broadcast %191 : vector<1x256xf32> to vector<8x256xf32>
    %193 = arith.divf %189, %192 : vector<8x256xf32>
    %c8_i32 = arith.constant 8 : i32
    %194 = arith.truncf %193 : vector<8x256xf32> to vector<8x256xbf16>
    %c0_76 = arith.constant 0 : index
    %c0_77 = arith.constant 0 : index
    %195 = vector.load %arg6[%c0_76, %c0_77] : memref<256x256xbf16, #tpu.memory_space<vmem>>, vector<256x256xbf16>
    %cst_78 = arith.constant dense<0.000000e+00> : vector<8x256xf32>
    %196 = tpu.matmul %194, %195, %cst_78 {dimension_numbers = #tpu.dot_dimension_numbers<[1], [0], [0], [1], [0, 0, 1, 1], [], []>} : vector<8x256xbf16>, vector<256x256xbf16>, vector<8x256xf32> -> vector<8x256xf32>
    %197 = arith.addf %80, %196 : vector<8x256xf32>
    %cst_79 = arith.constant dense<0xFF800000> : vector<256xf32>
    %198 = vector.multi_reduction <maximumf>, %197, %cst_79 [0] : vector<8x256xf32> to vector<256xf32>
    %199 = vector.shape_cast %198 : vector<256xf32> to vector<1x256xf32>
    %200 = vector.broadcast %199 : vector<1x256xf32> to vector<8x256xf32>
    %201 = arith.subf %197, %200 : vector<8x256xf32>
    %202 = math.exp %201 : vector<8x256xf32>
    %cst_80 = arith.constant dense<0.000000e+00> : vector<256xf32>
    %203 = vector.multi_reduction <add>, %202, %cst_80 [0] : vector<8x256xf32> to vector<256xf32>
    %204 = vector.shape_cast %203 : vector<256xf32> to vector<1x256xf32>
    %205 = vector.broadcast %204 : vector<1x256xf32> to vector<8x256xf32>
    %206 = arith.divf %202, %205 : vector<8x256xf32>
    %c9_i32 = arith.constant 9 : i32
    %207 = arith.truncf %206 : vector<8x256xf32> to vector<8x256xbf16>
    %c0_81 = arith.constant 0 : index
    %c0_82 = arith.constant 0 : index
    %208 = vector.load %arg6[%c0_81, %c0_82] : memref<256x256xbf16, #tpu.memory_space<vmem>>, vector<256x256xbf16>
    %cst_83 = arith.constant dense<0.000000e+00> : vector<8x256xf32>
    %209 = tpu.matmul %207, %208, %cst_83 {dimension_numbers = #tpu.dot_dimension_numbers<[1], [0], [0], [1], [0, 0, 1, 1], [], []>} : vector<8x256xbf16>, vector<256x256xbf16>, vector<8x256xf32> -> vector<8x256xf32>
    %210 = arith.addf %80, %209 : vector<8x256xf32>
    %cst_84 = arith.constant dense<0xFF800000> : vector<256xf32>
    %211 = vector.multi_reduction <maximumf>, %210, %cst_84 [0] : vector<8x256xf32> to vector<256xf32>
    %212 = vector.shape_cast %211 : vector<256xf32> to vector<1x256xf32>
    %213 = vector.broadcast %212 : vector<1x256xf32> to vector<8x256xf32>
    %214 = arith.subf %210, %213 : vector<8x256xf32>
    %215 = math.exp %214 : vector<8x256xf32>
    %cst_85 = arith.constant dense<0.000000e+00> : vector<256xf32>
    %216 = vector.multi_reduction <add>, %215, %cst_85 [0] : vector<8x256xf32> to vector<256xf32>
    %217 = vector.shape_cast %216 : vector<256xf32> to vector<1x256xf32>
    %218 = vector.broadcast %217 : vector<1x256xf32> to vector<8x256xf32>
    %219 = arith.divf %215, %218 : vector<8x256xf32>
    %cst_86 = arith.constant dense<0xFF800000> : vector<256xf32>
    %220 = vector.multi_reduction <maximumf>, %219, %cst_86 [0] : vector<8x256xf32> to vector<256xf32>
    %221 = vector.shape_cast %220 : vector<256xf32> to vector<1x256xf32>
    %222 = tpu.iota {dimensions = array<i32: 0>} : vector<8x256xi32>
    %223 = vector.broadcast %221 : vector<1x256xf32> to vector<8x256xf32>
    %224 = arith.cmpf oeq, %219, %223 : vector<8x256xf32>
    %c8_i32_87 = arith.constant 8 : i32
    %225 = vector.broadcast %c8_i32_87 : i32 to vector<8x256xi32>
    %226 = arith.select %224, %222, %225 : vector<8x256xi1>, vector<8x256xi32>
    %cst_88 = arith.constant dense<2147483647> : vector<256xi32>
    %227 = vector.multi_reduction <minsi>, %226, %cst_88 [0] : vector<8x256xi32> to vector<256xi32>
    %228 = vector.shape_cast %227 : vector<256xi32> to vector<1x256xi32>
    %c0_89 = arith.constant 0 : index
    %c0_90 = arith.constant 0 : index
    %229 = vector.load %arg5[%c0_89, %c0_90] : memref<1x256xi32, #tpu.memory_space<vmem>>, vector<1x256xi32>
    tpu.vector_store %arg5[%c0_89, %c0_90], %228 {strides = array<i32>} : memref<1x256xi32, #tpu.memory_space<vmem>>, vector<1x256xi32>,
    return
  }
}

</mosaic_0001>

<bundles_post_ra>
// kernel: tpu_custom_call.1
= control target key start
LH: loop header
LB: loop body
LE: loop exit
PB: predicated region body
PF: predicated region fallthrough
CT: control target
= control target key end

     0   :  { %vm1570_vm0 = vcmask 64512   ;;  %s13422_s0 = inlined_call_operand.vmem [shape: s32[1,256], index: 0, kind: input, shape index: {}]   ;;  %s13423_s1 = inlined_call_operand.vmem [shape: f32[256,8], index: 1, kind: input, shape index: {}]   ;;  %s13424_s2 = inlined_call_operand.vmem [shape: f32[1,256], index: 2, kind: input, shape index: {}]   ;;  %s13425_s3 = inlined_call_operand.vmem [shape: f32[256,2], index: 3, kind: input, shape index: {}]   ;;  %s13426_s4 = inlined_call_operand.vmem [shape: f32[2,256], index: 4, kind: input, shape index: {}]   ;;  %s13427_s5 = inlined_call_operand.hbm [shape: s32[1,256], index: 5, kind: output, shape index: {}]  }
   0x1   :  { %v7989_v0 = vld [vmem:[%s13423_s1 + $0xf0] sm:$0xff]  ;;  %v7994_v1 = vld [vmem:[%s13423_s1 + $0x78] sm:$0xff]  ;;  %v8010_v6 = vld [vmem:[%s13423_s1 + $0x88] sm:$0xff] }
   0x2   :  { %13991 = vst [vmem:[#allocation6_spill] sm:$0xff] %v7994_v1  ;;  %v7999_v2 = vld [vmem:[%s13423_s1 + $0x70] sm:$0xff]  ;;  %v4301_v3 = vmul.f32 %v7989_v0, %v7989_v0  ;;  %v1617_v4 = vsel %vm1570_vm0, %v7994_v1, 0  ;;  %v8015_v7 = vld [vmem:[%s13423_s1 + $0x68] sm:$0xff]  ;;  %v8020_v8 = vld [vmem:[%s13423_s1 + $0x60] sm:$0xff]  ;;  %v4288_v15 = vmul.f32 %v8010_v6, %v8010_v6 }
   0x3   :  { %13992 = vst [vmem:[#allocation7_spill] sm:$0xff] %v7999_v2  ;;  %v1614_v5 = vsel %vm1570_vm0, %v7999_v2, 0  ;;  %v8022_v9 = vand.u32 4294901760, %v1617_v4  ;;  %v1611_v12 = vsel %vm1570_vm0, %v8015_v7, 0  ;;  %v1608_v13 = vsel %vm1570_vm0, %v8020_v8, 0  ;;  %v8040_v16 = vld [vmem:[%s13423_s1 + $0x58] sm:$0xff] }
   0x4   :  { %13993 = vst [vmem:[#allocation8_spill] sm:$0xff] %v8010_v6  ;;  %v8024_v10 = vand.u32 4294901760, %v1614_v5  ;;  %v4393_v11 = vsel %vm1570_vm0, %v4301_v3, 0.0  ;;  %v8043_v17 = vand.u32 4294901760, %v1611_v12  ;;  %v8048_v19 = vand.u32 4294901760, %v1608_v13  ;;  %v8057_v21 = vld [vmem:[%s13423_s1 + $0xf8] sm:$0xff] }
   0x5   :  { %13994 = vst [vmem:[#allocation9_spill] sm:$0xff] %v8022_v9  ;;  %4394 = vadd.xlane.f32.xlu1 %v4393_v11  ;;  %1668 = vmatpush.xpose.msra.mxu0 %v8022_v9  ;;  %v8033_v14 = vsub.f32 %v1617_v4, %v8022_v9  ;;  %v1605_v24 = vsel %vm1570_vm0, %v8040_v16, 0  ;;  %v8070_v25 = vld [vmem:[%s13423_s1 + $0x50] sm:$0xff] }
   0x6   :  { %13995 = vst [vmem:[#allocation10_spill] sm:$0xff] %v8024_v10  ;;  %2391 = vmatpush.xpose.msra.mxu3 %v8022_v9  ;;  %v8046_v18 = vsub.f32 %v1614_v5, %v8024_v10  ;;  %v8063_v23 = vsub.f32 %v1611_v12, %v8043_v17 }
   0x7   :  { %13996 = vst [vmem:[#allocation11_spill] sm:$0xff] %v8033_v14  ;;  %2183 = vmatpush.xpose.msra.mxu2 %v8033_v14  ;;  %v8052_v20 = vand.u32 4294901760, %v8033_v14 }
   0x8   :  { %13997 = vst [vmem:[#allocation12_spill] sm:$0xff] %v8043_v17  ;;  %v8060_v22 = vand.u32 4294901760, %v8046_v18 }
   0x9   :  { %13998 = vst [vmem:[#allocation13_spill] sm:$0xff] %v8046_v18 }
   0xa   :  { %13999 = vst [vmem:[#allocation14_spill] sm:$0xff] %v8048_v19 }
   0xb   :  { %14000 = vst [vmem:[#allocation15_spill] sm:$0xff] %v8052_v20 }
   0xc   :  { %14001 = vst [vmem:[#allocation16_spill] sm:$0xff] %v8060_v22 }
   0xd   :  { %14002 = vst [vmem:[#allocation17_spill] sm:$0xff] %v8063_v23 }
   0xe   :  { %10 = vsyncpa [#allocation4], 0  ;;  %1670 = vmatpush.xpose.msra.mxu0 %v8024_v10  ;;  %v4354_v26 = vsel %vm1570_vm0, %v4288_v15, 0.0  ;;  %v1822_v27 = vsub.f32 %v8033_v14, %v8052_v20  ;;  %v8076_v28 = vand.u32 4294901760, %v1605_v24  ;;  %2393 = vmatpush.xpose.msra.mxu3 %v8024_v10  ;;  %v1814_v29 = vsub.f32 %v8046_v18, %v8060_v22  ;;  %v8084_v30 = vld [vmem:[%s13423_s1 + $0xe8] sm:$0xff]  ;;  %v8116_v41 = vld [vmem:[%s13423_s1 + $0x90] sm:$0xff] }
   0xf   :  { %v8087_v31 = vand.u32 4294901760, %v8063_v23  ;;  %v8090_v32 = vsub.f32 %v1608_v13, %v8048_v19  ;;  %v4302_v33 = vmul.f32 %v8057_v21, %v8057_v21  ;;  %2186 = vmatpush.xpose.msra.mxu2 %v8046_v18  ;;  %v1602_v35 = vsel %vm1570_vm0, %v8070_v25, 0  ;;  %v8103_v37 = vld [vmem:[%s13423_s1 + $0x48] sm:$0xff]  ;;  %4355 = vadd.xlane.f32.xlu1 %v4354_v26  ;;  %14009 = vst [vmem:[#allocation24_spill] sm:$0xff] %v8116_v41  ;;  %v8130_v45 = vld [vmem:[%s13423_s1] sm:$0xff]  ;;  %v8161_v55 = vld [vmem:[%s13423_s1 + $0x98] sm:$0xff] }
  0x10   :  { %14003 = vst [vmem:[#allocation18_spill] sm:$0xff] %v8076_v28  ;;  %v8094_v34 = vand.u32 4294901760, %v1822_v27  ;;  %v4300_v38 = vmul.f32 %v8084_v30, %v8084_v30  ;;  %v8108_v39 = vand.u32 4294901760, %v1602_v35  ;;  %v8111_v40 = vsub.f32 %v1605_v24, %v8076_v28  ;;  %v8138_v47 = vld [vmem:[%s13423_s1 + $0x40] sm:$0xff]  ;;  %v8173_v60 = vld [vmem:[%s13423_s1 + $0x38] sm:$0xff]  ;;  %v8188_v4 = vld [vmem:[%s13423_s1 + $0xd0] sm:$0xff] }
  0x11   :  { %14004 = vst [vmem:[#allocation19_spill] sm:$0xff] %v8087_v31  ;;  %v4396_v36 = vsel %vm1570_vm0, %v4302_v33, 0.0  ;;  %v8119_v42 = vand.u32 4294901760, %v1814_v29  ;;  %v1806_v43 = vsub.f32 %v8063_v23, %v8087_v31  ;;  %v8125_v44 = vand.u32 4294901760, %v8090_v32  ;;  %v8193_v5 = vld [vmem:[%s13423_s1 + $0x8] sm:$0xff]  ;;  %v8208_v15 = vld [vmem:[%s13423_s1 + $0x30] sm:$0xff] }
  0x12   :  { %14005 = vst [vmem:[#allocation20_spill] sm:$0xff] %v8090_v32  ;;  %1672 = vmatpush.xpose.msra.mxu0 %v8043_v17  ;;  %1961 = vmatpush.xpose.msra.mxu1 %v8094_v34  ;;  %v1599_v46 = vsel %vm1570_vm0, %v8103_v37, 0  ;;  %v4289_v48 = vmul.f32 %v8116_v41, %v8116_v41  ;;  %v4390_v49 = vsel %vm1570_vm0, %v4300_v38, 0.0  ;;  %v8145_v50 = vand.u32 4294901760, %v8111_v40  ;;  %s7256_s13 = sshll.u32 %s13427_s5, 4  ;;  %s7257_s13 = int_to_ptr.hbm [resolvable:$true] %s7256_s13 }
  0x13   :  { %14006 = vst [vmem:[#allocation21_spill] sm:$0xff] %v8094_v34  ;;  %2395 = vmatpush.xpose.msra.mxu3 %v8043_v17  ;;  %2189 = vmatpush.xpose.msra.mxu2 %v8063_v23  ;;  %v8148_v51 = vsub.f32 %v1602_v35, %v8108_v39  ;;  %v4271_v52 = vmul.f32 %v8130_v45, %v8130_v45  ;;  %v8153_v53 = vand.u32 4294901760, %v1806_v43  ;;  %v8163_v56 = vand.u32 4294901760, %v1599_v46 }
  0x14   :  { %14007 = vst [vmem:[#allocation22_spill] sm:$0xff] %v8108_v39  ;;  %4397 = vadd.xlane.f32.xlu2 %v4396_v36  ;;  %v1798_v54 = vsub.f32 %v8090_v32, %v8125_v44  ;;  %v1596_v57 = vsel %vm1570_vm0, %v8138_v47, 0  ;;  %v4357_v59 = vsel %vm1570_vm0, %v4289_v48, 0.0  ;;  %v4290_v61 = vmul.f32 %v8161_v55, %v8161_v55  ;;  %v8228_v36 = vld [vmem:[%s13423_s1 + $0xd8] sm:$0xff] }
  0x15   :  { %14008 = vst [vmem:[#allocation23_spill] sm:$0xff] %v8111_v40  ;;  %v4303_v58 = vsel %vm1570_vm0, %v4271_v52, 0.0  ;;  %v1790_v62 = vsub.f32 %v8111_v40, %v8145_v50  ;;  %v8180_v63 = vand.u32 4294901760, %v1596_v57  ;;  %v8183_v3 = vand.u32 4294901760, %v8148_v51 }
  0x16   :  { %14010 = vst [vmem:[#allocation25_spill] sm:$0xff] %v8119_v42  ;;  %1674 = vmatpush.xpose.msra.mxu0 %v8048_v19  ;;  %1967 = vmatpush.xpose.msra.mxu1 %v8119_v42  ;;  %v8196_v11 = vand.u32 4294901760, %v1798_v54  ;;  %v8200_v12 = vsub.f32 %v1599_v46, %v8163_v56  ;;  %v1593_v13 = vsel %vm1570_vm0, %v8173_v60, 0  ;;  %v4297_v24 = vmul.f32 %v8188_v4, %v8188_v4  ;;  %v8246_v54 = vld [vmem:[%s13423_s1 + $0x28] sm:$0xff] }
  0x17   :  { %14011 = vst [vmem:[#allocation26_spill] sm:$0xff] %v8125_v44  ;;  %2397 = vmatpush.xpose.msra.mxu3 %v8048_v19  ;;  %2192 = vmatpush.xpose.msra.mxu2 %v8090_v32  ;;  %v4272_v26 = vmul.f32 %v8193_v5, %v8193_v5  ;;  %v4360_v27 = vsel %vm1570_vm0, %v4290_v61, 0.0  ;;  %v8216_v29 = vand.u32 4294901760, %v1790_v62  ;;  %v1782_v33 = vsub.f32 %v8148_v51, %v8183_v3 }
  0x18   :  { %14012 = vst [vmem:[#allocation27_spill] sm:$0xff] %v8145_v50  ;;  %4304 = vadd.xlane.f32.xlu0 %v4303_v58  ;;  %4391 = vadd.xlane.f32.xlu1 %v4390_v49  ;;  %v8221_v35 = vsub.f32 %v1596_v57, %v8180_v63  ;;  %v8230_v38 = vand.u32 4294901760, %v1593_v13  ;;  %v8233_v43 = vand.u32 4294901760, %v8200_v12  ;;  %v1590_v48 = vsel %vm1570_vm0, %v8208_v15, 0  ;;  %v1540_v49 = vld [vmem:[%s13423_s1 + $0x10] sm:$0xff] }
  0x19   :  { %14013 = vst [vmem:[#allocation28_spill] sm:$0xff] %v8148_v51  ;;  %v4306_v46 = vsel %vm1570_vm0, %v4272_v26, 0.0  ;;  %v4381_v52 = vsel %vm1570_vm0, %v4297_v24, 0.0  ;;  %v4298_v57 = vmul.f32 %v8228_v36, %v8228_v36  ;;  %v8251_v58 = vand.u32 4294901760, %v1590_v48 }
  0x1a   :  { %14014 = vst [vmem:[#allocation29_spill] sm:$0xff] %v8153_v53  ;;  %1676 = vmatpush.xpose.msra.mxu0 %v8076_v28  ;;  %1973 = vmatpush.xpose.msra.mxu1 %v8153_v53  ;;  %v8254_v61 = vand.u32 4294901760, %v1782_v33  ;;  %v1774_v62 = vsub.f32 %v8200_v12, %v8233_v43  ;;  %v8260_v24 = vand.u32 4294901760, %v8221_v35  ;;  %v8263_v26 = vsub.f32 %v1593_v13, %v8230_v38  ;;  %v1542_v33 = vld [vmem:[%s13423_s1 + $0x20] sm:$0xff] }
  0x1b   :  { %14015 = vst [vmem:[#allocation30_spill] sm:$0xff] %v8161_v55  ;;  %2399 = vmatpush.xpose.msra.mxu3 %v8076_v28  ;;  %2195 = vmatpush.xpose.msra.mxu2 %v8111_v40  ;;  %v8274_v55 = vsub.f32 %v1590_v48, %v8251_v58  ;;  %v13437_v14 = vmov 1   ;;  %v1584_v48 = vsel %vm1570_vm0, %v1542_v33, 0  ;;  %v14039_v23 = vmov 1  }
  0x1c   :  { %14016 = vst [vmem:[#allocation31_spill] sm:$0xff] %v8163_v56  ;;  %4358 = vadd.xlane.f32.xlu2 %v4357_v59  ;;  %v4273_v59 = vmul.f32 %v1540_v49, %v1540_v49  ;;  %7432 = vset.pattern.permute.xlu1 %v13437_v14  ;;  %v1766_v41 = vsub.f32 %v8221_v35, %v8260_v24 }
  0x1d   :  { %14017 = vst [vmem:[#allocation32_spill] sm:$0xff] %v8180_v63  ;;  %7431 = vset.pattern.permute.xlu2 %v13437_v14  ;;  %v8305_v14 = vand.u32 4294901760, %v1584_v48  ;;  %7430 = vset.pattern.permute.xlu0 %v14039_v23  ;;  %v4275_v40 = vmul.f32 %v1542_v33, %v1542_v33  ;;  %v4277_v1 = vmul.f32 %v8208_v15, %v8208_v15 }
  0x1e   :  { %14018 = vst [vmem:[#allocation33_spill] sm:$0xff] %v8183_v3  ;;  %1678 = vmatpush.xpose.msra.mxu0 %v8108_v39  ;;  %1979 = vmatpush.xpose.msra.mxu1 %v8196_v11  ;;  %v4309_v13 = vsel %vm1570_vm0, %v4273_v59, 0.0  ;;  %v1541_v59 = vld [vmem:[%s13423_s1 + $0x18] sm:$0xff]  ;;  %v8300_v6 = vand.u32 4294901760, %v1766_v41  ;;  %v1578_v41 = vsel %vm1570_vm0, %v1540_v49, 0  ;;  %v1575_v49 = vsel %vm1570_vm0, %v8193_v5, 0 }
  0x1f   :  { %14019 = vst [vmem:[#allocation34_spill] sm:$0xff] %v8188_v4  ;;  %2401 = vmatpush.xpose.msra.mxu3 %v8108_v39  ;;  %2198 = vmatpush.xpose.msra.mxu2 %v8148_v51  ;;  %v4274_v18 = vmul.f32 %v1541_v59, %v1541_v59  ;;  %v8328_v23 = vsub.f32 %v1584_v48, %v8305_v14  ;;  %v8353_v33 = vand.u32 4294901760, %v1575_v49  ;;  %v4321_v15 = vsel %vm1570_vm0, %v4277_v1, 0.0 }
  0x20   :  { %14020 = vst [vmem:[#allocation35_spill] sm:$0xff] %v8196_v11  ;;  %4307 = vadd.xlane.f32.xlu0 %v4306_v46  ;;  %4361 = vadd.xlane.f32.xlu1 %v4360_v27  ;;  %v1587_v27 = vsel %vm1570_vm0, %v8246_v54, 0  ;;  %v4384_v46 = vsel %vm1570_vm0, %v4298_v57, 0.0  ;;  %v8287_v57 = vand.u32 4294901760, %v8263_v26  ;;  %v8453_v1 = vsel %vm1570_vm0, %v7989_v0, 0 }
  0x21   :  { %14021 = vst [vmem:[#allocation36_spill] sm:$0xff] %v8200_v12  ;;  %v8284_v34 = vand.u32 4294901760, %v1587_v27  ;;  %v4312_v32 = vsel %vm1570_vm0, %v4274_v18, 0.0  ;;  %v1572_v18 = vsel %vm1570_vm0, %v8130_v45, 0  ;;  %v8345_v48 = vand.u32 4294901760, %v8328_v23 }
  0x22   :  { %14022 = vst [vmem:[#allocation37_spill] sm:$0xff] %v8216_v29  ;;  %1680 = vmatpush.xpose.msra.mxu0 %v8163_v56  ;;  %1985 = vmatpush.xpose.msra.mxu1 %v8216_v29  ;;  %v8351_v5 = vand.u32 4294901760, %v1572_v18  ;;  %v8474_v0 = vsel %vm1570_vm0, %v8084_v30, 0  ;;  %v8491_v30 = vld [vmem:[%s13425_s3 + $0x18] sm:$0xff] }
  0x23   :  { %14023 = vst [vmem:[#allocation38_spill] sm:$0xff] %v8221_v35  ;;  %2403 = vmatpush.xpose.msra.mxu3 %v8163_v56  ;;  %2201 = vmatpush.xpose.msra.mxu2 %v8200_v12  ;;  %v8308_v42 = vsub.f32 %v1587_v27, %v8284_v34 }
  0x24   :  { %14024 = vst [vmem:[#allocation39_spill] sm:$0xff] %v8228_v36  ;;  %4382 = vadd.xlane.f32.xlu2 %v4381_v52  ;;  %v8279_v52 = vand.u32 4294901760, %v1774_v62  ;;  %v8297_v62 = vand.u32 4294901760, %v8274_v55 }
  0x25   :  { %14025 = vst [vmem:[#allocation40_spill] sm:$0xff] %v8230_v38 }
  0x26   :  { %14026 = vst [vmem:[#allocation41_spill] sm:$0xff] %v8233_v43  ;;  %1682 = vmatpush.xpose.msra.mxu0 %v8180_v63  ;;  %1991 = vmatpush.xpose.msra.mxu1 %v8254_v61  ;;  %v1750_v53 = vsub.f32 %v8274_v55, %v8297_v62 }
  0x27   :  { %14027 = vst [vmem:[#allocation42_spill] sm:$0xff] %v8251_v58  ;;  %2405 = vmatpush.xpose.msra.mxu3 %v8180_v63  ;;  %2204 = vmatpush.xpose.msra.mxu2 %v8221_v35 }
  0x28   :  { %14028 = vst [vmem:[#allocation43_spill] sm:$0xff] %v8254_v61  ;;  %4310 = vadd.xlane.f32.xlu0 %v4309_v13  ;;  %4385 = vadd.xlane.f32.xlu1 %v4384_v46  ;;  %v1758_v13 = vsub.f32 %v8263_v26, %v8287_v57  ;;  %v1581_v46 = vsel %vm1570_vm0, %v1541_v59, 0  ;;  %v8325_v59 = vand.u32 4294901760, %v8308_v42  ;;  %v8339_v29 = vand.u32 4294901760, %v1750_v53 }
  0x29   :  { %14029 = vst [vmem:[#allocation44_spill] sm:$0xff] %v8260_v24  ;;  %v8322_v27 = vand.u32 4294901760, %v1581_v46  ;;  %v4315_v53 = vsel %vm1570_vm0, %v4275_v40, 0.0  ;;  %v8376_v40 = vld [vmem:[%s13425_s3] sm:$0xff] }
  0x2a   :  { %14030 = vst [vmem:[#allocation45_spill] sm:$0xff] %v8263_v26  ;;  %1684 = vmatpush.xpose.msra.mxu0 %v8230_v38  ;;  %1997 = vmatpush.xpose.msra.mxu1 %v8279_v52  ;;  %v8319_v11 = vand.u32 4294901760, %v1758_v13  ;;  %v8336_v13 = vand.u32 4294901760, %v1578_v41 }
  0x2b   :  { %14031 = vst [vmem:[#allocation46_spill] sm:$0xff] %v8274_v55  ;;  %2407 = vmatpush.xpose.msra.mxu3 %v8230_v38  ;;  %2207 = vmatpush.xpose.msra.mxu2 %v8263_v26  ;;  %v8348_v45 = vsub.f32 %v1581_v46, %v8322_v27  ;;  %v1734_v46 = vsub.f32 %v8328_v23, %v8345_v48 }
  0x2c   :  { %14032 = vst [vmem:[#allocation47_spill] sm:$0xff] %v8279_v52  ;;  %v8358_v51 = vsub.f32 %v1578_v41, %v8336_v13  ;;  %v8371_v52 = vsub.f32 %v1572_v18, %v8351_v5  ;;  %v4276_v41 = vmul.f32 %v8246_v54, %v8246_v54 }
  0x2d   :  { %14033 = vst [vmem:[#allocation48_spill] sm:$0xff] %v8284_v34  ;;  %v8367_v12 = vand.u32 4294901760, %v8348_v45  ;;  %v8385_v4 = vand.u32 4294901760, %v1734_v46 }
  0x2e   :  { %14034 = vst [vmem:[#allocation49_spill] sm:$0xff] %v8287_v57  ;;  %1686 = vmatpush.xpose.msra.mxu0 %v8251_v58  ;;  %2003 = vmatpush.xpose.msra.mxu1 %v8300_v6  ;;  %v8396_v54 = vand.u32 4294901760, %v8371_v52 }
  0x2f   :  { %14035 = vst [vmem:[#allocation50_spill] sm:$0xff] %v8297_v62  ;;  %2409 = vmatpush.xpose.msra.mxu3 %v8251_v58  ;;  %2210 = vmatpush.xpose.msra.mxu2 %v8274_v55  ;;  %v1726_v18 = vsub.f32 %v8348_v45, %v8367_v12 }
  0x30   :  { %14036 = vst [vmem:[#allocation51_spill] sm:$0xff] %v8300_v6  ;;  %4313 = vadd.xlane.f32.xlu0 %v4312_v32  ;;  %v1742_v32 = vsub.f32 %v8308_v42, %v8325_v59 }
  0x31   :  { %14037 = vst [vmem:[#allocation52_spill] sm:$0xff] %v8305_v14  ;;  %v8401_v46 = vand.u32 4294901760, %v1726_v18  ;;  %v8419_v18 = vld [vmem:[%s13425_s3 + $0x8] sm:$0xff] }
  0x32   :  { %14038 = vst [vmem:[#allocation53_spill] sm:$0xff] %v8308_v42  ;;  %1688 = vmatpush.xpose.msra.mxu0 %v8284_v34  ;;  %2009 = vmatpush.xpose.msra.mxu1 %v8319_v11  ;;  %v8361_v61 = vand.u32 4294901760, %v1742_v32  ;;  %v8382_v32 = vsub.f32 %v1575_v49, %v8353_v33  ;;  %v4318_v49 = vsel %vm1570_vm0, %v4276_v41, 0.0  ;;  %v1702_v41 = vsub.f32 %v8371_v52, %v8396_v54 }
  0x33   :  { %14040 = vst [vmem:[#allocation54_spill] sm:$0xff] %v8319_v11  ;;  %2411 = vmatpush.xpose.msra.mxu3 %v8284_v34  ;;  %2213 = vmatpush.xpose.msra.mxu2 %v8308_v42 }
  0x34   :  { %14041 = vst [vmem:[#allocation55_spill] sm:$0xff] %v8322_v27  ;;  %v8407_v35 = vand.u32 4294901760, %v8382_v32  ;;  %v8434_v2 = vand.u32 4294901760, %v1702_v41  ;;  %v4278_v41 = vmul.f32 %v8173_v60, %v8173_v60 }
  0x35   :  { %14042 = vst [vmem:[#allocation56_spill] sm:$0xff] %v8325_v59 }
  0x36   :  { %14043 = vst [vmem:[#allocation57_spill] sm:$0xff] %v8328_v23  ;;  %1690 = vmatpush.xpose.msra.mxu0 %v8305_v14  ;;  %2015 = vmatpush.xpose.msra.mxu1 %v8339_v29  ;;  %v1710_v26 = vsub.f32 %v8382_v32, %v8407_v35  ;;  %v4324_v60 = vsel %vm1570_vm0, %v4278_v41, 0.0  ;;  %v4279_v41 = vmul.f32 %v8138_v47, %v8138_v47  ;;  %v8508_v47 = vld [vmem:[%s13425_s3 + $0x20] sm:$0xff] }
  0x37   :  { %14044 = vst [vmem:[#allocation58_spill] sm:$0xff] %v8336_v13  ;;  %2413 = vmatpush.xpose.msra.mxu3 %v8305_v14  ;;  %2216 = vmatpush.xpose.msra.mxu2 %v8328_v23 }
  0x38   :  { %14045 = vst [vmem:[#allocation59_spill] sm:$0xff] %v8339_v29  ;;  %4316 = vadd.xlane.f32.xlu0 %v4315_v53  ;;  %v8391_v53 = vand.u32 4294901760, %v8358_v51 }
  0x39   :  { %14046 = vst [vmem:[#allocation60_spill] sm:$0xff] %v8345_v48 }
  0x3a   :  { %14047 = vst [vmem:[#allocation61_spill] sm:$0xff] %v8348_v45  ;;  %1692 = vmatpush.xpose.msra.mxu0 %v8322_v27  ;;  %2021 = vmatpush.xpose.msra.mxu1 %v8361_v61  ;;  %v1718_v36 = vsub.f32 %v8358_v51, %v8391_v53 }
  0x3b   :  { %14048 = vst [vmem:[#allocation62_spill] sm:$0xff] %v8351_v5  ;;  %2415 = vmatpush.xpose.msra.mxu3 %v8322_v27  ;;  %2219 = vmatpush.xpose.msra.mxu2 %v8348_v45 }
  0x3c   :  { %14049 = vst [vmem:[#allocation63_spill] sm:$0xff] %v8353_v33  ;;  %286 = vperm.xlu2 %7431, %v8376_v40   ;;  %v8424_v6 = vand.u32 4294901760, %v1718_v36  ;;  %v8440_v36 = vand.u32 4294901760, %v1710_v26  ;;  %v8459_v26 = vld [vmem:[%s13425_s3 + $0x10] sm:$0xff] }
  0x3d   :  { %14050 = vst [vmem:[#allocation64_spill] sm:$0xff] %v8358_v51 }
  0x3e   :  { %14051 = vst [vmem:[#allocation65_spill] sm:$0xff] %v8361_v61  ;;  %1694 = vmatpush.xpose.msra.mxu0 %v8336_v13  ;;  %2027 = vmatpush.xpose.msra.mxu1 %v8385_v4 }
  0x3f   :  { %14052 = vst [vmem:[#allocation66_spill] sm:$0xff] %v8367_v12  ;;  %2417 = vmatpush.xpose.msra.mxu3 %v8336_v13  ;;  %2222 = vmatpush.xpose.msra.mxu2 %v8358_v51 }
  0x40   :  { %14053 = vst [vmem:[#allocation67_spill] sm:$0xff] %v8371_v52  ;;  %4319 = vadd.xlane.f32.xlu0 %v4318_v49  ;;  %v8432_v49 = vsel %vm1570_vm0, %v8057_v21, 0  ;;  %v41_v21 = vld [vmem:[%s13425_s3 + $0xa0] sm:$0xff] }
  0x41   :  { %14054 = vst [vmem:[#allocation68_spill] sm:$0xff] %v8376_v40  ;;  %v39_v40 = vld [vmem:[%s13425_s3 + $0x90] sm:$0xff] }
  0x42   :  { %14055 = vst [vmem:[#allocation69_spill] sm:$0xff] %v8382_v32  ;;  %1696 = vmatpush.xpose.msra.mxu0 %v8353_v33  ;;  %2033 = vmatpush.xpose.msra.mxu1 %v8401_v46 }
  0x43   :  { %14056 = vst [vmem:[#allocation70_spill] sm:$0xff] %v8385_v4  ;;  %358 = vperm.xlu1 %7432, %v39_v40   ;;  %2225 = vmatpush.xpose.msra.mxu2 %v8382_v32  ;;  %v8444_v40 = vand.u32 4294901760, %v8432_v49 }
  0x44   :  { %14057 = vst [vmem:[#allocation71_spill] sm:$0xff] %v8391_v53  ;;  %2419 = vmatpush.xpose.msra.mxu3 %v8353_v33  ;;  %290 = vperm.xlu2 %7431, %v8419_v18  }
  0x45   :  { %14058 = vst [vmem:[#allocation72_spill] sm:$0xff] %v8396_v54 }
  0x46   :  { %14059 = vst [vmem:[#allocation73_spill] sm:$0xff] %v8401_v46  ;;  %1698 = vmatpush.xpose.msra.mxu0 %v8351_v5  ;;  %2039 = vmatpush.xpose.msra.mxu1 %v8424_v6 }
  0x47   :  { %14060 = vst [vmem:[#allocation74_spill] sm:$0xff] %v8407_v35  ;;  %2228 = vmatpush.xpose.msra.mxu2 %v8371_v52 }
  0x48   :  { %14061 = vst [vmem:[#allocation75_spill] sm:$0xff] %v8424_v6  ;;  %2421 = vmatpush.xpose.msra.mxu3 %v8351_v5  ;;  %4322 = vadd.xlane.f32.xlu0 %v4321_v15  ;;  %v47_v15 = vld [vmem:[%s13425_s3 + $0xd0] sm:$0xff] }
  0x49   :  { %14062 = vst [vmem:[#allocation76_spill] sm:$0xff] %v8434_v2  ;;  %1704 = vmatmul.f32.vlgmr.msra.gmra.mxu0 %v8434_v2 }
  0x4a   :  { %14063 = vst [vmem:[#allocation77_spill] sm:$0xff] %v8440_v36  ;;  %2618 = vmatpush.xpose.msrb.mxu0 %v8052_v20  ;;  %2045 = vmatpush.xpose.msra.mxu1 %v8440_v36  ;;  %v8466_v20 = vand.u32 4294901760, %v8453_v1 }
  0x4b   :  { %14064 = vst [vmem:[#allocation78_spill] sm:$0xff] %v8444_v40  ;;  %2970 = vmatpush.xpose.msrb.mxu2 %v8444_v40  ;;  %366 = vperm.xlu1 %7432, %v41_v21   ;;  %v8484_v21 = vand.u32 4294901760, %v8474_v0 }
  0x4c   :  { %14065 = vst [vmem:[#allocation79_spill] sm:$0xff] %v8466_v20  ;;  %2231 = vmatmul.f32.vlgmr.msra.gmra.mxu2 %v8371_v52  ;;  %2425 = vmatmul.f32.vlgmr.msra.gmra.mxu3 %v8396_v54 }
  0x4d   :  { %294 = vperm.xlu2 %7431, %v8459_v26   ;;  %14066 = vst [vmem:[#allocation80_spill] sm:$0xff] %v8484_v21 }
  0x4e   :  { %2622 = vmatpush.xpose.msrb.mxu0 %v8060_v22  ;;  %2051 = vmatpush.xpose.msra.mxu1 %v8434_v2 }
  0x4f   :  { %2972 = vmatpush.xpose.msrb.mxu2 %v8466_v20 }
  0x50   :  { %4325 = vadd.xlane.f32.xlu0 %v4324_v60  ;;  %v4327_v60 = vsel %vm1570_vm0, %v4279_v41, 0.0 }
  0x51   :  { %1712 = vmatmul.f32.gmra.mxu0 %v8440_v36  ;;  %2053 = vmatmul.f32.vlgmr.msra.gmra.mxu1 %v8351_v5 }
  0x52   :  { %2809 = vmatpush.xpose.msrb.mxu1 %v8022_v9  ;;  %2626 = vmatpush.xpose.msrb.mxu0 %v8087_v31 }
  0x53   :  { %390 = vperm.xlu1 %7432, %v47_v15   ;;  %2974 = vmatpush.xpose.msrb.mxu2 %v8484_v21  ;;  %v4280_v15 = vmul.f32 %v8103_v37, %v8103_v37  ;;  %v8525_v37 = vld [vmem:[%s13425_s3 + $0x28] sm:$0xff] }
  0x54   :  { %2236 = vmatmul.f32.gmra.mxu2 %v8382_v32  ;;  %2431 = vmatmul.f32.gmra.mxu3 %v8407_v35 }
  0x55   :  { %298 = vperm.xlu2 %7431, %v8491_v30   ;;  %v4330_v41 = vsel %vm1570_vm0, %v4280_v15, 0.0 }
  0x56   :  { %2811 = vmatpush.xpose.msrb.mxu1 %v8024_v10  ;;  %2630 = vmatpush.xpose.msrb.mxu0 %v8125_v44 }
  0x58   :  { %4328 = vadd.xlane.f32.xlu0 %v4327_v60  ;;  %v4281_v60 = vmul.f32 %v8070_v25, %v8070_v25  ;;  %v8542_v25 = vld [vmem:[%s13425_s3 + $0x30] sm:$0xff] }
  0x59   :  { %1720 = vmatmul.f32.gmra.mxu0 %v8424_v6  ;;  %2057 = vmatmul.f32.gmra.mxu1 %v8353_v33 }
  0x5a   :  { %2634 = vmatpush.xpose.msrb.mxu0 %v8145_v50  ;;  %2813 = vmatpush.xpose.msrb.mxu1 %v8043_v17  ;;  %v4333_v15 = vsel %vm1570_vm0, %v4281_v60, 0.0 }
  0x5c   :  { %2241 = vmatmul.f32.gmra.mxu2 %v8358_v51  ;;  %2437 = vmatmul.f32.gmra.mxu3 %v8391_v53  ;;  %v8679_v51 = vld [vmem:[%s13425_s3 + $0x58] sm:$0xff] }
  0x5d   :  { %302 = vperm.xlu2 %7431, %v8508_v47  }
  0x5e   :  { %2638 = vmatpush.xpose.msrb.mxu0 %v8183_v3  ;;  %2815 = vmatpush.xpose.msrb.mxu1 %v8048_v19 }
  0x60   :  { %4331 = vadd.xlane.f32.xlu0 %v4330_v41  ;;  %v4282_v41 = vmul.f32 %v8040_v16, %v8040_v16  ;;  %v8559_v16 = vld [vmem:[%s13425_s3 + $0x38] sm:$0xff] }
  0x61   :  { %1728 = vmatmul.f32.gmra.mxu0 %v8401_v46  ;;  %2061 = vmatmul.f32.gmra.mxu1 %v8336_v13 }
  0x62   :  { %2642 = vmatpush.xpose.msrb.mxu0 %v8233_v43  ;;  %2817 = vmatpush.xpose.msrb.mxu1 %v8076_v28  ;;  %v4336_v60 = vsel %vm1570_vm0, %v4282_v41, 0.0  ;;  %v8567_v41 = vld [vmem:[%s13423_s1 + $0xa8] sm:$0xff] }
  0x64   :  { %2246 = vmatmul.f32.gmra.mxu2 %v8348_v45  ;;  %2443 = vmatmul.f32.gmra.mxu3 %v8367_v12 }
  0x65   :  { %306 = vperm.xlu2 %7431, %v8525_v37  }
  0x66   :  { %2646 = vmatpush.xpose.msrb.mxu0 %v8260_v24  ;;  %2819 = vmatpush.xpose.msrb.mxu1 %v8108_v39 }
  0x68   :  { %4334 = vadd.xlane.f32.xlu0 %v4333_v15  ;;  %v4283_v15 = vmul.f32 %v8020_v8, %v8020_v8 }
  0x69   :  { %1736 = vmatmul.f32.gmra.mxu0 %v8385_v4  ;;  %2065 = vmatmul.f32.gmra.mxu1 %v8322_v27 }
  0x6a   :  { %2650 = vmatpush.xpose.msrb.mxu0 %v8287_v57  ;;  %2821 = vmatpush.xpose.msrb.mxu1 %v8163_v56  ;;  %v4339_v8 = vsel %vm1570_vm0, %v4283_v15, 0.0  ;;  %v8592_v15 = vld [vmem:[%s13423_s1 + $0xc8] sm:$0xff] }
  0x6b   :  { %v1647_v32 = vsel %vm1570_vm0, %v8592_v15, 0 }
  0x6c   :  { %2251 = vmatmul.f32.gmra.mxu2 %v8328_v23  ;;  %2449 = vmatmul.f32.gmra.mxu3 %v8345_v48  ;;  %v4284_v23 = vmul.f32 %v8015_v7, %v8015_v7 }
  0x6d   :  { %310 = vperm.xlu2 %7431, %v8542_v25  }
  0x6e   :  { %2654 = vmatpush.xpose.msrb.mxu0 %v8297_v62  ;;  %2823 = vmatpush.xpose.msrb.mxu1 %v8180_v63  ;;  %v4342_v7 = vsel %vm1570_vm0, %v4284_v23, 0.0  ;;  %v14067_v23 = vld [vmem:[#allocation7_spill] sm:$0xff] }
  0x70   :  { %4337 = vadd.xlane.f32.xlu0 %v4336_v60  ;;  %v4292_v60 = vmul.f32 %v8567_v41, %v8567_v41 }
  0x71   :  { %1744 = vmatmul.f32.gmra.mxu0 %v8361_v61  ;;  %2069 = vmatmul.f32.gmra.mxu1 %v8305_v14 }
  0x72   :  { %2658 = vmatpush.xpose.msrb.mxu0 %v8325_v59  ;;  %2825 = vmatpush.xpose.msrb.mxu1 %v8230_v38 }
  0x74   :  { %2256 = vmatmul.f32.gmra.mxu2 %v8308_v42  ;;  %2455 = vmatmul.f32.gmra.mxu3 %v8325_v59  ;;  %v4366_v42 = vsel %vm1570_vm0, %v4292_v60, 0.0  ;;  %v8584_v59 = vld [vmem:[%s13425_s3 + $0x40] sm:$0xff]  ;;  %v4296_v60 = vmul.f32 %v8592_v15, %v8592_v15 }
  0x75   :  { %314 = vperm.xlu2 %7431, %v8559_v16   ;;  %v8709_v15 = vld [vmem:[%s13425_s3 + $0x60] sm:$0xff] }
  0x76   :  { %2662 = vmatpush.xpose.msrb.mxu0 %v8345_v48  ;;  %2827 = vmatpush.xpose.msrb.mxu1 %v8251_v58 }
  0x78   :  { %4340 = vadd.xlane.f32.xlu0 %v4339_v8  ;;  %v13479_v8 = vmov 0  }
  0x79   :  { %1752 = vmatmul.f32.gmra.mxu0 %v8339_v29  ;;  %2073 = vmatmul.f32.gmra.mxu1 %v8284_v34 }
  0x7a   :  { %2666 = vmatpush.xpose.msrb.mxu0 %v8367_v12  ;;  %2829 = vmatpush.xpose.msrb.mxu1 %v8284_v34  ;;  %v8652_v12 = vsub.f32 %v8474_v0, %v8484_v21 }
  0x7b   :  { %7435 = vset.pattern.permute.xlu1 %v13479_v8  ;;  %v14068_v8 = vld [vmem:[#allocation45_spill] sm:$0xff] }
  0x7c   :  { %2261 = vmatmul.f32.gmra.mxu2 %v8274_v55  ;;  %2461 = vmatmul.f32.gmra.mxu3 %v8297_v62  ;;  %v8610_v62 = vld [vmem:[%s13425_s3 + $0x48] sm:$0xff]  ;;  %v4285_v55 = vmul.f32 %v14067_v23, %v14067_v23  ;;  %v8629_v23 = vsub.f32 %v8453_v1, %v8466_v20  ;;  %14075 = vst [vmem:[#allocation82_spill] sm:$0xff] %v8652_v12 }
  0x7d   :  { %4367 = vadd.xlane.f32.xlu1 %v4366_v42  ;;  %318 = vperm.xlu2 %7431, %v8584_v59   ;;  %v4378_v42 = vsel %vm1570_vm0, %v4296_v60, 0.0 }
  0x7e   :  { %2670 = vmatpush.xpose.msrb.mxu0 %v8391_v53  ;;  %2831 = vmatpush.xpose.msrb.mxu1 %v8305_v14  ;;  %v4345_v60 = vsel %vm1570_vm0, %v4285_v55, 0.0  ;;  %14070 = vst [vmem:[#allocation81_spill] sm:$0xff] %v8629_v23  ;;  %v14072_v55 = vld [vmem:[#allocation6_spill] sm:$0xff] }
  0x80   :  { %4343 = vadd.xlane.f32.xlu0 %v4342_v7  ;;  %v8620_v7 = vsub.f32 %v8432_v49, %v8444_v40  ;;  %v8636_v49 = vld [vmem:[%s13425_s3 + $0x50] sm:$0xff] }
  0x81   :  { %1760 = vmatmul.f32.gmra.mxu0 %v8319_v11  ;;  %2077 = vmatmul.f32.gmra.mxu1 %v8251_v58 }
  0x82   :  { %2674 = vmatpush.xpose.msrb.mxu0 %v8407_v35  ;;  %2833 = vmatpush.xpose.msrb.mxu1 %v8322_v27  ;;  %14069 = vst [vmem:[#allocation7_spill] sm:$0xff] %v8620_v7  ;;  %v14079_v35 = vld [vmem:[#allocation47_spill] sm:$0xff]  ;;  %v1635_v27 = vsel %vm1570_vm0, %v8567_v41, 0 }
  0x84   :  { %2266 = vmatmul.f32.gmra.mxu2 %v14068_v8  ;;  %2467 = vmatmul.f32.gmra.mxu3 %v8287_v57  ;;  %v14071_v57 = vld [vmem:[#allocation51_spill] sm:$0xff]  ;;  %v1566_v8 = vld [vmem:[%s13423_s1 + $0xe0] sm:$0xff] }
  0x85   :  { %4379 = vadd.xlane.f32.xlu1 %v4378_v42  ;;  %322 = vperm.xlu2 %7431, %v8610_v62   ;;  %v4286_v42 = vmul.f32 %v14072_v55, %v14072_v55  ;;  %v1656_v1 = vsel %vm1570_vm0, %v1566_v8, 0  ;;  %v14076_v55 = vld [vmem:[#allocation39_spill] sm:$0xff] }
  0x86   :  { %2678 = vmatpush.xpose.msrb.mxu0 %v8396_v54  ;;  %2835 = vmatpush.xpose.msrb.mxu1 %v8336_v13  ;;  %v8648_v48 = vand.u32 4294901760, %v1656_v1  ;;  %v1653_v53 = vsel %vm1570_vm0, %v14076_v55, 0  ;;  %v14078_v55 = vld [vmem:[#allocation34_spill] sm:$0xff]  ;;  %v8950_v13 = vand.u32 4294901760, %v1635_v27 }
  0x87   :  { %v4348_v45 = vsel %vm1570_vm0, %v4286_v42, 0.0  ;;  %v8666_v0 = vand.u32 4294901760, %v1653_v53 }
  0x88   :  { %4346 = vadd.xlane.f32.xlu0 %v4345_v60  ;;  %v14073_v60 = vld [vmem:[#allocation38_spill] sm:$0xff]  ;;  %14074 = vst [vmem:[#allocation6_spill] sm:$0xff] %v8648_v48  ;;  %2976 = vmatpush.xpose.msrb.mxu2 %v8648_v48  ;;  %v8673_v42 = vsub.f32 %v1656_v1, %v8648_v48 }
  0x89   :  { %1768 = vmatmul.f32.gmra.mxu0 %v14071_v57  ;;  %2081 = vmatmul.f32.gmra.mxu1 %v8230_v38  ;;  %14077 = vst [vmem:[#allocation39_spill] sm:$0xff] %v8666_v0  ;;  %v8690_v1 = vsub.f32 %v1653_v53, %v8666_v0  ;;  %v14086_v53 = vld [vmem:[#allocation43_spill] sm:$0xff] }
  0x8a   :  { %3485 = vmatpush.xpose.msra.mxu0 %v8620_v7  ;;  %2837 = vmatpush.xpose.msrb.mxu1 %v8353_v33  ;;  %14080 = vst [vmem:[#allocation34_spill] sm:$0xff] %v8673_v42  ;;  %v8973_v33 = vld [vmem:[%s13423_s1 + $0xb0] sm:$0xff] }
  0x8b   :  { %14083 = vst [vmem:[#allocation84_spill] sm:$0xff] %v8690_v1 }
  0x8c   :  { %2271 = vmatmul.f32.gmra.mxu2 %v14073_v60  ;;  %2473 = vmatmul.f32.gmra.mxu3 %v8260_v24  ;;  %v8662_v60 = vld [vmem:[%s13423_s1 + $0x80] sm:$0xff]  ;;  %v1650_v24 = vsel %vm1570_vm0, %v14078_v55, 0  ;;  %14144 = vst [vmem:[#allocation124_spill] sm:$0xff] %v8950_v13 }
  0x8d   :  { %326 = vperm.xlu2 %7431, %v8636_v49   ;;  %v4287_v54 = vmul.f32 %v8662_v60, %v8662_v60  ;;  %2978 = vmatpush.xpose.msrb.mxu2 %v8666_v0  ;;  %v8685_v55 = vand.u32 4294901760, %v1650_v24 }
  0x8e   :  { %3488 = vmatpush.xpose.msra.mxu0 %v8629_v23  ;;  %2839 = vmatpush.xpose.msrb.mxu1 %v8351_v5  ;;  %v8978_v5 = vsub.f32 %v1635_v27, %v8950_v13 }
  0x8f   :  { %14081 = vst [vmem:[#allocation83_spill] sm:$0xff] %v8685_v55  ;;  %v4351_v52 = vsel %vm1570_vm0, %v4287_v54, 0.0  ;;  %v4299_v54 = vmul.f32 %v1566_v8, %v1566_v8  ;;  %v8722_v8 = vpop.xlane.xlu2 %4397 }
  0x90   :  { %4349 = vadd.xlane.f32.xlu0 %v4348_v45  ;;  %v14082_v45 = vld [vmem:[#allocation36_spill] sm:$0xff]  ;;  %14149 = vst [vmem:[#allocation128_spill] sm:$0xff] %v8978_v5 }
  0x91   :  { %1776 = vmatmul.f32.gmra.mxu0 %v14079_v35  ;;  %2085 = vmatmul.f32.gmra.mxu1 %v8180_v63  ;;  %v8699_v35 = vand.u32 4294901760, %v1647_v32 }
  0x92   :  { %3491 = vmatpush.xpose.msra.mxu0 %v8652_v12  ;;  %3693 = vmatpush.xpose.msra.mxu1 %v8444_v40 }
  0x93   :  { %2980 = vmatpush.xpose.msrb.mxu2 %v8685_v55  ;;  %14084 = vst [vmem:[#allocation85_spill] sm:$0xff] %v8699_v35 }
  0x94   :  { %2276 = vmatmul.f32.gmra.mxu2 %v14082_v45  ;;  %2479 = vmatmul.f32.gmra.mxu3 %v8233_v43  ;;  %v8702_v43 = vsub.f32 %v1650_v24, %v8685_v55  ;;  %v14087_v45 = vld [vmem:[#allocation28_spill] sm:$0xff]  ;;  %v8717_v24 = vsub.f32 %v1647_v32, %v8699_v35  ;;  %v8736_v32 = vld [vmem:[%s13425_s3 + $0x68] sm:$0xff] }
  0x95   :  { %330 = vperm.xlu2 %7431, %v8679_v51  }
  0x96   :  { %3494 = vmatpush.xpose.msra.mxu0 %v8673_v42  ;;  %3695 = vmatpush.xpose.msra.mxu1 %v8466_v20  ;;  %14085 = vst [vmem:[#allocation86_spill] sm:$0xff] %v8702_v43  ;;  %v9028_v20 = vand.u32 4294901760, %v8620_v7 }
  0x97   :  { %2982 = vmatpush.xpose.msrb.mxu2 %v8699_v35  ;;  %14088 = vst [vmem:[#allocation87_spill] sm:$0xff] %v8717_v24 }
  0x98   :  { %4352 = vadd.xlane.f32.xlu0 %v4351_v52  ;;  %v14089_v52 = vld [vmem:[#allocation68_spill] sm:$0xff]  ;;  %14162 = vst [vmem:[#allocation141_spill] sm:$0xff] %v9028_v20 }
  0x99   :  { %1784 = vmatmul.f32.gmra.mxu0 %v14086_v53  ;;  %2089 = vmatmul.f32.gmra.mxu1 %v8163_v56  ;;  %v4387_v53 = vsel %vm1570_vm0, %v4299_v54, 0.0  ;;  %14090 = vst [vmem:[#allocation68_spill] sm:$0xff] %v8722_v8  ;;  %v8727_v56 = vld [vmem:[%s13423_s1 + $0xa0] sm:$0xff]  ;;  %v8747_v8 = vpop.xlane.xlu2 %4358 }
  0x9a   :  { %3497 = vmatpush.xpose.msra.mxu0 %v8690_v1  ;;  %3697 = vmatpush.xpose.msra.mxu1 %v8484_v21  ;;  %v4291_v54 = vmul.f32 %v8727_v56, %v8727_v56  ;;  %14093 = vst [vmem:[#allocation88_spill] sm:$0xff] %v8747_v8  ;;  %v8770_v8 = vld [vmem:[%s13425_s3 + $0x78] sm:$0xff]  ;;  %v1632_v4 = vsel %vm1570_vm0, %v8727_v56, 0 }
  0x9c   :  { %2281 = vmatmul.f32.gmra.mxu2 %v14087_v45  ;;  %2485 = vmatmul.f32.gmra.mxu3 %v8183_v3  ;;  %v14091_v3 = vld [vmem:[#allocation37_spill] sm:$0xff]  ;;  %v14094_v45 = vld [vmem:[#allocation35_spill] sm:$0xff] }
  0x9d   :  { %334 = vperm.xlu2 %7431, %v8709_v15  }
  0x9e   :  { %3500 = vmatpush.xpose.msra.mxu0 %v8702_v43  ;;  %56 = vperm.xlu1 %7435, %v14089_v52   ;;  %v14092_v52 = vld [vmem:[#allocation23_spill] sm:$0xff] }
  0x9f   :  { %3699 = vmatpush.xpose.msra.mxu1 %v8648_v48 }
  0xa0   :  { %4388 = vadd.xlane.f32.xlu0 %v4387_v53  ;;  %v4363_v53 = vsel %vm1570_vm0, %v4291_v54, 0.0  ;;  %v14097_v54 = vld [vmem:[#allocation29_spill] sm:$0xff] }
  0xa1   :  { %1792 = vmatmul.f32.gmra.mxu0 %v14091_v3  ;;  %2093 = vmatmul.f32.gmra.mxu1 %v8108_v39  ;;  %v8829_v3 = vld [vmem:[%s13425_s3 + $0x88] sm:$0xff] }
  0xa2   :  { %3503 = vmatpush.xpose.msra.mxu0 %v8717_v24 }
  0xa3   :  { %3701 = vmatpush.xpose.msra.mxu1 %v8666_v0 }
  0xa4   :  { %2286 = vmatmul.f32.gmra.mxu2 %v14092_v52  ;;  %2491 = vmatmul.f32.gmra.mxu3 %v8145_v50  ;;  %v8754_v52 = vld [vmem:[%s13425_s3 + $0x70] sm:$0xff] }
  0xa5   :  { %338 = vperm.xlu2 %7431, %v8736_v32   ;;  %v14095_v50 = vld [vmem:[#allocation20_spill] sm:$0xff] }
  0xa6   :  { %61 = vperm.xlu1 %7435, %v8419_v18   ;;  %v8759_v18 = vpop.xlane.xlu1 %4394 }
  0xa7   :  { %3703 = vmatpush.xpose.msra.mxu1 %v8685_v55  ;;  %14096 = vst [vmem:[#allocation89_spill] sm:$0xff] %v8759_v18  ;;  %v14100_v18 = vld [vmem:[#allocation17_spill] sm:$0xff] }
  0xa8   :  { %4364 = vadd.xlane.f32.xlu0 %v4363_v53  ;;  %v1620_v53 = vsel %vm1570_vm0, %v8662_v60, 0 }
  0xa9   :  { %1800 = vmatmul.f32.gmra.mxu0 %v14094_v45  ;;  %2097 = vmatmul.f32.gmra.mxu1 %v8076_v28  ;;  %v14104_v45 = vld [vmem:[#allocation25_spill] sm:$0xff]  ;;  %v14118_v28 = vld [vmem:[#allocation15_spill] sm:$0xff] }
  0xab   :  { %3705 = vmatpush.xpose.msra.mxu1 %v8699_v35 }
  0xac   :  { %2291 = vmatmul.f32.gmra.mxu2 %v14095_v50  ;;  %2497 = vmatmul.f32.gmra.mxu3 %v8125_v44  ;;  %v8772_v50 = vpop.xlane.xlu2 %4382  ;;  %v8774_v44 = vpop.xlane.xlu0 %4304 }
  0xad   :  { %342 = vperm.xlu2 %7431, %v8754_v52   ;;  %14098 = vst [vmem:[#allocation90_spill] sm:$0xff] %v8772_v50  ;;  %v14105_v50 = vld [vmem:[#allocation8_spill] sm:$0xff] }
  0xae   :  { %66 = vperm.xlu1 %7435, %v8459_v26   ;;  %14099 = vst [vmem:[#allocation91_spill] sm:$0xff] %v8774_v44  ;;  %v8778_v26 = vand.u32 4294901760, %v1620_v53  ;;  %v8782_v60 = vpop.xlane.xlu1 %4355  ;;  %v1623_v44 = vsel %vm1570_vm0, %v14105_v50, 0 }
  0xaf   :  { %14102 = vst [vmem:[#allocation93_spill] sm:$0xff] %v8782_v60  ;;  %v8807_v50 = vand.u32 4294901760, %v1623_v44 }
  0xb0   :  { %14101 = vst [vmem:[#allocation92_spill] sm:$0xff] %v8778_v26 }
  0xb1   :  { %1808 = vmatmul.f32.gmra.mxu0 %v14097_v54  ;;  %2101 = vmatmul.f32.gmra.mxu1 %v8048_v19  ;;  %v8785_v54 = vsub.f32 %v1620_v53, %v8778_v26  ;;  %14109 = vst [vmem:[#allocation96_spill] sm:$0xff] %v8807_v50 }
  0xb3   :  { %14103 = vst [vmem:[#allocation94_spill] sm:$0xff] %v8785_v54 }
  0xb4   :  { %2296 = vmatmul.f32.gmra.mxu2 %v14100_v18  ;;  %2503 = vmatmul.f32.gmra.mxu3 %v8087_v31  ;;  %v8794_v31 = vld [vmem:[%s13425_s3 + $0xf8] sm:$0xff]  ;;  %v8801_v60 = vpop.permute.xlu2 %286  ;;  %v8803_v53 = vpop.xlane.xlu0 %4307 }
  0xb5   :  { %346 = vperm.xlu2 %7431, %v8770_v8   ;;  %14106 = vst [vmem:[#allocation8_spill] sm:$0xff] %v8801_v60  ;;  %v14108_v18 = vld [vmem:[#allocation13_spill] sm:$0xff]  ;;  %v8818_v60 = vsub.f32 %v1623_v44, %v8807_v50  ;;  %v8834_v44 = vld [vmem:[%s13425_s3 + $0xf0] sm:$0xff] }
  0xb6   :  { %71 = vperm.xlu1 %7435, %v8491_v30   ;;  %v8799_v30 = vld [vmem:[%s13425_s3 + $0x80] sm:$0xff]  ;;  %14107 = vst [vmem:[#allocation95_spill] sm:$0xff] %v8803_v53 }
  0xb7   :  { %14112 = vst [vmem:[#allocation99_spill] sm:$0xff] %v8818_v60  ;;  %v14113_v53 = vld [vmem:[#allocation21_spill] sm:$0xff]  ;;  %v8848_v39 = vand.u32 4294901760, %v8818_v60 }
  0xb9   :  { %1816 = vmatmul.f32.gmra.mxu0 %v14104_v45  ;;  %2105 = vmatmul.f32.gmra.mxu1 %v8043_v17  ;;  %v8811_v45 = vand.u32 4294901760, %v8785_v54  ;;  %v8815_v17 = vpop.xlane.xlu1 %4391  ;;  %14121 = vst [vmem:[#allocation103_spill] sm:$0xff] %v8848_v39 }
  0xba   :  { %14111 = vst [vmem:[#allocation98_spill] sm:$0xff] %v8815_v17 }
  0xbb   :  { %14110 = vst [vmem:[#allocation97_spill] sm:$0xff] %v8811_v45 }
  0xbc   :  { %2301 = vmatmul.f32.gmra.mxu2 %v14108_v18  ;;  %2509 = vmatmul.f32.gmra.mxu3 %v8060_v22  ;;  %v1830_v22 = vsub.f32 %v8785_v54, %v8811_v45  ;;  %v14114_v18 = vld [vmem:[#allocation24_spill] sm:$0xff]  ;;  %v8838_v17 = vpop.xlane.xlu0 %4310 }
  0xbd   :  { %410 = vperm.xlu2 %7431, %v8794_v31   ;;  %350 = vperm.xlu0 %7430, %v8799_v30   ;;  %v1626_v19 = vsel %vm1570_vm0, %v14114_v18, 0  ;;  %14116 = vst [vmem:[#allocation100_spill] sm:$0xff] %v8838_v17  ;;  %v8864_v17 = vld [vmem:[%s13425_s3 + $0xe0] sm:$0xff] }
  0xbe   :  { %76 = vperm.xlu1 %7435, %v8508_v47   ;;  %v8836_v47 = vpop.permute.xlu2 %290  ;;  %v8842_v18 = vand.u32 4294901760, %v1626_v19 }
  0xbf   :  { %14115 = vst [vmem:[#allocation24_spill] sm:$0xff] %v8836_v47 }
  0xc0   :  { %14119 = vst [vmem:[#allocation101_spill] sm:$0xff] %v8842_v18  ;;  %v8853_v47 = vsub.f32 %v1626_v19, %v8842_v18  ;;  %v8871_v19 = vld [vmem:[%s13425_s3 + $0xe8] sm:$0xff] }
  0xc1   :  { %1824 = vmatmul.f32.gmra.mxu0 %v14113_v53  ;;  %2109 = vmatmul.f32.gmra.mxu1 %v8024_v10  ;;  %v14117_v53 = vld [vmem:[#allocation11_spill] sm:$0xff]  ;;  %v8844_v10 = vand.u32 4294901760, %v1830_v22  ;;  %v14123_v22 = vld [vmem:[#allocation30_spill] sm:$0xff]  ;;  %v8866_v63 = vpop.xlane.xlu1 %4361 }
  0xc2   :  { %14122 = vst [vmem:[#allocation104_spill] sm:$0xff] %v8853_v47 }
  0xc3   :  { %14120 = vst [vmem:[#allocation102_spill] sm:$0xff] %v8844_v10 }
  0xc4   :  { %2306 = vmatmul.f32.gmra.mxu2 %v14117_v53  ;;  %2515 = vmatmul.f32.gmra.mxu3 %v14118_v28  ;;  %v1838_v28 = vsub.f32 %v8818_v60, %v8848_v39  ;;  %v1629_v53 = vsel %vm1570_vm0, %v14123_v22, 0  ;;  %14124 = vst [vmem:[#allocation30_spill] sm:$0xff] %v8866_v63  ;;  %v8875_v11 = vpop.xlane.xlu0 %4313  ;;  %v8885_v63 = vand.u32 4294901760, %v8853_v47 }
  0xc5   :  { %354 = vperm.xlu2 %7431, %v8829_v3   ;;  %406 = vperm.xlu0 %7430, %v8834_v44   ;;  %14126 = vst [vmem:[#allocation106_spill] sm:$0xff] %v8875_v11  ;;  %v8879_v22 = vand.u32 4294901760, %v1629_v53 }
  0xc6   :  { %v1705_v57 = vpop.f32.mrf.mxu0  ;;  %81 = vperm.xlu1 %7435, %v8525_v37   ;;  %v8873_v37 = vpop.permute.xlu2 %294  ;;  %14129 = vst [vmem:[#allocation109_spill] sm:$0xff] %v8885_v63 }
  0xc7   :  { %14125 = vst [vmem:[#allocation105_spill] sm:$0xff] %v8873_v37  ;;  %v8890_v34 = vsub.f32 %v1629_v53, %v8879_v22 }
  0xc8   :  { %14127 = vst [vmem:[#allocation107_spill] sm:$0xff] %v8879_v22 }
  0xc9   :  { %1832 = vmatmul.f32.gmra.mxu0 %v8844_v10  ;;  %2113 = vmatmul.f32.gmra.mxu1 %v8022_v9  ;;  %v8881_v9 = vand.u32 4294901760, %v1838_v28  ;;  %14130 = vst [vmem:[#allocation110_spill] sm:$0xff] %v8890_v34  ;;  %v1846_v28 = vsub.f32 %v8853_v47, %v8885_v63  ;;  %v8916_v56 = vpop.xlane.xlu1 %4385  ;;  %v8924_v46 = vand.u32 4294901760, %v8890_v34 }
  0xca   :  { %14136 = vst [vmem:[#allocation116_spill] sm:$0xff] %v8916_v56 }
  0xcb   :  { %14128 = vst [vmem:[#allocation108_spill] sm:$0xff] %v8881_v9 }
  0xcc   :  { %2311 = vmatmul.f32.gmra.mxu2 %v8785_v54  ;;  %2521 = vmatmul.f32.gmra.mxu3 %v8811_v45  ;;  %v8910_v53 = vpop.xlane.xlu0 %4316  ;;  %14139 = vst [vmem:[#allocation119_spill] sm:$0xff] %v8924_v46 }
  0xcd   :  { %398 = vperm.xlu2 %7431, %v8864_v17   ;;  %402 = vperm.xlu0 %7430, %v8871_v19   ;;  %14134 = vst [vmem:[#allocation114_spill] sm:$0xff] %v8910_v53 }
  0xce   :  { %v1713_v38 = vpop.f32.mrf.mxu0  ;;  %86 = vperm.xlu1 %7435, %v8542_v25   ;;  %v2054_v29 = vpop.f32.mrf.mxu1  ;;  %v8901_v25 = vld [vmem:[%s13425_s3 + $0x98] sm:$0xff] }
  0xcf   :  { %v2232_v11 = vpop.f32.mrf.mxu2  ;;  %v2055_v58 = vadd.f32 %v2054_v29, %v1705_v57  ;;  %v2426_v61 = vpop.f32.mrf.mxu3  ;;  %14131 = vst [vmem:[#allocation111_spill] sm:$0xff] %v8901_v25  ;;  %v8906_v29 = vld [vmem:[%s13425_s3 + $0xa8] sm:$0xff] }
  0xd0   :  { %14132 = vst [vmem:[#allocation112_spill] sm:$0xff] %v8906_v29  ;;  %v8908_v57 = vpop.permute.xlu2 %298 }
  0xd1   :  { %1840 = vmatmul.f32.gmra.mxu0 %v8881_v9  ;;  %v2233_v37 = vadd.f32 %v2232_v11, %v2055_v58  ;;  %2117 = vmatmul.f32.gmra.mxu1 %v8778_v26  ;;  %14133 = vst [vmem:[#allocation113_spill] sm:$0xff] %v8908_v57  ;;  %v8918_v11 = vand.u32 4294901760, %v1632_v4  ;;  %v8920_v58 = vand.u32 4294901760, %v1846_v28  ;;  %v1854_v28 = vsub.f32 %v8890_v34, %v8924_v46  ;;  %v8959_v36 = vpop.permute.xlu1 %358 }
  0xd2   :  { %14147 = vst [vmem:[#allocation127_spill] sm:$0xff] %v8959_v36 }
  0xd3   :  { %v8912_v14 = vadd.f32 %v2426_v61, %v2233_v37  ;;  %14137 = vst [vmem:[#allocation117_spill] sm:$0xff] %v8918_v11  ;;  %v8929_v56 = vsub.f32 %v1632_v4, %v8918_v11 }
  0xd4   :  { %2316 = vmatmul.f32.gmra.mxu2 %v8818_v60  ;;  %2527 = vmatmul.f32.gmra.mxu3 %v8848_v39  ;;  %14138 = vst [vmem:[#allocation118_spill] sm:$0xff] %v8920_v58  ;;  %v8944_v4 = vpop.xlane.xlu0 %4319 }
  0xd5   :  { %14135 = vst [vmem:[#allocation115_spill] sm:$0xff] %v8912_v14  ;;  %362 = vperm.xlu2 %7431, %v8901_v25   ;;  %370 = vperm.xlu0 %7430, %v8906_v29   ;;  %v8956_v41 = vand.u32 4294901760, %v8929_v56 }
  0xd6   :  { %v1721_v53 = vpop.f32.mrf.mxu0  ;;  %91 = vperm.xlu1 %7435, %v8559_v16   ;;  %v2058_v61 = vpop.f32.mrf.mxu1  ;;  %14140 = vst [vmem:[#allocation120_spill] sm:$0xff] %v8929_v56  ;;  %v8940_v16 = vld [vmem:[%s13425_s3 + $0xd8] sm:$0xff] }
  0xd7   :  { %v2237_v37 = vpop.f32.mrf.mxu2  ;;  %v2059_v14 = vadd.f32 %v2058_v61, %v1713_v38  ;;  %v2432_v57 = vpop.f32.mrf.mxu3  ;;  %14141 = vst [vmem:[#allocation121_spill] sm:$0xff] %v8940_v16  ;;  %v1862_v45 = vsub.f32 %v8929_v56, %v8956_v41 }
  0xd8   :  { %v8942_v38 = vpop.permute.xlu2 %302  ;;  %14142 = vst [vmem:[#allocation122_spill] sm:$0xff] %v8944_v4 }
  0xd9   :  { %1848 = vmatmul.f32.gmra.mxu0 %v8920_v58  ;;  %v2238_v6 = vadd.f32 %v2237_v37, %v2059_v14  ;;  %2121 = vmatmul.f32.gmra.mxu1 %v8807_v50  ;;  %v8952_v14 = vand.u32 4294901760, %v1854_v28  ;;  %14146 = vst [vmem:[#allocation126_spill] sm:$0xff] %v8956_v41  ;;  %v14148_v28 = vmov 0  }
  0xdb   :  { %v8946_v61 = vadd.f32 %v2432_v57, %v2238_v6  ;;  %14145 = vst [vmem:[#allocation125_spill] sm:$0xff] %v8952_v14  ;;  %v1561_v6 = vld [vmem:[%s13423_s1 + $0xb8] sm:$0xff]  ;;  %v8967_v57 = vld [vmem:[%s13423_s1 + $0xc0] sm:$0xff] }
  0xdc   :  { %2321 = vmatmul.f32.gmra.mxu2 %v8853_v47  ;;  %2533 = vmatmul.f32.gmra.mxu3 %v8885_v63  ;;  %v1644_v2 = vsel %vm1570_vm0, %v8967_v57, 0  ;;  %v1641_v39 = vsel %vm1570_vm0, %v1561_v6, 0  ;;  %v8991_v21 = vpop.xlane.xlu0 %4322 }
  0xdd   :  { %14143 = vst [vmem:[#allocation123_spill] sm:$0xff] %v8946_v61  ;;  %394 = vperm.xlu2 %7431, %v8940_v16   ;;  %7434 = vset.pattern.permute.xlu0 %v14148_v28  ;;  %v8984_v29 = vand.u32 4294901760, %v1644_v2  ;;  %v9007_v16 = vand.u32 4294901760, %v8978_v5 }
  0xde   :  { %v1729_v37 = vpop.f32.mrf.mxu0  ;;  %96 = vperm.xlu1 %7435, %v8584_v59   ;;  %v2062_v4 = vpop.f32.mrf.mxu1  ;;  %14152 = vst [vmem:[#allocation131_spill] sm:$0xff] %v8991_v21 }
  0xdf   :  { %v2242_v61 = vpop.f32.mrf.mxu2  ;;  %v2063_v59 = vadd.f32 %v2062_v4, %v1721_v53  ;;  %v2438_v36 = vpop.f32.mrf.mxu3  ;;  %14150 = vst [vmem:[#allocation129_spill] sm:$0xff] %v8984_v29  ;;  %v1638_v53 = vsel %vm1570_vm0, %v8973_v33, 0  ;;  %v8994_v27 = vsub.f32 %v1644_v2, %v8984_v29  ;;  %2984 = vmatpush.xpose.msrb.mxu2 %v8984_v29  ;;  %3707 = vmatpush.xpose.msra.mxu1 %v8984_v29 }
  0xe0   :  { %v8989_v4 = vpop.permute.xlu2 %306  ;;  %14157 = vst [vmem:[#allocation136_spill] sm:$0xff] %v9007_v16  ;;  %v9009_v21 = vand.u32 4294901760, %v1638_v53 }
  0xe1   :  { %1856 = vmatmul.f32.gmra.mxu0 %v8952_v14  ;;  %v2243_v63 = vadd.f32 %v2242_v61, %v2063_v59  ;;  %2125 = vmatmul.f32.gmra.mxu1 %v8842_v18  ;;  %14151 = vst [vmem:[#allocation130_spill] sm:$0xff] %v8989_v4  ;;  %v9002_v61 = vand.u32 4294901760, %v1641_v39  ;;  %v9004_v59 = vand.u32 4294901760, %v1862_v45 }
  0xe2   :  { %14153 = vst [vmem:[#allocation132_spill] sm:$0xff] %v8994_v27  ;;  %3506 = vmatpush.xpose.msra.mxu0 %v8994_v27 }
  0xe3   :  { %v8998_v6 = vadd.f32 %v2438_v36, %v2243_v63  ;;  %14155 = vst [vmem:[#allocation134_spill] sm:$0xff] %v9002_v61  ;;  %2986 = vmatpush.xpose.msrb.mxu2 %v9002_v61  ;;  %3709 = vmatpush.xpose.msra.mxu1 %v9002_v61  ;;  %v9019_v4 = vsub.f32 %v1641_v39, %v9002_v61 }
  0xe4   :  { %2326 = vmatmul.f32.gmra.mxu2 %v8890_v34  ;;  %2539 = vmatmul.f32.gmra.mxu3 %v8924_v46  ;;  %14156 = vst [vmem:[#allocation135_spill] sm:$0xff] %v9004_v59  ;;  %v9016_v46 = vpop.permute.xlu1 %366  ;;  %v9034_v39 = vpop.xlane.xlu0 %4325 }
  0xe5   :  { %14154 = vst [vmem:[#allocation133_spill] sm:$0xff] %v8998_v6  ;;  %7433 = vset.pattern.permute.xlu2 %v14148_v28  ;;  %v1870_v28 = vsub.f32 %v8978_v5, %v9007_v16 }
  0xe6   :  { %14158 = vst [vmem:[#allocation137_spill] sm:$0xff] %v9009_v21  ;;  %v1737_v2 = vpop.f32.mrf.mxu0  ;;  %101 = vperm.xlu1 %7435, %v8610_v62   ;;  %v2066_v63 = vpop.f32.mrf.mxu1  ;;  %v9025_v62 = vsub.f32 %v1638_v53, %v9009_v21  ;;  %3509 = vmatpush.xpose.msra.mxu0 %v9019_v4 }
  0xe7   :  { %v2247_v36 = vpop.f32.mrf.mxu2  ;;  %v2067_v45 = vadd.f32 %v2066_v63, %v1729_v37  ;;  %v2444_v6 = vpop.f32.mrf.mxu3  ;;  %14159 = vst [vmem:[#allocation138_spill] sm:$0xff] %v9016_v46  ;;  %v1950_v63 = vsub.f32 %v8620_v7, %v9028_v20  ;;  %2988 = vmatpush.xpose.msrb.mxu2 %v9009_v21  ;;  %3711 = vmatpush.xpose.msra.mxu1 %v9009_v21  ;;  %v9053_v7 = vand.u32 4294901760, %v8629_v23 }
  0xe8   :  { %14160 = vst [vmem:[#allocation139_spill] sm:$0xff] %v9019_v4  ;;  %v9031_v37 = vpop.permute.xlu2 %310 }
  0xe9   :  { %1864 = vmatmul.f32.gmra.mxu0 %v9004_v59  ;;  %14161 = vst [vmem:[#allocation140_spill] sm:$0xff] %v9025_v62  ;;  %v2248_v48 = vadd.f32 %v2247_v36, %v2067_v45  ;;  %2129 = vmatmul.f32.gmra.mxu1 %v8879_v22  ;;  %v9044_v36 = vand.u32 4294901760, %v1870_v28  ;;  %v9047_v45 = vand.u32 4294901760, %v9025_v62  ;;  %v9049_v46 = vand.u32 4294901760, %v1950_v63 }
  0xea   :  { %14163 = vst [vmem:[#allocation142_spill] sm:$0xff] %v9031_v37  ;;  %3512 = vmatpush.xpose.msra.mxu0 %v9025_v62  ;;  %v1942_v63 = vsub.f32 %v8629_v23, %v9053_v7  ;;  %v9065_v37 = vand.u32 4294901760, %v8652_v12 }
  0xeb   :  { %14164 = vst [vmem:[#allocation143_spill] sm:$0xff] %v9034_v39  ;;  %v9040_v53 = vadd.f32 %v2444_v6, %v2248_v48  ;;  %3263 = vmatpush.xpose.msrb.mxu3 %v9049_v46  ;;  %2990 = vmatpush.xpose.msrb.mxu2 %v8950_v13 }
  0xec   :  { %2331 = vmatmul.f32.gmra.mxu2 %v8929_v56  ;;  %2545 = vmatmul.f32.gmra.mxu3 %v8956_v41  ;;  %14166 = vst [vmem:[#allocation145_spill] sm:$0xff] %v9044_v36  ;;  %v9075_v23 = vpop.xlane.xlu0 %4328  ;;  %v1934_v40 = vsub.f32 %v8652_v12, %v9065_v37 }
  0xed   :  { %14165 = vst [vmem:[#allocation144_spill] sm:$0xff] %v9040_v53  ;;  %3713 = vmatpush.xpose.msra.mxu1 %v8950_v13 }
  0xee   :  { %14167 = vst [vmem:[#allocation146_spill] sm:$0xff] %v9047_v45  ;;  %v1745_v39 = vpop.f32.mrf.mxu0  ;;  %106 = vperm.xlu1 %7435, %v8636_v49   ;;  %v2070_v48 = vpop.f32.mrf.mxu1  ;;  %v1878_v49 = vsub.f32 %v9025_v62, %v9047_v45  ;;  %3515 = vmatpush.xpose.msra.mxu0 %v8978_v5 }
  0xef   :  { %14168 = vst [vmem:[#allocation147_spill] sm:$0xff] %v9049_v46  ;;  %v2252_v6 = vpop.f32.mrf.mxu2  ;;  %v2071_v28 = vadd.f32 %v2070_v48, %v1737_v2  ;;  %v2450_v53 = vpop.f32.mrf.mxu3  ;;  %v9072_v48 = vand.u32 4294901760, %v1942_v63  ;;  %2992 = vmatpush.xpose.msrb.mxu2 %v8918_v11  ;;  %v9090_v63 = vand.u32 4294901760, %v1934_v40 }
  0xf0   :  { %14169 = vst [vmem:[#allocation148_spill] sm:$0xff] %v9053_v7  ;;  %v9068_v46 = vpop.permute.xlu1 %390  ;;  %v9070_v2 = vpop.permute.xlu2 %314 }
  0xf1   :  { %1872 = vmatmul.f32.gmra.mxu0 %v9044_v36  ;;  %14170 = vst [vmem:[#allocation149_spill] sm:$0xff] %v9065_v37  ;;  %v2253_v41 = vadd.f32 %v2252_v6, %v2071_v28  ;;  %2133 = vmatmul.f32.gmra.mxu1 %v8918_v11  ;;  %v9084_v6 = vand.u32 4294901760, %v1878_v49  ;;  %v9087_v28 = vand.u32 4294901760, %v9019_v4 }
  0xf2   :  { %14171 = vst [vmem:[#allocation150_spill] sm:$0xff] %v9068_v46  ;;  %3269 = vmatpush.xpose.msrb.mxu3 %v9072_v48  ;;  %3715 = vmatpush.xpose.msra.mxu1 %v8918_v11  ;;  %v4295_v46 = vmul.f32 %v8967_v57, %v8967_v57 }
  0xf3   :  { %14172 = vst [vmem:[#allocation151_spill] sm:$0xff] %v9070_v2  ;;  %v9080_v25 = vadd.f32 %v2450_v53, %v2253_v41  ;;  %3518 = vmatpush.xpose.msra.mxu0 %v8929_v56  ;;  %2994 = vmatpush.xpose.msrb.mxu2 %v8879_v22  ;;  %v1886_v11 = vsub.f32 %v9019_v4, %v9087_v28  ;;  %v9110_v56 = vand.u32 4294901760, %v8690_v1 }
  0xf4   :  { %14173 = vst [vmem:[#allocation152_spill] sm:$0xff] %v9072_v48  ;;  %2336 = vmatmul.f32.gmra.mxu2 %v8978_v5  ;;  %2551 = vmatmul.f32.gmra.mxu3 %v9007_v16  ;;  %v9116_v57 = vpop.xlane.xlu0 %4331 }
  0xf5   :  { %14174 = vst [vmem:[#allocation153_spill] sm:$0xff] %v9075_v23  ;;  %v9093_v23 = vand.u32 4294901760, %v8673_v42  ;;  %v1918_v48 = vsub.f32 %v8690_v1, %v9110_v56 }
  0xf6   :  { %14175 = vst [vmem:[#allocation154_spill] sm:$0xff] %v9080_v25  ;;  %v1753_v41 = vpop.f32.mrf.mxu0  ;;  %111 = vperm.xlu1 %7435, %v8679_v51   ;;  %v2074_v53 = vpop.f32.mrf.mxu1  ;;  %3275 = vmatpush.xpose.msrb.mxu3 %v9090_v63 }
  0xf7   :  { %14176 = vst [vmem:[#allocation155_spill] sm:$0xff] %v9084_v6  ;;  %v2257_v49 = vpop.f32.mrf.mxu2  ;;  %v1926_v5 = vsub.f32 %v8673_v42, %v9093_v23  ;;  %v2075_v25 = vadd.f32 %v2074_v53, %v1745_v39  ;;  %v2456_v40 = vpop.f32.mrf.mxu3  ;;  %3521 = vmatpush.xpose.msra.mxu0 %v8890_v34  ;;  %v9119_v53 = vand.u32 4294901760, %v8702_v43  ;;  %2996 = vmatpush.xpose.msrb.mxu2 %v8842_v18  ;;  %v9132_v34 = vand.u32 4294901760, %v1886_v11 }
  0xf8   :  { %14177 = vst [vmem:[#allocation156_spill] sm:$0xff] %v9087_v28  ;;  %v9113_v39 = vpop.permute.xlu2 %318  ;;  %3717 = vmatpush.xpose.msra.mxu1 %v8879_v22  ;;  %v9145_v11 = vand.u32 4294901760, %v8717_v24 }
  0xf9   :  { %14178 = vst [vmem:[#allocation157_spill] sm:$0xff] %v9090_v63  ;;  %1880 = vmatmul.f32.gmra.mxu0 %v9084_v6  ;;  %v9107_v51 = vand.u32 4294901760, %v1926_v5  ;;  %v2258_v2 = vadd.f32 %v2257_v49, %v2075_v25  ;;  %2137 = vmatmul.f32.gmra.mxu1 %v8950_v13  ;;  %v9129_v25 = vpop.xlane.xlu1 %4367  ;;  %v4375_v49 = vsel %vm1570_vm0, %v4295_v46, 0.0  ;;  %v9138_v13 = vand.u32 4294901760, %v1918_v48 }
  0xfa   :  { %14179 = vst [vmem:[#allocation158_spill] sm:$0xff] %v9093_v23  ;;  %v4293_v46 = vmul.f32 %v8973_v33, %v8973_v33 }
  0xfb   :  { %14180 = vst [vmem:[#allocation159_spill] sm:$0xff] %v9107_v51  ;;  %v9125_v5 = vadd.f32 %v2456_v40, %v2258_v2  ;;  %3281 = vmatpush.xpose.msrb.mxu3 %v9107_v51  ;;  %3524 = vmatpush.xpose.msra.mxu0 %v8853_v47 }
  0xfc   :  { %14181 = vst [vmem:[#allocation160_spill] sm:$0xff] %v9110_v56  ;;  %2341 = vmatmul.f32.gmra.mxu2 %v9025_v62  ;;  %2557 = vmatmul.f32.gmra.mxu3 %v9047_v45  ;;  %v1910_v62 = vsub.f32 %v8702_v43, %v9119_v53  ;;  %v4369_v47 = vsel %vm1570_vm0, %v4293_v46, 0.0 }
  0xfd   :  { %14182 = vst [vmem:[#allocation161_spill] sm:$0xff] %v9116_v57  ;;  %v9135_v57 = vand.u32 4294901760, %v8994_v27  ;;  %2998 = vmatpush.xpose.msrb.mxu2 %v8807_v50  ;;  %3719 = vmatpush.xpose.msra.mxu1 %v8842_v18 }
  0xfe   :  { %14183 = vst [vmem:[#allocation162_spill] sm:$0xff] %v9119_v53  ;;  %v1761_v22 = vpop.f32.mrf.mxu0  ;;  %116 = vperm.xlu1 %7435, %v8709_v15   ;;  %v2078_v2 = vpop.f32.mrf.mxu1 }
  0xff   :  { %14184 = vst [vmem:[#allocation163_spill] sm:$0xff] %v9125_v5  ;;  %v2262_v40 = vpop.f32.mrf.mxu2  ;;  %4376 = vadd.xlane.f32.xlu0 %v4375_v49  ;;  %v2079_v48 = vadd.f32 %v2078_v2, %v1753_v41  ;;  %v1894_v15 = vsub.f32 %v8994_v27, %v9135_v57  ;;  %3287 = vmatpush.xpose.msrb.mxu3 %v9138_v13  ;;  %v9162_v2 = vand.u32 4294901760, %v1910_v62  ;;  %v9164_v5 = vpop.xlane.xlu0 %4334 }
 0x100   :  { %14185 = vst [vmem:[#allocation164_spill] sm:$0xff] %v9129_v25  ;;  %v2462_v25 = vpop.f32.mrf.mxu3  ;;  %v9156_v49 = vpop.permute.xlu2 %322  ;;  %3527 = vmatpush.xpose.msra.mxu0 %v8818_v60  ;;  %v1902_v41 = vsub.f32 %v8717_v24, %v9145_v11 }
 0x101   :  { %14186 = vst [vmem:[#allocation165_spill] sm:$0xff] %v9132_v34  ;;  %1888 = vmatmul.f32.gmra.mxu0 %v9132_v34  ;;  %v2263_v33 = vadd.f32 %v2262_v40, %v2079_v48  ;;  %2141 = vmatmul.f32.gmra.mxu1 %v9009_v21  ;;  %v9171_v40 = vand.u32 4294901760, %v1894_v15  ;;  %v9176_v62 = vpop.xlane.xlu1 %4379 }
 0x102   :  { %14187 = vst [vmem:[#allocation166_spill] sm:$0xff] %v9135_v57  ;;  %3000 = vmatpush.xpose.msrb.mxu2 %v8778_v26  ;;  %3721 = vmatpush.xpose.msra.mxu1 %v8807_v50 }
 0x103   :  { %14188 = vst [vmem:[#allocation167_spill] sm:$0xff] %v9138_v13  ;;  %v9167_v18 = vadd.f32 %v2462_v25, %v2263_v33  ;;  %3293 = vmatpush.xpose.msrb.mxu3 %v9162_v2  ;;  %v9178_v25 = vand.u32 4294901760, %v1902_v41 }
 0x104   :  { %14189 = vst [vmem:[#allocation168_spill] sm:$0xff] %v9145_v11  ;;  %2346 = vmatmul.f32.gmra.mxu2 %v9019_v4  ;;  %2563 = vmatmul.f32.gmra.mxu3 %v9087_v28 }
 0x105   :  { %14190 = vst [vmem:[#allocation169_spill] sm:$0xff] %v9162_v2  ;;  %3530 = vmatpush.xpose.msra.mxu0 %v8785_v54 }
 0x106   :  { %14191 = vst [vmem:[#allocation170_spill] sm:$0xff] %v9164_v5  ;;  %3920 = vmatpush.xpose.msra.mxu2 %v9028_v20  ;;  %v1769_v46 = vpop.f32.mrf.mxu0  ;;  %121 = vperm.xlu1 %7435, %v8736_v32   ;;  %v2082_v48 = vpop.f32.mrf.mxu1 }
 0x107   :  { %14192 = vst [vmem:[#allocation171_spill] sm:$0xff] %v9167_v18  ;;  %4370 = vadd.xlane.f32.xlu2 %v4369_v47  ;;  %v2267_v60 = vpop.f32.mrf.mxu2  ;;  %v2083_v15 = vadd.f32 %v2082_v48, %v1761_v22  ;;  %3299 = vmatpush.xpose.msrb.mxu3 %v9178_v25  ;;  %v9188_v47 = vpop.xlane.xlu0 %4337 }
 0x108   :  { %14193 = vst [vmem:[#allocation172_spill] sm:$0xff] %v9171_v40  ;;  %v2468_v33 = vpop.f32.mrf.mxu3  ;;  %v9185_v32 = vpop.permute.xlu2 %326  ;;  %3723 = vmatpush.xpose.msra.mxu1 %v8778_v26 }
 0x109   :  { %14194 = vst [vmem:[#allocation173_spill] sm:$0xff] %v9176_v62  ;;  %1896 = vmatmul.f32.gmra.mxu0 %v9171_v40  ;;  %v2268_v4 = vadd.f32 %v2267_v60, %v2083_v15  ;;  %2145 = vmatmul.f32.gmra.mxu1 %v9002_v61 }
 0x10a   :  { %14195 = vst [vmem:[#allocation174_spill] sm:$0xff] %v9178_v25  ;;  %3924 = vmatpush.xpose.msra.mxu2 %v9053_v7 }
 0x10b   :  { %14196 = vst [vmem:[#allocation175_spill] sm:$0xff] %v9188_v47  ;;  %v9191_v41 = vadd.f32 %v2468_v33, %v2268_v4  ;;  %3305 = vmatpush.xpose.msrb.mxu3 %v9171_v40  ;;  %v14210_v47 = vld [vmem:[#allocation6_spill] sm:$0xff]  ;;  %v14254_v40 = vld [vmem:[#allocation52_spill] sm:$0xff] }
 0x10c   :  { %2351 = vmatmul.f32.gmra.mxu2 %v8994_v27  ;;  %2569 = vmatmul.f32.gmra.mxu3 %v9135_v57 }
 0x10d   :  { %14197 = vst [vmem:[#allocation176_spill] sm:$0xff] %v9191_v41 }
 0x10e   :  { %v1777_v22 = vpop.f32.mrf.mxu0  ;;  %126 = vperm.xlu1 %7435, %v8754_v52   ;;  %3928 = vmatpush.xpose.msra.mxu2 %v9065_v37  ;;  %v2086_v60 = vpop.f32.mrf.mxu1 }
 0x10f   :  { %v2272_v48 = vpop.f32.mrf.mxu2  ;;  %v2087_v15 = vadd.f32 %v2086_v60, %v1769_v46  ;;  %3311 = vmatpush.xpose.msrb.mxu3 %v9132_v34  ;;  %v9207_v52 = vpop.xlane.xlu0 %4340 }
 0x110   :  { %v2474_v54 = vpop.f32.mrf.mxu3  ;;  %v9198_v62 = vpop.permute.xlu1 %56  ;;  %14199 = vst [vmem:[#allocation178_spill] sm:$0xff] %v9207_v52 }
 0x111   :  { %14198 = vst [vmem:[#allocation177_spill] sm:$0xff] %v9198_v62  ;;  %1904 = vmatmul.f32.gmra.mxu0 %v9178_v25  ;;  %v2273_v4 = vadd.f32 %v2272_v48, %v2087_v15  ;;  %2149 = vmatmul.f32.gmra.mxu1 %v8984_v29  ;;  %v9203_v33 = vpop.permute.xlu2 %330 }
 0x112   :  { %3932 = vmatpush.xpose.msra.mxu2 %v9093_v23 }
 0x113   :  { %136 = vperm.xlu0 %7434, %v8799_v30   ;;  %v9209_v27 = vadd.f32 %v2474_v54, %v2273_v4  ;;  %3317 = vmatpush.xpose.msrb.mxu3 %v9084_v6 }
 0x114   :  { %2356 = vmatmul.f32.gmra.mxu2 %v8717_v24  ;;  %2575 = vmatmul.f32.gmra.mxu3 %v9145_v11 }
 0x115   :  { %14200 = vst [vmem:[#allocation179_spill] sm:$0xff] %v9209_v27 }
 0x116   :  { %v1785_v46 = vpop.f32.mrf.mxu0  ;;  %131 = vperm.xlu1 %7435, %v8770_v8   ;;  %3936 = vmatpush.xpose.msra.mxu2 %v9110_v56  ;;  %v2090_v60 = vpop.f32.mrf.mxu1 }
 0x117   :  { %v2277_v48 = vpop.f32.mrf.mxu2  ;;  %v2091_v15 = vadd.f32 %v2090_v60, %v1777_v22  ;;  %3323 = vmatpush.xpose.msrb.mxu3 %v9044_v36  ;;  %v9225_v8 = vpop.xlane.xlu0 %4343  ;;  %v14260_v36 = vld [vmem:[#allocation113_spill] sm:$0xff] }
 0x118   :  { %v2480_v62 = vpop.f32.mrf.mxu3  ;;  %v9216_v30 = vpop.permute.xlu1 %61  ;;  %14202 = vst [vmem:[#allocation181_spill] sm:$0xff] %v9225_v8 }
 0x119   :  { %14201 = vst [vmem:[#allocation180_spill] sm:$0xff] %v9216_v30  ;;  %1912 = vmatmul.f32.gmra.mxu0 %v9162_v2  ;;  %v2278_v54 = vadd.f32 %v2277_v48, %v2091_v15  ;;  %2153 = vmatmul.f32.gmra.mxu1 %v8699_v35  ;;  %v9221_v4 = vpop.permute.xlu2 %334 }
 0x11a   :  { %3940 = vmatpush.xpose.msra.mxu2 %v9119_v53 }
 0x11b   :  { %141 = vperm.xlu0 %7434, %v8829_v3   ;;  %v9227_v24 = vadd.f32 %v2480_v62, %v2278_v54  ;;  %3329 = vmatpush.xpose.msrb.mxu3 %v9004_v59 }
 0x11c   :  { %2361 = vmatmul.f32.gmra.mxu2 %v8702_v43  ;;  %2581 = vmatmul.f32.gmra.mxu3 %v9119_v53 }
 0x11d   :  { %14203 = vst [vmem:[#allocation182_spill] sm:$0xff] %v9227_v24 }
 0x11e   :  { %v1793_v22 = vpop.f32.mrf.mxu0  ;;  %211 = vperm.xlu1 %7435, %v8794_v31   ;;  %v2094_v60 = vpop.f32.mrf.mxu1  ;;  %3944 = vmatpush.xpose.msra.mxu2 %v9145_v11  ;;  %v7923_v11 = vld [vmem:[%s13425_s3 + $0xa0] sm:$0xff] }
 0x11f   :  { %206 = vperm.xlu2 %7433, %v8834_v44   ;;  %v2282_v48 = vpop.f32.mrf.mxu2  ;;  %v2095_v3 = vadd.f32 %v2094_v60, %v1785_v46  ;;  %3335 = vmatpush.xpose.msrb.mxu3 %v8952_v14  ;;  %v9241_v31 = vpop.xlane.xlu0 %4346  ;;  %v7921_v60 = vld [vmem:[%s13425_s3 + $0x90] sm:$0xff] }
 0x120   :  { %v2486_v15 = vpop.f32.mrf.mxu3  ;;  %v9235_v30 = vpop.permute.xlu1 %66  ;;  %14204 = vst [vmem:[#allocation183_spill] sm:$0xff] %v9241_v31 }
 0x121   :  { %1920 = vmatmul.f32.gmra.mxu0 %v9138_v13  ;;  %v2283_v62 = vadd.f32 %v2282_v48, %v2095_v3  ;;  %2157 = vmatmul.f32.gmra.mxu1 %v8685_v55  ;;  %v9248_v46 = vpop.permute.xlu2 %338  ;;  %v7265_v3 = vld [vmem:[%s13426_s4 + $0x1] ss:$2 sm:$0x3] }
 0x122   :  { %3948 = vmatpush.xpose.msra.mxu2 %v9135_v57 }
 0x123   :  { %201 = vperm.xlu0 %7434, %v8871_v19   ;;  %v9244_v44 = vadd.f32 %v2486_v15, %v2283_v62  ;;  %3341 = vmatpush.xpose.msrb.mxu3 %v8920_v58 }
 0x124   :  { %2366 = vmatmul.f32.gmra.mxu2 %v8690_v1  ;;  %2587 = vmatmul.f32.gmra.mxu3 %v9110_v56  ;;  %v7922_v1 = vld [vmem:[%s13425_s3 + $0xd0] sm:$0xff] }
 0x125   :  { %14205 = vst [vmem:[#allocation184_spill] sm:$0xff] %v9244_v44 }
 0x126   :  { %v1801_v54 = vpop.f32.mrf.mxu0  ;;  %146 = vperm.xlu1 %7435, %v7921_v60   ;;  %v2098_v19 = vpop.f32.mrf.mxu1  ;;  %3952 = vmatpush.xpose.msra.mxu2 %v9087_v28  ;;  %v9266_v60 = vperm.slane %v7265_v3, 1  ;;  %v14209_v28 = vld [vmem:[#allocation78_spill] sm:$0xff] }
 0x127   :  { %196 = vperm.xlu2 %7433, %v8864_v17   ;;  %v2287_v48 = vpop.f32.mrf.mxu2  ;;  %v2099_v15 = vadd.f32 %v2098_v19, %v1793_v22  ;;  %3347 = vmatpush.xpose.msrb.mxu3 %v8881_v9  ;;  %v9264_v17 = vperm.slane %v7265_v3, 0  ;;  %v9271_v22 = vpop.xlane.xlu0 %4349  ;;  %v53_v19 = vld [vmem:[%s13426_s4] ss:$2 sm:$0x3] }
 0x128   :  { %v2492_v62 = vpop.f32.mrf.mxu3  ;;  %v9259_v56 = vpop.permute.xlu1 %71  ;;  %14206 = vst [vmem:[#allocation185_spill] sm:$0xff] %v9271_v22 }
 0x129   :  { %1928 = vmatmul.f32.gmra.mxu0 %v9107_v51  ;;  %v2288_v53 = vadd.f32 %v2287_v48, %v2099_v15  ;;  %2161 = vmatmul.f32.gmra.mxu1 %v8666_v0  ;;  %v426_v3 = vsub.f32 %v8942_v38, %v9264_v17 }
 0x12a   :  { %3956 = vmatpush.xpose.msra.mxu2 %v9047_v45 }
 0x12b   :  { %186 = vperm.xlu0 %7434, %v7922_v1   ;;  %v9277_v48 = vadd.f32 %v2492_v62, %v2288_v53  ;;  %v427_v1 = vsub.f32 %v8942_v38, %v9266_v60  ;;  %3353 = vmatpush.xpose.msrb.mxu3 %v8844_v10  ;;  %v14208_v53 = vld [vmem:[#allocation111_spill] sm:$0xff]  ;;  %v9290_v62 = vpop.permute.xlu2 %342 }
 0x12c   :  { %2371 = vmatmul.f32.gmra.mxu2 %v8673_v42  ;;  %2593 = vmatmul.f32.gmra.mxu3 %v9093_v23  ;;  %v9292_v42 = vperm.slane %v53_v19, 0  ;;  %v9294_v23 = vperm.slane %v53_v19, 1 }
 0x12d   :  { %14207 = vst [vmem:[#allocation186_spill] sm:$0xff] %v9277_v48  ;;  %v555_v31 = vmul.f32 %v427_v1, %v427_v1  ;;  %v14213_v1 = vld [vmem:[#allocation130_spill] sm:$0xff] }
 0x12e   :  { %v1809_v15 = vpop.f32.mrf.mxu0  ;;  %156 = vperm.xlu1 %7435, %v7923_v11   ;;  %v2102_v43 = vpop.f32.mrf.mxu1  ;;  %3960 = vmatpush.xpose.msra.mxu2 %v9007_v16  ;;  %v9301_v11 = vld [vmem:[%s13425_s3 + $0xc8] sm:$0xff] }
 0x12f   :  { %151 = vperm.xlu2 %7433, %v14208_v53   ;;  %v2292_v57 = vpop.f32.mrf.mxu2  ;;  %4111 = vmatpush.xpose.msra.mxu3 %v14209_v28  ;;  %v2103_v38 = vadd.f32 %v2102_v43, %v1801_v54  ;;  %v554_v53 = vmul.f32 %v426_v3, %v426_v3  ;;  %v43_v54 = vld [vmem:[%s13425_s3 + $0xb0] sm:$0xff]  ;;  %v9311_v51 = vpop.xlane.xlu0 %4352 }
 0x130   :  { %v2498_v45 = vpop.f32.mrf.mxu3  ;;  %v77_v22 = vpop.permute.xlu1 %76  ;;  %14211 = vst [vmem:[#allocation111_spill] sm:$0xff] %v9311_v51  ;;  %v14212_v3 = vld [vmem:[#allocation79_spill] sm:$0xff]  ;;  %v14216_v51 = vld [vmem:[#allocation121_spill] sm:$0xff] }
 0x131   :  { %1936 = vmatmul.f32.gmra.mxu0 %v9090_v63  ;;  %v227_v19 = vsub.f32 %v77_v22, %v9292_v42  ;;  %v228_v8 = vsub.f32 %v77_v22, %v9294_v23  ;;  %v2293_v52 = vadd.f32 %v2292_v57, %v2103_v38  ;;  %2165 = vmatmul.f32.gmra.mxu1 %v14210_v47  ;;  %v14215_v38 = vld [vmem:[#allocation126_spill] sm:$0xff] }
 0x132   :  { %v428_v63 = vsub.f32 %v14213_v1, %v9264_v17  ;;  %v429_v57 = vsub.f32 %v14213_v1, %v9266_v60  ;;  %3964 = vmatpush.xpose.msra.mxu2 %v14215_v38  ;;  %v14218_v1 = vld [vmem:[#allocation152_spill] sm:$0xff] }
 0x133   :  { %v490_v16 = vmul.f32 %v227_v19, %v227_v19  ;;  %v491_v43 = vmul.f32 %v228_v8, %v228_v8  ;;  %181 = vperm.xlu0 %7434, %v9301_v11   ;;  %4113 = vmatpush.xpose.msra.mxu3 %v14212_v3  ;;  %v9316_v48 = vadd.f32 %v2498_v45, %v2293_v52  ;;  %v14217_v52 = vld [vmem:[#allocation80_spill] sm:$0xff] }
 0x134   :  { %2376 = vmatmul.f32.gmra.mxu2 %v8652_v12  ;;  %2599 = vmatmul.f32.gmra.mxu3 %v9065_v37  ;;  %v556_v12 = vmul.f32 %v428_v63, %v428_v63  ;;  %v557_v44 = vmul.f32 %v429_v57, %v429_v57  ;;  %v14221_v63 = vld [vmem:[#allocation142_spill] sm:$0xff] }
 0x135   :  { %14214 = vst [vmem:[#allocation130_spill] sm:$0xff] %v9316_v48  ;;  %v9322_v8 = vadd.f32 %v554_v53, %v490_v16  ;;  %v9324_v22 = vadd.f32 %v555_v31, %v491_v43  ;;  %v14219_v53 = vld [vmem:[#allocation119_spill] sm:$0xff] }
 0x136   :  { %v1817_v19 = vpop.f32.mrf.mxu0  ;;  %166 = vperm.xlu1 %7435, %v43_v54   ;;  %v2106_v13 = vpop.f32.mrf.mxu1  ;;  %3968 = vmatpush.xpose.msra.mxu2 %v14219_v53 }
 0x137   :  { %191 = vperm.xlu2 %7433, %v14216_v51   ;;  %v2297_v45 = vpop.f32.mrf.mxu2  ;;  %4115 = vmatpush.xpose.msra.mxu3 %v14217_v52  ;;  %v2107_v48 = vadd.f32 %v2106_v13, %v1809_v15  ;;  %v9334_v51 = vpop.permute.xlu2 %346  ;;  %v14220_v13 = vmov 1   ;;  %v430_v15 = vsub.f32 %v14221_v63, %v9264_v17  ;;  %v683_v9 = vmul.f32 -0.5, %v9324_v22 }
 0x138   :  { %v2504_v37 = vpop.f32.mrf.mxu3  ;;  %v82_v5 = vpop.permute.xlu1 %81 }
 0x139   :  { %1944 = vmatmul.f32.gmra.mxu0 %v14218_v1  ;;  %v229_v16 = vsub.f32 %v82_v5, %v9292_v42  ;;  %v230_v31 = vsub.f32 %v82_v5, %v9294_v23  ;;  %v2298_v43 = vadd.f32 %v2297_v45, %v2107_v48  ;;  %2169 = vmatmul.f32.gmra.mxu1 %v14217_v52  ;;  %v14223_v1 = vld [vmem:[#allocation81_spill] sm:$0xff]  ;;  %v9344_v5 = vpop.xlane.xlu0 %4388 }
 0x13a   :  { %14224 = vst [vmem:[#allocation142_spill] sm:$0xff] %v9344_v5  ;;  %v431_v48 = vsub.f32 %v14221_v63, %v9266_v60 }
 0x13b   :  { %v492_v38 = vmul.f32 %v229_v16, %v229_v16  ;;  %v493_v2 = vmul.f32 %v230_v31, %v230_v31  ;;  %4117 = vmatpush.xpose.msra.mxu3 %v14210_v47  ;;  %7440 = vset.pattern.permute.xlu0 %v14220_v13  ;;  %v9340_v57 = vadd.f32 %v2504_v37, %v2298_v43  ;;  %v14227_v31 = vld [vmem:[#allocation109_spill] sm:$0xff]  ;;  %v14228_v37 = vld [vmem:[#allocation112_spill] sm:$0xff] }
 0x13c   :  { %2381 = vmatmul.f32.gmra.mxu2 %v14223_v1  ;;  %2605 = vmatmul.f32.gmra.mxu3 %v9053_v7  ;;  %v558_v7 = vmul.f32 %v430_v15, %v430_v15 }
 0x13d   :  { %14222 = vst [vmem:[#allocation121_spill] sm:$0xff] %v9340_v57  ;;  %v9348_v45 = vadd.f32 %v556_v12, %v492_v38  ;;  %v9350_v16 = vadd.f32 %v557_v44, %v493_v2  ;;  %3972 = vmatpush.xpose.msra.mxu2 %v14227_v31  ;;  %v559_v12 = vmul.f32 %v431_v48, %v431_v48  ;;  %v14229_v38 = vld [vmem:[#allocation147_spill] sm:$0xff] }
 0x13e   :  { %v1825_v53 = vpop.f32.mrf.mxu0  ;;  %7436 = vset.pattern.permute.xlu1 %v14220_v13  ;;  %v2110_v43 = vpop.f32.mrf.mxu1  ;;  %v14230_v31 = vld [vmem:[#allocation103_spill] sm:$0xff] }
 0x13f   :  { %14225 = vst [vmem:[#allocation187_spill] sm:$0xff] %v9348_v45  ;;  %161 = vperm.xlu2 %7433, %v14228_v37   ;;  %374 = vperm.xlu1 %7436, %v43_v54   ;;  %v2302_v1 = vpop.f32.mrf.mxu2  ;;  %v2111_v5 = vadd.f32 %v2110_v43, %v1817_v19  ;;  %v45_v19 = vld [vmem:[%s13425_s3 + $0xc0] sm:$0xff]  ;;  %v14232_v48 = vld [vmem:[#allocation7_spill] sm:$0xff]  ;;  %v9369_v43 = vpop.permute.xlu2 %410  ;;  %v14267_v45 = vld [vmem:[#allocation48_spill] sm:$0xff] }
 0x140   :  { %14226 = vst [vmem:[#allocation188_spill] sm:$0xff] %v9350_v16  ;;  %4119 = vmatpush.xpose.msra.mxu3 %v8666_v0  ;;  %v2510_v57 = vpop.f32.mrf.mxu3  ;;  %v87_v63 = vpop.permute.xlu1 %86 }
 0x141   :  { %1952 = vmatmul.f32.gmra.mxu0 %v14229_v38  ;;  %v231_v2 = vsub.f32 %v87_v63, %v9292_v42  ;;  %v232_v44 = vsub.f32 %v87_v63, %v9294_v23  ;;  %3976 = vmatpush.xpose.msra.mxu2 %v14230_v31  ;;  %v2303_v52 = vadd.f32 %v2302_v1, %v2111_v5  ;;  %v14233_v1 = vld [vmem:[#allocation151_spill] sm:$0xff]  ;;  %v14234_v31 = vld [vmem:[#allocation97_spill] sm:$0xff] }
 0x142   :  { %2173 = vmatmul.f32.gmra.mxu1 %v14212_v3  ;;  %v432_v5 = vsub.f32 %v14233_v1, %v9264_v17  ;;  %v433_v63 = vsub.f32 %v14233_v1, %v9266_v60 }
 0x143   :  { %v494_v54 = vmul.f32 %v231_v2, %v231_v2  ;;  %v495_v37 = vmul.f32 %v232_v44, %v232_v44  ;;  %v9365_v15 = vadd.f32 %v2510_v57, %v2303_v52  ;;  %v9380_v57 = vpop.xlane.xlu0 %4364 }
 0x144   :  { %4121 = vmatpush.xpose.msra.mxu3 %v8685_v55  ;;  %2386 = vmatmul.f32.gmra.mxu2 %v14232_v48  ;;  %14235 = vst [vmem:[#allocation151_spill] sm:$0xff] %v9380_v57  ;;  %v560_v1 = vmul.f32 %v432_v5, %v432_v5  ;;  %v435_v5 = vsub.f32 %v9113_v39, %v9266_v60 }
 0x145   :  { %14231 = vst [vmem:[#allocation112_spill] sm:$0xff] %v9365_v15  ;;  %2611 = vmatmul.f32.gmra.mxu3 %v9028_v20  ;;  %v9375_v2 = vadd.f32 %v558_v7, %v494_v54  ;;  %v9377_v44 = vadd.f32 %v559_v12, %v495_v37  ;;  %3980 = vmatpush.xpose.msra.mxu2 %v14234_v31  ;;  %v14236_v54 = vld [vmem:[#allocation62_spill] sm:$0xff] }
 0x146   :  { %v1833_v52 = vpop.f32.mrf.mxu0  ;;  %v2114_v48 = vpop.f32.mrf.mxu1  ;;  %v561_v7 = vmul.f32 %v433_v63, %v433_v63 }
 0x147   :  { %176 = vperm.xlu2 %7433, %v45_v19   ;;  %386 = vperm.xlu1 %7436, %v9301_v11   ;;  %v2307_v20 = vpop.f32.mrf.mxu2  ;;  %v2115_v38 = vadd.f32 %v2114_v48, %v1825_v53  ;;  %v14238_v53 = vld [vmem:[#allocation76_spill] sm:$0xff]  ;;  %v434_v48 = vsub.f32 %v9113_v39, %v9264_v17 }
 0x148   :  { %4123 = vmatpush.xpose.msra.mxu3 %v8699_v35  ;;  %v2516_v15 = vpop.f32.mrf.mxu3  ;;  %v92_v3 = vpop.permute.xlu1 %91 }
 0x149   :  { %2680 = vmatmul.f32.vlgmr.msrb.gmra.mxu0 %v14236_v54  ;;  %v233_v12 = vsub.f32 %v92_v3, %v9292_v42  ;;  %v234_v37 = vsub.f32 %v92_v3, %v9294_v23  ;;  %v2308_v31 = vadd.f32 %v2307_v20, %v2115_v38  ;;  %v44_v38 = vld [vmem:[%s13425_s3 + $0xb8] sm:$0xff] }
 0x14a   :  { %2177 = vmatmul.f32.gmra.mxu1 %v14209_v28 }
 0x14b   :  { %v496_v57 = vmul.f32 %v233_v12, %v233_v12  ;;  %v497_v47 = vmul.f32 %v234_v37, %v234_v37  ;;  %v9389_v11 = vadd.f32 %v2516_v15, %v2308_v31  ;;  %v9405_v15 = vpop.permute.xlu2 %354  ;;  %v14239_v12 = vmov 0  }
 0x14c   :  { %4125 = vmatpush.xpose.msra.mxu3 %v8984_v29  ;;  %3006 = vmatmul.f32.vlgmr.msrb.gmra.mxu2 %v14238_v53 }
 0x14d   :  { %14237 = vst [vmem:[#allocation189_spill] sm:$0xff] %v9389_v11  ;;  %3355 = vmatmul.f32.vlgmr.msrb.gmra.mxu3 %v14236_v54  ;;  %v9397_v3 = vadd.f32 %v560_v1, %v496_v57  ;;  %v9399_v20 = vadd.f32 %v561_v7, %v497_v47  ;;  %v562_v47 = vmul.f32 %v434_v48, %v434_v48  ;;  %v14240_v7 = vld [vmem:[#allocation63_spill] sm:$0xff]  ;;  %v14242_v48 = vld [vmem:[#allocation77_spill] sm:$0xff] }
 0x14e   :  { %v1841_v31 = vpop.f32.mrf.mxu0  ;;  %v2118_v63 = vpop.f32.mrf.mxu1  ;;  %v563_v1 = vmul.f32 %v435_v5, %v435_v5  ;;  %v437_v5 = vsub.f32 %v9156_v49, %v9266_v60 }
 0x14f   :  { %7437 = vset.pattern.permute.xlu2 %v14220_v13  ;;  %7438 = vset.pattern.permute.xlu1 %v14239_v12  ;;  %v2312_v37 = vpop.f32.mrf.mxu2  ;;  %v2119_v53 = vadd.f32 %v2118_v63, %v1833_v52  ;;  %v9413_v12 = vpop.permute.xlu0 %350  ;;  %v436_v63 = vsub.f32 %v9156_v49, %v9264_v17 }
 0x150   :  { %382 = vperm.xlu2 %7437, %v45_v19   ;;  %v2522_v39 = vpop.f32.mrf.mxu3  ;;  %171 = vperm.xlu1 %7438, %v44_v38   ;;  %v97_v57 = vpop.permute.xlu1 %96 }
 0x151   :  { %4127 = vmatpush.xpose.msra.mxu3 %v9002_v61  ;;  %2684 = vmatmul.f32.gmra.mxu0 %v14240_v7  ;;  %v235_v11 = vsub.f32 %v97_v57, %v9292_v42  ;;  %v236_v28 = vsub.f32 %v97_v57, %v9294_v23  ;;  %v2313_v0 = vadd.f32 %v2312_v37, %v2119_v53 }
 0x152   :  { %2841 = vmatmul.f32.vlgmr.msrb.gmra.mxu1 %v14236_v54  ;;  %v564_v54 = vmul.f32 %v436_v63, %v436_v63 }
 0x153   :  { %v498_v19 = vmul.f32 %v235_v11, %v235_v11  ;;  %v499_v52 = vmul.f32 %v236_v28, %v236_v28  ;;  %v9417_v55 = vadd.f32 %v2522_v39, %v2313_v0 }
 0x154   :  { %3014 = vmatmul.f32.gmra.mxu2 %v14242_v48  ;;  %v565_v48 = vmul.f32 %v437_v5, %v437_v5 }
 0x155   :  { %14241 = vst [vmem:[#allocation76_spill] sm:$0xff] %v9417_v55  ;;  %3359 = vmatmul.f32.gmra.mxu3 %v14240_v7  ;;  %v9423_v57 = vadd.f32 %v562_v47, %v498_v19  ;;  %v9425_v37 = vadd.f32 %v563_v1, %v499_v52  ;;  %v14243_v55 = vld [vmem:[#allocation58_spill] sm:$0xff]  ;;  %v9433_v19 = vpop.permute.xlu2 %398  ;;  %v14244_v52 = vld [vmem:[#allocation124_spill] sm:$0xff] }
 0x156   :  { %4129 = vmatpush.xpose.msra.mxu3 %v9009_v21  ;;  %v1849_v11 = vpop.f32.mrf.mxu0  ;;  %v2122_v28 = vpop.f32.mrf.mxu1  ;;  %v14257_v21 = vld [vmem:[#allocation138_spill] sm:$0xff] }
 0x157   :  { %v2317_v53 = vpop.f32.mrf.mxu2  ;;  %v2123_v24 = vadd.f32 %v2122_v28, %v1841_v31 }
 0x158   :  { %v2528_v0 = vpop.f32.mrf.mxu3  ;;  %7439 = vset.pattern.permute.xlu1 %v14220_v13  ;;  %v102_v39 = vpop.permute.xlu1 %101  ;;  %v14246_v13 = vld [vmem:[#allocation75_spill] sm:$0xff] }
 0x159   :  { %2688 = vmatmul.f32.gmra.mxu0 %v14243_v55  ;;  %378 = vperm.xlu1 %7439, %v44_v38   ;;  %v237_v49 = vsub.f32 %v102_v39, %v9292_v42  ;;  %v238_v47 = vsub.f32 %v102_v39, %v9294_v23  ;;  %v2318_v1 = vadd.f32 %v2317_v53, %v2123_v24  ;;  %v9440_v38 = vpop.permute.xlu0 %406  ;;  %v14247_v53 = vld [vmem:[#allocation117_spill] sm:$0xff] }
 0x15a   :  { %2845 = vmatmul.f32.gmra.mxu1 %v14240_v7  ;;  %4131 = vmatpush.xpose.msra.mxu3 %v14244_v52  ;;  %v424_v52 = vsub.f32 %v14260_v36, %v9264_v17 }
 0x15b   :  { %v500_v31 = vmul.f32 %v237_v49, %v237_v49  ;;  %v501_v63 = vmul.f32 %v238_v47, %v238_v47  ;;  %v9436_v28 = vadd.f32 %v2528_v0, %v2318_v1  ;;  %v14248_v0 = vld [vmem:[#allocation55_spill] sm:$0xff] }
 0x15c   :  { %3022 = vmatmul.f32.gmra.mxu2 %v14246_v13  ;;  %v14249_v13 = vld [vmem:[#allocation107_spill] sm:$0xff] }
 0x15d   :  { %14245 = vst [vmem:[#allocation77_spill] sm:$0xff] %v9436_v28  ;;  %3363 = vmatmul.f32.gmra.mxu3 %v14243_v55  ;;  %v9442_v5 = vadd.f32 %v564_v54, %v500_v31  ;;  %v9444_v39 = vadd.f32 %v565_v48, %v501_v63  ;;  %v14251_v48 = vld [vmem:[#allocation73_spill] sm:$0xff]  ;;  %v9456_v31 = vpop.permute.xlu2 %362 }
 0x15e   :  { %v1857_v24 = vpop.f32.mrf.mxu0  ;;  %4133 = vmatpush.xpose.msra.mxu3 %v14247_v53  ;;  %v2126_v7 = vpop.f32.mrf.mxu1  ;;  %14252 = vst [vmem:[#allocation73_spill] sm:$0xff] %v9456_v31 }
 0x15f   :  { %v2322_v25 = vpop.f32.mrf.mxu2  ;;  %v2127_v35 = vadd.f32 %v2126_v7, %v1849_v11  ;;  %v440_v7 = vsub.f32 %v9203_v33, %v9264_v17  ;;  %v441_v11 = vsub.f32 %v9203_v33, %v9266_v60  ;;  %v14255_v33 = vld [vmem:[#allocation127_spill] sm:$0xff] }
 0x160   :  { %v2534_v49 = vpop.f32.mrf.mxu3  ;;  %v9447_v47 = vpop.permute.xlu1 %106  ;;  %v454_v34 = vsub.f32 %v14255_v33, %v9264_v17  ;;  %v455_v61 = vsub.f32 %v14255_v33, %v9266_v60  ;;  %v458_v33 = vsub.f32 %v14257_v21, %v9264_v17 }
 0x161   :  { %2692 = vmatmul.f32.gmra.mxu0 %v14248_v0  ;;  %v2323_v1 = vadd.f32 %v2322_v25, %v2127_v35  ;;  %v9462_v35 = vpop.permute.xlu0 %402  ;;  %v14253_v25 = vld [vmem:[#allocation101_spill] sm:$0xff]  ;;  %v569_v27 = vmul.f32 %v441_v11, %v441_v11 }
 0x162   :  { %2849 = vmatmul.f32.gmra.mxu1 %v14243_v55  ;;  %4135 = vmatpush.xpose.msra.mxu3 %v14249_v13  ;;  %v568_v55 = vmul.f32 %v440_v7, %v440_v7  ;;  %v9499_v53 = vmul.f32 %v454_v34, %v454_v34 }
 0x163   :  { %v9452_v54 = vadd.f32 %v2534_v49, %v2323_v1 }
 0x164   :  { %3030 = vmatmul.f32.gmra.mxu2 %v14251_v48 }
 0x165   :  { %14250 = vst [vmem:[#allocation75_spill] sm:$0xff] %v9452_v54  ;;  %3367 = vmatmul.f32.gmra.mxu3 %v14248_v0 }
 0x166   :  { %v1865_v63 = vpop.f32.mrf.mxu0  ;;  %4137 = vmatpush.xpose.msra.mxu3 %v14253_v25  ;;  %v2130_v28 = vpop.f32.mrf.mxu1 }
 0x167   :  { %v2327_v49 = vpop.f32.mrf.mxu2  ;;  %v2131_v1 = vadd.f32 %v2130_v28, %v1857_v24  ;;  %v4399_v28 = vld [vmem:[%s13424_s2] sm:$0x3] }
 0x168   :  { %v2540_v54 = vpop.f32.mrf.mxu3  ;;  %v112_v48 = vpop.permute.xlu1 %111  ;;  %v14256_v24 = vld [vmem:[#allocation105_spill] sm:$0xff]  ;;  %v9497_v59 = vperm.slane %v4399_v28, 0 }
 0x169   :  { %2696 = vmatmul.f32.gmra.mxu0 %v14254_v40  ;;  %v241_v29 = vsub.f32 %v112_v48, %v9292_v42  ;;  %v242_v41 = vsub.f32 %v112_v48, %v9294_v23  ;;  %v2328_v18 = vadd.f32 %v2327_v49, %v2131_v1  ;;  %v422_v7 = vsub.f32 %v14256_v24, %v9264_v17 }
 0x16a   :  { %2853 = vmatmul.f32.gmra.mxu1 %v14248_v0  ;;  %4139 = vmatpush.xpose.msra.mxu3 %v8807_v50  ;;  %v423_v11 = vsub.f32 %v14256_v24, %v9266_v60  ;;  %v459_v49 = vsub.f32 %v14257_v21, %v9266_v60  ;;  %v14259_v0 = vld [vmem:[#allocation70_spill] sm:$0xff]  ;;  %v225_v24 = vsub.f32 %v9259_v56, %v9292_v42 }
 0x16b   :  { %v504_v48 = vmul.f32 %v241_v29, %v241_v29  ;;  %v505_v6 = vmul.f32 %v242_v41, %v242_v41  ;;  %v9485_v1 = vadd.f32 %v2540_v54, %v2328_v18  ;;  %14261 = vst [vmem:[#allocation105_spill] sm:$0xff] %v9497_v59  ;;  %v425_v21 = vsub.f32 %v14260_v36, %v9266_v60 }
 0x16c   :  { %3038 = vmatmul.f32.gmra.mxu2 %v14259_v0  ;;  %v9503_v0 = vpop.permute.xlu2 %394  ;;  %v9506_v54 = vmul.f32 %v455_v61, %v455_v61  ;;  %v9516_v36 = vmul.f32 %v458_v33, %v458_v33  ;;  %v9518_v14 = vmul.f32 %v459_v49, %v459_v49  ;;  %v488_v25 = vmul.f32 %v225_v24, %v225_v24 }
 0x16d   :  { %14258 = vst [vmem:[#allocation127_spill] sm:$0xff] %v9485_v1  ;;  %3371 = vmatmul.f32.gmra.mxu3 %v14254_v40  ;;  %v9493_v29 = vadd.f32 %v568_v55, %v504_v48  ;;  %v9495_v41 = vadd.f32 %v569_v27, %v505_v6  ;;  %v9508_v1 = vmul.f32 %v422_v7, %v422_v7  ;;  %v14263_v55 = vld [vmem:[#allocation150_spill] sm:$0xff] }
 0x16e   :  { %v1873_v18 = vpop.f32.mrf.mxu0  ;;  %4141 = vmatpush.xpose.msra.mxu3 %v8778_v26  ;;  %v470_v27 = vsub.f32 %v14263_v55, %v9264_v17  ;;  %v226_v6 = vsub.f32 %v9259_v56, %v9294_v23  ;;  %v2134_v34 = vpop.f32.mrf.mxu1  ;;  %v9514_v48 = vmul.f32 %v423_v11, %v423_v11  ;;  %14265 = vst [vmem:[#allocation113_spill] sm:$0xff] %v9516_v36 }
 0x16f   :  { %14262 = vst [vmem:[#allocation138_spill] sm:$0xff] %v9508_v1  ;;  %v2332_v28 = vpop.f32.mrf.mxu2  ;;  %v2135_v13 = vadd.f32 %v2134_v34, %v1865_v63  ;;  %v552_v7 = vmul.f32 %v424_v52, %v424_v52  ;;  %v471_v16 = vsub.f32 %v14263_v55, %v9266_v60  ;;  %v438_v56 = vsub.f32 %v9185_v32, %v9264_v17  ;;  %v9527_v11 = vpop.permute.xlu0 %370 }
 0x170   :  { %14264 = vst [vmem:[#allocation70_spill] sm:$0xff] %v9514_v48  ;;  %v2546_v58 = vpop.f32.mrf.mxu3  ;;  %v9520_v61 = vpop.permute.xlu1 %116  ;;  %v553_v33 = vmul.f32 %v425_v21, %v425_v21  ;;  %v439_v49 = vsub.f32 %v9185_v32, %v9266_v60  ;;  %v682_v63 = vmul.f32 -0.5, %v9322_v8  ;;  %v9533_v52 = vmul.f32 %v470_v27, %v470_v27 }
 0x171   :  { %14266 = vst [vmem:[#allocation150_spill] sm:$0xff] %v9518_v14  ;;  %2700 = vmatmul.f32.gmra.mxu0 %v14267_v45  ;;  %v2333_v34 = vadd.f32 %v2332_v28, %v2135_v13  ;;  %v223_v24 = vsub.f32 %v9235_v30, %v9292_v42  ;;  %v224_v55 = vsub.f32 %v9235_v30, %v9294_v23  ;;  %v14269_v13 = vld [vmem:[#allocation65_spill] sm:$0xff] }
 0x172   :  { %2857 = vmatmul.f32.gmra.mxu1 %v14254_v40  ;;  %v489_v59 = vmul.f32 %v226_v6, %v226_v6  ;;  %v442_v21 = vsub.f32 %v9221_v4, %v9264_v17  ;;  %v443_v32 = vsub.f32 %v9221_v4, %v9266_v60  ;;  %v9548_v27 = vmul.f32 %v471_v16, %v471_v16 }
 0x173   :  { %v9544_v8 = vadd.f32 %v2546_v58, %v2333_v34  ;;  %v616_v28 = vadd.f32 %v552_v7, %v488_v25  ;;  %v9550_v40 = vmul.f32 %v438_v56, %v438_v56  ;;  %v444_v30 = vsub.f32 %v9248_v46, %v9264_v17 }
 0x174   :  { %3046 = vmatmul.f32.gmra.mxu2 %v14269_v13  ;;  %v9554_v22 = vmul.f32 %v439_v49, %v439_v49  ;;  %v754_v6 = vmul.f32 1.442695, %v682_v63  ;;  %v445_v4 = vsub.f32 %v9248_v46, %v9266_v60  ;;  %v446_v58 = vsub.f32 %v9290_v62, %v9264_v17 }
 0x175   :  { %14268 = vst [vmem:[#allocation190_spill] sm:$0xff] %v9544_v8  ;;  %3375 = vmatmul.f32.gmra.mxu3 %v14267_v45  ;;  %v9560_v13 = vmul.f32 %v223_v24, %v223_v24  ;;  %v9562_v16 = vmul.f32 %v224_v55, %v224_v55  ;;  %v9564_v25 = vadd.f32 %v553_v33, %v489_v59  ;;  %v756_v8 = vmul.f32 1.442695, %v683_v9  ;;  %v14274_v33 = vld [vmem:[#allocation42_spill] sm:$0xff] }
 0x176   :  { %v1881_v34 = vpop.f32.mrf.mxu0  ;;  %v447_v7 = vsub.f32 %v9290_v62, %v9266_v60  ;;  %v2138_v56 = vpop.f32.mrf.mxu1  ;;  %v9568_v63 = vmul.f32 %v442_v21, %v442_v21  ;;  %v9570_v31 = vmul.f32 %v443_v32, %v443_v32  ;;  %v9574_v24 = vmul.f32 -0.5, %v616_v28 }
 0x177   :  { %14270 = vst [vmem:[#allocation65_spill] sm:$0xff] %v9560_v13  ;;  %v2337_v49 = vpop.f32.mrf.mxu2  ;;  %v2139_v46 = vadd.f32 %v2138_v56, %v1873_v18  ;;  %v9576_v55 = vmul.f32 %v444_v30, %v444_v30  ;;  %v448_v59 = vsub.f32 %v9334_v51, %v9264_v17  ;;  %v449_v62 = vsub.f32 %v9334_v51, %v9266_v60 }
 0x178   :  { %14271 = vst [vmem:[#allocation191_spill] sm:$0xff] %v9562_v16  ;;  %v2552_v50 = vpop.f32.mrf.mxu3  ;;  %v9572_v48 = vpop.permute.xlu1 %121  ;;  %7441 = vpow2.f32 %v754_v6  ;;  %v9585_v21 = vmul.f32 %v445_v4, %v445_v4  ;;  %v9587_v18 = vmul.f32 %v446_v58, %v446_v58  ;;  %v686_v28 = vmul.f32 -0.5, %v9375_v2  ;;  %v14278_v58 = vld [vmem:[#allocation59_spill] sm:$0xff]  ;;  %v7924_v2 = vld [vmem:[%s13423_s1 + $0xb8] sm:$0xff] }
 0x179   :  { %14272 = vst [vmem:[#allocation192_spill] sm:$0xff] %v9564_v25  ;;  %2704 = vmatmul.f32.gmra.mxu0 %v14274_v33  ;;  %v2338_v32 = vadd.f32 %v2337_v49, %v2139_v46  ;;  %v9591_v30 = vmul.f32 %v447_v7, %v447_v7  ;;  %v480_v56 = vsub.f32 %v9369_v43, %v9264_v17  ;;  %7443 = vpow2.f32 %v756_v8 }
 0x17a   :  { %14273 = vst [vmem:[#allocation193_spill] sm:$0xff] %v9574_v24  ;;  %v9583_v9 = vpop.xlane.xlu2 %4370  ;;  %2861 = vmatmul.f32.gmra.mxu1 %v14267_v45  ;;  %v481_v51 = vsub.f32 %v9369_v43, %v9266_v60  ;;  %v9597_v24 = vpop.xlane.xlu0 %4376  ;;  %v239_v6 = vsub.f32 %v9447_v47, %v9292_v42  ;;  %v4294_v7 = vmul.f32 %v7924_v2, %v7924_v2  ;;  %v690_v49 = vmul.f32 -0.5, %v9423_v57 }
 0x17b   :  { %14275 = vst [vmem:[#allocation194_spill] sm:$0xff] %v9583_v9  ;;  %v9601_v4 = vadd.f32 %v2552_v50, %v2338_v32  ;;  %v9609_v43 = vmul.f32 %v448_v59, %v448_v59  ;;  %v9611_v46 = vmul.f32 %v449_v62, %v449_v62  ;;  %v240_v8 = vsub.f32 %v9447_v47, %v9294_v23 }
 0x17c   :  { %14276 = vst [vmem:[#allocation195_spill] sm:$0xff] %v9597_v24  ;;  %3054 = vmatmul.f32.gmra.mxu2 %v14278_v58  ;;  %v9616_v50 = vmul.f32 -0.5, %v9377_v44  ;;  %v691_v32 = vmul.f32 -0.5, %v9425_v37  ;;  %v452_v58 = vsub.f32 %v9405_v15, %v9264_v17  ;;  %v4372_v2 = vsel %vm1570_vm0, %v4294_v7, 0.0 }
 0x17d   :  { %14277 = vst [vmem:[#allocation196_spill] sm:$0xff] %v9601_v4  ;;  %3379 = vmatmul.f32.gmra.mxu3 %v14274_v33  ;;  %v9622_v9 = vmul.f32 1.442695, %v686_v28  ;;  %v9625_v57 = vmul.f32 -0.5, %v9397_v3  ;;  %v9627_v59 = vmul.f32 %v480_v56, %v480_v56  ;;  %v9629_v62 = vmul.f32 %v481_v51, %v481_v51  ;;  %4373 = vadd.xlane.f32.xlu2 %v4372_v2 }
 0x17e   :  { %14279 = vst [vmem:[#allocation59_spill] sm:$0xff] %v9616_v50  ;;  %v1889_v24 = vpop.f32.mrf.mxu0  ;;  %v2142_v47 = vpop.f32.mrf.mxu1  ;;  %v502_v37 = vmul.f32 %v239_v6, %v239_v6  ;;  %v453_v45 = vsub.f32 %v9405_v15, %v9266_v60  ;;  %v450_v28 = vsub.f32 %v9413_v12, %v9264_v17  ;;  %v770_v56 = vmul.f32 1.442695, %v690_v49 }
 0x17f   :  { %14280 = vst [vmem:[#allocation197_spill] sm:$0xff] %v9622_v9  ;;  %v2342_v44 = vpop.f32.mrf.mxu2  ;;  %v9631_v4 = vpop.eup %7441  ;;  %v2143_v7 = vadd.f32 %v2142_v47, %v1881_v34  ;;  %v692_v51 = vmul.f32 -0.5, %v9442_v5  ;;  %v503_v50 = vmul.f32 %v240_v8, %v240_v8  ;;  %v451_v2 = vsub.f32 %v9413_v12, %v9266_v60  ;;  %v14282_v9 = vld [vmem:[#allocation40_spill] sm:$0xff] }
 0x180   :  { %14281 = vst [vmem:[#allocation198_spill] sm:$0xff] %v9631_v4  ;;  %v2558_v16 = vpop.f32.mrf.mxu3  ;;  %v9637_v3 = vpop.permute.xlu1 %126  ;;  %v772_v15 = vmul.f32 1.442695, %v691_v32  ;;  %v693_v25 = vmul.f32 -0.5, %v9444_v39  ;;  %v9646_v1 = vmul.f32 %v452_v58, %v452_v58  ;;  %v474_v5 = vsub.f32 %v9433_v19, %v9264_v17 }
 0x181   :  { %2708 = vmatmul.f32.gmra.mxu0 %v14282_v9  ;;  %v9643_v4 = vpop.eup %7443  ;;  %v2343_v34 = vadd.f32 %v2342_v44, %v2143_v7  ;;  %v475_v49 = vsub.f32 %v9433_v19, %v9266_v60  ;;  %v478_v12 = vsub.f32 %v9440_v38, %v9264_v17  ;;  %v479_v8 = vsub.f32 %v9440_v38, %v9266_v60  ;;  %v14285_v44 = vld [vmem:[#allocation54_spill] sm:$0xff] }
 0x182   :  { %v207_v6 = vpop.permute.xlu2 %206  ;;  %14283 = vst [vmem:[#allocation199_spill] sm:$0xff] %v9643_v4  ;;  %2865 = vmatmul.f32.gmra.mxu1 %v14274_v33  ;;  %v9658_v32 = vmul.f32 -0.5, %v9399_v20  ;;  %v630_v39 = vadd.f32 %v9550_v40, %v502_v37  ;;  %v9661_v58 = vmul.f32 %v453_v45, %v453_v45  ;;  %7445 = vpow2.f32 %v770_v56 }
 0x183   :  { %v9663_v47 = vadd.f32 %v2558_v16, %v2343_v34  ;;  %v774_v19 = vmul.f32 1.442695, %v692_v51  ;;  %v631_v7 = vadd.f32 %v9554_v22, %v503_v50  ;;  %v578_v33 = vmul.f32 %v450_v28, %v450_v28 }
 0x184   :  { %3062 = vmatmul.f32.gmra.mxu2 %v14285_v44  ;;  %7447 = vpow2.f32 %v772_v15  ;;  %v776_v38 = vmul.f32 1.442695, %v693_v25  ;;  %v579_v20 = vmul.f32 %v451_v2, %v451_v2  ;;  %v9669_v45 = vmul.f32 %v474_v5, %v474_v5 }
 0x185   :  { %14284 = vst [vmem:[#allocation200_spill] sm:$0xff] %v9663_v47  ;;  %3383 = vmatmul.f32.gmra.mxu3 %v14282_v9  ;;  %v137_v4 = vpop.permute.xlu0 %136  ;;  %v9671_v16 = vmul.f32 %v475_v49, %v475_v49  ;;  %v9673_v37 = vmul.f32 %v478_v12, %v478_v12  ;;  %v9675_v34 = vmul.f32 %v479_v8, %v479_v8  ;;  %v694_v44 = vmul.f32 -0.5, %v630_v39  ;;  %v14286_v47 = vld [vmem:[#allocation32_spill] sm:$0xff] }
 0x186   :  { %v1897_v13 = vpop.f32.mrf.mxu0  ;;  %v251_v40 = vsub.f32 %v137_v4, %v9292_v42  ;;  %v2146_v56 = vpop.f32.mrf.mxu1  ;;  %v252_v25 = vsub.f32 %v137_v4, %v9294_v23  ;;  %7449 = vpow2.f32 %v774_v19  ;;  %v695_v15 = vmul.f32 -0.5, %v631_v7 }
 0x187   :  { %v2347_v51 = vpop.f32.mrf.mxu2  ;;  %v2147_v22 = vadd.f32 %v2146_v56, %v1889_v24  ;;  %7451 = vpow2.f32 %v776_v38  ;;  %v476_v12 = vsub.f32 %v9462_v35, %v9264_v17  ;;  %v279_v24 = vsub.f32 %v207_v6, %v9292_v42 }
 0x188   :  { %v2564_v50 = vpop.f32.mrf.mxu3  ;;  %v132_v28 = vpop.permute.xlu1 %131  ;;  %v514_v2 = vmul.f32 %v251_v40, %v251_v40  ;;  %v477_v19 = vsub.f32 %v9462_v35, %v9266_v60  ;;  %v280_v56 = vsub.f32 %v207_v6, %v9294_v23  ;;  %v778_v38 = vmul.f32 1.442695, %v694_v44 }
 0x189   :  { %2712 = vmatmul.f32.gmra.mxu0 %v14286_v47  ;;  %v249_v5 = vsub.f32 %v132_v28, %v9292_v42  ;;  %v250_v49 = vsub.f32 %v132_v28, %v9294_v23  ;;  %v2348_v8 = vadd.f32 %v2347_v51, %v2147_v22  ;;  %v9685_v4 = vpop.eup %7445  ;;  %v14290_v51 = vld [vmem:[#allocation51_spill] sm:$0xff]  ;;  %v515_v22 = vmul.f32 %v252_v25, %v252_v25 }
 0x18a   :  { %2869 = vmatmul.f32.gmra.mxu1 %v14282_v9  ;;  %v197_v39 = vpop.permute.xlu2 %196  ;;  %14287 = vst [vmem:[#allocation54_spill] sm:$0xff] %v9685_v4  ;;  %v9690_v28 = vpop.eup %7447  ;;  %v9696_v9 = vadd.f32 %v578_v33, %v514_v2  ;;  %v780_v14 = vmul.f32 1.442695, %v695_v15  ;;  %v9701_v6 = vmul.f32 %v476_v12, %v476_v12  ;;  %v9708_v25 = vmul.f32 %v477_v19, %v477_v19  ;;  %v14295_v19 = vld [vmem:[#allocation31_spill] sm:$0xff] }
 0x18b   :  { %v512_v7 = vmul.f32 %v249_v5, %v249_v5  ;;  %v513_v40 = vmul.f32 %v250_v49, %v250_v49  ;;  %14288 = vst [vmem:[#allocation201_spill] sm:$0xff] %v9690_v28  ;;  %v9692_v10 = vadd.f32 %v2564_v50, %v2348_v8  ;;  %v275_v5 = vsub.f32 %v197_v39, %v9292_v42 }
 0x18c   :  { %3070 = vmatmul.f32.gmra.mxu2 %v14290_v51  ;;  %14291 = vst [vmem:[#allocation51_spill] sm:$0xff] %v9696_v9  ;;  %v542_v49 = vmul.f32 %v279_v24, %v279_v24  ;;  %v9703_v50 = vadd.f32 %v579_v20, %v515_v22  ;;  %v276_v8 = vsub.f32 %v197_v39, %v9294_v23  ;;  %v9706_v51 = vpop.eup %7449  ;;  %7453 = vpow2.f32 %v778_v38 }
 0x18d   :  { %14289 = vst [vmem:[#allocation202_spill] sm:$0xff] %v9692_v10  ;;  %3387 = vmatmul.f32.gmra.mxu3 %v14286_v47  ;;  %v640_v36 = vadd.f32 %v9609_v43, %v512_v7  ;;  %v641_v35 = vadd.f32 %v9611_v46, %v513_v40  ;;  %v543_v15 = vmul.f32 %v280_v56, %v280_v56  ;;  %v9710_v46 = vpop.eup %7451  ;;  %7455 = vpow2.f32 %v780_v14 }
 0x18e   :  { %v1905_v44 = vpop.f32.mrf.mxu0  ;;  %14292 = vst [vmem:[#allocation203_spill] sm:$0xff] %v9703_v50  ;;  %v2150_v43 = vpop.f32.mrf.mxu1  ;;  %v243_v12 = vsub.f32 %v9520_v61, %v9292_v42  ;;  %v538_v22 = vmul.f32 %v275_v5, %v275_v5  ;;  %v9716_v39 = vsub.f32 %v9503_v0, %v9264_v17  ;;  %v539_v56 = vmul.f32 %v276_v8, %v276_v8 }
 0x18f   :  { %14293 = vst [vmem:[#allocation204_spill] sm:$0xff] %v9706_v51  ;;  %v704_v33 = vmul.f32 -0.5, %v640_v36  ;;  %v705_v2 = vmul.f32 -0.5, %v641_v35  ;;  %v2352_v7 = vpop.f32.mrf.mxu2  ;;  %v2151_v24 = vadd.f32 %v2150_v43, %v1897_v13  ;;  %v142_v35 = vpop.permute.xlu0 %141  ;;  %v670_v38 = vadd.f32 %v9673_v37, %v542_v49 }
 0x190   :  { %14294 = vst [vmem:[#allocation205_spill] sm:$0xff] %v9710_v46  ;;  %v2570_v20 = vpop.f32.mrf.mxu3  ;;  %v212_v40 = vpop.permute.xlu1 %211  ;;  %v253_v13 = vsub.f32 %v142_v35, %v9292_v42  ;;  %v9723_v5 = vmul.f32 -0.5, %v9493_v29  ;;  %v244_v14 = vsub.f32 %v9520_v61, %v9294_v23  ;;  %v671_v8 = vadd.f32 %v9675_v34, %v543_v15 }
 0x191   :  { %v798_v36 = vmul.f32 1.442695, %v704_v33  ;;  %2716 = vmatmul.f32.gmra.mxu0 %v14295_v19  ;;  %v800_v10 = vmul.f32 1.442695, %v705_v2  ;;  %v2353_v50 = vadd.f32 %v2352_v7, %v2151_v24  ;;  %v9729_v33 = vsub.f32 %v9503_v0, %v9266_v60  ;;  %v14297_v7 = vld [vmem:[#allocation47_spill] sm:$0xff] }
 0x192   :  { %2873 = vmatmul.f32.gmra.mxu1 %v14286_v47  ;;  %v9733_v2 = vmul.f32 -0.5, %v9495_v41  ;;  %v506_v37 = vmul.f32 %v243_v12, %v243_v12  ;;  %v666_v43 = vadd.f32 %v9669_v45, %v538_v22  ;;  %v9740_v29 = vpop.permute.xlu2 %151  ;;  %v281_v0 = vsub.f32 %v212_v40, %v9292_v42  ;;  %v9745_v41 = vpop.eup %7453 }
 0x193   :  { %v9735_v49 = vadd.f32 %v2570_v20, %v2353_v50  ;;  %14298 = vst [vmem:[#allocation47_spill] sm:$0xff] %v9740_v29  ;;  %7457 = vpow2.f32 %v798_v36  ;;  %v667_v61 = vadd.f32 %v9671_v16, %v539_v56  ;;  %v254_v34 = vsub.f32 %v142_v35, %v9294_v23  ;;  %v9748_v24 = vpop.eup %7455  ;;  %v14300_v29 = vld [vmem:[#allocation22_spill] sm:$0xff] }
 0x194   :  { %3078 = vmatmul.f32.gmra.mxu2 %v14297_v7  ;;  %7459 = vpow2.f32 %v800_v10  ;;  %v734_v50 = vmul.f32 -0.5, %v670_v38  ;;  %v282_v15 = vsub.f32 %v212_v40, %v9294_v23  ;;  %v516_v12 = vmul.f32 %v253_v13, %v253_v13 }
 0x195   :  { %14296 = vst [vmem:[#allocation206_spill] sm:$0xff] %v9735_v49  ;;  %3391 = vmatmul.f32.gmra.mxu3 %v14295_v19  ;;  %v245_v20 = vsub.f32 %v9572_v48, %v9292_v42  ;;  %v247_v22 = vsub.f32 %v9637_v3, %v9292_v42  ;;  %v735_v36 = vmul.f32 -0.5, %v671_v8  ;;  %v517_v35 = vmul.f32 %v254_v34, %v254_v34 }
 0x196   :  { %v1913_v45 = vpop.f32.mrf.mxu0  ;;  %v2154_v16 = vpop.f32.mrf.mxu1  ;;  %v248_v10 = vsub.f32 %v9637_v3, %v9294_v23  ;;  %v730_v38 = vmul.f32 -0.5, %v666_v43  ;;  %v9757_v13 = vadd.f32 %v9646_v1, %v516_v12  ;;  %v544_v9 = vmul.f32 %v281_v0, %v281_v0 }
 0x197   :  { %v2357_v56 = vpop.f32.mrf.mxu2  ;;  %v2155_v7 = vadd.f32 %v2154_v16, %v1905_v44  ;;  %v731_v47 = vmul.f32 -0.5, %v667_v61  ;;  %v9761_v26 = vadd.f32 %v9661_v58, %v517_v35  ;;  %v246_v34 = vsub.f32 %v9572_v48, %v9294_v23 }
 0x198   :  { %v2576_v40 = vpop.f32.mrf.mxu3  ;;  %14299 = vst [vmem:[#allocation207_spill] sm:$0xff] %v9757_v13  ;;  %v147_v49 = vpop.permute.xlu1 %146  ;;  %v858_v3 = vmul.f32 1.442695, %v734_v50  ;;  %v545_v43 = vmul.f32 %v282_v15, %v282_v15  ;;  %v507_v12 = vmul.f32 %v244_v14, %v244_v14  ;;  %v510_v0 = vmul.f32 %v247_v22, %v247_v22  ;;  %v14304_v50 = vld [vmem:[#allocation43_spill] sm:$0xff] }
 0x199   :  { %2720 = vmatmul.f32.gmra.mxu0 %v14300_v29  ;;  %14301 = vst [vmem:[#allocation22_spill] sm:$0xff] %v9761_v26  ;;  %v255_v8 = vsub.f32 %v147_v49, %v9292_v42  ;;  %v2358_v44 = vadd.f32 %v2357_v56, %v2155_v7  ;;  %v9767_v1 = vpop.eup %7457  ;;  %v860_v61 = vmul.f32 1.442695, %v735_v36  ;;  %v256_v16 = vsub.f32 %v147_v49, %v9294_v23  ;;  %v202_v13 = vpop.permute.xlu0 %201 }
 0x19a   :  { %2877 = vmatmul.f32.gmra.mxu1 %v14295_v19  ;;  %14302 = vst [vmem:[#allocation208_spill] sm:$0xff] %v9767_v1  ;;  %v9770_v58 = vpop.eup %7459  ;;  %v634_v35 = vadd.f32 %v9568_v63, %v506_v37  ;;  %v511_v26 = vmul.f32 %v248_v10, %v248_v10  ;;  %v850_v28 = vmul.f32 1.442695, %v730_v38  ;;  %v508_v15 = vmul.f32 %v245_v20, %v245_v20  ;;  %v192_v63 = vpop.permute.xlu2 %191 }
 0x19b   :  { %14303 = vst [vmem:[#allocation209_spill] sm:$0xff] %v9770_v58  ;;  %v9773_v48 = vadd.f32 %v2576_v40, %v2358_v44  ;;  %v672_v14 = vadd.f32 %v9627_v59, %v544_v9  ;;  %v852_v22 = vmul.f32 1.442695, %v731_v47  ;;  %v518_v36 = vmul.f32 %v255_v8, %v255_v8 }
 0x19c   :  { %3086 = vmatmul.f32.gmra.mxu2 %v14304_v50  ;;  %v509_v56 = vmul.f32 %v246_v34, %v246_v34  ;;  %7461 = vpow2.f32 %v858_v3  ;;  %v673_v49 = vadd.f32 %v9629_v62, %v545_v43  ;;  %v519_v7 = vmul.f32 %v256_v16, %v256_v16  ;;  %v14307_v50 = vld [vmem:[#allocation37_spill] sm:$0xff] }
 0x19d   :  { %3395 = vmatmul.f32.gmra.mxu3 %v14300_v29  ;;  %v638_v37 = vadd.f32 %v9587_v18, %v510_v0  ;;  %7463 = vpow2.f32 %v860_v61  ;;  %v9783_v10 = vadd.f32 %v9499_v53, %v518_v36  ;;  %v911_v20 = vadd.f32 %v9770_v58, %v9767_v1  ;;  %v14305_v53 = vld [vmem:[#allocation18_spill] sm:$0xff] }
 0x19e   :  { %v9779_v19 = vpop.f32.mrf.mxu0  ;;  %v2158_v9 = vpop.f32.mrf.mxu1  ;;  %v639_v47 = vadd.f32 %v9591_v30, %v511_v26  ;;  %7465 = vpow2.f32 %v850_v28  ;;  %v9789_v62 = vadd.f32 %v9506_v54, %v519_v7  ;;  %v782_v18 = vmul.f32 1.442695, %v9723_v5 }
 0x19f   :  { %v2362_v59 = vpop.f32.mrf.mxu2  ;;  %v2159_v38 = vadd.f32 %v2158_v9, %v1913_v45  ;;  %v736_v34 = vmul.f32 -0.5, %v672_v14  ;;  %7467 = vpow2.f32 %v852_v22  ;;  %912 = vadd.xlane.f32.xlu1 %v911_v20  ;;  %v277_v3 = vsub.f32 %v202_v13, %v9292_v42 }
 0x1a0   :  { %v2582_v40 = vpop.f32.mrf.mxu3  ;;  %v9791_v8 = vpop.permute.xlu1 %156  ;;  %v784_v43 = vmul.f32 1.442695, %v9733_v2  ;;  %v636_v26 = vadd.f32 %v9576_v55, %v508_v15  ;;  %v737_v30 = vmul.f32 -0.5, %v673_v49  ;;  %v635_v28 = vadd.f32 %v9570_v31, %v507_v12 }
 0x1a1   :  { %2724 = vmatmul.f32.gmra.mxu0 %v14305_v53  ;;  %v2363_v54 = vadd.f32 %v2362_v59, %v2159_v38  ;;  %v698_v45 = vmul.f32 -0.5, %v634_v35  ;;  %v9802_v5 = vsub.f32 %v9527_v11, %v9264_v17  ;;  %v702_v44 = vmul.f32 -0.5, %v638_v37  ;;  %v187_v14 = vpop.permute.xlu0 %186 }
 0x1a2   :  { %2881 = vmatmul.f32.gmra.mxu1 %v14300_v29  ;;  %v9804_v0 = vpop.eup %7461  ;;  %v637_v61 = vadd.f32 %v9585_v21, %v509_v56  ;;  %v703_v16 = vmul.f32 -0.5, %v639_v47  ;;  %v278_v55 = vsub.f32 %v202_v13, %v9294_v23  ;;  %7469 = vpow2.f32 %v782_v18  ;;  %v9822_v49 = vpop.permute.xlu2 %161 }
 0x1a3   :  { %14306 = vst [vmem:[#allocation43_spill] sm:$0xff] %v9804_v0  ;;  %v9807_v2 = vadd.f32 %v2582_v40, %v2363_v54  ;;  %v9812_v31 = vpop.eup %7463  ;;  %v600_v12 = vmul.f32 %v9716_v39, %v9716_v39  ;;  %v862_v35 = vmul.f32 1.442695, %v736_v34  ;;  %v540_v15 = vmul.f32 %v277_v3, %v277_v3  ;;  %v14311_v54 = vld [vmem:[#allocation14_spill] sm:$0xff] }
 0x1a4   :  { %3094 = vmatmul.f32.gmra.mxu2 %v14307_v50  ;;  %14308 = vst [vmem:[#allocation18_spill] sm:$0xff] %v9812_v31  ;;  %v9816_v22 = vpop.eup %7465  ;;  %7471 = vpow2.f32 %v784_v43  ;;  %v700_v21 = vmul.f32 -0.5, %v636_v26  ;;  %v601_v13 = vmul.f32 %v9729_v33, %v9729_v33  ;;  %v864_v36 = vmul.f32 1.442695, %v737_v30 }
 0x1a5   :  { %3399 = vmatmul.f32.gmra.mxu3 %v14305_v53  ;;  %14309 = vst [vmem:[#allocation37_spill] sm:$0xff] %v9816_v22  ;;  %v9824_v7 = vpop.eup %7467  ;;  %v699_v37 = vmul.f32 -0.5, %v635_v28  ;;  %v786_v20 = vmul.f32 1.442695, %v698_v45  ;;  %v794_v39 = vmul.f32 1.442695, %v702_v44  ;;  %v273_v9 = vsub.f32 %v192_v63, %v9292_v42 }
 0x1a6   :  { %v9820_v56 = vpop.f32.mrf.mxu0  ;;  %14310 = vst [vmem:[#allocation210_spill] sm:$0xff] %v9824_v7  ;;  %v2162_v59 = vpop.f32.mrf.mxu1  ;;  %v701_v38 = vmul.f32 -0.5, %v637_v61  ;;  %v796_v40 = vmul.f32 1.442695, %v703_v16  ;;  %v541_v18 = vmul.f32 %v278_v55, %v278_v55  ;;  %v274_v34 = vsub.f32 %v192_v63, %v9294_v23 }
 0x1a7   :  { %v2367_v47 = vpop.f32.mrf.mxu2  ;;  %7473 = vpow2.f32 %v862_v35  ;;  %v668_v43 = vadd.f32 %v9701_v6, %v540_v15  ;;  %v536_v26 = vmul.f32 %v273_v9, %v273_v9  ;;  %v956_v30 = vadd.f32 %v9812_v31, %v9804_v0 }
 0x1a8   :  { %v2588_v33 = vpop.f32.mrf.mxu3  ;;  %v9828_v3 = vpop.permute.xlu1 %166  ;;  %v790_v28 = vmul.f32 1.442695, %v700_v21  ;;  %7475 = vpow2.f32 %v864_v36  ;;  %v537_v45 = vmul.f32 %v274_v34, %v274_v34  ;;  %v950_v44 = vadd.f32 %v9824_v7, %v9816_v22  ;;  %v14314_v21 = vld [vmem:[#allocation35_spill] sm:$0xff] }
 0x1a9   :  { %2728 = vmatmul.f32.gmra.mxu0 %v14311_v54  ;;  %v9837_v63 = vpop.eup %7469  ;;  %7477 = vpow2.f32 %v794_v39  ;;  %v664_v61 = vadd.f32 %v600_v12, %v536_v26  ;;  %957 = vadd.xlane.f32.xlu2 %v956_v30  ;;  %v2163_v6 = vadd.f32 %v2162_v59, %v9779_v19  ;;  %v271_v16 = vsub.f32 %v187_v14, %v9292_v42 }
 0x1aa   :  { %2885 = vmatmul.f32.gmra.mxu1 %v14305_v53  ;;  %14312 = vst [vmem:[#allocation14_spill] sm:$0xff] %v9837_v63  ;;  %v9841_v55 = vpop.eup %7471  ;;  %v792_v50 = vmul.f32 1.442695, %v701_v38  ;;  %7479 = vpow2.f32 %v796_v40  ;;  %v669_v35 = vadd.f32 %v9708_v25, %v541_v18  ;;  %v665_v15 = vadd.f32 %v601_v13, %v537_v45  ;;  %951 = vadd.xlane.f32.xlu1 %v950_v44 }
 0x1ab   :  { %14313 = vst [vmem:[#allocation211_spill] sm:$0xff] %v9841_v55  ;;  %v732_v36 = vmul.f32 -0.5, %v668_v43  ;;  %v728_v9 = vmul.f32 -0.5, %v664_v61  ;;  %v2368_v34 = vadd.f32 %v2367_v47, %v2163_v6  ;;  %v272_v12 = vsub.f32 %v187_v14, %v9294_v23  ;;  %v177_v6 = vpop.permute.xlu2 %176 }
 0x1ac   :  { %3102 = vmatmul.f32.gmra.mxu2 %v14314_v21  ;;  %7481 = vpow2.f32 %v786_v20  ;;  %v461_v19 = vsub.f32 %v9527_v11, %v9266_v60  ;;  %v729_v39 = vmul.f32 -0.5, %v665_v15  ;;  %v534_v59 = vmul.f32 %v271_v16, %v271_v16 }
 0x1ad   :  { %3403 = vmatmul.f32.gmra.mxu3 %v14311_v54  ;;  %v9851_v25 = vpop.eup %7473  ;;  %v788_v13 = vmul.f32 1.442695, %v699_v37  ;;  %7483 = vpow2.f32 %v790_v28  ;;  %v846_v40 = vmul.f32 1.442695, %v728_v9  ;;  %v9853_v18 = vadd.f32 %v2588_v33, %v2368_v34  ;;  %v14319_v33 = vld [vmem:[#allocation12_spill] sm:$0xff] }
 0x1ae   :  { %v9849_v38 = vpop.f32.mrf.mxu0  ;;  %14315 = vst [vmem:[#allocation35_spill] sm:$0xff] %v9851_v25  ;;  %v2166_v47 = vpop.f32.mrf.mxu1  ;;  %7485 = vpow2.f32 %v792_v50  ;;  %v848_v20 = vmul.f32 1.442695, %v729_v39  ;;  %v535_v26 = vmul.f32 %v272_v12, %v272_v12  ;;  %v662_v11 = vadd.f32 %v9533_v52, %v534_v59  ;;  %v14322_v39 = vld [vmem:[#allocation29_spill] sm:$0xff] }
 0x1af   :  { %14316 = vst [vmem:[#allocation212_spill] sm:$0xff] %v9853_v18  ;;  %v2372_v43 = vpop.f32.mrf.mxu2  ;;  %v9855_v14 = vpop.eup %7475  ;;  %v9862_v44 = vmul.f32 %v9802_v5, %v9802_v5  ;;  %v733_v37 = vmul.f32 -0.5, %v669_v35  ;;  %v854_v28 = vmul.f32 1.442695, %v732_v36  ;;  %7487 = vpow2.f32 %v846_v40 }
 0x1b0   :  { %14317 = vst [vmem:[#allocation213_spill] sm:$0xff] %v9855_v14  ;;  %v2594_v30 = vpop.f32.mrf.mxu3  ;;  %v9858_v45 = vpop.eup %7477  ;;  %7489 = vpow2.f32 %v848_v20  ;;  %v663_v50 = vadd.f32 %v9548_v27, %v535_v26  ;;  %v726_v52 = vmul.f32 -0.5, %v662_v11  ;;  %v263_v15 = vsub.f32 %v9828_v3, %v9292_v42 }
 0x1b1   :  { %14318 = vst [vmem:[#allocation214_spill] sm:$0xff] %v9858_v45  ;;  %2732 = vmatmul.f32.gmra.mxu0 %v14319_v33  ;;  %v375_v61 = vpop.permute.xlu1 %374  ;;  %v9865_v16 = vpop.eup %7479  ;;  %7491 = vpow2.f32 %v788_v13  ;;  %v9871_v5 = vmul.f32 %v461_v19, %v461_v19  ;;  %v264_v35 = vsub.f32 %v9828_v3, %v9294_v23  ;;  %v959_v21 = vadd.f32 %v9855_v14, %v9851_v25 }
 0x1b2   :  { %14320 = vst [vmem:[#allocation215_spill] sm:$0xff] %v9865_v16  ;;  %2889 = vmatmul.f32.gmra.mxu1 %v14311_v54  ;;  %v9877_v36 = vpop.eup %7481  ;;  %v727_v9 = vmul.f32 -0.5, %v663_v50  ;;  %v842_v34 = vmul.f32 1.442695, %v726_v52  ;;  %v896_v27 = vadd.f32 %v9748_v24, %v9745_v41  ;;  %v2167_v12 = vadd.f32 %v2166_v47, %v9820_v56  ;;  %v182_v14 = vpop.permute.xlu0 %181 }
 0x1b3   :  { %14321 = vst [vmem:[#allocation216_spill] sm:$0xff] %v9877_v36  ;;  %v9883_v59 = vpop.eup %7483  ;;  %7493 = vpow2.f32 %v854_v28  ;;  %v856_v19 = vmul.f32 1.442695, %v733_v37  ;;  %v261_v3 = vsub.f32 %v9822_v49, %v9292_v42  ;;  %960 = vadd.xlane.f32.xlu2 %v959_v21  ;;  %v908_v13 = vadd.f32 %v9865_v16, %v9858_v45  ;;  %v14505_v45 = vld [vmem:[#allocation57_spill] sm:$0xff] }
 0x1b4   :  { %3110 = vmatmul.f32.gmra.mxu2 %v14322_v39  ;;  %v9889_v40 = vpop.eup %7485  ;;  %v844_v20 = vmul.f32 1.442695, %v727_v9  ;;  %v526_v26 = vmul.f32 %v263_v15, %v263_v15  ;;  %v262_v56 = vsub.f32 %v9822_v49, %v9294_v23  ;;  %897 = vadd.xlane.f32.xlu1 %v896_v27  ;;  %v2373_v47 = vadd.f32 %v2372_v43, %v2167_v12 }
 0x1b5   :  { %14323 = vst [vmem:[#allocation29_spill] sm:$0xff] %v9889_v40  ;;  %3407 = vmatmul.f32.gmra.mxu3 %v14319_v33  ;;  %v9896_v37 = vpop.eup %7487  ;;  %7495 = vpow2.f32 %v842_v34  ;;  %v527_v28 = vmul.f32 %v264_v35, %v264_v35  ;;  %909 = vadd.xlane.f32.xlu0 %v908_v13  ;;  %v462_v50 = vsub.f32 %v375_v61, %v9264_v17  ;;  %v14328_v13 = vld [vmem:[#allocation10_spill] sm:$0xff] }
 0x1b6   :  { %v9894_v11 = vpop.f32.mrf.mxu0  ;;  %14324 = vst [vmem:[#allocation217_spill] sm:$0xff] %v9896_v37  ;;  %v463_v52 = vsub.f32 %v375_v61, %v9266_v60  ;;  %v2170_v21 = vpop.f32.mrf.mxu1  ;;  %v9904_v49 = vsub.f32 %v9791_v8, %v9292_v42  ;;  %7497 = vpow2.f32 %v844_v20  ;;  %v9906_v43 = vadd.f32 %v2594_v30, %v2373_v47 }
 0x1b7   :  { %v2377_v15 = vpop.f32.mrf.mxu2  ;;  %v9900_v9 = vpop.eup %7489  ;;  %v267_v27 = vsub.f32 %v177_v6, %v9292_v42  ;;  %7499 = vpow2.f32 %v856_v19  ;;  %v9913_v61 = vsub.f32 %v9791_v8, %v9294_v23  ;;  %v590_v12 = vmul.f32 %v462_v50, %v462_v50 }
 0x1b8   :  { %14325 = vst [vmem:[#allocation218_spill] sm:$0xff] %v9900_v9  ;;  %v2600_v34 = vpop.f32.mrf.mxu3  ;;  %v9909_v35 = vpop.eup %7491  ;;  %v591_v39 = vmul.f32 %v463_v52, %v463_v52  ;;  %v524_v25 = vmul.f32 %v261_v3, %v261_v3  ;;  %v9916_v31 = vmul.f32 %v262_v56, %v262_v56  ;;  %v905_v30 = vadd.f32 %v9889_v40, %v9883_v59 }
 0x1b9   :  { %14326 = vst [vmem:[#allocation219_spill] sm:$0xff] %v9906_v43  ;;  %2736 = vmatmul.f32.gmra.mxu0 %v14328_v13  ;;  %v947_v20 = vadd.f32 %v9900_v9, %v9896_v37  ;;  %v387_v19 = vpop.permute.xlu1 %386  ;;  %v9923_v47 = vpop.eup %7493  ;;  %v654_v8 = vadd.f32 %v590_v12, %v526_v26  ;;  %v268_v52 = vsub.f32 %v177_v6, %v9294_v23  ;;  %v14330_v37 = vld [vmem:[#allocation25_spill] sm:$0xff] }
 0x1ba   :  { %14327 = vst [vmem:[#allocation220_spill] sm:$0xff] %v9909_v35  ;;  %2893 = vmatmul.f32.gmra.mxu1 %v14319_v33  ;;  %v655_v50 = vadd.f32 %v591_v39, %v527_v28  ;;  %v2171_v0 = vadd.f32 %v2170_v21, %v9849_v38  ;;  %v383_v3 = vpop.permute.xlu2 %382  ;;  %v530_v56 = vmul.f32 %v267_v27, %v267_v27  ;;  %v14506_v33 = vld [vmem:[#allocation66_spill] sm:$0xff] }
 0x1bb   :  { %14329 = vst [vmem:[#allocation221_spill] sm:$0xff] %v9923_v47  ;;  %v902_v7 = vadd.f32 %v9909_v35, %v9877_v36  ;;  %v269_v22 = vsub.f32 %v182_v14, %v9292_v42  ;;  %v270_v9 = vsub.f32 %v182_v14, %v9294_v23  ;;  %v9932_v43 = vpop.eup %7495  ;;  %v718_v58 = vmul.f32 -0.5, %v654_v8  ;;  %906 = vadd.xlane.f32.xlu2 %v905_v30 }
 0x1bc   :  { %3118 = vmatmul.f32.gmra.mxu2 %v14330_v37  ;;  %14331 = vst [vmem:[#allocation25_spill] sm:$0xff] %v9932_v43  ;;  %v719_v26 = vmul.f32 -0.5, %v655_v50  ;;  %v2378_v28 = vadd.f32 %v2377_v15, %v2171_v0  ;;  %v468_v6 = vsub.f32 %v387_v19, %v9264_v17  ;;  %v9935_v38 = vpop.eup %7497  ;;  %948 = vadd.xlane.f32.xlu1 %v947_v20 }
 0x1bd   :  { %14332 = vst [vmem:[#allocation222_spill] sm:$0xff] %v9935_v38  ;;  %v532_v21 = vmul.f32 %v269_v22, %v269_v22  ;;  %v533_v27 = vmul.f32 %v270_v9, %v270_v9  ;;  %v469_v12 = vsub.f32 %v387_v19, %v9266_v60  ;;  %v466_v39 = vsub.f32 %v383_v3, %v9264_v17  ;;  %v9939_v1 = vpop.eup %7499 }
 0x1be   :  { %v1953_v14 = vpop.f32.mrf.mxu0  ;;  %14333 = vst [vmem:[#allocation223_spill] sm:$0xff] %v9939_v1  ;;  %v826_v37 = vmul.f32 1.442695, %v718_v58  ;;  %v828_v18 = vmul.f32 1.442695, %v719_v26  ;;  %903 = vadd.xlane.f32.xlu0 %v902_v7  ;;  %v9941_v8 = vadd.f32 %v2600_v34, %v2378_v28  ;;  %v596_v0 = vmul.f32 %v468_v6, %v468_v6  ;;  %3411 = vmatmul.f32.gmra.mxu3 %v14328_v13  ;;  %v14335_v34 = vld [vmem:[#allocation9_spill] sm:$0xff] }
 0x1bf   :  { %v2174_v15 = vpop.f32.mrf.mxu1  ;;  %v2382_v30 = vpop.f32.mrf.mxu2  ;;  %v531_v20 = vmul.f32 %v268_v52, %v268_v52  ;;  %v597_v22 = vmul.f32 %v469_v12, %v469_v12  ;;  %v467_v9 = vsub.f32 %v383_v3, %v9266_v60  ;;  %v594_v19 = vmul.f32 %v466_v39, %v466_v39 }
 0x1c0   :  { %14334 = vst [vmem:[#allocation224_spill] sm:$0xff] %v9941_v8  ;;  %v2606_v50 = vpop.f32.mrf.mxu3  ;;  %7501 = vpow2.f32 %v826_v37  ;;  %v660_v16 = vadd.f32 %v596_v0, %v532_v21  ;;  %v944_v58 = vadd.f32 %v9935_v38, %v9932_v43  ;;  %v2175_v7 = vadd.f32 %v2174_v15, %v9894_v11  ;;  %v14356_v38 = vld [vmem:[#allocation70_spill] sm:$0xff] }
 0x1c1   :  { %2740 = vmatmul.f32.gmra.mxu0 %v14335_v34  ;;  %7503 = vpow2.f32 %v828_v18  ;;  %v661_v26 = vadd.f32 %v597_v22, %v533_v27  ;;  %v595_v28 = vmul.f32 %v467_v9, %v467_v9  ;;  %v893_v52 = vadd.f32 %v9710_v46, %v9706_v51  ;;  %v14336_v27 = vld [vmem:[#allocation21_spill] sm:$0xff] }
 0x1c2   :  { %2897 = vmatmul.f32.gmra.mxu1 %v14328_v13  ;;  %v172_v3 = vpop.permute.xlu1 %171  ;;  %v652_v6 = vadd.f32 %v9862_v44, %v524_v25  ;;  %v724_v12 = vmul.f32 -0.5, %v660_v16  ;;  %v658_v21 = vadd.f32 %v594_v19, %v530_v56  ;;  %v953_v39 = vadd.f32 %v9939_v1, %v9923_v47  ;;  %v14355_v47 = vld [vmem:[#allocation191_spill] sm:$0xff] }
 0x1c3   :  { %v766_v11 = vmul.f32 1.442695, %v9625_v57  ;;  %v725_v37 = vmul.f32 -0.5, %v661_v26  ;;  %v659_v0 = vadd.f32 %v595_v28, %v531_v20  ;;  %v2383_v18 = vadd.f32 %v2382_v30, %v2175_v7  ;;  %945 = vadd.xlane.f32.xlu2 %v944_v58 }
 0x1c4   :  { %3126 = vmatmul.f32.gmra.mxu2 %v14336_v27  ;;  %v522_v15 = vmul.f32 %v9904_v49, %v9904_v49  ;;  %v653_v22 = vadd.f32 %v9871_v5, %v9916_v31  ;;  %v838_v9 = vmul.f32 1.442695, %v724_v12  ;;  %v722_v25 = vmul.f32 -0.5, %v658_v21  ;;  %894 = vadd.xlane.f32.xlu1 %v893_v52  ;;  %v14341_v12 = vld [vmem:[#allocation201_spill] sm:$0xff] }
 0x1c5   :  { %v523_v44 = vmul.f32 %v9913_v61, %v9913_v61  ;;  %v840_v16 = vmul.f32 1.442695, %v725_v37  ;;  %v723_v56 = vmul.f32 -0.5, %v659_v0  ;;  %v9963_v57 = vadd.f32 %v2606_v50, %v2383_v18  ;;  %v14343_v37 = vld [vmem:[#allocation113_spill] sm:$0xff] }
 0x1c6   :  { %v9965_v30 = vpop.f32.mrf.mxu0  ;;  %v9967_v20 = vpop.eup %7501  ;;  %v716_v19 = vmul.f32 -0.5, %v652_v6  ;;  %7505 = vpow2.f32 %v838_v9  ;;  %v834_v49 = vmul.f32 1.442695, %v722_v25  ;;  %954 = vadd.xlane.f32.xlu0 %v953_v39  ;;  %v265_v31 = vsub.f32 %v172_v3, %v9292_v42  ;;  %3415 = vmatmul.f32.gmra.mxu3 %v14335_v34  ;;  %v14342_v39 = vld [vmem:[#allocation92_spill] sm:$0xff] }
 0x1c7   :  { %14337 = vst [vmem:[#allocation21_spill] sm:$0xff] %v9963_v57  ;;  %v2178_v5 = vpop.f32.mrf.mxu1  ;;  %v2387_v58 = vpop.f32.mrf.mxu2  ;;  %7507 = vpow2.f32 %v840_v16  ;;  %v836_v7 = vmul.f32 1.442695, %v723_v56  ;;  %v266_v50 = vsub.f32 %v172_v3, %v9294_v23  ;;  %v768_v52 = vmul.f32 1.442695, %v9658_v32 }
 0x1c8   :  { %14338 = vst [vmem:[#allocation225_spill] sm:$0xff] %v9965_v30  ;;  %v9971_v61 = vpop.eup %7503  ;;  %v2179_v26 = vadd.f32 %v2178_v5, %v1953_v14  ;;  %v2612_v28 = vpop.f32.mrf.mxu3  ;;  %v717_v6 = vmul.f32 -0.5, %v653_v22  ;;  %7509 = vpow2.f32 %v834_v49  ;;  %v890_v21 = vadd.f32 %v14341_v12, %v9685_v4  ;;  %v14344_v14 = vld [vmem:[#allocation150_spill] sm:$0xff] }
 0x1c9   :  { %14339 = vst [vmem:[#allocation226_spill] sm:$0xff] %v9967_v20  ;;  %2744 = vmatmul.f32.gmra.mxu0 %v14342_v39  ;;  %v650_v0 = vadd.f32 %v14343_v37, %v522_v15  ;;  %7511 = vpow2.f32 %v836_v7  ;;  %v932_v18 = vadd.f32 %v9971_v61, %v9967_v20  ;;  %v651_v3 = vadd.f32 %v14344_v14, %v523_v44  ;;  %v14346_v5 = vld [vmem:[#allocation102_spill] sm:$0xff]  ;;  %v14348_v7 = vld [vmem:[#allocation65_spill] sm:$0xff] }
 0x1ca   :  { %14340 = vst [vmem:[#allocation227_spill] sm:$0xff] %v9971_v61  ;;  %v2388_v27 = vadd.f32 %v2387_v58, %v2179_v26  ;;  %2901 = vmatmul.f32.gmra.mxu1 %v14335_v34  ;;  %v822_v9 = vmul.f32 1.442695, %v716_v19  ;;  %v528_v32 = vmul.f32 %v265_v31, %v265_v31  ;;  %v899_v22 = vadd.f32 %v9841_v55, %v9837_v63  ;;  %v14349_v26 = vld [vmem:[#allocation138_spill] sm:$0xff]  ;;  %v14350_v19 = vld [vmem:[#allocation192_spill] sm:$0xff]  ;;  %v14351_v37 = vld [vmem:[#allocation197_spill] sm:$0xff] }
 0x1cb   :  { %v379_v25 = vpop.permute.xlu1 %378  ;;  %v529_v16 = vmul.f32 %v266_v50, %v266_v50  ;;  %v614_v44 = vadd.f32 %v14349_v26, %v14348_v7  ;;  %v681_v31 = vmul.f32 -0.5, %v14350_v19  ;;  %7513 = vpow2.f32 %v14351_v37  ;;  %891 = vadd.xlane.f32.xlu2 %v890_v21  ;;  %v14357_v26 = vld [vmem:[#allocation193_spill] sm:$0xff]  ;;  %v14374_v61 = vld [vmem:[#allocation123_spill] sm:$0xff] }
 0x1cc   :  { %v9985_v56 = vadd.f32 %v2612_v28, %v2388_v27  ;;  %v464_v15 = vsub.f32 %v379_v25, %v9264_v17  ;;  %v465_v49 = vsub.f32 %v379_v25, %v9266_v60  ;;  %3134 = vmatmul.f32.gmra.mxu2 %v14346_v5  ;;  %v9990_v58 = vpop.eup %7505  ;;  %v824_v14 = vmul.f32 1.442695, %v717_v6  ;;  %v14353_v28 = vld [vmem:[#allocation59_spill] sm:$0xff]  ;;  %933 = vadd.xlane.f32.xlu1 %v932_v18 }
 0x1cd   :  { %14347 = vst [vmem:[#allocation150_spill] sm:$0xff] %v9990_v58  ;;  %v9996_v50 = vpop.eup %7507  ;;  %v764_v27 = vmul.f32 1.442695, %v14353_v28  ;;  %7515 = vpow2.f32 %v766_v11  ;;  %v615_v7 = vadd.f32 %v14356_v38, %v14355_v47  ;;  %v750_v19 = vmul.f32 1.442695, %v14357_v26  ;;  %v14362_v26 = vld [vmem:[#allocation198_spill] sm:$0xff] }
 0x1ce   :  { %14345 = vst [vmem:[#allocation113_spill] sm:$0xff] %v9985_v56  ;;  %v592_v25 = vmul.f32 %v464_v15, %v464_v15  ;;  %v593_v30 = vmul.f32 %v465_v49, %v465_v49  ;;  %v2685_v5 = vpop.f32.mrf.mxu0  ;;  %v9999_v1 = vpop.eup %7509  ;;  %7517 = vpow2.f32 %v768_v52  ;;  %v714_v37 = vmul.f32 -0.5, %v650_v0  ;;  %900 = vadd.xlane.f32.xlu0 %v899_v22  ;;  %3419 = vmatmul.f32.gmra.mxu3 %v14342_v39  ;;  %v14361_v52 = vld [vmem:[#allocation96_spill] sm:$0xff] }
 0x1cf   :  { %14352 = vst [vmem:[#allocation102_spill] sm:$0xff] %v9996_v50  ;;  %v10005_v6 = vpop.f32.mrf.mxu1  ;;  %v3007_v21 = vpop.f32.mrf.mxu2  ;;  %v715_v18 = vmul.f32 -0.5, %v651_v3  ;;  %7519 = vpow2.f32 %v822_v9  ;;  %v752_v43 = vmul.f32 1.442695, %v681_v31  ;;  %v941_v47 = vadd.f32 %v9996_v50, %v9990_v58  ;;  %v14370_v50 = vld [vmem:[#allocation95_spill] sm:$0xff]  ;;  %v14371_v58 = vld [vmem:[#allocation105_spill] sm:$0xff] }
 0x1d0   :  { %14354 = vst [vmem:[#allocation65_spill] sm:$0xff] %v9999_v1  ;;  %v10007_v11 = vpop.eup %7511  ;;  %v656_v15 = vadd.f32 %v592_v25, %v528_v32  ;;  %v657_v49 = vadd.f32 %v593_v30, %v529_v16  ;;  %v3356_v28 = vpop.f32.mrf.mxu3  ;;  %7521 = vpow2.f32 %v824_v14  ;;  %v14365_v30 = vld [vmem:[#allocation73_spill] sm:$0xff]  ;;  %v14366_v32 = vld [vmem:[#allocation47_spill] sm:$0xff]  ;;  %v818_v31 = vmul.f32 1.442695, %v714_v37 }
 0x1d1   :  { %14358 = vst [vmem:[#allocation138_spill] sm:$0xff] %v10005_v6  ;;  %v10011_v38 = vadd.f32 %v3356_v28, %v3007_v21  ;;  %2748 = vmatmul.f32.gmra.mxu0 %v14361_v52  ;;  %7523 = vpow2.f32 %v764_v27  ;;  %v14363_v6 = vld [vmem:[#allocation199_spill] sm:$0xff]  ;;  %v10017_v3 = vpop.eup %7513  ;;  %v456_v9 = vsub.f32 %v14365_v30, %v9264_v17  ;;  %v257_v16 = vsub.f32 %v14366_v32, %v9292_v42 }
 0x1d2   :  { %14359 = vst [vmem:[#allocation192_spill] sm:$0xff] %v10007_v11  ;;  %v720_v0 = vmul.f32 -0.5, %v656_v15  ;;  %v721_v22 = vmul.f32 -0.5, %v657_v49  ;;  %v878_v56 = vadd.f32 %v14363_v6, %v14362_v26  ;;  %2905 = vmatmul.f32.gmra.mxu1 %v14342_v39  ;;  %v938_v14 = vadd.f32 %v10007_v11, %v9999_v1  ;;  %v14368_v49 = vld [vmem:[#allocation108_spill] sm:$0xff] }
 0x1d3   :  { %14360 = vst [vmem:[#allocation197_spill] sm:$0xff] %v10011_v38  ;;  %v10025_v27 = vpop.eup %7515  ;;  %v457_v25 = vsub.f32 %v14365_v30, %v9266_v60  ;;  %v258_v21 = vsub.f32 %v14366_v32, %v9294_v23  ;;  %v820_v15 = vmul.f32 1.442695, %v715_v18  ;;  %v10036_v38 = vadd.f32 %v14371_v58, %v14370_v50  ;;  %942 = vadd.xlane.f32.xlu2 %v941_v47 }
 0x1d4   :  { %14364 = vst [vmem:[#allocation59_spill] sm:$0xff] %v10017_v3  ;;  %3142 = vmatmul.f32.gmra.mxu2 %v14368_v49  ;;  %v10032_v28 = vpop.eup %7517  ;;  %7525 = vpow2.f32 %v750_v19  ;;  %v830_v37 = vmul.f32 1.442695, %v720_v0  ;;  %v678_v1 = vmul.f32 -0.5, %v614_v44  ;;  %v832_v30 = vmul.f32 1.442695, %v721_v22  ;;  %879 = vadd.xlane.f32.xlu1 %v878_v56 }
 0x1d5   :  { %14367 = vst [vmem:[#allocation191_spill] sm:$0xff] %v10025_v27  ;;  %v10038_v11 = vpop.eup %7519  ;;  %7527 = vpow2.f32 %v752_v43  ;;  %v2686_v32 = vadd.f32 %v2685_v5, %v14374_v61  ;;  %v679_v49 = vmul.f32 -0.5, %v615_v7  ;;  %v584_v57 = vmul.f32 %v456_v9, %v456_v9  ;;  %v14377_v61 = vld [vmem:[#allocation187_spill] sm:$0xff] }
 0x1d6   :  { %14369 = vst [vmem:[#allocation70_spill] sm:$0xff] %v10032_v28  ;;  %v2689_v18 = vpop.f32.mrf.mxu0  ;;  %v10041_v20 = vpop.eup %7521  ;;  %v520_v39 = vmul.f32 %v257_v16, %v257_v16  ;;  %7529 = vpow2.f32 %v818_v31  ;;  %939 = vadd.xlane.f32.xlu0 %v938_v14  ;;  %3423 = vmatmul.f32.gmra.mxu3 %v14361_v52  ;;  %v585_v44 = vmul.f32 %v457_v25, %v457_v25  ;;  %v684_v5 = vmul.f32 -0.5, %v14377_v61  ;;  %v14379_v16 = vld [vmem:[#allocation101_spill] sm:$0xff]  ;;  %v14380_v31 = vld [vmem:[#allocation188_spill] sm:$0xff] }
 0x1d7   :  { %14372 = vst [vmem:[#allocation193_spill] sm:$0xff] %v10036_v38  ;;  %v2846_v19 = vpop.f32.mrf.mxu1  ;;  %v3015_v47 = vpop.f32.mrf.mxu2  ;;  %v521_v43 = vmul.f32 %v258_v21, %v258_v21  ;;  %7531 = vpow2.f32 %v820_v15  ;;  %v887_v7 = vadd.f32 %v10032_v28, %v10025_v27  ;;  %v685_v14 = vmul.f32 -0.5, %v14380_v31  ;;  %v14384_v31 = vld [vmem:[#allocation118_spill] sm:$0xff] }
 0x1d8   :  { %14373 = vst [vmem:[#allocation73_spill] sm:$0xff] %v10038_v11  ;;  %v10044_v0 = vpop.eup %7523  ;;  %v2847_v56 = vadd.f32 %v2846_v19, %v2686_v32  ;;  %v3360_v22 = vpop.f32.mrf.mxu3  ;;  %7533 = vpow2.f32 %v830_v37  ;;  %v929_v25 = vadd.f32 %v10041_v20, %v10038_v11  ;;  %v746_v37 = vmul.f32 1.442695, %v678_v1 }
 0x1d9   :  { %14375 = vst [vmem:[#allocation47_spill] sm:$0xff] %v10041_v20  ;;  %v10049_v9 = vadd.f32 %v3360_v22, %v3015_v47  ;;  %2752 = vmatmul.f32.gmra.mxu0 %v14379_v16  ;;  %7535 = vpow2.f32 %v832_v30  ;;  %v648_v32 = vadd.f32 %v584_v57, %v520_v39  ;;  %v884_v19 = vadd.f32 %v10044_v0, %v10017_v3  ;;  %v14387_v57 = vld [vmem:[#allocation133_spill] sm:$0xff] }
 0x1da   :  { %14376 = vst [vmem:[#allocation108_spill] sm:$0xff] %v10044_v0  ;;  %v10055_v21 = vmul.f32 2.0, %v2847_v56  ;;  %2909 = vmatmul.f32.gmra.mxu1 %v14361_v52  ;;  %v10058_v15 = vpop.eup %7525  ;;  %v748_v22 = vmul.f32 1.442695, %v679_v49  ;;  %v649_v61 = vadd.f32 %v585_v44, %v521_v43  ;;  %v758_v50 = vmul.f32 1.442695, %v684_v5 }
 0x1db   :  { %14378 = vst [vmem:[#allocation105_spill] sm:$0xff] %v10049_v9  ;;  %v10062_v47 = vpop.eup %7527  ;;  %888 = vadd.xlane.f32.xlu2 %v887_v7  ;;  %v760_v1 = vmul.f32 1.442695, %v685_v14  ;;  %v2690_v39 = vadd.f32 %v2689_v18, %v14387_v57  ;;  %7537 = vpow2.f32 %v746_v37  ;;  %v712_v49 = vmul.f32 -0.5, %v648_v32  ;;  %v14390_v5 = vld [vmem:[#allocation100_spill] sm:$0xff] }
 0x1dc   :  { %14381 = vst [vmem:[#allocation123_spill] sm:$0xff] %v10055_v21  ;;  %3150 = vmatmul.f32.gmra.mxu2 %v14384_v31  ;;  %v10067_v56 = vpop.eup %7529  ;;  %930 = vadd.xlane.f32.xlu1 %v929_v25  ;;  %v10079_v7 = vadd.f32 %v14371_v58, %v14390_v5  ;;  %7539 = vpow2.f32 %v748_v22  ;;  %v713_v14 = vmul.f32 -0.5, %v649_v61  ;;  %v710_v57 = vmul.f32 -0.5, %v9783_v10 }
 0x1dd   :  { %14382 = vst [vmem:[#allocation187_spill] sm:$0xff] %v10058_v15  ;;  %v10069_v9 = vpop.eup %7531  ;;  %7541 = vpow2.f32 %v758_v50  ;;  %v711_v30 = vmul.f32 -0.5, %v9789_v62  ;;  %v875_v21 = vadd.f32 %v10062_v47, %v10058_v15  ;;  %v814_v50 = vmul.f32 1.442695, %v712_v49 }
 0x1de   :  { %14383 = vst [vmem:[#allocation188_spill] sm:$0xff] %v10062_v47  ;;  %v2693_v52 = vpop.f32.mrf.mxu0  ;;  %v10072_v20 = vpop.eup %7533  ;;  %885 = vadd.xlane.f32.xlu0 %v884_v19  ;;  %3427 = vmatmul.f32.gmra.mxu3 %v14379_v16  ;;  %v926_v37 = vadd.f32 %v10069_v9, %v10067_v56  ;;  %v14393_v19 = vld [vmem:[#allocation107_spill] sm:$0xff]  ;;  %7543 = vpow2.f32 %v760_v1  ;;  %v816_v61 = vmul.f32 1.442695, %v713_v14  ;;  %v810_v62 = vmul.f32 1.442695, %v710_v57 }
 0x1df   :  { %14385 = vst [vmem:[#allocation118_spill] sm:$0xff] %v10067_v56  ;;  %v2850_v44 = vpop.f32.mrf.mxu1  ;;  %v3023_v43 = vpop.f32.mrf.mxu2  ;;  %7545 = vpow2.f32 %v814_v50  ;;  %v14404_v50 = vld [vmem:[#allocation117_spill] sm:$0xff]  ;;  %v14502_v56 = vld [vmem:[#allocation71_spill] sm:$0xff] }
 0x1e0   :  { %14386 = vst [vmem:[#allocation228_spill] sm:$0xff] %v10069_v9  ;;  %v10075_v31 = vpop.eup %7535  ;;  %v2851_v25 = vadd.f32 %v2850_v44, %v2690_v39  ;;  %v3364_v18 = vpop.f32.mrf.mxu3  ;;  %v14395_v44 = vld [vmem:[#allocation125_spill] sm:$0xff]  ;;  %7547 = vpow2.f32 %v816_v61  ;;  %v14406_v61 = vld [vmem:[#allocation135_spill] sm:$0xff] }
 0x1e1   :  { %14388 = vst [vmem:[#allocation133_spill] sm:$0xff] %v10072_v20  ;;  %v10084_v32 = vadd.f32 %v3364_v18, %v3023_v43  ;;  %2756 = vmatmul.f32.gmra.mxu0 %v14393_v19  ;;  %v935_v10 = vadd.f32 %v10075_v31, %v10072_v20  ;;  %v10098_v1 = vpop.eup %7537  ;;  %v14398_v18 = vld [vmem:[#allocation144_spill] sm:$0xff]  ;;  %7549 = vpow2.f32 %v810_v62  ;;  %v14501_v9 = vld [vmem:[#allocation61_spill] sm:$0xff] }
 0x1e2   :  { %14389 = vst [vmem:[#allocation229_spill] sm:$0xff] %v10075_v31  ;;  %v10090_v22 = vmul.f32 2.0, %v2851_v25  ;;  %2913 = vmatmul.f32.gmra.mxu1 %v14379_v16  ;;  %v10100_v43 = vpop.eup %7539  ;;  %v812_v25 = vmul.f32 1.442695, %v711_v30  ;;  %v2694_v38 = vadd.f32 %v2693_v52, %v14398_v18 }
 0x1e3   :  { %14391 = vst [vmem:[#allocation230_spill] sm:$0xff] %v10079_v7  ;;  %927 = vadd.xlane.f32.xlu2 %v926_v37  ;;  %v10103_v5 = vpop.eup %7541  ;;  %v872_v52 = vadd.f32 %v10100_v43, %v10098_v1 }
 0x1e4   :  { %14392 = vst [vmem:[#allocation231_spill] sm:$0xff] %v10084_v32  ;;  %3158 = vmatmul.f32.gmra.mxu2 %v14395_v44  ;;  %876 = vadd.xlane.f32.xlu1 %v875_v21  ;;  %v10106_v44 = vpop.eup %7543  ;;  %7551 = vpow2.f32 %v812_v25 }
 0x1e5   :  { %14394 = vst [vmem:[#allocation232_spill] sm:$0xff] %v10090_v22  ;;  %v14401_v22 = vld [vmem:[#allocation106_spill] sm:$0xff]  ;;  %v881_v18 = vadd.f32 %v10106_v44, %v10103_v5  ;;  %v10125_v62 = vpop.eup %7545 }
 0x1e6   :  { %14396 = vst [vmem:[#allocation125_spill] sm:$0xff] %v10098_v1  ;;  %v2697_v49 = vpop.f32.mrf.mxu0  ;;  %936 = vadd.xlane.f32.xlu0 %v935_v10  ;;  %3431 = vmatmul.f32.gmra.mxu3 %v14393_v19  ;;  %v10110_v57 = vadd.f32 %v14371_v58, %v14401_v22 }
 0x1e7   :  { %14397 = vst [vmem:[#allocation233_spill] sm:$0xff] %v10100_v43  ;;  %v2854_v14 = vpop.f32.mrf.mxu1  ;;  %v3031_v39 = vpop.f32.mrf.mxu2 }
 0x1e8   :  { %14399 = vst [vmem:[#allocation144_spill] sm:$0xff] %v10103_v5  ;;  %v2855_v30 = vadd.f32 %v2854_v14, %v2694_v38  ;;  %v3368_v21 = vpop.f32.mrf.mxu3  ;;  %v14409_v14 = vld [vmem:[#allocation154_spill] sm:$0xff] }
 0x1e9   :  { %14400 = vst [vmem:[#allocation234_spill] sm:$0xff] %v10106_v44  ;;  %v10114_v37 = vadd.f32 %v3368_v21, %v3031_v39  ;;  %2760 = vmatmul.f32.gmra.mxu0 %v14404_v50  ;;  %v10127_v39 = vpop.eup %7547  ;;  %v2698_v21 = vadd.f32 %v2697_v49, %v14409_v14  ;;  %v14412_v38 = vld [vmem:[#allocation114_spill] sm:$0xff]  ;;  %v14415_v14 = vld [vmem:[#allocation124_spill] sm:$0xff] }
 0x1ea   :  { %14402 = vst [vmem:[#allocation235_spill] sm:$0xff] %v10110_v57  ;;  %v10117_v10 = vmul.f32 2.0, %v2855_v30  ;;  %2917 = vmatmul.f32.gmra.mxu1 %v14393_v19  ;;  %v10130_v30 = vpop.eup %7549  ;;  %v923_v57 = vadd.f32 %v10127_v39, %v10125_v62  ;;  %v14417_v19 = vld [vmem:[#allocation145_spill] sm:$0xff] }
 0x1eb   :  { %14403 = vst [vmem:[#allocation236_spill] sm:$0xff] %v10114_v37  ;;  %873 = vadd.xlane.f32.xlu2 %v872_v52  ;;  %v10133_v37 = vpop.eup %7551 }
 0x1ec   :  { %14405 = vst [vmem:[#allocation237_spill] sm:$0xff] %v10117_v10  ;;  %3166 = vmatmul.f32.gmra.mxu2 %v14406_v61  ;;  %v10137_v61 = vadd.f32 %v14371_v58, %v14412_v38  ;;  %v920_v32 = vadd.f32 %v10133_v37, %v10130_v30  ;;  %v14422_v38 = vld [vmem:[#allocation137_spill] sm:$0xff] }
 0x1ed   :  { %14407 = vst [vmem:[#allocation135_spill] sm:$0xff] %v10125_v62 }
 0x1ee   :  { %14408 = vst [vmem:[#allocation238_spill] sm:$0xff] %v10127_v39  ;;  %v2701_v25 = vpop.f32.mrf.mxu0  ;;  %882 = vadd.xlane.f32.xlu0 %v881_v18  ;;  %3435 = vmatmul.f32.gmra.mxu3 %v14404_v50 }
 0x1ef   :  { %14410 = vst [vmem:[#allocation154_spill] sm:$0xff] %v10130_v30  ;;  %v2858_v7 = vpop.f32.mrf.mxu1  ;;  %v3039_v22 = vpop.f32.mrf.mxu2 }
 0x1f0   :  { %14411 = vst [vmem:[#allocation239_spill] sm:$0xff] %v10133_v37  ;;  %v2859_v10 = vadd.f32 %v2858_v7, %v2698_v21  ;;  %v3372_v52 = vpop.f32.mrf.mxu3  ;;  %v14418_v7 = vld [vmem:[#allocation163_spill] sm:$0xff] }
 0x1f1   :  { %14413 = vst [vmem:[#allocation240_spill] sm:$0xff] %v10137_v61  ;;  %v10141_v49 = vadd.f32 %v3372_v52, %v3039_v22  ;;  %2764 = vmatmul.f32.gmra.mxu0 %v14415_v14  ;;  %v2702_v21 = vadd.f32 %v2701_v25, %v14418_v7  ;;  %v14419_v52 = vld [vmem:[#allocation122_spill] sm:$0xff]  ;;  %v14425_v25 = vld [vmem:[#allocation171_spill] sm:$0xff] }
 0x1f2   :  { %v10144_v18 = vmul.f32 2.0, %v2859_v10  ;;  %2921 = vmatmul.f32.gmra.mxu1 %v14404_v50  ;;  %v14429_v61 = vld [vmem:[#allocation134_spill] sm:$0xff] }
 0x1f3   :  { %14414 = vst [vmem:[#allocation241_spill] sm:$0xff] %v10141_v49  ;;  %924 = vadd.xlane.f32.xlu2 %v923_v57  ;;  %v10156_v49 = vadd.f32 %v14371_v58, %v14419_v52  ;;  %v14424_v57 = vld [vmem:[#allocation155_spill] sm:$0xff] }
 0x1f4   :  { %14416 = vst [vmem:[#allocation242_spill] sm:$0xff] %v10144_v18  ;;  %3174 = vmatmul.f32.gmra.mxu2 %v14417_v19 }
 0x1f5   :  { %14420 = vst [vmem:[#allocation145_spill] sm:$0xff] %v10156_v49 }
 0x1f6   :  { %v2705_v16 = vpop.f32.mrf.mxu0  ;;  %921 = vadd.xlane.f32.xlu0 %v920_v32  ;;  %3439 = vmatmul.f32.gmra.mxu3 %v14415_v14 }
 0x1f7   :  { %v2862_v22 = vpop.f32.mrf.mxu1  ;;  %v3047_v10 = vpop.f32.mrf.mxu2  ;;  %v2706_v7 = vadd.f32 %v2705_v16, %v14425_v25  ;;  %v14432_v25 = vld [vmem:[#allocation176_spill] sm:$0xff] }
 0x1f8   :  { %v2863_v50 = vadd.f32 %v2862_v22, %v2702_v21  ;;  %v3376_v31 = vpop.f32.mrf.mxu3 }
 0x1f9   :  { %v10158_v20 = vadd.f32 %v3376_v31, %v3047_v10  ;;  %2768 = vmatmul.f32.gmra.mxu0 %v14422_v38  ;;  %v14426_v31 = vld [vmem:[#allocation131_spill] sm:$0xff] }
 0x1fa   :  { %v10161_v19 = vmul.f32 2.0, %v2863_v50  ;;  %2925 = vmatmul.f32.gmra.mxu1 %v14415_v14  ;;  %v10171_v10 = vadd.f32 %v14371_v58, %v14426_v31 }
 0x1fb   :  { %14421 = vst [vmem:[#allocation163_spill] sm:$0xff] %v10158_v20 }
 0x1fc   :  { %14423 = vst [vmem:[#allocation243_spill] sm:$0xff] %v10161_v19  ;;  %3182 = vmatmul.f32.gmra.mxu2 %v14424_v57  ;;  %v14431_v57 = vld [vmem:[#allocation165_spill] sm:$0xff] }
 0x1fd   :  { %14427 = vst [vmem:[#allocation155_spill] sm:$0xff] %v10171_v10 }
 0x1fe   :  { %v2709_v18 = vpop.f32.mrf.mxu0  ;;  %3443 = vmatmul.f32.gmra.mxu3 %v14422_v38 }
 0x1ff   :  { %v2866_v21 = vpop.f32.mrf.mxu1  ;;  %v3055_v22 = vpop.f32.mrf.mxu2  ;;  %v2710_v19 = vadd.f32 %v2709_v18, %v14432_v25  ;;  %v14439_v25 = vld [vmem:[#allocation179_spill] sm:$0xff] }
 0x200   :  { %v2867_v50 = vadd.f32 %v2866_v21, %v2706_v7  ;;  %v3380_v52 = vpop.f32.mrf.mxu3 }
 0x201   :  { %v10173_v20 = vadd.f32 %v3380_v52, %v3055_v22  ;;  %2772 = vmatmul.f32.gmra.mxu0 %v14429_v61  ;;  %v14433_v52 = vld [vmem:[#allocation143_spill] sm:$0xff] }
 0x202   :  { %v10176_v32 = vmul.f32 2.0, %v2867_v50  ;;  %2929 = vmatmul.f32.gmra.mxu1 %v14422_v38  ;;  %v10186_v22 = vadd.f32 %v14371_v58, %v14433_v52  ;;  %v14436_v38 = vld [vmem:[#allocation129_spill] sm:$0xff] }
 0x203   :  { %14428 = vst [vmem:[#allocation171_spill] sm:$0xff] %v10173_v20 }
 0x204   :  { %14430 = vst [vmem:[#allocation244_spill] sm:$0xff] %v10176_v32  ;;  %3190 = vmatmul.f32.gmra.mxu2 %v14431_v57  ;;  %v14438_v57 = vld [vmem:[#allocation172_spill] sm:$0xff] }
 0x205   :  { %14434 = vst [vmem:[#allocation165_spill] sm:$0xff] %v10186_v22 }
 0x206   :  { %v2713_v49 = vpop.f32.mrf.mxu0  ;;  %3447 = vmatmul.f32.gmra.mxu3 %v14429_v61 }
 0x207   :  { %v2870_v7 = vpop.f32.mrf.mxu1  ;;  %v3063_v21 = vpop.f32.mrf.mxu2  ;;  %v2714_v32 = vadd.f32 %v2713_v49, %v14439_v25  ;;  %v14446_v25 = vld [vmem:[#allocation182_spill] sm:$0xff] }
 0x208   :  { %v2871_v50 = vadd.f32 %v2870_v7, %v2710_v19  ;;  %v3384_v31 = vpop.f32.mrf.mxu3 }
 0x209   :  { %v10188_v20 = vadd.f32 %v3384_v31, %v3063_v21  ;;  %2776 = vmatmul.f32.gmra.mxu0 %v14436_v38  ;;  %v14440_v31 = vld [vmem:[#allocation153_spill] sm:$0xff] }
 0x20a   :  { %v10191_v16 = vmul.f32 2.0, %v2871_v50  ;;  %2933 = vmatmul.f32.gmra.mxu1 %v14429_v61  ;;  %v10201_v21 = vadd.f32 %v14371_v58, %v14440_v31  ;;  %v14443_v61 = vld [vmem:[#allocation85_spill] sm:$0xff] }
 0x20b   :  { %14435 = vst [vmem:[#allocation176_spill] sm:$0xff] %v10188_v20 }
 0x20c   :  { %14437 = vst [vmem:[#allocation245_spill] sm:$0xff] %v10191_v16  ;;  %3198 = vmatmul.f32.gmra.mxu2 %v14438_v57  ;;  %v14445_v57 = vld [vmem:[#allocation174_spill] sm:$0xff] }
 0x20d   :  { %14441 = vst [vmem:[#allocation172_spill] sm:$0xff] %v10201_v21 }
 0x20e   :  { %v2717_v10 = vpop.f32.mrf.mxu0  ;;  %3451 = vmatmul.f32.gmra.mxu3 %v14436_v38 }
 0x20f   :  { %v2874_v19 = vpop.f32.mrf.mxu1  ;;  %v3071_v7 = vpop.f32.mrf.mxu2  ;;  %v2718_v16 = vadd.f32 %v2717_v10, %v14446_v25  ;;  %v14453_v25 = vld [vmem:[#allocation184_spill] sm:$0xff] }
 0x210   :  { %v2875_v50 = vadd.f32 %v2874_v19, %v2714_v32  ;;  %v3388_v52 = vpop.f32.mrf.mxu3 }
 0x211   :  { %v10203_v20 = vadd.f32 %v3388_v52, %v3071_v7  ;;  %2780 = vmatmul.f32.gmra.mxu0 %v14443_v61  ;;  %v14447_v52 = vld [vmem:[#allocation161_spill] sm:$0xff] }
 0x212   :  { %v10206_v18 = vmul.f32 2.0, %v2875_v50  ;;  %2937 = vmatmul.f32.gmra.mxu1 %v14436_v38  ;;  %v10216_v7 = vadd.f32 %v14371_v58, %v14447_v52  ;;  %v14450_v38 = vld [vmem:[#allocation83_spill] sm:$0xff] }
 0x213   :  { %14442 = vst [vmem:[#allocation179_spill] sm:$0xff] %v10203_v20 }
 0x214   :  { %14444 = vst [vmem:[#allocation246_spill] sm:$0xff] %v10206_v18  ;;  %3206 = vmatmul.f32.gmra.mxu2 %v14445_v57  ;;  %v14452_v57 = vld [vmem:[#allocation169_spill] sm:$0xff] }
 0x215   :  { %14448 = vst [vmem:[#allocation174_spill] sm:$0xff] %v10216_v7 }
 0x216   :  { %v2721_v22 = vpop.f32.mrf.mxu0  ;;  %3455 = vmatmul.f32.gmra.mxu3 %v14443_v61 }
 0x217   :  { %v2878_v32 = vpop.f32.mrf.mxu1  ;;  %v3079_v19 = vpop.f32.mrf.mxu2  ;;  %v2722_v18 = vadd.f32 %v2721_v22, %v14453_v25  ;;  %v14459_v22 = vld [vmem:[#allocation167_spill] sm:$0xff] }
 0x218   :  { %v2879_v50 = vadd.f32 %v2878_v32, %v2718_v16  ;;  %v3392_v20 = vpop.f32.mrf.mxu3 }
 0x219   :  { %v10218_v31 = vadd.f32 %v3392_v20, %v3079_v19  ;;  %2784 = vmatmul.f32.gmra.mxu0 %v14450_v38 }
 0x21a   :  { %v10221_v49 = vmul.f32 2.0, %v2879_v50  ;;  %2941 = vmatmul.f32.gmra.mxu1 %v14443_v61  ;;  %v14457_v61 = vld [vmem:[#allocation39_spill] sm:$0xff] }
 0x21b   :  { %14449 = vst [vmem:[#allocation182_spill] sm:$0xff] %v10218_v31  ;;  %v14454_v31 = vld [vmem:[#allocation170_spill] sm:$0xff] }
 0x21c   :  { %14451 = vst [vmem:[#allocation247_spill] sm:$0xff] %v10221_v49  ;;  %3214 = vmatmul.f32.gmra.mxu2 %v14452_v57  ;;  %v10231_v50 = vadd.f32 %v14371_v58, %v14454_v31  ;;  %v14460_v49 = vld [vmem:[#allocation186_spill] sm:$0xff]  ;;  %v14463_v31 = vld [vmem:[#allocation175_spill] sm:$0xff] }
 0x21e   :  { %v2725_v21 = vpop.f32.mrf.mxu0  ;;  %3459 = vmatmul.f32.gmra.mxu3 %v14450_v38  ;;  %14455 = vst [vmem:[#allocation169_spill] sm:$0xff] %v10231_v50 }
 0x21f   :  { %v2882_v16 = vpop.f32.mrf.mxu1  ;;  %v3087_v20 = vpop.f32.mrf.mxu2  ;;  %v2726_v7 = vadd.f32 %v2725_v21, %v14460_v49 }
 0x220   :  { %v2883_v32 = vadd.f32 %v2882_v16, %v2722_v18  ;;  %v3396_v19 = vpop.f32.mrf.mxu3 }
 0x221   :  { %v10233_v52 = vadd.f32 %v3396_v19, %v3087_v20  ;;  %2788 = vmatmul.f32.gmra.mxu0 %v14457_v61  ;;  %v14461_v19 = vld [vmem:[#allocation6_spill] sm:$0xff] }
 0x222   :  { %2945 = vmatmul.f32.gmra.mxu1 %v14450_v38  ;;  %v10237_v57 = vmul.f32 2.0, %v2883_v32  ;;  %v14462_v32 = vld [vmem:[#allocation159_spill] sm:$0xff] }
 0x223   :  { %14456 = vst [vmem:[#allocation184_spill] sm:$0xff] %v10233_v52 }
 0x224   :  { %14458 = vst [vmem:[#allocation248_spill] sm:$0xff] %v10237_v57  ;;  %3222 = vmatmul.f32.gmra.mxu2 %v14459_v22  ;;  %v10249_v22 = vadd.f32 %v14371_v58, %v14463_v31 }
 0x226   :  { %v2729_v18 = vpop.f32.mrf.mxu0  ;;  %3463 = vmatmul.f32.gmra.mxu3 %v14457_v61  ;;  %14464 = vst [vmem:[#allocation167_spill] sm:$0xff] %v10249_v22  ;;  %v14474_v22 = vld [vmem:[#allocation79_spill] sm:$0xff] }
 0x227   :  { %v2886_v16 = vpop.f32.mrf.mxu1  ;;  %v3095_v10 = vpop.f32.mrf.mxu2 }
 0x228   :  { %v3400_v20 = vpop.f32.mrf.mxu3  ;;  %v2887_v52 = vadd.f32 %v2886_v16, %v2726_v7  ;;  %v14467_v7 = vld [vmem:[#allocation80_spill] sm:$0xff]  ;;  %v14468_v16 = vld [vmem:[#allocation130_spill] sm:$0xff] }
 0x229   :  { %2792 = vmatmul.f32.gmra.mxu0 %v14461_v19  ;;  %v10253_v57 = vadd.f32 %v3400_v20, %v3095_v10  ;;  %v14470_v10 = vld [vmem:[#allocation157_spill] sm:$0xff]  ;;  %v14471_v20 = vld [vmem:[#allocation178_spill] sm:$0xff] }
 0x22a   :  { %2949 = vmatmul.f32.gmra.mxu1 %v14457_v61  ;;  %v10251_v25 = vmul.f32 2.0, %v2887_v52 }
 0x22b   :  { %14466 = vst [vmem:[#allocation159_spill] sm:$0xff] %v10253_v57  ;;  %v10267_v57 = vadd.f32 %v14371_v58, %v14471_v20 }
 0x22c   :  { %3230 = vmatmul.f32.gmra.mxu2 %v14462_v32  ;;  %14465 = vst [vmem:[#allocation186_spill] sm:$0xff] %v10251_v25  ;;  %v2730_v32 = vadd.f32 %v2729_v18, %v14468_v16  ;;  %v14475_v18 = vld [vmem:[#allocation112_spill] sm:$0xff]  ;;  %v14477_v16 = vld [vmem:[#allocation78_spill] sm:$0xff] }
 0x22d   :  { %14472 = vst [vmem:[#allocation157_spill] sm:$0xff] %v10267_v57  ;;  %v14484_v57 = vld [vmem:[#allocation62_spill] sm:$0xff] }
 0x22e   :  { %3467 = vmatmul.f32.gmra.mxu3 %v14461_v19  ;;  %v2733_v50 = vpop.f32.mrf.mxu0 }
 0x22f   :  { %v3103_v21 = vpop.f32.mrf.mxu2  ;;  %v2890_v38 = vpop.f32.mrf.mxu1 }
 0x230   :  { %v3404_v61 = vpop.f32.mrf.mxu3  ;;  %v2891_v52 = vadd.f32 %v2890_v38, %v2730_v32 }
 0x231   :  { %2796 = vmatmul.f32.gmra.mxu0 %v14467_v7  ;;  %v10260_v14 = vadd.f32 %v3404_v61, %v3103_v21  ;;  %v14476_v21 = vld [vmem:[#allocation152_spill] sm:$0xff]  ;;  %v14480_v61 = vld [vmem:[#allocation181_spill] sm:$0xff] }
 0x232   :  { %2953 = vmatmul.f32.gmra.mxu1 %v14461_v19  ;;  %v10269_v49 = vmul.f32 2.0, %v2891_v52  ;;  %v14478_v52 = vld [vmem:[#allocation147_spill] sm:$0xff]  ;;  %v14479_v19 = vld [vmem:[#allocation121_spill] sm:$0xff] }
 0x233   :  { %14469 = vst [vmem:[#allocation130_spill] sm:$0xff] %v10260_v14 }
 0x234   :  { %3238 = vmatmul.f32.gmra.mxu2 %v14470_v10  ;;  %14473 = vst [vmem:[#allocation249_spill] sm:$0xff] %v10269_v49 }
 0x236   :  { %3471 = vmatmul.f32.gmra.mxu3 %v14467_v7  ;;  %v2737_v25 = vpop.f32.mrf.mxu0 }
 0x237   :  { %v2738_v38 = vadd.f32 %v2737_v25, %v14475_v18  ;;  %v2894_v32 = vpop.f32.mrf.mxu1  ;;  %v3111_v10 = vpop.f32.mrf.mxu2  ;;  %v10285_v25 = vadd.f32 %v14371_v58, %v14480_v61 }
 0x238   :  { %v3408_v14 = vpop.f32.mrf.mxu3 }
 0x239   :  { %2800 = vmatmul.f32.gmra.mxu0 %v14474_v22  ;;  %14481 = vst [vmem:[#allocation112_spill] sm:$0xff] %v10285_v25 }
 0x23a   :  { %2957 = vmatmul.f32.gmra.mxu1 %v14467_v7  ;;  %v2734_v7 = vadd.f32 %v2733_v50, %v14479_v19 }
 0x23c   :  { %3246 = vmatmul.f32.gmra.mxu2 %v14476_v21  ;;  %v2895_v18 = vadd.f32 %v2894_v32, %v2734_v7  ;;  %v14482_v21 = vld [vmem:[#allocation67_spill] sm:$0xff]  ;;  %v14486_v7 = vld [vmem:[#allocation69_spill] sm:$0xff]  ;;  %v14487_v32 = vld [vmem:[#allocation72_spill] sm:$0xff] }
 0x23e   :  { %3475 = vmatmul.f32.gmra.mxu3 %v14474_v22  ;;  %v10289_v49 = vmul.f32 2.0, %v2895_v18  ;;  %v2741_v50 = vpop.f32.mrf.mxu0  ;;  %v14489_v18 = vld [vmem:[#allocation189_spill] sm:$0xff] }
 0x23f   :  { %v2898_v19 = vpop.f32.mrf.mxu1  ;;  %v3119_v20 = vpop.f32.mrf.mxu2 }
 0x240   :  { %14483 = vst [vmem:[#allocation152_spill] sm:$0xff] %v10289_v49 }
 0x241   :  { %2804 = vmatmul.f32.gmra.mxu0 %v14477_v16  ;;  %v3412_v31 = vpop.f32.mrf.mxu3 }
 0x242   :  { %2961 = vmatmul.f32.gmra.mxu1 %v14474_v22  ;;  %v10294_v22 = vadd.f32 %v3408_v14, %v3111_v10  ;;  %v2899_v14 = vadd.f32 %v2898_v19, %v2738_v38  ;;  %v14490_v10 = vld [vmem:[#allocation183_spill] sm:$0xff]  ;;  %v14497_v38 = vld [vmem:[#allocation8_spill] sm:$0xff] }
 0x243   :  { %v418_v19 = vsub.f32 %v14497_v38, %v9264_v17 }
 0x244   :  { %3254 = vmatmul.f32.gmra.mxu2 %v14478_v52  ;;  %14485 = vst [vmem:[#allocation147_spill] sm:$0xff] %v10294_v22  ;;  %v10304_v52 = vadd.f32 %v14371_v58, %v14490_v10  ;;  %v10310_v22 = vadd.f32 %v3412_v31, %v3119_v20 }
 0x246   :  { %3479 = vmatmul.f32.gmra.mxu3 %v14477_v16  ;;  %v2745_v61 = vpop.f32.mrf.mxu0  ;;  %14491 = vst [vmem:[#allocation121_spill] sm:$0xff] %v10304_v52  ;;  %v546_v52 = vmul.f32 %v418_v19, %v418_v19  ;;  %v14504_v19 = vld [vmem:[#allocation76_spill] sm:$0xff] }
 0x247   :  { %v2902_v11 = vpop.f32.mrf.mxu1  ;;  %v3127_v49 = vpop.f32.mrf.mxu2  ;;  %14495 = vst [vmem:[#allocation62_spill] sm:$0xff] %v10310_v22  ;;  %v2746_v34 = vadd.f32 %v2745_v61, %v14504_v19  ;;  %v14513_v19 = vld [vmem:[#allocation48_spill] sm:$0xff] }
 0x249   :  { %3533 = vmatmul.f32.vlgmr.msra.gmra.mxu0 %v14482_v21  ;;  %v14488_v21 = vld [vmem:[#allocation63_spill] sm:$0xff]  ;;  %v3416_v25 = vpop.f32.mrf.mxu3 }
 0x24a   :  { %2965 = vmatmul.f32.gmra.mxu1 %v14477_v16  ;;  %v2742_v16 = vadd.f32 %v2741_v50, %v14489_v18  ;;  %v14496_v50 = vld [vmem:[#allocation58_spill] sm:$0xff]  ;;  %v14498_v18 = vld [vmem:[#allocation177_spill] sm:$0xff] }
 0x24b   :  { %v219_v10 = vsub.f32 %v14498_v18, %v9292_v42  ;;  %v220_v39 = vsub.f32 %v14498_v18, %v9294_v23 }
 0x24c   :  { %3982 = vmatmul.f32.vlgmr.msra.gmra.mxu2 %v14484_v57 }
 0x24d   :  { %v482_v62 = vmul.f32 %v219_v10, %v219_v10  ;;  %v483_v30 = vmul.f32 %v220_v39, %v220_v39  ;;  %v14508_v39 = vld [vmem:[#allocation52_spill] sm:$0xff] }
 0x24e   :  { %4143 = vmatmul.f32.vlgmr.msra.gmra.mxu3 %v14484_v57  ;;  %v14492_v57 = vld [vmem:[#allocation64_spill] sm:$0xff]  ;;  %v2749_v20 = vpop.f32.mrf.mxu0 }
 0x24f   :  { %v2906_v22 = vpop.f32.mrf.mxu1 }
 0x251   :  { %3538 = vmatmul.f32.gmra.mxu0 %v14486_v7  ;;  %v10307_v7 = vmul.f32 2.0, %v2899_v14  ;;  %v14499_v14 = vld [vmem:[#allocation24_spill] sm:$0xff] }
 0x252   :  { %3727 = vmatmul.f32.vlgmr.msra.gmra.mxu1 %v14487_v32  ;;  %v14494_v32 = vld [vmem:[#allocation74_spill] sm:$0xff] }
 0x253   :  { %14493 = vst [vmem:[#allocation67_spill] sm:$0xff] %v10307_v7  ;;  %v419_v7 = vsub.f32 %v14497_v38, %v9266_v60  ;;  %v610_v38 = vadd.f32 %v546_v52, %v482_v62 }
 0x254   :  { %3986 = vmatmul.f32.gmra.mxu2 %v14488_v21 }
 0x255   :  { %v547_v37 = vmul.f32 %v419_v7, %v419_v7  ;;  %v674_v7 = vmul.f32 -0.5, %v610_v38 }
 0x256   :  { %4147 = vmatmul.f32.gmra.mxu3 %v14488_v21  ;;  %v3135_v21 = vpop.f32.mrf.mxu2 }
 0x259   :  { %3543 = vmatmul.f32.gmra.mxu0 %v14492_v57  ;;  %v420_v57 = vsub.f32 %v14499_v14, %v9264_v17  ;;  %v14503_v17 = vld [vmem:[#allocation55_spill] sm:$0xff] }
 0x25a   :  { %3733 = vmatmul.f32.gmra.mxu1 %v14494_v32  ;;  %v14500_v32 = vld [vmem:[#allocation180_spill] sm:$0xff] }
 0x25b   :  { %v221_v31 = vsub.f32 %v14500_v32, %v9292_v42  ;;  %v421_v42 = vsub.f32 %v14499_v14, %v9266_v60  ;;  %v548_v8 = vmul.f32 %v420_v57, %v420_v57  ;;  %v14507_v60 = vld [vmem:[#allocation185_spill] sm:$0xff]  ;;  %v2753_v57 = vpop.f32.mrf.mxu0 }
 0x25c   :  { %3990 = vmatmul.f32.gmra.mxu2 %v14496_v50  ;;  %v10341_v14 = vadd.f32 %v14371_v58, %v14507_v60 }
 0x25d   :  { %v549_v13 = vmul.f32 %v421_v42, %v421_v42  ;;  %v14510_v42 = vld [vmem:[#allocation53_spill] sm:$0xff] }
 0x25e   :  { %4151 = vmatmul.f32.gmra.mxu3 %v14496_v50  ;;  %v3420_v50 = vpop.f32.mrf.mxu3 }
 0x261   :  { %3548 = vmatmul.f32.gmra.mxu0 %v14501_v9  ;;  %v222_v9 = vsub.f32 %v14500_v32, %v9294_v23  ;;  %v2903_v23 = vadd.f32 %v2902_v11, %v2742_v16  ;;  %v2910_v32 = vpop.f32.mrf.mxu1  ;;  %v738_v16 = vmul.f32 1.442695, %v674_v7 }
 0x262   :  { %3739 = vmatmul.f32.gmra.mxu1 %v14502_v56  ;;  %v484_v56 = vmul.f32 %v221_v31, %v221_v31  ;;  %v611_v31 = vadd.f32 %v547_v37, %v483_v30  ;;  %v10353_v30 = vadd.f32 %v3416_v25, %v3127_v49  ;;  %v2907_v49 = vadd.f32 %v2906_v22, %v2746_v34  ;;  %v14521_v22 = vld [vmem:[#allocation42_spill] sm:$0xff] }
 0x263   :  { %v485_v18 = vmul.f32 %v222_v9, %v222_v9  ;;  %v10344_v52 = vmul.f32 2.0, %v2903_v23  ;;  %v14512_v9 = vld [vmem:[#allocation77_spill] sm:$0xff]  ;;  %7553 = vpow2.f32 %v738_v16  ;;  %v14519_v16 = vld [vmem:[#allocation56_spill] sm:$0xff] }
 0x264   :  { %3994 = vmatmul.f32.gmra.mxu2 %v14503_v17  ;;  %v612_v10 = vadd.f32 %v548_v8, %v484_v56  ;;  %v10346_v8 = vpop.f32.mrf.mxu2  ;;  %v675_v11 = vmul.f32 -0.5, %v611_v31  ;;  %v2750_v56 = vadd.f32 %v2749_v20, %v14512_v9  ;;  %v14514_v31 = vld [vmem:[#allocation111_spill] sm:$0xff]  ;;  %v10364_v20 = vmul.f32 2.0, %v2907_v49 }
 0x265   :  { %v613_v62 = vadd.f32 %v549_v13, %v485_v18  ;;  %14509 = vst [vmem:[#allocation69_spill] sm:$0xff] %v10344_v52  ;;  %v14511_v13 = vld [vmem:[#allocation60_spill] sm:$0xff]  ;;  %v10361_v7 = vadd.f32 %v14371_v58, %v14514_v31 }
 0x266   :  { %4155 = vmatmul.f32.gmra.mxu3 %v14503_v17  ;;  %v676_v61 = vmul.f32 -0.5, %v612_v10  ;;  %v740_v38 = vmul.f32 1.442695, %v675_v11  ;;  %v2757_v10 = vpop.f32.mrf.mxu0  ;;  %14516 = vst [vmem:[#allocation63_spill] sm:$0xff] %v10364_v20  ;;  %v10389_v34 = vadd.f32 %v2910_v32, %v2750_v56  ;;  %v14530_v56 = vld [vmem:[#allocation49_spill] sm:$0xff] }
 0x267   :  { %v677_v17 = vmul.f32 -0.5, %v613_v62  ;;  %14515 = vst [vmem:[#allocation72_spill] sm:$0xff] %v10361_v7  ;;  %v10366_v62 = vadd.f32 %v3420_v50, %v3135_v21 }
 0x268   :  { %v742_v37 = vmul.f32 1.442695, %v676_v61  ;;  %v14517_v61 = vld [vmem:[#allocation46_spill] sm:$0xff]  ;;  %14526 = vst [vmem:[#allocation8_spill] sm:$0xff] %v10389_v34 }
 0x269   :  { %3553 = vmatmul.f32.gmra.mxu0 %v14505_v45  ;;  %v10348_v45 = vpop.f32.mrf.mxu3  ;;  %v744_v18 = vmul.f32 1.442695, %v677_v17  ;;  %v2914_v23 = vpop.f32.mrf.mxu1 }
 0x26a   :  { %3745 = vmatmul.f32.gmra.mxu1 %v14506_v33  ;;  %7555 = vpow2.f32 %v742_v37  ;;  %v10369_v11 = vpop.eup %7553  ;;  %v14527_v33 = vld [vmem:[#allocation50_spill] sm:$0xff] }
 0x26b   :  { %7557 = vpow2.f32 %v740_v38  ;;  %14518 = vst [vmem:[#allocation189_spill] sm:$0xff] %v10369_v11 }
 0x26c   :  { %3998 = vmatmul.f32.gmra.mxu2 %v14508_v39  ;;  %v3151_v25 = vpop.f32.mrf.mxu2  ;;  %7559 = vpow2.f32 %v744_v18 }
 0x26e   :  { %4159 = vmatmul.f32.gmra.mxu3 %v14508_v39  ;;  %v2761_v37 = vpop.f32.mrf.mxu0 }
 0x270   :  { %v10372_v17 = vpop.eup %7555 }
 0x271   :  { %3558 = vmatmul.f32.gmra.mxu0 %v14510_v42  ;;  %v3428_v39 = vpop.f32.mrf.mxu3  ;;  %14520 = vst [vmem:[#allocation64_spill] sm:$0xff] %v10372_v17  ;;  %v2918_v42 = vpop.f32.mrf.mxu1  ;;  %v1314_v21 = vadd.f32 %v10372_v17, %v10369_v11  ;;  %v14528_v17 = vld [vmem:[#allocation40_spill] sm:$0xff] }
 0x272   :  { %3751 = vmatmul.f32.gmra.mxu1 %v14511_v13  ;;  %v10377_v13 = vpop.eup %7557 }
 0x273   :  { %14522 = vst [vmem:[#allocation74_spill] sm:$0xff] %v10377_v13  ;;  %v10381_v50 = vpop.eup %7559  ;;  %v1315_v49 = vadd.f32 %v10098_v1, %v1314_v21 }
 0x274   :  { %4002 = vmatmul.f32.gmra.mxu2 %v14513_v19  ;;  %14523 = vst [vmem:[#allocation58_spill] sm:$0xff] %v10381_v50  ;;  %v3159_v9 = vpop.f32.mrf.mxu2  ;;  %v1351_v18 = vadd.f32 %v10381_v50, %v10377_v13  ;;  %v14529_v50 = vld [vmem:[#allocation38_spill] sm:$0xff] }
 0x276   :  { %4163 = vmatmul.f32.gmra.mxu3 %v14513_v19  ;;  %v14524_v19 = vld [vmem:[#allocation45_spill] sm:$0xff]  ;;  %v2765_v11 = vpop.f32.mrf.mxu0  ;;  %v1352_v7 = vadd.f32 %v10100_v43, %v1351_v18  ;;  %v10405_v43 = vadd.f32 %v10348_v45, %v10346_v8  ;;  %v14538_v8 = vld [vmem:[#allocation31_spill] sm:$0xff] }
 0x278   :  { %14532 = vst [vmem:[#allocation177_spill] sm:$0xff] %v10405_v43 }
 0x279   :  { %3563 = vmatmul.f32.gmra.mxu0 %v14517_v61  ;;  %v3432_v38 = vpop.f32.mrf.mxu3  ;;  %v14525_v61 = vld [vmem:[#allocation75_spill] sm:$0xff]  ;;  %v2922_v20 = vpop.f32.mrf.mxu1 }
 0x27a   :  { %3757 = vmatmul.f32.gmra.mxu1 %v14519_v16  ;;  %v2754_v16 = vadd.f32 %v2753_v57, %v14525_v61  ;;  %v1353_v57 = vadd.f32 %v10062_v47, %v1352_v7  ;;  %v14533_v7 = vld [vmem:[#allocation127_spill] sm:$0xff] }
 0x27c   :  { %4006 = vmatmul.f32.gmra.mxu2 %v14521_v22  ;;  %v1354_v18 = vadd.f32 %v14363_v6, %v1353_v57  ;;  %v10409_v1 = vadd.f32 %v2914_v23, %v2754_v16 }
 0x27e   :  { %4167 = vmatmul.f32.gmra.mxu3 %v14521_v22  ;;  %v1316_v22 = vadd.f32 %v10058_v15, %v1315_v49  ;;  %v2769_v21 = vpop.f32.mrf.mxu0  ;;  %14534 = vst [vmem:[#allocation24_spill] sm:$0xff] %v10409_v1  ;;  %v1355_v47 = vadd.f32 %v10106_v44, %v1354_v18  ;;  %v14536_v15 = vld [vmem:[#allocation44_spill] sm:$0xff] }
 0x280   :  { %v1317_v32 = vadd.f32 %v14362_v26, %v1316_v22  ;;  %v2758_v22 = vadd.f32 %v2757_v10, %v14533_v7  ;;  %v14539_v7 = vld [vmem:[#allocation28_spill] sm:$0xff] }
 0x281   :  { %3568 = vmatmul.f32.gmra.mxu0 %v14524_v19  ;;  %v3167_v19 = vpop.f32.mrf.mxu2  ;;  %v3436_v52 = vpop.f32.mrf.mxu3 }
 0x282   :  { %3763 = vmatmul.f32.gmra.mxu1 %v14527_v33  ;;  %v14531_v33 = vld [vmem:[#allocation32_spill] sm:$0xff]  ;;  %v2926_v61 = vpop.f32.mrf.mxu1  ;;  %v1318_v49 = vadd.f32 %v10103_v5, %v1317_v32  ;;  %v10415_v32 = vadd.f32 %v3428_v39, %v3151_v25  ;;  %v14540_v25 = vld [vmem:[#allocation41_spill] sm:$0xff]  ;;  %v14541_v39 = vld [vmem:[#allocation190_spill] sm:$0xff]  ;;  %v10431_v5 = vadd.f32 %v3432_v38, %v3159_v9 }
 0x283   :  { %v14549_v9 = vld [vmem:[#allocation200_spill] sm:$0xff] }
 0x284   :  { %4010 = vmatmul.f32.gmra.mxu2 %v14528_v17  ;;  %v1319_v57 = vadd.f32 %v10017_v3, %v1318_v49  ;;  %14537 = vst [vmem:[#allocation180_spill] sm:$0xff] %v10415_v32  ;;  %v2762_v49 = vadd.f32 %v2761_v37, %v14541_v39  ;;  %v2770_v38 = vadd.f32 %v2769_v21, %v14549_v9  ;;  %v14550_v3 = vld [vmem:[#allocation33_spill] sm:$0xff] }
 0x285   :  { %14543 = vst [vmem:[#allocation71_spill] sm:$0xff] %v10431_v5 }
 0x286   :  { %4171 = vmatmul.f32.gmra.mxu3 %v14528_v17  ;;  %v2773_v45 = vpop.f32.mrf.mxu0  ;;  %v1320_v10 = vadd.f32 %v10025_v27, %v1319_v57  ;;  %v14558_v27 = vld [vmem:[#allocation203_spill] sm:$0xff] }
 0x287   :  { %v707_v5 = vmul.f32 -0.5, %v14558_v27 }
 0x289   :  { %3573 = vmatmul.f32.gmra.mxu0 %v14529_v50  ;;  %v3175_v17 = vpop.f32.mrf.mxu2  ;;  %v3440_v50 = vpop.f32.mrf.mxu3 }
 0x28a   :  { %3769 = vmatmul.f32.gmra.mxu1 %v14530_v56  ;;  %v14535_v56 = vld [vmem:[#allocation36_spill] sm:$0xff]  ;;  %v2930_v13 = vpop.f32.mrf.mxu1 }
 0x28b   :  { %v2931_v43 = vadd.f32 %v2930_v13, %v2770_v38 }
 0x28c   :  { %4014 = vmatmul.f32.gmra.mxu2 %v14531_v33 }
 0x28e   :  { %4175 = vmatmul.f32.gmra.mxu3 %v14531_v33  ;;  %v1356_v33 = vadd.f32 %v10044_v0, %v1355_v47  ;;  %v2777_v47 = vpop.f32.mrf.mxu0  ;;  %v14545_v0 = vld [vmem:[#allocation151_spill] sm:$0xff] }
 0x28f   :  { %v10437_v37 = vadd.f32 %v14371_v58, %v14545_v0 }
 0x290   :  { %v1357_v18 = vadd.f32 %v10032_v28, %v1356_v33 }
 0x291   :  { %3578 = vmatmul.f32.gmra.mxu0 %v14535_v56  ;;  %v3183_v23 = vpop.f32.mrf.mxu2  ;;  %v3444_v16 = vpop.f32.mrf.mxu3  ;;  %v10427_v56 = vadd.f32 %v2918_v42, %v2758_v22  ;;  %14546 = vst [vmem:[#allocation55_spill] sm:$0xff] %v10437_v37  ;;  %v2923_v42 = vadd.f32 %v2922_v20, %v2762_v49  ;;  %v14547_v22 = vld [vmem:[#allocation23_spill] sm:$0xff] }
 0x292   :  { %3775 = vmatmul.f32.gmra.mxu1 %v14536_v15  ;;  %v1321_v15 = vadd.f32 %v9685_v4, %v1320_v10  ;;  %v2934_v57 = vpop.f32.mrf.mxu1  ;;  %v1358_v44 = vadd.f32 %v14341_v12, %v1357_v18  ;;  %v14544_v10 = vld [vmem:[#allocation196_spill] sm:$0xff]  ;;  %v14708_v12 = vld [vmem:[#allocation87_spill] sm:$0xff] }
 0x293   :  { %14542 = vst [vmem:[#allocation61_spill] sm:$0xff] %v10427_v56  ;;  %v14712_v4 = vld [vmem:[#allocation243_spill] sm:$0xff] }
 0x294   :  { %4018 = vmatmul.f32.gmra.mxu2 %v14538_v8  ;;  %v1359_v39 = vadd.f32 %v9710_v46, %v1358_v44 }
 0x296   :  { %4179 = vmatmul.f32.gmra.mxu3 %v14538_v8  ;;  %v1322_v8 = vadd.f32 %v9706_v51, %v1321_v15  ;;  %v10442_v15 = vadd.f32 %v3436_v52, %v3167_v19  ;;  %v2781_v20 = vpop.f32.mrf.mxu0  ;;  %v14552_v19 = vld [vmem:[#allocation20_spill] sm:$0xff] }
 0x298   :  { %v1323_v18 = vadd.f32 %v9745_v41, %v1322_v8  ;;  %14548 = vst [vmem:[#allocation76_spill] sm:$0xff] %v10442_v15  ;;  %v14687_v15 = vld [vmem:[#allocation132_spill] sm:$0xff] }
 0x299   :  { %3583 = vmatmul.f32.gmra.mxu0 %v14539_v7  ;;  %v3191_v7 = vpop.f32.mrf.mxu2  ;;  %v3448_v33 = vpop.f32.mrf.mxu3 }
 0x29a   :  { %3781 = vmatmul.f32.gmra.mxu1 %v14540_v25  ;;  %v2766_v25 = vadd.f32 %v2765_v11, %v14544_v10  ;;  %v2938_v49 = vpop.f32.mrf.mxu1  ;;  %v1360_v10 = vadd.f32 %v9748_v24, %v1359_v39  ;;  %v1324_v44 = vadd.f32 %v9837_v63, %v1323_v18  ;;  %v10462_v39 = vadd.f32 %v3440_v50, %v3175_v17  ;;  %v14557_v18 = vld [vmem:[#allocation51_spill] sm:$0xff] }
 0x29b   :  { %v706_v28 = vmul.f32 -0.5, %v14557_v18  ;;  %v14563_v50 = vld [vmem:[#allocation195_spill] sm:$0xff]  ;;  %v10482_v18 = vmul.f32 2.0, %v2931_v43 }
 0x29c   :  { %4022 = vmatmul.f32.gmra.mxu2 %v14300_v29  ;;  %v1325_v21 = vadd.f32 %v9877_v36, %v1324_v44  ;;  %v2927_v11 = vadd.f32 %v2926_v61, %v2766_v25  ;;  %14556 = vst [vmem:[#allocation185_spill] sm:$0xff] %v10462_v39  ;;  %v10478_v27 = vadd.f32 %v14371_v58, %v14563_v50  ;;  %v14567_v39 = vld [vmem:[#allocation206_spill] sm:$0xff]  ;;  %v14598_v43 = vld [vmem:[#allocation11_spill] sm:$0xff] }
 0x29d   :  { %14565 = vst [vmem:[#allocation77_spill] sm:$0xff] %v10482_v18  ;;  %v10494_v25 = vadd.f32 %v3448_v33, %v3191_v7  ;;  %v14775_v36 = vld [vmem:[#allocation246_spill] sm:$0xff] }
 0x29e   :  { %4183 = vmatmul.f32.gmra.mxu3 %v14300_v29  ;;  %v10446_v29 = vmul.f32 2.0, %v2923_v42  ;;  %v14553_v42 = vld [vmem:[#allocation27_spill] sm:$0xff]  ;;  %v10471_v44 = vmul.f32 2.0, %v2927_v11  ;;  %v2785_v6 = vpop.f32.mrf.mxu0  ;;  %v1326_v17 = vadd.f32 %v9883_v59, %v1325_v21  ;;  %14564 = vst [vmem:[#allocation60_spill] sm:$0xff] %v10478_v27  ;;  %v10484_v11 = vadd.f32 %v3444_v16, %v3183_v23  ;;  %v14572_v16 = vld [vmem:[#allocation17_spill] sm:$0xff] }
 0x29f   :  { %v14568_v21 = vld [vmem:[#allocation207_spill] sm:$0xff]  ;;  %14571 = vst [vmem:[#allocation46_spill] sm:$0xff] %v10494_v25  ;;  %v2782_v23 = vadd.f32 %v2781_v20, %v9773_v48  ;;  %v14579_v20 = vld [vmem:[#allocation12_spill] sm:$0xff] }
 0x2a0   :  { %14551 = vst [vmem:[#allocation57_spill] sm:$0xff] %v10446_v29  ;;  %v14570_v29 = vld [vmem:[#allocation22_spill] sm:$0xff] }
 0x2a1   :  { %3588 = vmatmul.f32.gmra.mxu0 %v14547_v22  ;;  %v3199_v8 = vpop.f32.mrf.mxu2  ;;  %v3452_v52 = vpop.f32.mrf.mxu3  ;;  %v14554_v22 = vld [vmem:[#allocation164_spill] sm:$0xff]  ;;  %14561 = vst [vmem:[#allocation53_spill] sm:$0xff] %v10471_v44  ;;  %v709_v37 = vmul.f32 -0.5, %v14570_v29 }
 0x2a2   :  { %3787 = vmatmul.f32.gmra.mxu1 %v14550_v3  ;;  %v1361_v3 = vadd.f32 %v9841_v55, %v1360_v10  ;;  %v10460_v9 = vadd.f32 %v14371_v58, %v14554_v22  ;;  %v2942_v26 = vpop.f32.mrf.mxu1  ;;  %14566 = vst [vmem:[#allocation48_spill] sm:$0xff] %v10484_v11  ;;  %v708_v55 = vmul.f32 -0.5, %v14568_v21  ;;  %v14625_v11 = vld [vmem:[#allocation113_spill] sm:$0xff]  ;;  %v14669_v44 = vld [vmem:[#allocation136_spill] sm:$0xff] }
 0x2a4   :  { %4026 = vmatmul.f32.gmra.mxu2 %v14305_v53  ;;  %14555 = vst [vmem:[#allocation66_spill] sm:$0xff] %v10460_v9  ;;  %v1362_v61 = vadd.f32 %v9909_v35, %v1361_v3  ;;  %v802_v3 = vmul.f32 1.442695, %v706_v28  ;;  %v10499_v28 = vadd.f32 %v3452_v52, %v3199_v8  ;;  %v806_v48 = vmul.f32 1.442695, %v708_v55 }
 0x2a5   :  { %v808_v52 = vmul.f32 1.442695, %v709_v37 }
 0x2a6   :  { %4187 = vmatmul.f32.gmra.mxu3 %v14305_v53  ;;  %v14559_v53 = vld [vmem:[#allocation194_spill] sm:$0xff]  ;;  %14573 = vst [vmem:[#allocation56_spill] sm:$0xff] %v10499_v28  ;;  %7561 = vpow2.f32 %v802_v3 }
 0x2a7   :  { %v10469_v10 = vadd.f32 %v14371_v58, %v14559_v53  ;;  %v14610_v28 = vld [vmem:[#allocation238_spill] sm:$0xff] }
 0x2a9   :  { %3593 = vmatmul.f32.gmra.mxu0 %v14552_v19  ;;  %14560 = vst [vmem:[#allocation52_spill] sm:$0xff] %v10469_v10  ;;  %v14562_v19 = vld [vmem:[#allocation202_spill] sm:$0xff]  ;;  %v3207_v13 = vpop.f32.mrf.mxu2  ;;  %v3456_v38 = vpop.f32.mrf.mxu3 }
 0x2aa   :  { %3793 = vmatmul.f32.gmra.mxu1 %v14553_v42  ;;  %v2774_v42 = vadd.f32 %v2773_v45, %v14562_v19  ;;  %v2778_v45 = vadd.f32 %v2777_v47, %v14567_v39  ;;  %v804_v19 = vmul.f32 1.442695, %v707_v5  ;;  %v1363_v47 = vadd.f32 %v9889_v40, %v1362_v61  ;;  %v14575_v39 = vld [vmem:[#allocation173_spill] sm:$0xff]  ;;  %v2946_v61 = vpop.f32.mrf.mxu1 }
 0x2ab   :  { %v2786_v5 = vadd.f32 %v2785_v6, %v9807_v2  ;;  %v10505_v29 = vadd.f32 %v14371_v58, %v14575_v39  ;;  %v10507_v7 = vadd.f32 %v3456_v38, %v3207_v13  ;;  %v2789_v6 = vpop.f32.mrf.mxu0  ;;  %v14583_v13 = vld [vmem:[#allocation212_spill] sm:$0xff] }
 0x2ac   :  { %4030 = vmatmul.f32.gmra.mxu2 %v14311_v54  ;;  %v10489_v63 = vadd.f32 %v2934_v57, %v2774_v42  ;;  %v14574_v57 = vld [vmem:[#allocation26_spill] sm:$0xff]  ;;  %v2943_v42 = vadd.f32 %v2942_v26, %v2782_v23  ;;  %7563 = vpow2.f32 %v804_v19  ;;  %v2790_v38 = vadd.f32 %v2789_v6, %v14583_v13  ;;  %v14586_v19 = vld [vmem:[#allocation208_spill] sm:$0xff] }
 0x2ad   :  { %14576 = vst [vmem:[#allocation42_spill] sm:$0xff] %v10505_v29  ;;  %v10519_v55 = vadd.f32 %v2946_v61, %v2786_v5  ;;  %7565 = vpow2.f32 %v806_v48  ;;  %v14592_v61 = vld [vmem:[#allocation10_spill] sm:$0xff] }
 0x2ae   :  { %4191 = vmatmul.f32.gmra.mxu3 %v14311_v54  ;;  %14569 = vst [vmem:[#allocation111_spill] sm:$0xff] %v10489_v63  ;;  %v2939_v54 = vadd.f32 %v2938_v49, %v2778_v45  ;;  %v14580_v49 = vld [vmem:[#allocation214_spill] sm:$0xff]  ;;  %v10513_v2 = vmul.f32 2.0, %v2943_v42  ;;  %v14582_v45 = vld [vmem:[#allocation215_spill] sm:$0xff]  ;;  %7567 = vpow2.f32 %v808_v52  ;;  %v14688_v63 = vld [vmem:[#allocation156_spill] sm:$0xff] }
 0x2af   :  { %14577 = vst [vmem:[#allocation45_spill] sm:$0xff] %v10507_v7  ;;  %v1327_v8 = vadd.f32 %v14580_v49, %v1326_v17  ;;  %v1364_v21 = vadd.f32 %v14582_v45, %v1363_v47  ;;  %v14587_v47 = vld [vmem:[#allocation13_spill] sm:$0xff]  ;;  %v14590_v42 = vld [vmem:[#allocation19_spill] sm:$0xff] }
 0x2b0   :  { %v10509_v33 = vmul.f32 2.0, %v2939_v54  ;;  %14581 = vst [vmem:[#allocation50_spill] sm:$0xff] %v10513_v2  ;;  %v10528_v54 = vpop.eup %7561  ;;  %v14594_v52 = vld [vmem:[#allocation219_spill] sm:$0xff] }
 0x2b1   :  { %3598 = vmatmul.f32.gmra.mxu0 %v14572_v16  ;;  %14584 = vst [vmem:[#allocation40_spill] sm:$0xff] %v10519_v55  ;;  %v3215_v23 = vpop.f32.mrf.mxu2  ;;  %v3460_v17 = vpop.f32.mrf.mxu3  ;;  %v1328_v16 = vadd.f32 %v14586_v19, %v1327_v8  ;;  %v14667_v55 = vld [vmem:[#allocation140_spill] sm:$0xff] }
 0x2b2   :  { %3799 = vmatmul.f32.gmra.mxu1 %v14574_v57  ;;  %14578 = vst [vmem:[#allocation75_spill] sm:$0xff] %v10509_v33  ;;  %v10524_v37 = vadd.f32 %v3460_v17, %v3215_v23  ;;  %v14589_v57 = vld [vmem:[#allocation209_spill] sm:$0xff]  ;;  %v10532_v6 = vpop.eup %7563  ;;  %v2950_v13 = vpop.f32.mrf.mxu1 }
 0x2b3   :  { %14588 = vst [vmem:[#allocation49_spill] sm:$0xff] %v10528_v54  ;;  %v1365_v5 = vadd.f32 %v14589_v57, %v1364_v21  ;;  %v2793_v48 = vpop.f32.mrf.mxu0  ;;  %v10536_v23 = vpop.eup %7565  ;;  %v10542_v3 = vadd.f32 %v2950_v13, %v2790_v38 }
 0x2b4   :  { %4034 = vmatmul.f32.gmra.mxu2 %v14579_v20  ;;  %14585 = vst [vmem:[#allocation38_spill] sm:$0xff] %v10524_v37  ;;  %v2794_v17 = vadd.f32 %v2793_v48, %v14594_v52  ;;  %v14599_v37 = vld [vmem:[#allocation16_spill] sm:$0xff]  ;;  %v14601_v48 = vld [vmem:[#allocation154_spill] sm:$0xff] }
 0x2b5   :  { %14591 = vst [vmem:[#allocation32_spill] sm:$0xff] %v10532_v6  ;;  %v1366_v8 = vadd.f32 %v10532_v6, %v1365_v5  ;;  %v14600_v5 = vld [vmem:[#allocation9_spill] sm:$0xff]  ;;  %v14602_v6 = vld [vmem:[#allocation142_spill] sm:$0xff] }
 0x2b6   :  { %4195 = vmatmul.f32.gmra.mxu3 %v14579_v20  ;;  %v1329_v20 = vadd.f32 %v10528_v54, %v1328_v16  ;;  %14593 = vst [vmem:[#allocation127_spill] sm:$0xff] %v10536_v23  ;;  %v10555_v7 = vadd.f32 %v14371_v58, %v14602_v6 }
 0x2b7   :  { %14596 = vst [vmem:[#allocation44_spill] sm:$0xff] %v10542_v3 }
 0x2b8   :  { %v1330_v16 = vadd.f32 %v10536_v23, %v1329_v20  ;;  %14603 = vst [vmem:[#allocation28_spill] sm:$0xff] %v10555_v7  ;;  %v14622_v7 = vld [vmem:[#allocation96_spill] sm:$0xff] }
 0x2b9   :  { %3603 = vmatmul.f32.gmra.mxu0 %v14587_v47  ;;  %v10540_v47 = vpop.eup %7567  ;;  %v3223_v21 = vpop.f32.mrf.mxu2 }
 0x2ba   :  { %3805 = vmatmul.f32.gmra.mxu1 %v14590_v42  ;;  %14595 = vst [vmem:[#allocation36_spill] sm:$0xff] %v10540_v47  ;;  %v3464_v42 = vpop.f32.mrf.mxu3  ;;  %v1367_v54 = vadd.f32 %v10540_v47, %v1366_v8  ;;  %v1331_v52 = vadd.f32 %v14601_v48, %v1330_v16  ;;  %v2954_v13 = vpop.f32.mrf.mxu1  ;;  %v14608_v16 = vld [vmem:[#allocation135_spill] sm:$0xff]  ;;  %v14609_v47 = vld [vmem:[#allocation94_spill] sm:$0xff] }
 0x2bb   :  { %v10545_v26 = vadd.f32 %v3464_v42, %v3223_v21  ;;  %v2797_v38 = vpop.f32.mrf.mxu0  ;;  %v14605_v42 = vld [vmem:[#allocation224_spill] sm:$0xff]  ;;  %v2955_v23 = vadd.f32 %v2954_v13, %v2794_v17 }
 0x2bc   :  { %4038 = vmatmul.f32.gmra.mxu2 %v14592_v61  ;;  %v2798_v20 = vadd.f32 %v2797_v38, %v14605_v42  ;;  %v1332_v48 = vadd.f32 %v14608_v16, %v1331_v52  ;;  %v14612_v17 = vld [vmem:[#allocation92_spill] sm:$0xff]  ;;  %v14613_v38 = vld [vmem:[#allocation118_spill] sm:$0xff] }
 0x2bd   :  { %14597 = vst [vmem:[#allocation31_spill] sm:$0xff] %v10545_v26  ;;  %v14614_v42 = vld [vmem:[#allocation228_spill] sm:$0xff] }
 0x2be   :  { %4199 = vmatmul.f32.gmra.mxu3 %v14592_v61  ;;  %v14604_v61 = vld [vmem:[#allocation239_spill] sm:$0xff]  ;;  %v1333_v13 = vadd.f32 %v14613_v38, %v1332_v48  ;;  %v14621_v38 = vld [vmem:[#allocation97_spill] sm:$0xff] }
 0x2bf   :  { %v1368_v21 = vadd.f32 %v14604_v61, %v1367_v54  ;;  %v14611_v61 = vld [vmem:[#allocation15_spill] sm:$0xff]  ;;  %v14618_v54 = vld [vmem:[#allocation73_spill] sm:$0xff] }
 0x2c1   :  { %3608 = vmatmul.f32.gmra.mxu0 %v14598_v43  ;;  %v3231_v43 = vpop.f32.mrf.mxu2  ;;  %v1369_v25 = vadd.f32 %v14610_v28, %v1368_v21  ;;  %v14619_v28 = vld [vmem:[#allocation99_spill] sm:$0xff] }
 0x2c2   :  { %3811 = vmatmul.f32.gmra.mxu1 %v14599_v37  ;;  %v3468_v26 = vpop.f32.mrf.mxu3  ;;  %v10560_v37 = vmul.f32 2.0, %v2955_v23  ;;  %v2958_v23 = vpop.f32.mrf.mxu1 }
 0x2c3   :  { %v10562_v8 = vadd.f32 %v3468_v26, %v3231_v43  ;;  %v1370_v26 = vadd.f32 %v14614_v42, %v1369_v25  ;;  %v14615_v43 = vld [vmem:[#allocation21_spill] sm:$0xff]  ;;  %v10574_v52 = vadd.f32 %v2958_v23, %v2798_v20  ;;  %v14623_v25 = vld [vmem:[#allocation226_spill] sm:$0xff] }
 0x2c4   :  { %4042 = vmatmul.f32.gmra.mxu2 %v14600_v5  ;;  %14606 = vst [vmem:[#allocation41_spill] sm:$0xff] %v10560_v37  ;;  %v14620_v37 = vld [vmem:[#allocation47_spill] sm:$0xff] }
 0x2c5   :  { %14607 = vst [vmem:[#allocation190_spill] sm:$0xff] %v10562_v8  ;;  %v1371_v48 = vadd.f32 %v14620_v37, %v1370_v26  ;;  %v14628_v26 = vld [vmem:[#allocation133_spill] sm:$0xff]  ;;  %v14629_v37 = vld [vmem:[#allocation104_spill] sm:$0xff] }
 0x2c6   :  { %4203 = vmatmul.f32.gmra.mxu3 %v14600_v5  ;;  %v2801_v5 = vpop.f32.mrf.mxu0  ;;  %14616 = vst [vmem:[#allocation196_spill] sm:$0xff] %v10574_v52  ;;  %v14632_v52 = vld [vmem:[#allocation101_spill] sm:$0xff] }
 0x2c7   :  { %v2802_v8 = vadd.f32 %v2801_v5, %v14615_v43  ;;  %v14624_v43 = vld [vmem:[#allocation227_spill] sm:$0xff] }
 0x2c8   :  { %v1372_v42 = vadd.f32 %v14624_v43, %v1371_v48  ;;  %v14633_v48 = vld [vmem:[#allocation65_spill] sm:$0xff] }
 0x2c9   :  { %3613 = vmatmul.f32.gmra.mxu0 %v14609_v47  ;;  %v3239_v47 = vpop.f32.mrf.mxu2 }
 0x2ca   :  { %3817 = vmatmul.f32.gmra.mxu1 %v14611_v61  ;;  %v3472_v16 = vpop.f32.mrf.mxu3  ;;  %v1334_v61 = vadd.f32 %v14618_v54, %v1333_v13  ;;  %v2962_v23 = vpop.f32.mrf.mxu1  ;;  %v14630_v54 = vld [vmem:[#allocation229_spill] sm:$0xff] }
 0x2cb   :  { %v10577_v21 = vadd.f32 %v3472_v16, %v3239_v47  ;;  %v10587_v16 = vadd.f32 %v2962_v23, %v2802_v8  ;;  %v14634_v23 = vld [vmem:[#allocation192_spill] sm:$0xff] }
 0x2cc   :  { %4046 = vmatmul.f32.gmra.mxu2 %v14612_v17  ;;  %v1335_v5 = vadd.f32 %v14623_v25, %v1334_v61  ;;  %v1373_v61 = vadd.f32 %v14630_v54, %v1372_v42  ;;  %v14638_v42 = vld [vmem:[#allocation150_spill] sm:$0xff] }
 0x2cd   :  { %14617 = vst [vmem:[#allocation151_spill] sm:$0xff] %v10577_v21  ;;  %v14631_v21 = vld [vmem:[#allocation103_spill] sm:$0xff]  ;;  %v14639_v54 = vld [vmem:[#allocation110_spill] sm:$0xff] }
 0x2ce   :  { %4207 = vmatmul.f32.gmra.mxu3 %v14612_v17  ;;  %v2805_v20 = vpop.f32.mrf.mxu0  ;;  %14626 = vst [vmem:[#allocation23_spill] sm:$0xff] %v10587_v16  ;;  %v1374_v16 = vadd.f32 %v14634_v23, %v1373_v61 }
 0x2cf   :  { %v2806_v17 = vadd.f32 %v2805_v20, %v14625_v11 }
 0x2d1   :  { %3618 = vmatmul.f32.gmra.mxu0 %v14619_v28  ;;  %v3247_v47 = vpop.f32.mrf.mxu2 }
 0x2d2   :  { %3823 = vmatmul.f32.gmra.mxu1 %v14621_v38  ;;  %v3476_v13 = vpop.f32.mrf.mxu3  ;;  %v1336_v38 = vadd.f32 %v14628_v26, %v1335_v5  ;;  %v2966_v8 = vpop.f32.mrf.mxu1  ;;  %v14640_v26 = vld [vmem:[#allocation102_spill] sm:$0xff] }
 0x2d3   :  { %v10590_v28 = vadd.f32 %v3476_v13, %v3247_v47  ;;  %v10599_v2 = vadd.f32 %v2966_v8, %v2806_v17  ;;  %v14643_v17 = vld [vmem:[#allocation25_spill] sm:$0xff] }
 0x2d4   :  { %4050 = vmatmul.f32.gmra.mxu2 %v14622_v7  ;;  %v1337_v11 = vadd.f32 %v14633_v48, %v1336_v38  ;;  %v1375_v38 = vadd.f32 %v14640_v26, %v1374_v16  ;;  %v14641_v48 = vld [vmem:[#allocation109_spill] sm:$0xff]  ;;  %v14647_v26 = vld [vmem:[#allocation120_spill] sm:$0xff] }
 0x2d5   :  { %14627 = vst [vmem:[#allocation200_spill] sm:$0xff] %v10590_v28  ;;  %v14642_v28 = vld [vmem:[#allocation107_spill] sm:$0xff] }
 0x2d6   :  { %4211 = vmatmul.f32.gmra.mxu3 %v14622_v7  ;;  %v3534_v20 = vpop.f32.mrf.mxu0  ;;  %14635 = vst [vmem:[#allocation33_spill] sm:$0xff] %v10599_v2  ;;  %v14636_v7 = vld [vmem:[#allocation197_spill] sm:$0xff] }
 0x2d7   :  { %v3535_v47 = vadd.f32 %v3534_v20, %v14636_v7  ;;  %v14644_v7 = vld [vmem:[#allocation222_spill] sm:$0xff]  ;;  %v14645_v2 = vld [vmem:[#allocation105_spill] sm:$0xff] }
 0x2d8   :  { %v1376_v23 = vadd.f32 %v14644_v7, %v1375_v38  ;;  %v14652_v38 = vld [vmem:[#allocation37_spill] sm:$0xff] }
 0x2d9   :  { %3623 = vmatmul.f32.gmra.mxu0 %v14629_v37  ;;  %v3255_v13 = vpop.f32.mrf.mxu2 }
 0x2da   :  { %3829 = vmatmul.f32.gmra.mxu1 %v14631_v21  ;;  %v3480_v5 = vpop.f32.mrf.mxu3  ;;  %v1338_v21 = vadd.f32 %v14638_v42, %v1337_v11  ;;  %v3728_v20 = vpop.f32.mrf.mxu1 }
 0x2db   :  { %v10603_v37 = vadd.f32 %v3480_v5, %v3255_v13  ;;  %v3729_v13 = vadd.f32 %v3728_v20, %v3535_v47  ;;  %v14653_v20 = vld [vmem:[#allocation210_spill] sm:$0xff] }
 0x2dc   :  { %4054 = vmatmul.f32.gmra.mxu2 %v14632_v52  ;;  %v1339_v61 = vadd.f32 %v14643_v17, %v1338_v21  ;;  %v14650_v21 = vld [vmem:[#allocation119_spill] sm:$0xff]  ;;  %v14651_v17 = vld [vmem:[#allocation117_spill] sm:$0xff] }
 0x2dd   :  { %14637 = vst [vmem:[#allocation20_spill] sm:$0xff] %v10603_v37 }
 0x2de   :  { %4215 = vmatmul.f32.gmra.mxu3 %v14632_v52  ;;  %v3539_v8 = vpop.f32.mrf.mxu0 }
 0x2df   :  { %v3540_v52 = vadd.f32 %v3539_v8, %v14645_v2 }
 0x2e1   :  { %3628 = vmatmul.f32.gmra.mxu0 %v14639_v54  ;;  %v3983_v5 = vpop.f32.mrf.mxu2  ;;  %v14646_v54 = vld [vmem:[#allocation217_spill] sm:$0xff] }
 0x2e2   :  { %3835 = vmatmul.f32.gmra.mxu1 %v14641_v48  ;;  %v3984_v11 = vadd.f32 %v3983_v5, %v3729_v13  ;;  %v1340_v42 = vadd.f32 %v14646_v54, %v1339_v61  ;;  %v4144_v16 = vpop.f32.mrf.mxu3  ;;  %v14648_v48 = vld [vmem:[#allocation218_spill] sm:$0xff]  ;;  %v3734_v8 = vpop.f32.mrf.mxu1  ;;  %v14654_v13 = vld [vmem:[#allocation231_spill] sm:$0xff] }
 0x2e3   :  { %v1377_v37 = vadd.f32 %v14648_v48, %v1376_v23  ;;  %v3735_v61 = vadd.f32 %v3734_v8, %v3540_v52  ;;  %v14655_v23 = vld [vmem:[#allocation221_spill] sm:$0xff]  ;;  %v14656_v48 = vld [vmem:[#allocation128_spill] sm:$0xff]  ;;  %v14659_v52 = vld [vmem:[#allocation95_spill] sm:$0xff] }
 0x2e4   :  { %4058 = vmatmul.f32.gmra.mxu2 %v14642_v28  ;;  %v10617_v29 = vadd.f32 %v4144_v16, %v3984_v11  ;;  %v1341_v2 = vadd.f32 %v14652_v38, %v1340_v42  ;;  %v7925_v42 = vld [vmem:[%s13424_s2] sm:$0x3] }
 0x2e6   :  { %4219 = vmatmul.f32.gmra.mxu3 %v14642_v28  ;;  %14649 = vst [vmem:[#allocation27_spill] sm:$0xff] %v10617_v29  ;;  %v3544_v47 = vpop.f32.mrf.mxu0  ;;  %v1378_v28 = vadd.f32 %v14653_v20, %v1377_v37  ;;  %v1342_v11 = vadd.f32 %v14655_v23, %v1341_v2  ;;  %v14657_v29 = vld [vmem:[#allocation223_spill] sm:$0xff]  ;;  %v14662_v2 = vld [vmem:[#allocation124_spill] sm:$0xff]  ;;  %v14664_v23 = vld [vmem:[#allocation18_spill] sm:$0xff] }
 0x2e7   :  { %v3545_v5 = vadd.f32 %v3544_v47, %v14654_v13  ;;  %v14658_v47 = vld [vmem:[#allocation126_spill] sm:$0xff] }
 0x2e8   :  { %v1379_v37 = vadd.f32 %v14657_v29, %v1378_v28 }
 0x2e9   :  { %3633 = vmatmul.f32.gmra.mxu0 %v14647_v26  ;;  %v3987_v7 = vpop.f32.mrf.mxu2 }
 0x2ea   :  { %3841 = vmatmul.f32.gmra.mxu1 %v14650_v21  ;;  %v3988_v26 = vadd.f32 %v3987_v7, %v3735_v61  ;;  %v4148_v16 = vpop.f32.mrf.mxu3  ;;  %v10630_v21 = vperm.slane %v7925_v42, 1  ;;  %v3740_v61 = vpop.f32.mrf.mxu1  ;;  %v1380_v42 = vadd.f32 %v14664_v23, %v1379_v37  ;;  %v14670_v37 = vld [vmem:[#allocation100_spill] sm:$0xff] }
 0x2ec   :  { %4062 = vmatmul.f32.gmra.mxu2 %v14651_v17  ;;  %v4149_v33 = vadd.f32 %v4148_v16, %v3988_v26  ;;  %v14665_v26 = vld [vmem:[#allocation236_spill] sm:$0xff]  ;;  %v10653_v28 = vadd.f32 %v10630_v21, %v14670_v37 }
 0x2ee   :  { %4223 = vmatmul.f32.gmra.mxu3 %v14651_v17  ;;  %v10636_v17 = vadd.f32 %v10630_v21, %v14659_v52  ;;  %v10638_v7 = vmul.f32 2.0, %v4149_v33  ;;  %v3549_v13 = vpop.f32.mrf.mxu0  ;;  %v14666_v33 = vld [vmem:[#allocation35_spill] sm:$0xff]  ;;  %14671 = vst [vmem:[#allocation203_spill] sm:$0xff] %v10653_v28 }
 0x2ef   :  { %v3550_v16 = vadd.f32 %v3549_v13, %v14665_v26 }
 0x2f0   :  { %14660 = vst [vmem:[#allocation164_spill] sm:$0xff] %v10636_v17  ;;  %v14678_v17 = vld [vmem:[#allocation241_spill] sm:$0xff] }
 0x2f1   :  { %3638 = vmatmul.f32.gmra.mxu0 %v14656_v48  ;;  %14661 = vst [vmem:[#allocation51_spill] sm:$0xff] %v10638_v7  ;;  %v14663_v48 = vld [vmem:[#allocation43_spill] sm:$0xff]  ;;  %v3991_v29 = vpop.f32.mrf.mxu2 }
 0x2f2   :  { %3847 = vmatmul.f32.gmra.mxu1 %v14658_v47  ;;  %v1343_v8 = vadd.f32 %v14663_v48, %v1342_v11  ;;  %v3741_v47 = vadd.f32 %v3740_v61, %v3545_v5  ;;  %v4152_v3 = vpop.f32.mrf.mxu3  ;;  %v14668_v11 = vld [vmem:[#allocation213_spill] sm:$0xff]  ;;  %v3746_v61 = vpop.f32.mrf.mxu1 }
 0x2f3   :  { %v1381_v18 = vadd.f32 %v14668_v11, %v1380_v42  ;;  %v14673_v5 = vld [vmem:[#allocation137_spill] sm:$0xff]  ;;  %v3747_v26 = vadd.f32 %v3746_v61, %v3550_v16  ;;  %v14675_v11 = vld [vmem:[#allocation146_spill] sm:$0xff] }
 0x2f4   :  { %4066 = vmatmul.f32.gmra.mxu2 %v14662_v2  ;;  %v3992_v52 = vadd.f32 %v3991_v29, %v3741_v47  ;;  %v1344_v27 = vadd.f32 %v14666_v33, %v1343_v8  ;;  %v14676_v33 = vld [vmem:[#allocation106_spill] sm:$0xff] }
 0x2f5   :  { %v1382_v8 = vrot.slane %v1381_v18, 4  ;;  %v10665_v7 = vadd.f32 %v10630_v21, %v14676_v33  ;;  %v14680_v16 = vld [vmem:[#allocation134_spill] sm:$0xff] }
 0x2f6   :  { %4227 = vmatmul.f32.gmra.mxu3 %v14662_v2  ;;  %v4153_v10 = vadd.f32 %v4152_v3, %v3992_v52  ;;  %v1345_v2 = vrot.slane %v1344_v27, 4  ;;  %v3554_v29 = vpop.f32.mrf.mxu0  ;;  %v14674_v52 = vld [vmem:[#allocation139_spill] sm:$0xff]  ;;  %v14683_v33 = vld [vmem:[#allocation138_spill] sm:$0xff] }
 0x2f7   :  { %14677 = vst [vmem:[#allocation202_spill] sm:$0xff] %v10665_v7  ;;  %v3555_v9 = vadd.f32 %v3554_v29, %v14678_v17 }
 0x2f8   :  { %v10655_v13 = vmul.f32 2.0, %v4153_v10  ;;  %v1346_v3 = vadd.f32 %v1345_v2, %v1344_v27  ;;  %v1383_v10 = vadd.f32 %v1382_v8, %v1381_v18  ;;  %v14681_v2 = vld [vmem:[#allocation115_spill] sm:$0xff] }
 0x2f9   :  { %3643 = vmatmul.f32.gmra.mxu0 %v14667_v55  ;;  %v3995_v42 = vpop.f32.mrf.mxu2 }
 0x2fa   :  { %3853 = vmatmul.f32.gmra.mxu1 %v14669_v44  ;;  %14672 = vst [vmem:[#allocation194_spill] sm:$0xff] %v10655_v13  ;;  %v3996_v44 = vadd.f32 %v3995_v42, %v3747_v26  ;;  %v4156_v47 = vpop.f32.mrf.mxu3  ;;  %v3752_v27 = vpop.f32.mrf.mxu1  ;;  %v14682_v26 = vld [vmem:[#allocation225_spill] sm:$0xff]  ;;  %v1384_v18 = vrot.slane %v1383_v10, 2 }
 0x2fb   :  { %v2682_v42 = vadd.f32 %v14682_v26, %v14681_v2  ;;  %v3753_v8 = vadd.f32 %v3752_v27, %v3555_v9  ;;  %v14690_v27 = vld [vmem:[#allocation114_spill] sm:$0xff] }
 0x2fc   :  { %4070 = vmatmul.f32.gmra.mxu2 %v14673_v5  ;;  %v4157_v37 = vadd.f32 %v4156_v47, %v3996_v44  ;;  %v1385_v2 = vadd.f32 %v1384_v18, %v1383_v10  ;;  %v14694_v10 = vld [vmem:[#allocation163_spill] sm:$0xff] }
 0x2fd   :  { %v2843_v17 = vadd.f32 %v14683_v33, %v2682_v42 }
 0x2fe   :  { %4231 = vmatmul.f32.gmra.mxu3 %v14673_v5  ;;  %v10668_v55 = vmul.f32 2.0, %v4157_v37  ;;  %v1347_v5 = vrot.slane %v1346_v3, 2  ;;  %v3559_v61 = vpop.f32.mrf.mxu0  ;;  %v14685_v37 = vld [vmem:[#allocation242_spill] sm:$0xff] }
 0x2ff   :  { %v4469_v42 = vmul.f32 2.0, %v2843_v17 }
 0x300   :  { %14679 = vst [vmem:[#allocation195_spill] sm:$0xff] %v10668_v55  ;;  %v1348_v47 = vadd.f32 %v1347_v5, %v1346_v3  ;;  %v14691_v3 = vld [vmem:[#allocation129_spill] sm:$0xff]  ;;  %v14692_v5 = vld [vmem:[#allocation68_spill] sm:$0xff] }
 0x301   :  { %3648 = vmatmul.f32.gmra.mxu0 %v14674_v52  ;;  %v3999_v44 = vpop.f32.mrf.mxu2  ;;  %v14684_v52 = vld [vmem:[#allocation240_spill] sm:$0xff]  ;;  %v10694_v33 = vadd.f32 %v10630_v21, %v14692_v5 }
 0x302   :  { %3859 = vmatmul.f32.gmra.mxu1 %v14675_v11  ;;  %v4000_v29 = vadd.f32 %v3999_v44, %v3753_v8  ;;  %v14686_v13 = vsub.f32 %v14684_v52, %v14685_v37  ;;  %v4160_v43 = vpop.f32.mrf.mxu3  ;;  %v14689_v11 = vld [vmem:[#allocation91_spill] sm:$0xff]  ;;  %v1349_v44 = vrot.slane %v1348_v47, 1  ;;  %v1386_v52 = vrot.slane %v1385_v2, 1 }
 0x303   :  { %v4405_v9 = vadd.f32 %v14371_v58, %v14689_v11  ;;  %14695 = vst [vmem:[#allocation207_spill] sm:$0xff] %v10694_v33  ;;  %v14702_v33 = vld [vmem:[#allocation93_spill] sm:$0xff] }
 0x304   :  { %4074 = vmatmul.f32.gmra.mxu2 %v14680_v16  ;;  %v4605_v28 = vmax.f32 %v14686_v13, 0.0  ;;  %v4161_v26 = vadd.f32 %v4160_v43, %v4000_v29  ;;  %v10689_v13 = vadd.f32 %v14371_v58, %v14692_v5  ;;  %v3560_v43 = vadd.f32 %v3559_v61, %v14694_v10  ;;  %v14696_v29 = vld [vmem:[#allocation89_spill] sm:$0xff] }
 0x305   :  { %v10698_v17 = vadd.f32 %v14371_v58, %v14696_v29  ;;  %v10715_v55 = vadd.f32 %v14371_v58, %v14702_v33 }
 0x306   :  { %4235 = vmatmul.f32.gmra.mxu3 %v14680_v16  ;;  %v4414_v16 = vadd.f32 %v10630_v21, %v14690_v27  ;;  %v4478_v8 = vmul.f32 2.0, %v4161_v26  ;;  %14693 = vst [vmem:[#allocation206_spill] sm:$0xff] %v10689_v13  ;;  %v3564_v18 = vpop.f32.mrf.mxu0  ;;  %v10702_v26 = vadd.f32 %v10630_v21, %v14696_v29  ;;  %v14699_v27 = vld [vmem:[#allocation88_spill] sm:$0xff]  ;;  %v14705_v29 = vld [vmem:[#allocation123_spill] sm:$0xff] }
 0x307   :  { %14697 = vst [vmem:[#allocation22_spill] sm:$0xff] %v10698_v17  ;;  %v10710_v61 = vadd.f32 %v10630_v21, %v14699_v27  ;;  %v10722_v17 = vadd.f32 %v10630_v21, %v14702_v33 }
 0x308   :  { %v4542_v37 = vsub.f32 %v4414_v16, %v4478_v8  ;;  %14698 = vst [vmem:[#allocation17_spill] sm:$0xff] %v10702_v26  ;;  %v4533_v16 = vsub.f32 %v4405_v9, %v4469_v42  ;;  %v14704_v8 = vld [vmem:[#allocation193_spill] sm:$0xff]  ;;  %v1387_v9 = vadd.f32 %v1386_v52, %v1385_v2 }
 0x309   :  { %3653 = vmatmul.f32.gmra.mxu0 %v14687_v15  ;;  %v4669_v15 = vmul.f32 -0.5, %v4605_v28  ;;  %v10706_v28 = vadd.f32 %v14371_v58, %v14699_v27  ;;  %14701 = vst [vmem:[#allocation173_spill] sm:$0xff] %v10710_v61  ;;  %v4003_v10 = vpop.f32.mrf.mxu2  ;;  %v14706_v26 = vsub.f32 %v14704_v8, %v14705_v29  ;;  %v1350_v27 = vadd.f32 %v1349_v44, %v1348_v47  ;;  %v14711_v42 = vld [vmem:[#allocation145_spill] sm:$0xff]  ;;  %v14714_v29 = vld [vmem:[#allocation166_spill] sm:$0xff] }
 0x30a   :  { %3865 = vmatmul.f32.gmra.mxu1 %v14688_v63  ;;  %v3758_v63 = vpop.f32.mrf.mxu1  ;;  %14703 = vst [vmem:[#allocation12_spill] sm:$0xff] %v10715_v55  ;;  %v4606_v13 = vmax.f32 %v4542_v37, 0.0  ;;  %v14713_v8 = vsub.f32 %v14711_v42, %v14712_v4  ;;  %v14716_v44 = vld [vmem:[#allocation98_spill] sm:$0xff]  ;;  %v4597_v2 = vmax.f32 %v4533_v16, 0.0  ;;  %v14719_v4 = vld [vmem:[#allocation171_spill] sm:$0xff]  ;;  %v10758_v16 = vadd.f32 %v10630_v21, %v14689_v11 }
 0x30b   :  { %14700 = vst [vmem:[#allocation26_spill] sm:$0xff] %v10706_v28  ;;  %v3759_v5 = vadd.f32 %v3758_v63, %v3560_v43  ;;  %v4599_v7 = vmax.f32 %v14706_v26, 0.0  ;;  %v4741_v61 = vmul.f32 1.442695, %v4669_v15  ;;  %v4164_v63 = vpop.f32.mrf.mxu3  ;;  %v10739_v15 = vadd.f32 %v14371_v58, %v14716_v44 }
 0x30c   :  { %4078 = vmatmul.f32.gmra.mxu2 %v14691_v3  ;;  %14707 = vst [vmem:[#allocation214_spill] sm:$0xff] %v10722_v17  ;;  %v4607_v26 = vmax.f32 %v14713_v8, 0.0  ;;  %v4670_v37 = vmul.f32 -0.5, %v4606_v13  ;;  %v3565_v42 = vadd.f32 %v3564_v18, %v14719_v4  ;;  %v14720_v13 = vld [vmem:[#allocation85_spill] sm:$0xff]  ;;  %v10745_v8 = vadd.f32 1e-20, %v1350_v27 }
 0x30d   :  { %v4004_v43 = vadd.f32 %v4003_v10, %v3759_v5  ;;  %14717 = vst [vmem:[#allocation208_spill] sm:$0xff] %v10739_v15  ;;  %v4663_v52 = vmul.f32 -0.5, %v4599_v7  ;;  %7569 = vpow2.f32 %v4741_v61  ;;  %v10750_v51 = vadd.f32 1e-20, %v1387_v9  ;;  %v14726_v27 = vld [vmem:[#allocation235_spill] sm:$0xff]  ;;  %v14729_v9 = vld [vmem:[#allocation30_spill] sm:$0xff] }
 0x30e   :  { %4239 = vmatmul.f32.gmra.mxu3 %v14691_v3  ;;  %v14709_v3 = vld [vmem:[#allocation90_spill] sm:$0xff]  ;;  %v4743_v10 = vmul.f32 1.442695, %v4670_v37  ;;  %v3569_v15 = vpop.f32.mrf.mxu0  ;;  %v10754_v18 = vadd.f32 %v10630_v21, %v14716_v44  ;;  %14725 = vst [vmem:[#allocation209_spill] sm:$0xff] %v10758_v16  ;;  %v4661_v44 = vmul.f32 -0.5, %v4597_v2  ;;  %v14733_v4 = vld [vmem:[#allocation244_spill] sm:$0xff]  ;;  %vm1396_vm1 = vweird.f32 %v10745_v8 }
 0x30f   :  { %v10727_v25 = vadd.f32 %v14371_v58, %v14709_v3  ;;  %v10735_v47 = vadd.f32 %v10630_v21, %v14709_v3  ;;  %v4165_v5 = vadd.f32 %v4164_v63, %v4004_v43  ;;  %v14722_v3 = vld [vmem:[#allocation232_spill] sm:$0xff]  ;;  %v4671_v43 = vmul.f32 -0.5, %v4607_v26  ;;  %v14727_v63 = vld [vmem:[#allocation237_spill] sm:$0xff] }
 0x310   :  { %7571 = vpow2.f32 %v4743_v10  ;;  %14724 = vst [vmem:[#allocation13_spill] sm:$0xff] %v10754_v18  ;;  %v14728_v37 = vsub.f32 %v14726_v27, %v14727_v63  ;;  %v10766_v26 = vadd.f32 %v14371_v58, %v14729_v9  ;;  %v4729_v11 = vmul.f32 1.442695, %v4663_v52  ;;  %v14732_v10 = vld [vmem:[#allocation155_spill] sm:$0xff]  ;;  %v10778_v63 = vpop.xlane.xlu2 %4373  ;;  %v14736_v2 = vld [vmem:[#allocation168_spill] sm:$0xff] }
 0x311   :  { %3658 = vmatmul.f32.gmra.mxu0 %v14708_v12  ;;  %14710 = vst [vmem:[#allocation215_spill] sm:$0xff] %v10727_v25  ;;  %v14718_v12 = vld [vmem:[#allocation122_spill] sm:$0xff]  ;;  %v4480_v25 = vmul.f32 2.0, %v4165_v5  ;;  %7573 = vrsqrt.f32 %v10745_v8  ;;  %v4745_v27 = vmul.f32 1.442695, %v4671_v43  ;;  %v14738_v52 = vld [vmem:[#allocation116_spill] sm:$0xff]  ;;  %vm1406_vm3 = vweird.f32 %v10750_v51 }
 0x312   :  { %3871 = vmatmul.f32.gmra.mxu1 %v14714_v29  ;;  %14715 = vst [vmem:[#allocation212_spill] sm:$0xff] %v10735_v47  ;;  %v4416_v33 = vadd.f32 %v10630_v21, %v14718_v12  ;;  %v14721_v29 = vld [vmem:[#allocation230_spill] sm:$0xff]  ;;  %v3764_v46 = vpop.f32.mrf.mxu1  ;;  %v4603_v61 = vmax.f32 %v14728_v37, 0.0  ;;  %v4007_v12 = vpop.f32.mrf.mxu2  ;;  %7575 = vrsqrt.f32 %v10750_v51  ;;  %v14743_v18 = vld [vmem:[#allocation83_spill] sm:$0xff] }
 0x313   :  { %v14723_v47 = vsub.f32 %v14721_v29, %v14722_v3  ;;  %v3765_v7 = vadd.f32 %v3764_v46, %v3565_v42  ;;  %14730 = vst [vmem:[#allocation19_spill] sm:$0xff] %v10766_v26  ;;  %v10770_v46 = vadd.f32 %v10630_v21, %v14729_v9  ;;  %v14734_v42 = vsub.f32 %v14732_v10, %v14733_v4  ;;  %v4168_v29 = vpop.f32.mrf.mxu3  ;;  %v14740_v9 = vld [vmem:[#allocation131_spill] sm:$0xff]  ;;  %v913_v4 = vpop.xlane.xlu1 %912 }
 0x314   :  { %4082 = vmatmul.f32.gmra.mxu2 %v14720_v13  ;;  %v4667_v10 = vmul.f32 -0.5, %v4603_v61  ;;  %v10791_v43 = vadd.f32 1e-20, %v913_v4  ;;  %7577 = vpow2.f32 %v4729_v11 }
 0x315   :  { %v4601_v17 = vmax.f32 %v14723_v47, 0.0  ;;  %v4544_v47 = vsub.f32 %v4416_v33, %v4480_v25  ;;  %14731 = vst [vmem:[#allocation10_spill] sm:$0xff] %v10770_v46  ;;  %v4008_v5 = vadd.f32 %v4007_v12, %v3765_v7  ;;  %v4609_v25 = vmax.f32 %v14734_v42, 0.0  ;;  %v10781_v7 = vpop.eup %7569 }
 0x316   :  { %4243 = vmatmul.f32.gmra.mxu3 %v14720_v13  ;;  %v14735_v13 = vld [vmem:[#allocation86_spill] sm:$0xff]  ;;  %14737 = vst [vmem:[#allocation219_spill] sm:$0xff] %v10781_v7  ;;  %v10785_v12 = vadd.f32 %v14371_v58, %v14738_v52  ;;  %7579 = vpow2.f32 %v4745_v27  ;;  %v14747_v27 = vld [vmem:[#allocation245_spill] sm:$0xff]  ;;  %vm1150_vm6 = vweird.f32 %v10791_v43 }
 0x317   :  { %v4608_v33 = vmax.f32 %v4544_v47, 0.0  ;;  %v4665_v3 = vmul.f32 -0.5, %v4601_v17  ;;  %v4169_v37 = vadd.f32 %v4168_v29, %v4008_v5  ;;  %v4418_v47 = vadd.f32 %v10630_v21, %v14740_v9  ;;  %v14742_v5 = vld [vmem:[#allocation176_spill] sm:$0xff] }
 0x318   :  { %14739 = vst [vmem:[#allocation11_spill] sm:$0xff] %v10785_v12  ;;  %v4725_v17 = vmul.f32 1.442695, %v4661_v44  ;;  %v3570_v29 = vadd.f32 %v3569_v15, %v14742_v5  ;;  %v4673_v46 = vmul.f32 -0.5, %v4609_v25  ;;  %v3574_v12 = vpop.f32.mrf.mxu0  ;;  %v10801_v15 = vadd.f32 %v10630_v21, %v14738_v52 }
 0x319   :  { %3663 = vmatmul.f32.gmra.mxu0 %v14735_v13  ;;  %v4672_v42 = vmul.f32 -0.5, %v4608_v33  ;;  %v10789_v13 = vpop.eup %7571  ;;  %v4733_v9 = vmul.f32 1.442695, %v4665_v3  ;;  %v4737_v25 = vmul.f32 1.442695, %v4667_v10  ;;  %v14746_v3 = vld [vmem:[#allocation165_spill] sm:$0xff] }
 0x31a   :  { %3877 = vmatmul.f32.gmra.mxu1 %v14736_v2  ;;  %14741 = vst [vmem:[#allocation16_spill] sm:$0xff] %v10789_v13  ;;  %v4482_v2 = vmul.f32 2.0, %v4169_v37  ;;  %v3770_v26 = vpop.f32.mrf.mxu1  ;;  %v4865_v61 = vadd.f32 %v10789_v13, %v10781_v7  ;;  %v10797_v44 = vpop.eup %7573  ;;  %v14745_v37 = vld [vmem:[#allocation143_spill] sm:$0xff]  ;;  %v14750_v10 = vld [vmem:[#allocation153_spill] sm:$0xff] }
 0x31b   :  { %v4747_v16 = vmul.f32 1.442695, %v4672_v42  ;;  %v3771_v56 = vadd.f32 %v3770_v26, %v3570_v29  ;;  %14744 = vst [vmem:[#allocation9_spill] sm:$0xff] %v10801_v15  ;;  %v4420_v11 = vadd.f32 %v10630_v21, %v14745_v37  ;;  %v4011_v4 = vpop.f32.mrf.mxu2  ;;  %v10806_v42 = vpop.eup %7575  ;;  %v14748_v26 = vsub.f32 %v14746_v3, %v14747_v27  ;;  %v14755_v3 = vld [vmem:[#allocation161_spill] sm:$0xff]  ;;  %v14761_v15 = vld [vmem:[#allocation178_spill] sm:$0xff] }
 0x31c   :  { %4086 = vmatmul.f32.gmra.mxu2 %v14743_v18  ;;  %v4546_v33 = vsub.f32 %v4418_v47, %v4482_v2  ;;  %4866 = vadd.xlane.f32.xlu0 %v4865_v61  ;;  %v10814_v29 = vadd.f32 %v10630_v21, %v14554_v22  ;;  %v4172_v2 = vpop.f32.mrf.mxu3  ;;  %v14751_v61 = vld [vmem:[#allocation84_spill] sm:$0xff]  ;;  %v10823_v37 = vadd.f32 %v10630_v21, %v14575_v39  ;;  %v10826_v22 = vpop.eup %7577  ;;  %vm1397_vm2 = vweird.f32 %v10797_v44 }
 0x31d   :  { %7581 = vpow2.f32 %v4747_v16  ;;  %v4611_v47 = vmax.f32 %v14748_v26, 0.0  ;;  %v4012_v52 = vadd.f32 %v4011_v4, %v3771_v56  ;;  %v10818_v16 = vadd.f32 %v10630_v21, %v14750_v10  ;;  %v14753_v4 = vld [vmem:[#allocation162_spill] sm:$0xff]  ;;  %14754 = vst [vmem:[#allocation94_spill] sm:$0xff] %v10826_v22  ;;  %vm10963_vm5 = vmor %vm1396_vm1, %vm1397_vm2 }
 0x31e   :  { %4247 = vmatmul.f32.gmra.mxu3 %v14743_v18  ;;  %7583 = vrsqrt.f32 %v10791_v43  ;;  %v4610_v5 = vmax.f32 %v4546_v33, 0.0  ;;  %14749 = vst [vmem:[#allocation142_spill] sm:$0xff] %v10814_v29  ;;  %v4749_v18 = vmul.f32 1.442695, %v4673_v46  ;;  %v10830_v27 = vadd.f32 %v10630_v21, %v14755_v3  ;;  %v14760_v3 = vld [vmem:[#allocation175_spill] sm:$0xff] }
 0x31f   :  { %7585 = vpow2.f32 %v4725_v17  ;;  %14752 = vst [vmem:[#allocation224_spill] sm:$0xff] %v10823_v37  ;;  %v4173_v56 = vadd.f32 %v4172_v2, %v4012_v52  ;;  %v14756_v17 = vld [vmem:[#allocation170_spill] sm:$0xff]  ;;  %v1391_v26 = vmul.f32 %v10797_v44, %v10745_v8  ;;  %v1401_v39 = vmul.f32 %v10806_v42, %v10750_v51  ;;  %v958_v52 = vpop.xlane.xlu2 %957  ;;  %v14762_v37 = vld [vmem:[#allocation179_spill] sm:$0xff] }
 0x320   :  { %7587 = vpow2.f32 %v4733_v9  ;;  %v4674_v33 = vmul.f32 -0.5, %v4610_v5  ;;  %v10834_v46 = vadd.f32 %v10630_v21, %v14756_v17  ;;  %v10840_v9 = vpop.eup %7579  ;;  %v4675_v5 = vmul.f32 -0.5, %v4611_v47 }
 0x321   :  { %3668 = vmatmul.f32.gmra.mxu0 %v14751_v61  ;;  %14757 = vst [vmem:[#allocation15_spill] sm:$0xff] %v10840_v9  ;;  %7589 = vpow2.f32 %v4737_v25  ;;  %v4484_v2 = vmul.f32 2.0, %v4173_v56  ;;  %v14758_v61 = vld [vmem:[#allocation39_spill] sm:$0xff]  ;;  %v10847_v17 = vadd.f32 %v10630_v21, %v14760_v3  ;;  %v10851_v13 = vadd.f32 %v10630_v21, %v14761_v15  ;;  %v3579_v25 = vpop.f32.mrf.mxu0 }
 0x322   :  { %3883 = vmatmul.f32.gmra.mxu1 %v14753_v4  ;;  %v4751_v10 = vmul.f32 1.442695, %v4674_v33  ;;  %7591 = vpow2.f32 %v4749_v18  ;;  %v3575_v29 = vadd.f32 %v3574_v12, %v14762_v37  ;;  %v3776_v47 = vpop.f32.mrf.mxu1  ;;  %v14763_v33 = vld [vmem:[#allocation181_spill] sm:$0xff]  ;;  %v10860_v55 = vadd.f32 1e-20, %v958_v52 }
 0x323   :  { %v10843_v4 = vpop.eup %7581  ;;  %v10858_v56 = vadd.f32 %v10630_v21, %v14763_v33  ;;  %v4548_v3 = vsub.f32 %v4420_v11, %v4484_v2  ;;  %v1392_v15 = vmul.f32 %v10797_v44, %v1391_v26  ;;  %v1402_v18 = vmul.f32 %v10806_v42, %v1401_v39  ;;  %v4015_v12 = vpop.f32.mrf.mxu2  ;;  %v14766_v33 = vld [vmem:[#allocation183_spill] sm:$0xff] }
 0x324   :  { %4090 = vmatmul.f32.gmra.mxu2 %v14758_v61  ;;  %14759 = vst [vmem:[#allocation92_spill] sm:$0xff] %v10843_v4  ;;  %v10854_v28 = vpop.eup %7583  ;;  %7593 = vpow2.f32 %v4751_v10  ;;  %v3777_v1 = vadd.f32 %v3776_v47, %v3575_v29  ;;  %v4868_v37 = vadd.f32 %v10843_v4, %v10840_v9  ;;  %v10873_v52 = vadd.f32 %v10630_v21, %v14766_v33  ;;  %v952_v10 = vpop.xlane.xlu1 %951  ;;  %v14767_v33 = vld [vmem:[#allocation34_spill] sm:$0xff] }
 0x325   :  { %v10862_v35 = vpop.eup %7585  ;;  %v10877_v11 = vadd.f32 %v10630_v21, %v14507_v60  ;;  %v4753_v26 = vmul.f32 1.442695, %v4675_v5  ;;  %v4612_v39 = vmax.f32 %v4548_v3, 0.0  ;;  %v1145_v2 = vmul.f32 %v10854_v28, %v10791_v43  ;;  %v4176_v4 = vpop.f32.mrf.mxu3 }
 0x326   :  { %14764 = vst [vmem:[#allocation21_spill] sm:$0xff] %v10862_v35  ;;  %4251 = vmatmul.f32.gmra.mxu3 %v14758_v61  ;;  %v10869_v54 = vpop.eup %7587  ;;  %v5301_v29 = vadd.f32 %v10862_v35, %v10826_v22  ;;  %v10883_v61 = vadd.f32 1e-20, %v952_v10  ;;  %v4016_v47 = vadd.f32 %v4015_v12, %v3777_v1  ;;  %4869 = vadd.xlane.f32.xlu2 %v4868_v37  ;;  %7595 = vrsqrt.f32 %v10860_v55  ;;  %v14771_v10 = vld [vmem:[#allocation160_spill] sm:$0xff] }
 0x327   :  { %14765 = vst [vmem:[#allocation99_spill] sm:$0xff] %v10869_v54  ;;  %v10886_v34 = vpop.eup %7589  ;;  %v10890_v60 = vadd.f32 %v10630_v21, %v14514_v31  ;;  %v10894_v5 = vadd.f32 %v10630_v21, %v14602_v6  ;;  %v4676_v3 = vmul.f32 -0.5, %v4612_v39  ;;  %v1393_v12 = vmul.f32 0.5, %v1392_v15  ;;  %v14774_v31 = vld [vmem:[#allocation172_spill] sm:$0xff]  ;;  %v14778_v39 = vld [vmem:[#allocation6_spill] sm:$0xff] }
 0x328   :  { %14768 = vst [vmem:[#allocation97_spill] sm:$0xff] %v10886_v34  ;;  %v10898_v1 = vpop.eup %7591  ;;  %v1403_v37 = vmul.f32 0.5, %v1402_v18  ;;  %v4177_v22 = vadd.f32 %v4176_v4, %v4016_v47  ;;  %7597 = vpow2.f32 %v4753_v26  ;;  %v14776_v32 = vsub.f32 %v14774_v31, %v14775_v36 }
 0x329   :  { %3673 = vmatmul.f32.gmra.mxu0 %v14767_v33  ;;  %14769 = vst [vmem:[#allocation96_spill] sm:$0xff] %v10890_v60  ;;  %v5302_v33 = vadd.f32 %v10869_v54, %v5301_v29  ;;  %v14777_v60 = vld [vmem:[#allocation182_spill] sm:$0xff]  ;;  %7599 = vrsqrt.f32 %v10883_v61  ;;  %v3584_v18 = vpop.f32.mrf.mxu0  ;;  %v10914_v26 = vadd.f32 %v10630_v21, %v14545_v0  ;;  %v10918_v36 = vadd.f32 %v10630_v21, %v14563_v50 }
 0x32a   :  { %14770 = vst [vmem:[#allocation113_spill] sm:$0xff] %v10894_v5  ;;  %3889 = vmatmul.f32.gmra.mxu1 %v14771_v10  ;;  %v10901_v35 = vpop.eup %7593  ;;  %v4613_v6 = vmax.f32 %v14776_v32, 0.0  ;;  %v4755_v5 = vmul.f32 1.442695, %v4676_v3  ;;  %v3580_v40 = vadd.f32 %v3579_v25, %v14777_v60  ;;  %v1146_v10 = vmul.f32 %v10854_v28, %v1145_v2  ;;  %v3782_v29 = vpop.f32.mrf.mxu1  ;;  %v14779_v3 = vld [vmem:[#allocation174_spill] sm:$0xff] }
 0x32b   :  { %14772 = vst [vmem:[#allocation104_spill] sm:$0xff] %v10898_v1  ;;  %v4486_v15 = vmul.f32 2.0, %v4177_v22  ;;  %v4871_v4 = vadd.f32 %v10901_v35, %v10898_v1  ;;  %v10922_v25 = vadd.f32 %v10630_v21, %v14559_v53  ;;  %v1394_v22 = vsub.f32 1.5, %v1393_v12  ;;  %v4019_v60 = vpop.f32.mrf.mxu2 }
 0x32c   :  { %14773 = vst [vmem:[#allocation103_spill] sm:$0xff] %v10901_v35  ;;  %4094 = vmatmul.f32.gmra.mxu2 %v14778_v39  ;;  %7601 = vpow2.f32 %v4755_v5  ;;  %v3783_v32 = vadd.f32 %v3782_v29, %v3580_v40  ;;  %v5303_v2 = vadd.f32 %v10886_v34, %v5302_v33  ;;  %v10927_v0 = vpop.eup %7595  ;;  %v4677_v50 = vmul.f32 -0.5, %v4613_v6  ;;  %v14780_v5 = vld [vmem:[#allocation247_spill] sm:$0xff] }
 0x32d   :  { %v4550_v47 = vsub.f32 %v10818_v16, %v4486_v15  ;;  %v14781_v40 = vsub.f32 %v14779_v3, %v14780_v5  ;;  %v1404_v53 = vsub.f32 1.5, %v1403_v37  ;;  %v1147_v54 = vmul.f32 0.5, %v1146_v10  ;;  %v4180_v16 = vpop.f32.mrf.mxu3  ;;  %v14782_v15 = vld [vmem:[#allocation82_spill] sm:$0xff] }
 0x32e   :  { %4255 = vmatmul.f32.gmra.mxu3 %v14778_v39  ;;  %v4020_v29 = vadd.f32 %v4019_v60, %v3783_v32  ;;  %v5304_v12 = vadd.f32 %v10781_v7, %v5303_v2  ;;  %4872 = vadd.xlane.f32.xlu2 %v4871_v4  ;;  %v10935_v39 = vpop.eup %7597  ;;  %vm1407_vm4 = vweird.f32 %v10806_v42  ;;  %v14784_v3 = vld [vmem:[#allocation158_spill] sm:$0xff]  ;;  %v1395_v10 = vmul.f32 %v10797_v44, %v1394_v22 }
 0x32f   :  { %v4615_v31 = vmax.f32 %v14781_v40, 0.0  ;;  %v4614_v33 = vmax.f32 %v4550_v47, 0.0  ;;  %14783 = vst [vmem:[#allocation101_spill] sm:$0xff] %v10935_v39  ;;  %v10941_v37 = vpop.eup %7599  ;;  %v1295_v32 = vmul.f32 %v10927_v0, %v10860_v55  ;;  %v4757_v60 = vmul.f32 1.442695, %v4677_v50  ;;  %v898_v40 = vpop.xlane.xlu1 %897  ;;  %vm10975_vm8 = vmor %vm1406_vm3, %vm1407_vm4 }
 0x330   :  { %v4181_v6 = vadd.f32 %v4180_v16, %v4020_v29  ;;  %v5305_v4 = vadd.f32 %v10840_v9, %v5304_v12  ;;  %v14786_v16 = vld [vmem:[#allocation80_spill] sm:$0xff]  ;;  %v1148_v34 = vsub.f32 1.5, %v1147_v54  ;;  %v10956_v50 = vadd.f32 1e-20, %v898_v40  ;;  %v14799_v54 = vld [vmem:[#allocation79_spill] sm:$0xff] }
 0x331   :  { %3678 = vmatmul.f32.gmra.mxu0 %v14782_v15  ;;  %v4678_v2 = vmul.f32 -0.5, %v4614_v33  ;;  %v4679_v5 = vmul.f32 -0.5, %v4615_v31  ;;  %v14785_v15 = vld [vmem:[#allocation184_spill] sm:$0xff]  ;;  %v3589_v35 = vpop.f32.mrf.mxu0  ;;  %v1275_v33 = vmul.f32 %v10941_v37, %v10883_v61  ;;  %vm1151_vm7 = vweird.f32 %v10854_v28 }
 0x332   :  { %3895 = vmatmul.f32.gmra.mxu1 %v14784_v3  ;;  %v10947_v47 = vpop.eup %7601  ;;  %v3585_v7 = vadd.f32 %v3584_v18, %v14785_v15  ;;  %v4488_v29 = vmul.f32 2.0, %v4181_v6  ;;  %v1405_v3 = vmul.f32 %v10806_v42, %v1404_v53  ;;  %v3788_v12 = vpop.f32.mrf.mxu1  ;;  %v1296_v53 = vmul.f32 %v10927_v0, %v1295_v32  ;;  %v14791_v15 = vld [vmem:[#allocation169_spill] sm:$0xff]  ;;  %vm10993_vm9 = vmor %vm1150_vm6, %vm1151_vm7 }
 0x333   :  { %v4759_v22 = vmul.f32 1.442695, %v4678_v2  ;;  %v4874_v9 = vadd.f32 %v10947_v47, %v10935_v39  ;;  %v4023_v6 = vpop.f32.mrf.mxu2  ;;  %v5306_v40 = vadd.f32 %v10898_v1, %v5305_v4  ;;  %v1149_v32 = vmul.f32 %v10854_v28, %v1148_v34  ;;  %v14877_v1 = vld [vmem:[#allocation72_spill] sm:$0xff] }
 0x334   :  { %4098 = vmatmul.f32.gmra.mxu2 %v14786_v16  ;;  %v4552_v31 = vsub.f32 %v10830_v27, %v4488_v29  ;;  %v3789_v18 = vadd.f32 %v3788_v12, %v3585_v7  ;;  %v4761_v7 = vmul.f32 1.442695, %v4679_v5  ;;  %v14792_v29 = vld [vmem:[#allocation248_spill] sm:$0xff]  ;;  %v14794_v12 = vld [vmem:[#allocation81_spill] sm:$0xff]  ;;  %v1276_v34 = vmul.f32 %v10941_v37, %v1275_v33 }
 0x335   :  { %7603 = vpow2.f32 %v4759_v22  ;;  %4875 = vadd.xlane.f32.xlu1 %v4874_v9  ;;  %v10983_v9 = vadd.f32 %v14371_v58, %v10778_v63  ;;  %v4184_v22 = vpop.f32.mrf.mxu3  ;;  %v14797_v5 = vld [vmem:[#allocation149_spill] sm:$0xff]  ;;  %v11008_v43 = vsel %vm10975_vm8, %v10806_v42, %v1405_v3  ;;  %v1297_v33 = vmul.f32 0.5, %v1296_v53 }
 0x336   :  { %4259 = vmatmul.f32.gmra.mxu3 %v14786_v16  ;;  %7605 = vpow2.f32 %v4757_v60  ;;  %v4616_v27 = vmax.f32 %v4552_v31, 0.0  ;;  %v4024_v2 = vadd.f32 %v4023_v6, %v3789_v18  ;;  %v14793_v16 = vsub.f32 %v14791_v15, %v14792_v29  ;;  %14798 = vst [vmem:[#allocation197_spill] sm:$0xff] %v11008_v43 }
 0x337   :  { %7607 = vrsqrt.f32 %v10956_v50  ;;  %v11003_v31 = vsel %vm10963_vm5, %v10797_v44, %v1395_v10  ;;  %v11012_v18 = vadd.f32 %v10630_v21, %v10778_v63  ;;  %v5307_v6 = vadd.f32 %v10935_v39, %v5306_v40  ;;  %v14800_v21 = vld [vmem:[#allocation159_spill] sm:$0xff] }
 0x338   :  { %v4617_v51 = vmax.f32 %v14793_v16, 0.0  ;;  %v4680_v58 = vmul.f32 -0.5, %v4616_v27  ;;  %v4185_v4 = vadd.f32 %v4184_v22, %v4024_v2  ;;  %7609 = vpow2.f32 %v4761_v7  ;;  %v961_v27 = vpop.xlane.xlu2 %960  ;;  %v910_v2 = vpop.xlane.xlu0 %909 }
 0x339   :  { %3683 = vmatmul.f32.gmra.mxu0 %v14794_v12  ;;  %v1153_v42 = vsel %vm10993_vm9, %v10854_v28, %v1149_v32  ;;  %v11021_v3 = vadd.f32 1e-20, %v961_v27  ;;  %v3590_v63 = vadd.f32 %v3589_v35, %v14800_v21  ;;  %v3594_v53 = vpop.f32.mrf.mxu0  ;;  %v1277_v40 = vmul.f32 0.5, %v1276_v34 }
 0x33a   :  { %3901 = vmatmul.f32.gmra.mxu1 %v14797_v5  ;;  %v4763_v15 = vmul.f32 1.442695, %v4680_v58  ;;  %v4490_v29 = vmul.f32 2.0, %v4185_v4  ;;  %v4681_v10 = vmul.f32 -0.5, %v4617_v51  ;;  %v3794_v8 = vpop.f32.mrf.mxu1  ;;  %v11026_v16 = vadd.f32 1e-20, %v910_v2 }
 0x33b   :  { %v11016_v44 = vpop.eup %7603  ;;  %v1298_v12 = vsub.f32 1.5, %v1297_v33  ;;  %vm1300_vm10 = vweird.f32 %v10860_v55  ;;  %v3795_v60 = vadd.f32 %v3794_v8, %v3590_v63  ;;  %v4027_v28 = vpop.f32.mrf.mxu2  ;;  %v1440_v51 = vmul.f32 %v14586_v19, %v1153_v42  ;;  %v14802_v33 = vld [vmem:[#allocation7_spill] sm:$0xff]  ;;  %v14808_v8 = vld [vmem:[#allocation186_spill] sm:$0xff] }
 0x33c   :  { %4102 = vmatmul.f32.gmra.mxu2 %v14799_v54  ;;  %v11024_v7 = vpop.eup %7605  ;;  %7611 = vpow2.f32 %v4763_v15  ;;  %v4554_v22 = vsub.f32 %v10834_v46, %v4490_v29  ;;  %vm1280_vm11 = vweird.f32 %v10883_v61  ;;  %vm1301_vm12 = vweird.f32 %v10927_v0  ;;  %v14804_v29 = vld [vmem:[#allocation148_spill] sm:$0xff]  ;;  %v14807_v63 = vld [vmem:[#allocation167_spill] sm:$0xff] }
 0x33d   :  { %14801 = vst [vmem:[#allocation110_spill] sm:$0xff] %v11024_v7  ;;  %v4877_v32 = vadd.f32 %v11024_v7, %v11016_v44  ;;  %v11033_v35 = vpop.eup %7607  ;;  %v1441_v46 = vmul.f32 %v14589_v57, %v1153_v42  ;;  %v4765_v58 = vmul.f32 1.442695, %v4681_v10  ;;  %7613 = vrsqrt.f32 %v11021_v3  ;;  %v4188_v5 = vpop.f32.mrf.mxu3  ;;  %vm11057_vm14 = vmor %vm1300_vm10, %vm1301_vm12 }
 0x33e   :  { %4263 = vmatmul.f32.gmra.mxu3 %v14799_v54  ;;  %v4618_v34 = vmax.f32 %v4554_v22, 0.0  ;;  %v4028_v4 = vadd.f32 %v4027_v28, %v3795_v60  ;;  %v11041_v27 = vpop.eup %7609  ;;  %v5308_v2 = vadd.f32 %v11024_v7, %v5307_v6  ;;  %v1278_v19 = vsub.f32 1.5, %v1277_v40  ;;  %v14810_v60 = vld [vmem:[#allocation130_spill] sm:$0xff] }
 0x33f   :  { %4878 = vadd.xlane.f32.xlu1 %v4877_v32  ;;  %14803 = vst [vmem:[#allocation109_spill] sm:$0xff] %v11041_v27  ;;  %7615 = vrsqrt.f32 %v11026_v16  ;;  %vm1281_vm13 = vweird.f32 %v10941_v37  ;;  %v1299_v57 = vmul.f32 %v10927_v0, %v1298_v12  ;;  %v1095_v54 = vmul.f32 %v11033_v35, %v10956_v50  ;;  %v14811_v32 = vld [vmem:[#allocation78_spill] sm:$0xff] }
 0x340   :  { %v4682_v15 = vmul.f32 -0.5, %v4618_v34  ;;  %v4189_v42 = vadd.f32 %v4188_v5, %v4028_v4  ;;  %v1504_v21 = vmul.f32 %v1440_v51, %v11003_v31  ;;  %v14809_v40 = vsub.f32 %v14807_v63, %v14808_v8  ;;  %vm11079_vm15 = vmor %vm1280_vm11, %vm1281_vm13 }
 0x341   :  { %3688 = vmatmul.f32.gmra.mxu0 %v14802_v33  ;;  %v3595_v28 = vadd.f32 %v3594_v53, %v14810_v60  ;;  %v1505_v34 = vmul.f32 %v1441_v46, %v11008_v43  ;;  %7617 = vpow2.f32 %v4765_v58  ;;  %v3599_v4 = vpop.f32.mrf.mxu0  ;;  %v11070_v33 = vadd.f32 %v11041_v27, %v5308_v2  ;;  %v907_v2 = vpop.xlane.xlu2 %906 }
 0x342   :  { %3907 = vmatmul.f32.gmra.mxu1 %v14804_v29  ;;  %v11050_v10 = vpop.eup %7611  ;;  %v4619_v22 = vmax.f32 %v14809_v40, 0.0  ;;  %v4767_v12 = vmul.f32 1.442695, %v4682_v15  ;;  %v4492_v51 = vmul.f32 2.0, %v4189_v42  ;;  %v3800_v5 = vpop.f32.mrf.mxu1  ;;  %v1279_v29 = vmul.f32 %v10941_v37, %v1278_v19 }
 0x343   :  { %v4880_v55 = vadd.f32 %v11050_v10, %v11041_v27  ;;  %v3801_v15 = vadd.f32 %v3800_v5, %v3595_v28  ;;  %v11073_v63 = vpop.eup %7613  ;;  %v1303_v46 = vsel %vm11057_vm14, %v10927_v0, %v1299_v57  ;;  %v1096_v58 = vmul.f32 %v11033_v35, %v1095_v54  ;;  %v4031_v42 = vpop.f32.mrf.mxu2  ;;  %v14817_v57 = vld [vmem:[#allocation249_spill] sm:$0xff] }
 0x344   :  { %4106 = vmatmul.f32.gmra.mxu2 %v14811_v32  ;;  %7619 = vpow2.f32 %v4767_v12  ;;  %v4556_v19 = vsub.f32 %v10847_v17, %v4492_v51  ;;  %v11091_v61 = vmul.f32 3.0, %v1504_v21  ;;  %v4683_v40 = vmul.f32 -0.5, %v4619_v22  ;;  %v949_v12 = vpop.xlane.xlu1 %948  ;;  %v14816_v17 = vld [vmem:[#allocation157_spill] sm:$0xff] }
 0x345   :  { %4881 = vadd.xlane.f32.xlu0 %v4880_v55  ;;  %v11089_v8 = vpop.eup %7615  ;;  %v11093_v60 = vadd.f32 1e-20, %v907_v2  ;;  %v4032_v28 = vadd.f32 %v4031_v42, %v3801_v15  ;;  %v11095_v6 = vmul.f32 3.0, %v1505_v34  ;;  %vm1100_vm0 = vweird.f32 %v10956_v50  ;;  %v4192_v5 = vpop.f32.mrf.mxu3  ;;  %v14819_v15 = vld [vmem:[#allocation141_spill] sm:$0xff] }
 0x346   :  { %4267 = vmatmul.f32.gmra.mxu3 %v14811_v32  ;;  %14814 = vst [vmem:[#allocation107_spill] sm:$0xff] %v11091_v61  ;;  %v11098_v0 = vadd.f32 1e-20, %v949_v12  ;;  %v14818_v54 = vsub.f32 %v14816_v17, %v14817_v57  ;;  %v4620_v32 = vmax.f32 %v4556_v19, 0.0  ;;  %v1283_v21 = vsel %vm11079_vm15, %v10941_v37, %v1279_v29  ;;  %v14822_v29 = vld [vmem:[#allocation147_spill] sm:$0xff] }
 0x347   :  { %14815 = vst [vmem:[#allocation105_spill] sm:$0xff] %v11095_v6  ;;  %v1470_v22 = vmul.f32 %v14663_v48, %v1303_v46  ;;  %v1305_v34 = vmul.f32 %v11073_v63, %v11021_v3  ;;  %v4193_v55 = vadd.f32 %v4192_v5, %v4032_v28  ;;  %v11110_v2 = vpop.eup %7617  ;;  %v1471_v42 = vmul.f32 %v14664_v23, %v1303_v46  ;;  %v904_v48 = vpop.xlane.xlu0 %903 }
 0x348   :  { %v4621_v51 = vmax.f32 %v14818_v54, 0.0  ;;  %14820 = vst [vmem:[#allocation120_spill] sm:$0xff] %v11110_v2  ;;  %v1097_v12 = vmul.f32 0.5, %v1096_v58  ;;  %v1135_v19 = vmul.f32 %v11089_v8, %v11026_v16  ;;  %v4684_v17 = vmul.f32 -0.5, %v4620_v32 }
 0x349   :  { %v4769_v37 = vmul.f32 1.442695, %v4683_v40  ;;  %7621 = vrsqrt.f32 %v11093_v60  ;;  %v3600_v53 = vadd.f32 %v3599_v4, %v14822_v29  ;;  %v4494_v28 = vmul.f32 2.0, %v4193_v55  ;;  %v3604_v6 = vpop.f32.mrf.mxu0 }
 0x34a   :  { %3913 = vmatmul.f32.gmra.mxu1 %v14819_v15  ;;  %v11115_v57 = vpop.eup %7619  ;;  %v1466_v54 = vmul.f32 %v14652_v38, %v1283_v21  ;;  %v4685_v5 = vmul.f32 -0.5, %v4621_v51  ;;  %v4771_v15 = vmul.f32 1.442695, %v4684_v17  ;;  %v3806_v23 = vpop.f32.mrf.mxu1  ;;  %v1306_v58 = vmul.f32 %v11073_v63, %v1305_v34 }
 0x34b   :  { %14821 = vst [vmem:[#allocation119_spill] sm:$0xff] %v11115_v57  ;;  %v4883_v46 = vadd.f32 %v11115_v57, %v11110_v2  ;;  %v11123_v32 = vadd.f32 1e-20, %v904_v48  ;;  %v4558_v40 = vsub.f32 %v10851_v13, %v4494_v28  ;;  %v3807_v61 = vadd.f32 %v3806_v23, %v3600_v53  ;;  %v4035_v38 = vpop.f32.mrf.mxu2  ;;  %v14825_v13 = vld [vmem:[#allocation112_spill] sm:$0xff] }
 0x34c   :  { %v1467_v27 = vmul.f32 %v14653_v20, %v1283_v21  ;;  %v1098_v4 = vsub.f32 1.5, %v1097_v12  ;;  %v1136_v55 = vmul.f32 %v11089_v8, %v1135_v19  ;;  %7623 = vpow2.f32 %v4771_v15  ;;  %v14826_v21 = vld [vmem:[#allocation152_spill] sm:$0xff] }
 0x34d   :  { %4884 = vadd.xlane.f32.xlu0 %v4883_v46  ;;  %vm1101_vm1 = vweird.f32 %v11033_v35  ;;  %7625 = vpow2.f32 %v4769_v37  ;;  %v4622_v51 = vmax.f32 %v4558_v40, 0.0  ;;  %v4036_v17 = vadd.f32 %v4035_v38, %v3807_v61  ;;  %v4196_v29 = vpop.f32.mrf.mxu3  ;;  %v895_v61 = vpop.xlane.xlu1 %894 }
 0x34e   :  { %v11130_v34 = vmul.f32 %v1470_v22, %v11003_v31  ;;  %v11133_v48 = vmul.f32 %v1471_v42, %v11008_v43  ;;  %vm1310_vm2 = vweird.f32 %v11021_v3  ;;  %v4773_v20 = vmul.f32 1.442695, %v4685_v5  ;;  %vm11155_vm4 = vmor %vm1100_vm0, %vm1101_vm1 }
 0x34f   :  { %v14827_v12 = vsub.f32 %v14825_v13, %v14826_v21  ;;  %v11139_v53 = vpop.eup %7621  ;;  %v1307_v28 = vmul.f32 0.5, %v1306_v58  ;;  %7627 = vrsqrt.f32 %v11123_v32  ;;  %v4686_v37 = vmul.f32 -0.5, %v4622_v51 }
 0x350   :  { %14823 = vst [vmem:[#allocation117_spill] sm:$0xff] %v11130_v34  ;;  %v4197_v22 = vadd.f32 %v4196_v29, %v4036_v17  ;;  %v11144_v42 = vadd.f32 %v11110_v2, %v11070_v33  ;;  %v1099_v15 = vmul.f32 %v11033_v35, %v1098_v4  ;;  %v1137_v5 = vmul.f32 0.5, %v1136_v55  ;;  %v11159_v33 = vpop.xlane.xlu2 %945 }
 0x351   :  { %14824 = vst [vmem:[#allocation37_spill] sm:$0xff] %v11133_v48  ;;  %v4623_v19 = vmax.f32 %v14827_v12, 0.0  ;;  %vm1140_vm3 = vweird.f32 %v11026_v16  ;;  %7629 = vrsqrt.f32 %v11098_v0  ;;  %v1530_v23 = vmul.f32 %v1466_v54, %v11003_v31  ;;  %v3609_v17 = vpop.f32.mrf.mxu0  ;;  %v11174_v48 = vpop.xlane.xlu0 %954 }
 0x352   :  { %v1531_v46 = vmul.f32 %v1467_v27, %v11008_v43  ;;  %v4775_v40 = vmul.f32 1.442695, %v4686_v37  ;;  %v4496_v4 = vmul.f32 2.0, %v4197_v22  ;;  %v11161_v55 = vpop.eup %7623  ;;  %v1125_v38 = vmul.f32 %v11139_v53, %v11093_v60  ;;  %v14831_v27 = vld [vmem:[#allocation62_spill] sm:$0xff]  ;;  %v3812_v13 = vpop.f32.mrf.mxu1 }
 0x353   :  { %14830 = vst [vmem:[#allocation210_spill] sm:$0xff] %v11161_v55  ;;  %7631 = vpow2.f32 %v4773_v20  ;;  %v4687_v54 = vmul.f32 -0.5, %v4623_v19  ;;  %v3605_v51 = vadd.f32 %v3604_v6, %v14831_v27  ;;  %v11166_v50 = vpop.eup %7625  ;;  %v1308_v21 = vsub.f32 1.5, %v1307_v28  ;;  %v4039_v19 = vpop.f32.mrf.mxu2 }
 0x354   :  { %14832 = vst [vmem:[#allocation231_spill] sm:$0xff] %v11166_v50  ;;  %v11168_v12 = vadd.f32 1e-20, %v895_v61  ;;  %7633 = vpow2.f32 %v4775_v40  ;;  %v4560_v29 = vsub.f32 %v10858_v56, %v4496_v4  ;;  %v1103_v37 = vsel %vm11155_vm4, %v11033_v35, %v1099_v15 }
 0x355   :  { %v1138_v22 = vsub.f32 1.5, %v1137_v5  ;;  %v3813_v20 = vadd.f32 %v3812_v13, %v3605_v51  ;;  %v4886_v6 = vadd.f32 %v11166_v50, %v11161_v55  ;;  %v11178_v27 = vpop.eup %7627  ;;  %v11180_v28 = vmul.f32 3.0, %v1530_v23  ;;  %v4200_v58 = vpop.f32.mrf.mxu3 }
 0x356   :  { %v11182_v61 = vmul.f32 3.0, %v1531_v46  ;;  %vm1311_vm5 = vweird.f32 %v11073_v63  ;;  %v4624_v56 = vmax.f32 %v4560_v29, 0.0  ;;  %vm1141_vm6 = vweird.f32 %v11089_v8 }
 0x357   :  { %14833 = vst [vmem:[#allocation128_spill] sm:$0xff] %v11180_v28  ;;  %v11185_v40 = vpop.eup %7629  ;;  %v1126_v35 = vmul.f32 %v11139_v53, %v1125_v38  ;;  %v4777_v15 = vmul.f32 1.442695, %v4687_v54  ;;  %v4040_v5 = vadd.f32 %v4039_v19, %v3813_v20  ;;  %4887 = vadd.xlane.f32.xlu2 %v4886_v6  ;;  %v1430_v4 = vmul.f32 %v9745_v41, %v1103_v37  ;;  %vm11204_vm7 = vmor %vm1310_vm2, %vm1311_vm5 }
 0x358   :  { %14834 = vst [vmem:[#allocation126_spill] sm:$0xff] %v11182_v61  ;;  %v1309_v23 = vmul.f32 %v11073_v63, %v1308_v21  ;;  %7635 = vrsqrt.f32 %v11168_v12  ;;  %v4688_v46 = vmul.f32 -0.5, %v4624_v56  ;;  %v1431_v13 = vmul.f32 %v9748_v24, %v1103_v37  ;;  %v934_v24 = vpop.xlane.xlu1 %933  ;;  %v14839_v37 = vld [vmem:[#allocation121_spill] sm:$0xff]  ;;  %vm11221_vm9 = vmor %vm1140_vm3, %vm1141_vm6 }
 0x359   :  { %v11192_v51 = vpop.eup %7631  ;;  %v1139_v29 = vmul.f32 %v11089_v8, %v1138_v22  ;;  %v1115_v38 = vmul.f32 %v11178_v27, %v11123_v32  ;;  %v4201_v54 = vadd.f32 %v4200_v58, %v4040_v5  ;;  %v1265_v21 = vmul.f32 %v11185_v40, %v11098_v0  ;;  %v14840_v22 = vld [vmem:[#allocation67_spill] sm:$0xff]  ;;  %v3614_v34 = vpop.f32.mrf.mxu0 }
 0x35a   :  { %14835 = vst [vmem:[#allocation95_spill] sm:$0xff] %v11192_v51  ;;  %v11198_v20 = vpop.eup %7633  ;;  %vm1130_vm8 = vweird.f32 %v11093_v60  ;;  %v14841_v19 = vsub.f32 %v14839_v37, %v14840_v22  ;;  %v4779_v56 = vmul.f32 1.442695, %v4688_v46  ;;  %v3610_v5 = vadd.f32 %v3609_v17, %v10353_v30  ;;  %v3818_v61 = vpop.f32.mrf.mxu1 }
 0x35b   :  { %14836 = vst [vmem:[#allocation124_spill] sm:$0xff] %v11198_v20  ;;  %v1127_v58 = vmul.f32 0.5, %v1126_v35  ;;  %7637 = vpow2.f32 %v4777_v15  ;;  %v4498_v3 = vmul.f32 2.0, %v4201_v54  ;;  %v4889_v28 = vadd.f32 %v11198_v20, %v11192_v51  ;;  %v892_v46 = vpop.xlane.xlu2 %891  ;;  %v4043_v22 = vpop.f32.mrf.mxu2 }
 0x35c   :  { %v4625_v6 = vmax.f32 %v14841_v19, 0.0  ;;  %v11225_v37 = vadd.f32 1e-20, %v934_v24  ;;  %7639 = vpow2.f32 %v4779_v56  ;;  %v3615_v30 = vadd.f32 %v3614_v34, %v10366_v62 }
 0x35d   :  { %v3819_v17 = vadd.f32 %v3818_v61, %v3610_v5  ;;  %v11231_v35 = vsel %vm11204_vm7, %v11073_v63, %v1309_v23  ;;  %v1116_v15 = vmul.f32 %v11178_v27, %v1115_v38  ;;  %v11234_v54 = vadd.f32 1e-20, %v892_v46  ;;  %v901_v23 = vpop.xlane.xlu0 %900 }
 0x35e   :  { %14844 = vst [vmem:[#allocation43_spill] sm:$0xff] %v11231_v35  ;;  %v4562_v16 = vsub.f32 %v10873_v52, %v4498_v3  ;;  %v11237_v19 = vpop.eup %7635  ;;  %v1494_v24 = vmul.f32 %v1430_v4, %v11003_v31  ;;  %v1266_v56 = vmul.f32 %v11185_v40, %v1265_v21  ;;  %v4689_v62 = vmul.f32 -0.5, %v4625_v6  ;;  %v14845_v52 = vld [vmem:[#allocation69_spill] sm:$0xff]  ;;  %v4204_v4 = vpop.f32.mrf.mxu3 }
 0x35f   :  { %v4044_v34 = vadd.f32 %v4043_v22, %v3819_v17  ;;  %v1495_v61 = vmul.f32 %v1431_v13, %v11008_v43  ;;  %v1143_v63 = vsel %vm11221_vm9, %v11089_v8, %v1139_v29  ;;  %vm1120_vm10 = vweird.f32 %v11123_v32  ;;  %4890 = vadd.xlane.f32.xlu2 %v4889_v28 }
 0x360   :  { %v14846_v38 = vsub.f32 %v10341_v14, %v14845_v52  ;;  %v4626_v5 = vmax.f32 %v4562_v16, 0.0  ;;  %v1128_v3 = vsub.f32 1.5, %v1127_v58  ;;  %7641 = vrsqrt.f32 %v11225_v37 }
 0x361   :  { %v11250_v21 = vadd.f32 1e-20, %v901_v23  ;;  %v4205_v13 = vadd.f32 %v4204_v4, %v4044_v34  ;;  %v11252_v6 = vpop.eup %7637  ;;  %vm1270_vm11 = vweird.f32 %v11098_v0  ;;  %vm1271_vm12 = vweird.f32 %v11185_v40  ;;  %v11265_v34 = vpop.f32.mrf.mxu0 }
 0x362   :  { %v4627_v41 = vmax.f32 %v14846_v38, 0.0  ;;  %14847 = vst [vmem:[#allocation18_spill] sm:$0xff] %v11252_v6  ;;  %v1117_v8 = vmul.f32 0.5, %v1116_v15  ;;  %v1085_v14 = vmul.f32 %v11237_v19, %v11168_v12  ;;  %7643 = vrsqrt.f32 %v11234_v54  ;;  %v11259_v28 = vpop.eup %7639  ;;  %v3824_v15 = vpop.f32.mrf.mxu1  ;;  %vm1272_vm1 = vmor %vm1270_vm11, %vm1271_vm12 }
 0x363   :  { %v4690_v2 = vmul.f32 -0.5, %v4626_v5  ;;  %14848 = vst [vmem:[#allocation236_spill] sm:$0xff] %v11259_v28  ;;  %v1267_v29 = vmul.f32 0.5, %v1266_v56  ;;  %vm1131_vm13 = vweird.f32 %v11139_v53  ;;  %v4781_v58 = vmul.f32 1.442695, %v4689_v62  ;;  %v4047_v4 = vpop.f32.mrf.mxu2 }
 0x364   :  { %v4500_v46 = vmul.f32 2.0, %v4205_v13  ;;  %v11263_v17 = vadd.f32 1e-20, %v11159_v33  ;;  %v4691_v16 = vmul.f32 -0.5, %v4627_v41  ;;  %v4892_v23 = vadd.f32 %v11259_v28, %v11252_v6  ;;  %vm11276_vm14 = vmor %vm1130_vm8, %vm1131_vm13 }
 0x365   :  { %v4783_v22 = vmul.f32 1.442695, %v4690_v2  ;;  %v1129_v52 = vmul.f32 %v11139_v53, %v1128_v3  ;;  %7645 = vrsqrt.f32 %v11250_v21  ;;  %v3825_v38 = vadd.f32 %v3824_v15, %v3615_v30 }
 0x366   :  { %14849 = vst [vmem:[#allocation140_spill] sm:$0xff] %v11263_v17  ;;  %v4564_v56 = vsub.f32 %v10877_v11, %v4500_v46  ;;  %v11272_v62 = vmul.f32 3.0, %v1494_v24  ;;  %v1118_v41 = vsub.f32 1.5, %v1117_v8  ;;  %v1086_v5 = vmul.f32 %v11237_v19, %v1085_v14  ;;  %4893 = vadd.xlane.f32.xlu1 %v4892_v23  ;;  %v11281_v3 = vpop.eup %7641  ;;  %v4208_v46 = vpop.f32.mrf.mxu3 }
 0x367   :  { %7647 = vpow2.f32 %v4783_v22  ;;  %v1438_v13 = vmul.f32 %v14580_v49, %v1143_v63  ;;  %v4048_v30 = vadd.f32 %v4047_v4, %v3825_v38  ;;  %v1439_v60 = vmul.f32 %v14582_v45, %v1143_v63 }
 0x368   :  { %14850 = vst [vmem:[#allocation136_spill] sm:$0xff] %v11272_v62  ;;  %7649 = vpow2.f32 %v4781_v58  ;;  %v4628_v11 = vmax.f32 %v4564_v56, 0.0  ;;  %v11284_v24 = vpop.eup %7643  ;;  %v1268_v2 = vsub.f32 1.5, %v1267_v29  ;;  %vm1121_vm15 = vweird.f32 %v11178_v27 }
 0x369   :  { %v4785_v8 = vmul.f32 1.442695, %v4691_v16  ;;  %v1133_v14 = vsel %vm11276_vm14, %v11139_v53, %v1129_v52  ;;  %7651 = vrsqrt.f32 %v11263_v17  ;;  %v4209_v49 = vadd.f32 %v4208_v46, %v4048_v30  ;;  %vm11302_vm0 = vmor %vm1120_vm10, %vm1121_vm15  ;;  %v3624_v32 = vpop.f32.mrf.mxu0  ;;  %v14859_v30 = vld [vmem:[#allocation96_spill] sm:$0xff] }
 0x36a   :  { %v4692_v22 = vmul.f32 -0.5, %v4628_v11  ;;  %v11292_v58 = vmul.f32 3.0, %v1495_v61  ;;  %v1119_v15 = vmul.f32 %v11178_v27, %v1118_v41  ;;  %v1087_v23 = vmul.f32 0.5, %v1086_v5  ;;  %v11315_v5 = vpop.f32.mrf.mxu1 }
 0x36b   :  { %v1215_v45 = vmul.f32 %v11281_v3, %v11225_v37  ;;  %v11297_v63 = vpop.eup %7645  ;;  %v1502_v29 = vmul.f32 %v1438_v13, %v11003_v31  ;;  %v1075_v61 = vmul.f32 %v11284_v24, %v11234_v54  ;;  %v11308_v52 = vmul.f32 2.0, %v4209_v49  ;;  %v14858_v13 = vld [vmem:[#allocation29_spill] sm:$0xff]  ;;  %v11331_v49 = vpop.f32.mrf.mxu2 }
 0x36c   :  { %14853 = vst [vmem:[#allocation100_spill] sm:$0xff] %v11292_v58  ;;  %v4787_v16 = vmul.f32 1.442695, %v4692_v22  ;;  %v1503_v38 = vmul.f32 %v1439_v60, %v11008_v43  ;;  %v1269_v33 = vmul.f32 %v11185_v40, %v1268_v2  ;;  %v1436_v41 = vmul.f32 %v9883_v59, %v1133_v14  ;;  %v14860_v2 = vld [vmem:[#allocation180_spill] sm:$0xff] }
 0x36d   :  { %v11310_v56 = vpop.eup %7647  ;;  %7653 = vpow2.f32 %v4785_v8  ;;  %v1437_v11 = vmul.f32 %v14858_v13, %v1133_v14  ;;  %v3625_v46 = vadd.f32 %v3624_v32, %v14860_v2  ;;  %v1123_v59 = vsel %vm11302_vm0, %v11178_v27, %v1119_v15  ;;  %v14866_v32 = vld [vmem:[#allocation216_spill] sm:$0xff] }
 0x36e   :  { %14856 = vst [vmem:[#allocation137_spill] sm:$0xff] %v11310_v56  ;;  %v11317_v4 = vpop.eup %7649  ;;  %7655 = vpow2.f32 %v4787_v16  ;;  %v1088_v8 = vsub.f32 1.5, %v1087_v23  ;;  %v1216_v22 = vmul.f32 %v11281_v3, %v1215_v45  ;;  %v11337_v14 = vmul.f32 3.0, %v1502_v29  ;;  %v11351_v45 = vpop.f32.mrf.mxu3  ;;  %v14868_v60 = vld [vmem:[#allocation8_spill] sm:$0xff] }
 0x36f   :  { %14857 = vst [vmem:[#allocation139_spill] sm:$0xff] %v11317_v4  ;;  %v4895_v0 = vadd.f32 %v11317_v4, %v11310_v56  ;;  %v11335_v35 = vpop.eup %7651  ;;  %vm1090_vm2 = vweird.f32 %v11168_v12  ;;  %v11341_v16 = vadd.f32 1e-20, %v11174_v48  ;;  %v1076_v53 = vmul.f32 %v11284_v24, %v1075_v61  ;;  %v14875_v12 = vld [vmem:[#allocation220_spill] sm:$0xff] }
 0x370   :  { %14861 = vst [vmem:[#allocation146_spill] sm:$0xff] %v11335_v35  ;;  %v11345_v27 = vsel %vm1272_vm1, %v11185_v40, %v1269_v33  ;;  %v1500_v15 = vmul.f32 %v1436_v41, %v11003_v31  ;;  %vm1091_vm3 = vweird.f32 %v11237_v19  ;;  %v1105_v23 = vmul.f32 %v11297_v63, %v11250_v21 }
 0x371   :  { %14862 = vst [vmem:[#allocation106_spill] sm:$0xff] %v11337_v14  ;;  %4896 = vadd.xlane.f32.xlu2 %v4895_v0  ;;  %v11353_v29 = vmul.f32 3.0, %v1503_v38  ;;  %v5311_v48 = vadd.f32 %v11166_v50, %v11144_v42  ;;  %v1501_v61 = vmul.f32 %v1437_v11, %v11008_v43  ;;  %v1434_v40 = vmul.f32 %v14866_v32, %v1123_v59  ;;  %v880_v0 = vpop.xlane.xlu1 %879  ;;  %vm1092_vm4 = vmor %vm1090_vm2, %vm1091_vm3  ;;  %v14873_v32 = vld [vmem:[#allocation24_spill] sm:$0xff]  ;;  %v11382_v14 = vpop.f32.mrf.mxu0 }
 0x372   :  { %14863 = vst [vmem:[#allocation241_spill] sm:$0xff] %v11341_v16  ;;  %v1089_v41 = vmul.f32 %v11237_v19, %v1088_v8  ;;  %v1255_v13 = vmul.f32 %v11335_v35, %v11263_v17  ;;  %v1217_v2 = vmul.f32 0.5, %v1216_v22  ;;  %v4503_v58 = vmul.f32 2.0, %v14868_v60  ;;  %v14876_v50 = vld [vmem:[#allocation12_spill] sm:$0xff] }
 0x373   :  { %14864 = vst [vmem:[#allocation134_spill] sm:$0xff] %v11345_v27  ;;  %v11359_v33 = vpop.eup %7653  ;;  %7657 = vrsqrt.f32 %v11341_v16  ;;  %v1077_v11 = vmul.f32 0.5, %v1076_v53  ;;  %v11376_v8 = vadd.f32 1e-20, %v880_v0  ;;  %v11378_v22 = vmul.f32 3.0, %v1500_v15  ;;  %v4055_v7 = vpop.f32.mrf.mxu2 }
 0x374   :  { %14865 = vst [vmem:[#allocation115_spill] sm:$0xff] %v11353_v29  ;;  %v11365_v38 = vpop.eup %7655  ;;  %v14870_v29 = vld [vmem:[#allocation217_spill] sm:$0xff]  ;;  %v1106_v60 = vmul.f32 %v11297_v63, %v1105_v23  ;;  %v4505_v17 = vmul.f32 2.0, %v14873_v32  ;;  %v1435_v62 = vmul.f32 %v14875_v12, %v1123_v59  ;;  %v1498_v53 = vmul.f32 %v1434_v40, %v11003_v31 }
 0x375   :  { %14867 = vst [vmem:[#allocation225_spill] sm:$0xff] %v11359_v33  ;;  %v11369_v42 = vmul.f32 %v14870_v29, %v11345_v27  ;;  %v3836_v29 = vpop.f32.mrf.mxu1  ;;  %v11386_v27 = vmul.f32 3.0, %v1501_v61  ;;  %v1093_v15 = vsel %vm1092_vm4, %v11237_v19, %v1089_v41  ;;  %v1218_v23 = vsub.f32 1.5, %v1217_v2  ;;  %v14878_v61 = vld [vmem:[#allocation63_spill] sm:$0xff] }
 0x376   :  { %14869 = vst [vmem:[#allocation138_spill] sm:$0xff] %v11365_v38  ;;  %v3837_v0 = vadd.f32 %v3836_v29, %v3625_v46  ;;  %v4567_v32 = vsub.f32 %v14876_v50, %v4503_v58  ;;  %v1078_v39 = vsub.f32 1.5, %v1077_v11  ;;  %7659 = vrsqrt.f32 %v11376_v8  ;;  %v14880_v46 = vld [vmem:[#allocation26_spill] sm:$0xff]  ;;  %v4216_v41 = vpop.f32.mrf.mxu3  ;;  %v14882_v50 = vld [vmem:[#allocation61_spill] sm:$0xff] }
 0x377   :  { %14871 = vst [vmem:[#allocation240_spill] sm:$0xff] %v11369_v42  ;;  %v4898_v42 = vadd.f32 %v11365_v38, %v11359_v33  ;;  %vm1220_vm5 = vweird.f32 %v11225_v37  ;;  %vm1221_vm6 = vweird.f32 %v11281_v3  ;;  %v1107_v19 = vmul.f32 0.5, %v1106_v60 }
 0x378   :  { %14872 = vst [vmem:[#allocation242_spill] sm:$0xff] %v11378_v22  ;;  %v1256_v22 = vmul.f32 %v11335_v35, %v1255_v13  ;;  %v4056_v59 = vadd.f32 %v4055_v7, %v3837_v0  ;;  %v4569_v40 = vsub.f32 %v14880_v46, %v4505_v17  ;;  %vm1080_vm7 = vweird.f32 %v11234_v54  ;;  %v14883_v7 = vld [vmem:[#allocation204_spill] sm:$0xff]  ;;  %vm11416_vm9 = vmor %vm1220_vm5, %vm1221_vm6  ;;  %v14893_v54 = vld [vmem:[#allocation19_spill] sm:$0xff] }
 0x379   :  { %14874 = vst [vmem:[#allocation132_spill] sm:$0xff] %v11386_v27  ;;  %4899 = vadd.xlane.f32.xlu0 %v4898_v42  ;;  %v14879_v27 = vsub.f32 %v14877_v1, %v14878_v61  ;;  %v11400_v13 = vpop.eup %7657  ;;  %vm1081_vm8 = vweird.f32 %v11284_v24  ;;  %v4507_v58 = vmul.f32 2.0, %v14882_v50  ;;  %v5312_v1 = vadd.f32 %v11192_v51, %v5311_v48  ;;  %v14884_v42 = vld [vmem:[#allocation205_spill] sm:$0xff]  ;;  %v943_v48 = vpop.xlane.xlu2 %942 }
 0x37a   :  { %14881 = vst [vmem:[#allocation156_spill] sm:$0xff] %v11400_v13  ;;  %v11405_v2 = vadd.f32 %v4216_v41, %v4056_v59  ;;  %v1429_v11 = vmul.f32 %v14884_v42, %v1093_v15  ;;  %v4631_v60 = vmax.f32 %v4567_v32, 0.0  ;;  %v1499_v17 = vmul.f32 %v1435_v62, %v11008_v43  ;;  %vm11427_vm10 = vmor %vm1080_vm7, %vm1081_vm8  ;;  %v3634_v59 = vpop.f32.mrf.mxu0 }
 0x37b   :  { %v4629_v38 = vmax.f32 %v14879_v27, 0.0  ;;  %v1428_v27 = vmul.f32 %v14883_v7, %v1093_v15  ;;  %v1219_v29 = vmul.f32 %v11281_v3, %v1218_v23  ;;  %v1079_v0 = vmul.f32 %v11284_v24, %v1078_v39  ;;  %v11446_v42 = vpop.f32.mrf.mxu2 }
 0x37c   :  { %v11423_v15 = vmul.f32 %v11400_v13, %v11341_v16  ;;  %v1108_v23 = vsub.f32 1.5, %v1107_v19  ;;  %v11431_v37 = vadd.f32 1e-20, %v943_v48  ;;  %v4633_v32 = vmax.f32 %v4569_v40, 0.0  ;;  %v11435_v39 = vpop.eup %7659  ;;  %v14901_v16 = vld [vmem:[#allocation201_spill] sm:$0xff] }
 0x37d   :  { %v4693_v61 = vmul.f32 -0.5, %v4629_v38  ;;  %v11433_v46 = vpop.f32.mrf.mxu1  ;;  %v11437_v38 = vmul.f32 3.0, %v1498_v53  ;;  %v11439_v41 = vmul.f32 0.5, %v1256_v22  ;;  %vm1110_vm11 = vweird.f32 %v11250_v21 }
 0x37e   :  { %14887 = vst [vmem:[#allocation91_spill] sm:$0xff] %v11423_v15  ;;  %v4571_v50 = vsub.f32 %v14893_v54, %v4507_v58  ;;  %v1492_v7 = vmul.f32 %v1428_v27, %v11003_v31  ;;  %v1493_v19 = vmul.f32 %v1429_v11, %v11008_v43  ;;  %vm1111_vm12 = vweird.f32 %v11297_v63 }
 0x37f   :  { %14890 = vst [vmem:[#allocation114_spill] sm:$0xff] %v11431_v37  ;;  %v4695_v40 = vmul.f32 -0.5, %v4631_v60  ;;  %v11448_v48 = vmul.f32 3.0, %v1499_v17  ;;  %v1223_v22 = vsel %vm11416_vm9, %v11281_v3, %v1219_v29  ;;  %v1083_v53 = vsel %vm11427_vm10, %v11284_v24, %v1079_v0  ;;  %v940_v60 = vpop.xlane.xlu0 %939  ;;  %v11460_v17 = vpop.f32.mrf.mxu3  ;;  %vm1112_vm13 = vmor %vm1110_vm11, %vm1111_vm12 }
 0x380   :  { %14891 = vst [vmem:[#allocation129_spill] sm:$0xff] %v11437_v38  ;;  %v4789_v58 = vmul.f32 1.442695, %v4693_v61  ;;  %v1109_v27 = vmul.f32 %v11297_v63, %v1108_v23  ;;  %v1035_v11 = vmul.f32 %v11435_v39, %v11376_v8  ;;  %7661 = vrsqrt.f32 %v11431_v37  ;;  %v14898_v61 = vld [vmem:[#allocation54_spill] sm:$0xff] }
 0x381   :  { %14892 = vst [vmem:[#allocation68_spill] sm:$0xff] %v11439_v41  ;;  %v4697_v54 = vmul.f32 -0.5, %v4633_v32  ;;  %v5313_v3 = vadd.f32 %v11252_v6, %v5312_v1  ;;  %v11468_v24 = vadd.f32 1e-20, %v940_v60  ;;  %v4635_v29 = vmax.f32 %v4571_v50, 0.0  ;;  %v14899_v32 = vld [vmem:[#allocation226_spill] sm:$0xff] }
 0x382   :  { %14894 = vst [vmem:[#allocation163_spill] sm:$0xff] %v11448_v48  ;;  %v11470_v12 = vmul.f32 3.0, %v1492_v7  ;;  %v11472_v0 = vmul.f32 3.0, %v1493_v19  ;;  %v1426_v62 = vmul.f32 %v14898_v61, %v1083_v53  ;;  %v4793_v23 = vmul.f32 1.442695, %v4695_v40  ;;  %v14902_v41 = vld [vmem:[#allocation111_spill] sm:$0xff]  ;;  %v3639_v19 = vpop.f32.mrf.mxu0 }
 0x383   :  { %14895 = vst [vmem:[#allocation89_spill] sm:$0xff] %v11468_v24  ;;  %v11476_v13 = vmul.f32 %v14899_v32, %v1223_v22  ;;  %v1427_v1 = vmul.f32 %v14901_v16, %v1083_v53  ;;  %7663 = vpow2.f32 %v4789_v58  ;;  %v4515_v15 = vmul.f32 2.0, %v14902_v41  ;;  %v14903_v7 = vld [vmem:[#allocation76_spill] sm:$0xff]  ;;  %v14906_v32 = vld [vmem:[#allocation55_spill] sm:$0xff]  ;;  %v14907_v16 = vld [vmem:[#allocation57_spill] sm:$0xff] }
 0x384   :  { %14896 = vst [vmem:[#allocation88_spill] sm:$0xff] %v11470_v12  ;;  %v1113_v21 = vsel %vm1112_vm13, %v11297_v63, %v1109_v27  ;;  %v1036_v60 = vmul.f32 %v11435_v39, %v1035_v11  ;;  %v4797_v50 = vmul.f32 1.442695, %v4697_v54  ;;  %v3635_v38 = vadd.f32 %v3634_v59, %v14903_v7  ;;  %v14910_v27 = vld [vmem:[#allocation66_spill] sm:$0xff]  ;;  %v14911_v11 = vld [vmem:[#allocation53_spill] sm:$0xff] }
 0x385   :  { %14897 = vst [vmem:[#allocation93_spill] sm:$0xff] %v11472_v0  ;;  %v3848_v48 = vpop.f32.mrf.mxu1  ;;  %v14904_v0 = vld [vmem:[#allocation227_spill] sm:$0xff]  ;;  %7665 = vrsqrt.f32 %v11468_v24  ;;  %v4699_v40 = vmul.f32 -0.5, %v4635_v29  ;;  %v14908_v53 = vsub.f32 %v14906_v32, %v14907_v16  ;;  %v1490_v63 = vmul.f32 %v1426_v62, %v11003_v31 }
 0x386   :  { %14900 = vst [vmem:[#allocation193_spill] sm:$0xff] %v11476_v13  ;;  %v11484_v61 = vmul.f32 %v14904_v0, %v1223_v22  ;;  %v11490_v41 = vpop.eup %7661  ;;  %7667 = vpow2.f32 %v4793_v23  ;;  %v14912_v59 = vsub.f32 %v14910_v27, %v14911_v11  ;;  %v3849_v7 = vadd.f32 %v3848_v48, %v3635_v38  ;;  %v4063_v13 = vpop.f32.mrf.mxu2  ;;  %v14913_v0 = vld [vmem:[#allocation14_spill] sm:$0xff]  ;;  %v14914_v29 = vld [vmem:[#allocation211_spill] sm:$0xff]  ;;  %v14917_v11 = vld [vmem:[#allocation52_spill] sm:$0xff] }
 0x387   :  { %v4637_v58 = vmax.f32 %v14908_v53, 0.0  ;;  %14909 = vst [vmem:[#allocation87_spill] sm:$0xff] %v11490_v41  ;;  %v1491_v22 = vmul.f32 %v1427_v1, %v11008_v43  ;;  %v11498_v24 = vmul.f32 %v14913_v0, %v1113_v21  ;;  %v4579_v32 = vsub.f32 %v10983_v9, %v4515_v15  ;;  %v4224_v53 = vpop.f32.mrf.mxu3 }
 0x388   :  { %14905 = vst [vmem:[#allocation123_spill] sm:$0xff] %v11484_v61  ;;  %v4639_v54 = vmax.f32 %v14912_v59, 0.0  ;;  %v11501_v61 = vmul.f32 %v14914_v29, %v1113_v21  ;;  %v5314_v16 = vadd.f32 %v11317_v4, %v5313_v3  ;;  %v11505_v62 = vmul.f32 0.5, %v1036_v60  ;;  %v14918_v21 = vld [vmem:[#allocation77_spill] sm:$0xff]  ;;  %v14920_v3 = vld [vmem:[#allocation40_spill] sm:$0xff] }
 0x389   :  { %7669 = vpow2.f32 %v4797_v50  ;;  %v4064_v23 = vadd.f32 %v4063_v13, %v3849_v7  ;;  %v11507_v27 = vpop.eup %7663  ;;  %v11511_v38 = vmul.f32 %v11490_v41, %v11431_v37  ;;  %v4801_v48 = vmul.f32 1.442695, %v4699_v40  ;;  %v14924_v41 = vld [vmem:[#allocation185_spill] sm:$0xff] }
 0x38a   :  { %14915 = vst [vmem:[#allocation90_spill] sm:$0xff] %v11507_v27  ;;  %v4701_v1 = vmul.f32 -0.5, %v4637_v58  ;;  %v14919_v59 = vsub.f32 %v14917_v11, %v14918_v21  ;;  %v5315_v9 = vadd.f32 %v11359_v33, %v5314_v16  ;;  %v4703_v15 = vmul.f32 -0.5, %v4639_v54  ;;  %v14926_v16 = vld [vmem:[#allocation44_spill] sm:$0xff]  ;;  %v14931_v11 = vld [vmem:[#allocation215_spill] sm:$0xff] }
 0x38b   :  { %14916 = vst [vmem:[#allocation145_spill] sm:$0xff] %v11511_v38  ;;  %v4521_v60 = vmul.f32 2.0, %v14920_v3  ;;  %v4225_v50 = vadd.f32 %v4224_v53, %v4064_v23  ;;  %v11518_v13 = vpop.eup %7665  ;;  %v11520_v7 = vmul.f32 3.0, %v1490_v63  ;;  %v11522_v29 = vmul.f32 3.0, %v1491_v22  ;;  %v3644_v3 = vpop.f32.mrf.mxu0 }
 0x38c   :  { %v4641_v0 = vmax.f32 %v14919_v59, 0.0  ;;  %14921 = vst [vmem:[#allocation243_spill] sm:$0xff] %v11518_v13  ;;  %v4643_v37 = vmax.f32 %v4579_v32, 0.0  ;;  %v3640_v40 = vadd.f32 %v3639_v19, %v14924_v41  ;;  %v11525_v58 = vpop.eup %7667  ;;  %v5316_v21 = vadd.f32 %v11507_v27, %v5315_v9  ;;  %v931_v32 = vpop.xlane.xlu1 %930  ;;  %v14928_v19 = vld [vmem:[#allocation60_spill] sm:$0xff]  ;;  %v14929_v41 = vld [vmem:[#allocation75_spill] sm:$0xff] }
 0x38d   :  { %14922 = vst [vmem:[#allocation166_spill] sm:$0xff] %v11520_v7  ;;  %v4523_v54 = vmul.f32 2.0, %v14926_v16  ;;  %v4510_v59 = vmul.f32 2.0, %v4225_v50  ;;  %v3854_v23 = vpop.f32.mrf.mxu1  ;;  %7671 = vpow2.f32 %v4801_v48  ;;  %v4805_v53 = vmul.f32 1.442695, %v4701_v1  ;;  %v14937_v7 = vld [vmem:[#allocation196_spill] sm:$0xff] }
 0x38e   :  { %14923 = vst [vmem:[#allocation98_spill] sm:$0xff] %v11522_v29  ;;  %v4705_v63 = vmul.f32 -0.5, %v4641_v0  ;;  %v3855_v13 = vadd.f32 %v3854_v23, %v3640_v40  ;;  %v4809_v38 = vmul.f32 1.442695, %v4703_v15  ;;  %v14930_v35 = vsub.f32 %v14928_v19, %v14929_v41  ;;  %v4067_v16 = vpop.f32.mrf.mxu2  ;;  %v14933_v40 = vld [vmem:[#allocation42_spill] sm:$0xff]  ;;  %v14936_v15 = vld [vmem:[#allocation11_spill] sm:$0xff] }
 0x38f   :  { %14925 = vst [vmem:[#allocation122_spill] sm:$0xff] %v11525_v58  ;;  %v11530_v22 = vpop.eup %7669  ;;  %v4585_v33 = vsub.f32 %v14931_v11, %v4521_v60  ;;  %v4574_v9 = vsub.f32 %v10914_v26, %v4510_v59  ;;  %v11537_v50 = vadd.f32 1e-20, %v931_v32  ;;  %v5317_v48 = vadd.f32 %v11525_v58, %v5316_v21  ;;  %v14934_v23 = vld [vmem:[#allocation50_spill] sm:$0xff]  ;;  %v4228_v41 = vpop.f32.mrf.mxu3 }
 0x390   :  { %14927 = vst [vmem:[#allocation171_spill] sm:$0xff] %v11530_v22  ;;  %v4645_v29 = vmax.f32 %v14930_v35, 0.0  ;;  %v4707_v1 = vmul.f32 -0.5, %v4643_v37  ;;  %v4068_v0 = vadd.f32 %v4067_v16, %v3855_v13  ;;  %v14935_v6 = vsub.f32 %v14933_v40, %v14934_v23  ;;  %v14939_v16 = vld [vmem:[#allocation23_spill] sm:$0xff]  ;;  %v14940_v40 = vld [vmem:[#allocation48_spill] sm:$0xff] }
 0x391   :  { %14932 = vst [vmem:[#allocation85_spill] sm:$0xff] %v11537_v50  ;;  %v4587_v51 = vsub.f32 %v14936_v15, %v4523_v54  ;;  %v4527_v19 = vmul.f32 2.0, %v14937_v7  ;;  %v4638_v35 = vmax.f32 %v4574_v9, 0.0  ;;  %v5318_v60 = vadd.f32 %v11530_v22, %v5317_v48  ;;  %v14941_v15 = vld [vmem:[#allocation208_spill] sm:$0xff] }
 0x392   :  { %v4647_v12 = vmax.f32 %v14935_v6, 0.0  ;;  %7673 = vpow2.f32 %v4805_v53  ;;  %v4813_v26 = vmul.f32 1.442695, %v4705_v63  ;;  %v4229_v11 = vadd.f32 %v4228_v41, %v4068_v0 }
 0x393   :  { %7675 = vpow2.f32 %v4809_v38  ;;  %v4709_v59 = vmul.f32 -0.5, %v4645_v29  ;;  %v4649_v21 = vmax.f32 %v4585_v33, 0.0  ;;  %v4702_v37 = vmul.f32 -0.5, %v4638_v35  ;;  %v11546_v13 = vpop.eup %7671  ;;  %v3649_v53 = vpop.f32.mrf.mxu0  ;;  %v14942_v38 = vld [vmem:[#allocation33_spill] sm:$0xff]  ;;  %v14943_v33 = vld [vmem:[#allocation142_spill] sm:$0xff] }
 0x394   :  { %14938 = vst [vmem:[#allocation230_spill] sm:$0xff] %v11546_v13  ;;  %v4817_v32 = vmul.f32 1.442695, %v4707_v1  ;;  %v4529_v6 = vmul.f32 2.0, %v14939_v16  ;;  %v3645_v54 = vadd.f32 %v3644_v3, %v14940_v40  ;;  %v4512_v23 = vmul.f32 2.0, %v4229_v11  ;;  %v14948_v40 = vld [vmem:[#allocation22_spill] sm:$0xff] }
 0x395   :  { %v4711_v7 = vmul.f32 -0.5, %v4647_v12  ;;  %v4651_v9 = vmax.f32 %v4587_v51, 0.0  ;;  %v4591_v58 = vsub.f32 %v14941_v15, %v4527_v19  ;;  %v4807_v48 = vmul.f32 1.442695, %v4702_v37  ;;  %v3860_v63 = vpop.f32.mrf.mxu1  ;;  %v14945_v51 = vld [vmem:[#allocation28_spill] sm:$0xff]  ;;  %v14946_v12 = vld [vmem:[#allocation41_spill] sm:$0xff] }
 0x396   :  { %7677 = vpow2.f32 %v4813_v26  ;;  %v4531_v29 = vmul.f32 2.0, %v14942_v38  ;;  %v4576_v0 = vsub.f32 %v14943_v33, %v4512_v23  ;;  %v3861_v35 = vadd.f32 %v3860_v63, %v3645_v54  ;;  %v4071_v3 = vpop.f32.mrf.mxu2  ;;  %v14951_v33 = vld [vmem:[#allocation27_spill] sm:$0xff] }
 0x397   :  { %v5319_v1 = vadd.f32 %v11546_v13, %v5318_v60  ;;  %v4821_v41 = vmul.f32 1.442695, %v4709_v59  ;;  %v4713_v16 = vmul.f32 -0.5, %v4649_v21  ;;  %7679 = vpow2.f32 %v4807_v48  ;;  %v4232_v59 = vpop.f32.mrf.mxu3  ;;  %v889_v21 = vpop.xlane.xlu2 %888  ;;  %v14950_v48 = vld [vmem:[#allocation206_spill] sm:$0xff] }
 0x398   :  { %v11554_v11 = vpop.eup %7673  ;;  %v14947_v19 = vsub.f32 %v14945_v51, %v14946_v12  ;;  %v4593_v15 = vsub.f32 %v14948_v40, %v4529_v6  ;;  %v4640_v26 = vmax.f32 %v4576_v0, 0.0  ;;  %v4072_v4 = vadd.f32 %v4071_v3, %v3861_v35 }
 0x399   :  { %14944 = vst [vmem:[#allocation232_spill] sm:$0xff] %v11554_v11  ;;  %v11560_v38 = vpop.eup %7675  ;;  %7681 = vpow2.f32 %v4817_v32  ;;  %v4825_v54 = vmul.f32 1.442695, %v4711_v7  ;;  %v4715_v23 = vmul.f32 -0.5, %v4651_v9  ;;  %v4655_v60 = vmax.f32 %v4591_v58, 0.0 }
 0x39a   :  { %v4653_v37 = vmax.f32 %v14947_v19, 0.0  ;;  %14949 = vst [vmem:[#allocation235_spill] sm:$0xff] %v11560_v38  ;;  %vm1040_vm14 = vweird.f32 %v11376_v8  ;;  %vm1041_vm15 = vweird.f32 %v11435_v39  ;;  %v4595_v63 = vsub.f32 %v14950_v48, %v4531_v29  ;;  %v14970_v8 = vld [vmem:[#allocation56_spill] sm:$0xff] }
 0x39b   :  { %v4470_v51 = vmul.f32 2.0, %v14951_v33  ;;  %v4704_v12 = vmul.f32 -0.5, %v4640_v26  ;;  %v4233_v6 = vadd.f32 %v4232_v59, %v4072_v4  ;;  %v11566_v0 = vadd.f32 1e-20, %v889_v21  ;;  %v14954_v33 = vld [vmem:[#allocation46_spill] sm:$0xff]  ;;  %v3654_v4 = vpop.f32.mrf.mxu0  ;;  %v886_v21 = vpop.xlane.xlu0 %885  ;;  %vm11605_vm0 = vmor %vm1040_vm14, %vm1041_vm15 }
 0x39c   :  { %v5320_v35 = vadd.f32 %v11554_v11, %v5319_v1  ;;  %7683 = vpow2.f32 %v4821_v41  ;;  %v4829_v32 = vmul.f32 1.442695, %v4713_v16  ;;  %v11569_v7 = vpop.eup %7677  ;;  %v4717_v58 = vmul.f32 -0.5, %v4653_v37  ;;  %v14955_v1 = vld [vmem:[#allocation209_spill] sm:$0xff] }
 0x39d   :  { %14952 = vst [vmem:[#allocation237_spill] sm:$0xff] %v11569_v7  ;;  %v4657_v9 = vmax.f32 %v4593_v15, 0.0  ;;  %v4811_v3 = vmul.f32 1.442695, %v4704_v12  ;;  %v4514_v19 = vmul.f32 2.0, %v4233_v6  ;;  %v11571_v40 = vpop.eup %7679  ;;  %7685 = vpow2.f32 %v4825_v54  ;;  %v3866_v59 = vpop.f32.mrf.mxu1 }
 0x39e   :  { %14953 = vst [vmem:[#allocation30_spill] sm:$0xff] %v11571_v40  ;;  %v4833_v29 = vmul.f32 1.442695, %v4715_v23  ;;  %v4719_v48 = vmul.f32 -0.5, %v4655_v60  ;;  %v3650_v26 = vadd.f32 %v3649_v53, %v14954_v33  ;;  %v4659_v13 = vmax.f32 %v4595_v63, 0.0  ;;  %v4075_v23 = vpop.f32.mrf.mxu2 }
 0x39f   :  { %v4534_v41 = vsub.f32 %v14955_v1, %v4470_v51  ;;  %7687 = vpow2.f32 %v4811_v3  ;;  %v4578_v16 = vsub.f32 %v10922_v25, %v4514_v19  ;;  %v11576_v37 = vpop.eup %7681  ;;  %v11578_v15 = vadd.f32 1e-20, %v886_v21  ;;  %v4236_v19 = vpop.f32.mrf.mxu3  ;;  %v14960_v21 = vld [vmem:[#allocation51_spill] sm:$0xff] }
 0x3a0   :  { %14956 = vst [vmem:[#allocation155_spill] sm:$0xff] %v11576_v37  ;;  %v5321_v12 = vadd.f32 %v11560_v38, %v5320_v35  ;;  %7689 = vpow2.f32 %v4829_v32  ;;  %v3867_v54 = vadd.f32 %v3866_v59, %v3650_v26  ;;  %v4837_v60 = vmul.f32 1.442695, %v4717_v58  ;;  %v14959_v59 = vld [vmem:[#allocation164_spill] sm:$0xff]  ;;  %v11618_v22 = vpop.xlane.xlu2 %927 }
 0x3a1   :  { %v4721_v53 = vmul.f32 -0.5, %v4657_v9  ;;  %v4642_v6 = vmax.f32 %v4578_v16, 0.0  ;;  %v4913_v63 = vadd.f32 %v11571_v40, %v11554_v11  ;;  %7691 = vrsqrt.f32 %v11566_v0 }
 0x3a2   :  { %v11583_v33 = vpop.eup %7683  ;;  %v5322_v25 = vadd.f32 %v11569_v7, %v5321_v12  ;;  %v4841_v51 = vmul.f32 1.442695, %v4719_v48  ;;  %v4076_v3 = vadd.f32 %v4075_v23, %v3867_v54  ;;  %7693 = vpow2.f32 %v4833_v29 }
 0x3a3   :  { %14957 = vst [vmem:[#allocation244_spill] sm:$0xff] %v11583_v33  ;;  %v4723_v35 = vmul.f32 -0.5, %v4659_v13  ;;  %v4598_v32 = vmax.f32 %v4534_v41, 0.0  ;;  %v4706_v26 = vmul.f32 -0.5, %v4642_v6  ;;  %4914 = vadd.xlane.f32.xlu1 %v4913_v63  ;;  %v11587_v58 = vpop.eup %7685  ;;  %7695 = vrsqrt.f32 %v11578_v15 }
 0x3a4   :  { %14958 = vst [vmem:[#allocation86_spill] sm:$0xff] %v11587_v58  ;;  %v5323_v9 = vadd.f32 %v11576_v37, %v5322_v25  ;;  %v14961_v1 = vsub.f32 %v14959_v59, %v14960_v21  ;;  %v4237_v11 = vadd.f32 %v4236_v19, %v4076_v3  ;;  %v14963_v48 = vsub.f32 1.5, %v11505_v62  ;;  %v3659_v62 = vpop.f32.mrf.mxu0  ;;  %v14967_v19 = vld [vmem:[#allocation203_spill] sm:$0xff] }
 0x3a5   :  { %v11594_v12 = vpop.eup %7687  ;;  %7697 = vpow2.f32 %v4837_v60  ;;  %v4845_v29 = vmul.f32 1.442695, %v4721_v53  ;;  %v4815_v41 = vmul.f32 1.442695, %v4706_v26  ;;  %v3872_v25 = vpop.f32.mrf.mxu1  ;;  %v4849_v53 = vmul.f32 1.442695, %v4723_v35 }
 0x3a6   :  { %v4600_v16 = vmax.f32 %v14961_v1, 0.0  ;;  %14962 = vst [vmem:[#allocation168_spill] sm:$0xff] %v11594_v12  ;;  %v1039_v13 = vmul.f32 %v11435_v39, %v14963_v48  ;;  %v11599_v54 = vpop.eup %7689  ;;  %v5324_v6 = vadd.f32 %v11583_v33, %v5323_v9  ;;  %7699 = vpow2.f32 %v4841_v51  ;;  %v14968_v26 = vld [vmem:[#allocation194_spill] sm:$0xff]  ;;  %v4079_v27 = vpop.f32.mrf.mxu2 }
 0x3a7   :  { %14964 = vst [vmem:[#allocation116_spill] sm:$0xff] %v11599_v54  ;;  %v4516_v63 = vmul.f32 2.0, %v4237_v11  ;;  %v4916_v60 = vadd.f32 %v11594_v12, %v11560_v38  ;;  %v4662_v3 = vmul.f32 -0.5, %v4598_v32  ;;  %v14969_v59 = vsub.f32 %v14967_v19, %v14968_v26  ;;  %v11616_v48 = vpop.eup %7691  ;;  %v14973_v19 = vld [vmem:[#allocation195_spill] sm:$0xff] }
 0x3a8   :  { %v3655_v1 = vadd.f32 %v3654_v4, %v14970_v8  ;;  %v5325_v51 = vadd.f32 %v11587_v58, %v5324_v6  ;;  %v4664_v11 = vmul.f32 -0.5, %v4600_v16  ;;  %7701 = vpow2.f32 %v4815_v41  ;;  %v11622_v35 = vpop.eup %7693  ;;  %v14972_v4 = vld [vmem:[#allocation202_spill] sm:$0xff]  ;;  %v4240_v6 = vpop.f32.mrf.mxu3 }
 0x3a9   :  { %v4602_v21 = vmax.f32 %v14969_v59, 0.0  ;;  %v4580_v9 = vsub.f32 %v11012_v18, %v4516_v63  ;;  %4917 = vadd.xlane.f32.xlu0 %v4916_v60  ;;  %14971 = vst [vmem:[#allocation131_spill] sm:$0xff] %v11622_v35  ;;  %v1043_v32 = vsel %vm11605_vm0, %v11435_v39, %v1039_v13  ;;  %7703 = vpow2.f32 %v4845_v29  ;;  %v11630_v38 = vpop.eup %7695  ;;  %v11640_v39 = vpop.xlane.xlu0 %936  ;;  %v14977_v60 = vld [vmem:[#allocation198_spill] sm:$0xff] }
 0x3aa   :  { %v14974_v26 = vsub.f32 %v14972_v4, %v14973_v19  ;;  %v3873_v8 = vadd.f32 %v3872_v25, %v3655_v1  ;;  %v11634_v16 = vmul.f32 %v11498_v24, %v11003_v31  ;;  %7705 = vrsqrt.f32 %v11537_v50 }
 0x3ab   :  { %v5326_v18 = vadd.f32 %v11599_v54, %v5325_v51  ;;  %v4644_v41 = vmax.f32 %v4580_v9, 0.0  ;;  %v11638_v23 = vpop.eup %7697  ;;  %7707 = vpow2.f32 %v4849_v53  ;;  %v4727_v13 = vmul.f32 1.442695, %v4662_v3  ;;  %v14978_v9 = vld [vmem:[#allocation199_spill] sm:$0xff] }
 0x3ac   :  { %v4604_v59 = vmax.f32 %v14974_v26, 0.0  ;;  %14975 = vst [vmem:[#allocation176_spill] sm:$0xff] %v11638_v23  ;;  %v4666_v29 = vmul.f32 -0.5, %v4602_v21  ;;  %v4080_v63 = vadd.f32 %v4079_v27, %v3873_v8  ;;  %v11642_v25 = vpop.eup %7699  ;;  %v1418_v1 = vmul.f32 %v14977_v60, %v1043_v32  ;;  %v14980_v21 = vld [vmem:[#allocation45_spill] sm:$0xff] }
 0x3ad   :  { %14976 = vst [vmem:[#allocation83_spill] sm:$0xff] %v11642_v25  ;;  %v5327_v24 = vadd.f32 %v11622_v35, %v5326_v18  ;;  %v4731_v4 = vmul.f32 1.442695, %v4664_v11  ;;  %v4708_v19 = vmul.f32 -0.5, %v4644_v41  ;;  %v1497_v51 = vmul.f32 %v11501_v61, %v11008_v43  ;;  %v3664_v18 = vpop.f32.mrf.mxu0  ;;  %v3878_v11 = vpop.f32.mrf.mxu1  ;;  %v14981_v60 = vld [vmem:[#allocation177_spill] sm:$0xff] }
 0x3ae   :  { %v1419_v26 = vmul.f32 %v14978_v9, %v1043_v32  ;;  %v4668_v12 = vmul.f32 -0.5, %v4604_v59  ;;  %v4241_v40 = vadd.f32 %v4240_v6, %v4080_v63  ;;  %v11649_v56 = vpop.eup %7701  ;;  %v1065_v27 = vmul.f32 %v11616_v48, %v11566_v0 }
 0x3af   :  { %14979 = vst [vmem:[#allocation143_spill] sm:$0xff] %v11649_v56  ;;  %v5328_v53 = vadd.f32 %v11638_v23, %v5327_v24  ;;  %v4819_v3 = vmul.f32 1.442695, %v4708_v19  ;;  %v3660_v8 = vadd.f32 %v3659_v62, %v14980_v21  ;;  %v11655_v41 = vpop.eup %7703  ;;  %7709 = vpow2.f32 %v4727_v13  ;;  %v4083_v19 = vpop.f32.mrf.mxu2 }
 0x3b0   :  { %v4735_v61 = vmul.f32 1.442695, %v4666_v29  ;;  %v3620_v32 = vadd.f32 %v11265_v34, %v14981_v60  ;;  %v4518_v59 = vmul.f32 2.0, %v4241_v40  ;;  %v11659_v6 = vpop.eup %7705  ;;  %v1482_v63 = vmul.f32 %v1418_v1, %v11003_v31  ;;  %v11671_v29 = vpop.xlane.xlu2 %873 }
 0x3b1   :  { %14982 = vst [vmem:[#allocation165_spill] sm:$0xff] %v11659_v6  ;;  %v5329_v9 = vadd.f32 %v11642_v25, %v5328_v53  ;;  %7711 = vpow2.f32 %v4731_v4  ;;  %v3879_v24 = vadd.f32 %v3878_v11, %v3660_v8  ;;  %v11663_v62 = vpop.eup %7707  ;;  %v4739_v21 = vmul.f32 1.442695, %v4668_v12  ;;  %v4244_v53 = vpop.f32.mrf.mxu3  ;;  %v14984_v12 = vld [vmem:[#allocation71_spill] sm:$0xff] }
 0x3b2   :  { %v3831_v23 = vadd.f32 %v11315_v5, %v3620_v32  ;;  %v4582_v13 = vsub.f32 %v10918_v36, %v4518_v59  ;;  %v4919_v34 = vadd.f32 %v11649_v56, %v11569_v7  ;;  %v1055_v40 = vmul.f32 %v11630_v38, %v11578_v15  ;;  %14983 = vst [vmem:[#allocation245_spill] sm:$0xff] %v11671_v29 }
 0x3b3   :  { %v5330_v1 = vadd.f32 %v11655_v41, %v5329_v9  ;;  %7713 = vpow2.f32 %v4819_v3  ;;  %v4084_v4 = vadd.f32 %v4083_v19, %v3879_v24  ;;  %v1066_v8 = vmul.f32 %v11616_v48, %v1065_v27  ;;  %v883_v3 = vpop.xlane.xlu0 %882 }
 0x3b4   :  { %7715 = vpow2.f32 %v4735_v61  ;;  %v3630_v5 = vadd.f32 %v11382_v14, %v14984_v12  ;;  %v4646_v36 = vmax.f32 %v4582_v13, 0.0  ;;  %4920 = vadd.xlane.f32.xlu0 %v4919_v34  ;;  %v1483_v11 = vmul.f32 %v1419_v26, %v11008_v43 }
 0x3b5   :  { %v1205_v60 = vmul.f32 %v11659_v6, %v11537_v50  ;;  %v5331_v32 = vadd.f32 %v11663_v62, %v5330_v1  ;;  %v4245_v59 = vadd.f32 %v4244_v53, %v4084_v4  ;;  %v11681_v9 = vpop.eup %7709  ;;  %7717 = vpow2.f32 %v4739_v21  ;;  %v3669_v34 = vpop.f32.mrf.mxu0 }
 0x3b6   :  { %14985 = vst [vmem:[#allocation153_spill] sm:$0xff] %v11681_v9  ;;  %v4052_v27 = vadd.f32 %v11331_v49, %v3831_v23  ;;  %v3843_v61 = vadd.f32 %v11433_v46, %v3630_v5  ;;  %v4710_v24 = vmul.f32 -0.5, %v4646_v36  ;;  %v11688_v19 = vmul.f32 3.0, %v11634_v16  ;;  %v3884_v1 = vpop.f32.mrf.mxu1  ;;  %v14991_v16 = vld [vmem:[#allocation38_spill] sm:$0xff] }
 0x3b7   :  { %v11685_v14 = vpop.eup %7711  ;;  %v11690_v26 = vmul.f32 3.0, %v1497_v51  ;;  %vm1070_vm1 = vweird.f32 %v11566_v0  ;;  %v4520_v13 = vmul.f32 2.0, %v4245_v59  ;;  %v11693_v4 = vmul.f32 3.0, %v1482_v63  ;;  %v14992_v51 = vld [vmem:[#allocation224_spill] sm:$0xff]  ;;  %v4087_v29 = vpop.f32.mrf.mxu2  ;;  %v15006_v0 = vld [vmem:[#allocation173_spill] sm:$0xff] }
 0x3b8   :  { %14986 = vst [vmem:[#allocation84_spill] sm:$0xff] %v11685_v14  ;;  %v1067_v21 = vmul.f32 0.5, %v1066_v8  ;;  %v1056_v49 = vmul.f32 %v11630_v38, %v1055_v40  ;;  %v4823_v23 = vmul.f32 1.442695, %v4710_v24  ;;  %v11698_v53 = vmul.f32 3.0, %v1483_v11 }
 0x3b9   :  { %14987 = vst [vmem:[#allocation162_spill] sm:$0xff] %v11688_v19  ;;  %v11696_v46 = vpop.eup %7713  ;;  %v5332_v12 = vrot.slane %v5331_v32, 4  ;;  %v3665_v5 = vadd.f32 %v3664_v18, %v14991_v16  ;;  %v4584_v36 = vsub.f32 %v14992_v51, %v4520_v13  ;;  %v1206_v59 = vmul.f32 %v11659_v6, %v1205_v60  ;;  %v4248_v13 = vpop.f32.mrf.mxu3 }
 0x3ba   :  { %14988 = vst [vmem:[#allocation161_spill] sm:$0xff] %v11690_v26  ;;  %v11702_v7 = vpop.eup %7715  ;;  %vm1060_vm2 = vweird.f32 %v11578_v15  ;;  %v4213_v63 = vadd.f32 %v11351_v45, %v4052_v27  ;;  %v4060_v40 = vadd.f32 %v11446_v42, %v3843_v61  ;;  %7719 = vpow2.f32 %v4823_v23  ;;  %v11717_v27 = vpop.xlane.xlu2 %924 }
 0x3bb   :  { %14989 = vst [vmem:[#allocation170_spill] sm:$0xff] %v11696_v46  ;;  %v11708_v8 = vadd.f32 1e-20, %v883_v3  ;;  %v5338_v11 = vadd.f32 %v11685_v14, %v11681_v9  ;;  %v4648_v18 = vmax.f32 %v4584_v36, 0.0  ;;  %v3885_v24 = vadd.f32 %v3884_v1, %v3665_v5  ;;  %v11712_v16 = vpop.eup %7717 }
 0x3bc   :  { %14990 = vst [vmem:[#allocation39_spill] sm:$0xff] %v11698_v53  ;;  %v1068_v51 = vsub.f32 1.5, %v1067_v21  ;;  %vm1071_vm3 = vweird.f32 %v11616_v48  ;;  %v1057_v60 = vmul.f32 0.5, %v1056_v49  ;;  %v4922_v45 = vadd.f32 %v11696_v46, %v11576_v37 }
 0x3bd   :  { %14993 = vst [vmem:[#allocation175_spill] sm:$0xff] %v11702_v7  ;;  %v5333_v42 = vadd.f32 %v5332_v12, %v5331_v32  ;;  %v5339_v3 = vadd.f32 %v11702_v7, %v5338_v11  ;;  %v4712_v61 = vmul.f32 -0.5, %v4648_v18  ;;  %v4088_v23 = vadd.f32 %v4087_v29, %v3885_v24  ;;  %v15001_v24 = vld [vmem:[#allocation16_spill] sm:$0xff]  ;;  %vm1072_vm5 = vmor %vm1070_vm1, %vm1071_vm3 }
 0x3be   :  { %14994 = vst [vmem:[#allocation178_spill] sm:$0xff] %v11712_v16  ;;  %v11720_v14 = vmul.f32 0.5, %v1206_v59  ;;  %vm1061_vm4 = vweird.f32 %v11630_v38  ;;  %v4504_v1 = vmul.f32 2.0, %v4213_v63  ;;  %v4221_v21 = vadd.f32 %v11460_v17, %v4060_v40  ;;  %4923 = vadd.xlane.f32.xlu2 %v4922_v45  ;;  %v3890_v32 = vpop.f32.mrf.mxu1  ;;  %v11736_v40 = vpop.xlane.xlu0 %921  ;;  %v15002_v45 = vld [vmem:[#allocation31_spill] sm:$0xff] }
 0x3bf   :  { %14995 = vst [vmem:[#allocation179_spill] sm:$0xff] %v11717_v27  ;;  %7721 = vrsqrt.f32 %v11708_v8  ;;  %v5340_v49 = vadd.f32 %v11712_v16, %v5339_v3  ;;  %v4827_v5 = vmul.f32 1.442695, %v4712_v61  ;;  %v4249_v36 = vadd.f32 %v4248_v13, %v4088_v23  ;;  %v3674_v27 = vpop.f32.mrf.mxu0  ;;  %v4091_v61 = vpop.f32.mrf.mxu2  ;;  %v15004_v23 = vld [vmem:[#allocation92_spill] sm:$0xff]  ;;  %vm11764_vm6 = vmor %vm1060_vm2, %vm1061_vm4 }
 0x3c0   :  { %14996 = vst [vmem:[#allocation181_spill] sm:$0xff] %v11720_v14  ;;  %v11726_v12 = vpop.eup %7719  ;;  %v1058_v11 = vsub.f32 1.5, %v1057_v60  ;;  %v11729_v29 = vadd.f32 1e-20, %v11618_v22  ;;  %v11732_v59 = vadd.f32 1e-20, %v11640_v39  ;;  %v1069_v63 = vmul.f32 %v11616_v48, %v1068_v51 }
 0x3c1   :  { %14997 = vst [vmem:[#allocation183_spill] sm:$0xff] %v11726_v12  ;;  %v4506_v17 = vmul.f32 2.0, %v11405_v2  ;;  %v5334_v18 = vrot.slane %v5333_v42, 2  ;;  %v5341_v13 = vadd.f32 %v15001_v24, %v5340_v49  ;;  %v3670_v3 = vadd.f32 %v3669_v34, %v15002_v45  ;;  %v15003_v22 = vld [vmem:[#allocation214_spill] sm:$0xff]  ;;  %v4252_v45 = vpop.f32.mrf.mxu3 }
 0x3c2   :  { %14998 = vst [vmem:[#allocation34_spill] sm:$0xff] %v11729_v29  ;;  %v4568_v39 = vsub.f32 %v15003_v22, %v4504_v1  ;;  %v4508_v60 = vmul.f32 2.0, %v4221_v21  ;;  %7723 = vpow2.f32 %v4827_v5  ;;  %v4522_v2 = vmul.f32 2.0, %v4249_v36  ;;  %v15007_v21 = vld [vmem:[#allocation212_spill] sm:$0xff]  ;;  %v15011_v22 = vld [vmem:[#allocation10_spill] sm:$0xff] }
 0x3c3   :  { %14999 = vst [vmem:[#allocation160_spill] sm:$0xff] %v11732_v59  ;;  %v5342_v51 = vadd.f32 %v15004_v23, %v5341_v13  ;;  %v3891_v49 = vadd.f32 %v3890_v32, %v3670_v3  ;;  %v4925_v34 = vadd.f32 %v11726_v12, %v11583_v33  ;;  %v1059_v6 = vmul.f32 %v11630_v38, %v1058_v11  ;;  %v11770_v11 = vpop.xlane.xlu2 %4869 }
 0x3c4   :  { %15000 = vst [vmem:[#allocation172_spill] sm:$0xff] %v11736_v40  ;;  %v15005_v40 = vsub.f32 %v14859_v30, %v11308_v52  ;;  %7725 = vrsqrt.f32 %v11729_v29  ;;  %v4570_v1 = vsub.f32 %v15006_v0, %v4506_v17  ;;  %v4586_v5 = vsub.f32 %v15007_v21, %v4522_v2  ;;  %v15010_v30 = vld [vmem:[#allocation103_spill] sm:$0xff]  ;;  %v15012_v0 = vld [vmem:[#allocation190_spill] sm:$0xff] }
 0x3c5   :  { %v11755_v36 = vpop.eup %7721  ;;  %v11758_v13 = vsel %vm1072_vm5, %v11616_v48, %v1069_v63  ;;  %7727 = vrsqrt.f32 %v11732_v59  ;;  %v5343_v32 = vadd.f32 %v15010_v30, %v5342_v51  ;;  %v4092_v17 = vadd.f32 %v4091_v61, %v3891_v49 }
 0x3c6   :  { %v4630_v37 = vmax.f32 %v15005_v40, 0.0  ;;  %v5335_v40 = vadd.f32 %v5334_v18, %v5333_v42  ;;  %v4632_v3 = vmax.f32 %v4568_v39, 0.0  ;;  %v4572_v48 = vsub.f32 %v15011_v22, %v4508_v60  ;;  %4926 = vadd.xlane.f32.xlu2 %v4925_v34  ;;  %v3896_v14 = vpop.f32.mrf.mxu1  ;;  %v4867_v51 = vpop.xlane.xlu0 %4866  ;;  %v15016_v22 = vld [vmem:[#allocation9_spill] sm:$0xff] }
 0x3c7   :  { %v4650_v63 = vmax.f32 %v4586_v5, 0.0  ;;  %v5344_v2 = vadd.f32 %v10947_v47, %v5343_v32  ;;  %v3675_v21 = vadd.f32 %v3674_v27, %v15012_v0  ;;  %v4253_v33 = vadd.f32 %v4252_v45, %v4092_v17  ;;  %v3679_v50 = vpop.f32.mrf.mxu0  ;;  %v4095_v27 = vpop.f32.mrf.mxu2 }
 0x3c8   :  { %v4694_v15 = vmul.f32 -0.5, %v4630_v37  ;;  %v11775_v59 = vpop.eup %7723  ;;  %v1063_v61 = vsel %vm11764_vm6, %v11630_v38, %v1059_v6  ;;  %v1045_v42 = vmul.f32 %v11755_v36, %v11708_v8  ;;  %v4634_v18 = vmax.f32 %v4570_v1, 0.0 }
 0x3c9   :  { %15013 = vst [vmem:[#allocation246_spill] sm:$0xff] %v11775_v59  ;;  %v4714_v39 = vmul.f32 -0.5, %v4650_v63  ;;  %v5345_v60 = vadd.f32 %v11016_v44, %v5344_v2  ;;  %v4524_v37 = vmul.f32 2.0, %v4253_v33  ;;  %v3897_v49 = vadd.f32 %v3896_v14, %v3675_v21  ;;  %v4256_v33 = vpop.f32.mrf.mxu3 }
 0x3ca   :  { %v4928_v34 = vadd.f32 %v11775_v59, %v11587_v58  ;;  %v11785_v45 = vpop.eup %7725  ;;  %v5336_v5 = vrot.slane %v5335_v40, 1  ;;  %v4696_v32 = vmul.f32 -0.5, %v4632_v3  ;;  %v4636_v52 = vmax.f32 %v4572_v48, 0.0  ;;  %v15017_v3 = vld [vmem:[#allocation191_spill] sm:$0xff] }
 0x3cb   :  { %15014 = vst [vmem:[#allocation182_spill] sm:$0xff] %v11785_v45  ;;  %v4831_v38 = vmul.f32 1.442695, %v4714_v39  ;;  %v11787_v6 = vpop.eup %7727  ;;  %v5346_v1 = vadd.f32 %v11050_v10, %v5345_v60  ;;  %v4791_v17 = vmul.f32 1.442695, %v4694_v15  ;;  %v4588_v63 = vsub.f32 %v15016_v22, %v4524_v37  ;;  %v11797_v60 = vpop.xlane.xlu1 %876 }
 0x3cc   :  { %15015 = vst [vmem:[#allocation6_spill] sm:$0xff] %v11787_v6  ;;  %v4096_v2 = vadd.f32 %v4095_v27, %v3897_v49  ;;  %4929 = vadd.xlane.f32.xlu1 %v4928_v34  ;;  %v1046_v14 = vmul.f32 %v11755_v36, %v1045_v42  ;;  %v4698_v0 = vmul.f32 -0.5, %v4634_v18  ;;  %v11792_v21 = vadd.f32 1e-20, %v4867_v51  ;;  %v15019_v27 = vld [vmem:[#allocation151_spill] sm:$0xff]  ;;  %v4873_v18 = vpop.xlane.xlu2 %4872 }
 0x3cd   :  { %7729 = vpow2.f32 %v4831_v38  ;;  %v1424_v48 = vmul.f32 %v15017_v3, %v11758_v13  ;;  %v5347_v39 = vadd.f32 %v11115_v57, %v5346_v1  ;;  %v4652_v58 = vmax.f32 %v4588_v63, 0.0  ;;  %15018 = vst [vmem:[#allocation174_spill] sm:$0xff] %v11797_v60  ;;  %v15020_v63 = vld [vmem:[#allocation70_spill] sm:$0xff] }
 0x3ce   :  { %v4257_v6 = vadd.f32 %v4256_v33, %v4096_v2  ;;  %v5337_v15 = vadd.f32 %v5336_v5, %v5335_v40  ;;  %v4795_v37 = vmul.f32 1.442695, %v4696_v32  ;;  %v4700_v49 = vmul.f32 -0.5, %v4636_v52  ;;  %v3902_v22 = vpop.f32.mrf.mxu1  ;;  %v15021_v40 = vld [vmem:[#allocation59_spill] sm:$0xff] }
 0x3cf   :  { %v3680_v34 = vadd.f32 %v3679_v50, %v15019_v27  ;;  %v5348_v42 = vadd.f32 %v11161_v55, %v5347_v39  ;;  %7731 = vpow2.f32 %v4791_v17  ;;  %v4716_v51 = vmul.f32 -0.5, %v4652_v58  ;;  %v3684_v52 = vpop.f32.mrf.mxu0  ;;  %v4099_v33 = vpop.f32.mrf.mxu2  ;;  %v15023_v58 = vld [vmem:[#allocation108_spill] sm:$0xff] }
 0x3d0   :  { %v4526_v38 = vmul.f32 2.0, %v4257_v6  ;;  %v1047_v19 = vmul.f32 0.5, %v1046_v14  ;;  %v4799_v3 = vmul.f32 1.442695, %v4698_v0  ;;  %7733 = vrsqrt.f32 %v11792_v21  ;;  %v15024_v0 = vld [vmem:[#allocation113_spill] sm:$0xff] }
 0x3d1   :  { %v3903_v1 = vadd.f32 %v3902_v22, %v3680_v34  ;;  %v1425_v2 = vmul.f32 %v15020_v63, %v11758_v13  ;;  %v1422_v5 = vmul.f32 %v15021_v40, %v1063_v61  ;;  %v5349_v32 = vadd.f32 %v11198_v20, %v5348_v42  ;;  %v4260_v22 = vpop.f32.mrf.mxu3 }
 0x3d2   :  { %v4835_v50 = vmul.f32 1.442695, %v4716_v51  ;;  %v1423_v6 = vmul.f32 %v15023_v58, %v1063_v61  ;;  %7735 = vpow2.f32 %v4795_v37  ;;  %v4803_v14 = vmul.f32 1.442695, %v4700_v49  ;;  %v15026_v61 = vld [vmem:[#allocation137_spill] sm:$0xff] }
 0x3d3   :  { %v11806_v17 = vpop.eup %7729  ;;  %v4590_v39 = vsub.f32 %v15024_v0, %v4526_v38  ;;  %v11810_v27 = vadd.f32 1e-20, %v5337_v15  ;;  %v5350_v34 = vadd.f32 %v11259_v28, %v5349_v32  ;;  %v4100_v13 = vadd.f32 %v4099_v33, %v3903_v1  ;;  %v15027_v1 = vld [vmem:[#allocation200_spill] sm:$0xff]  ;;  %v15028_v33 = vld [vmem:[#allocation138_spill] sm:$0xff] }
 0x3d4   :  { %15022 = vst [vmem:[#allocation247_spill] sm:$0xff] %v11806_v17  ;;  %7737 = vpow2.f32 %v4835_v50  ;;  %v1048_v63 = vsub.f32 1.5, %v1047_v19  ;;  %v4931_v51 = vadd.f32 %v11806_v17, %v11599_v54  ;;  %vm1050_vm7 = vweird.f32 %v11708_v8  ;;  %v4876_v19 = vpop.xlane.xlu1 %4875  ;;  %v11829_v0 = vpop.xlane.xlu2 %4887  ;;  %v15034_v8 = vld [vmem:[#allocation13_spill] sm:$0xff] }
 0x3d5   :  { %7739 = vpow2.f32 %v4799_v3  ;;  %v4654_v42 = vmax.f32 %v4590_v39, 0.0  ;;  %v11815_v40 = vpop.eup %7731  ;;  %v5351_v37 = vadd.f32 %v15026_v61, %v5350_v34  ;;  %v11820_v15 = vadd.f32 1e-20, %v11770_v11 }
 0x3d6   :  { %15025 = vst [vmem:[#allocation82_spill] sm:$0xff] %v11815_v40  ;;  %v4261_v49 = vadd.f32 %v4260_v22, %v4100_v13  ;;  %v11822_v38 = vpop.eup %7733  ;;  %vm1051_vm8 = vweird.f32 %v11755_v36  ;;  %7741 = vpow2.f32 %v4803_v14  ;;  %v3685_v32 = vadd.f32 %v3684_v52, %v15027_v1  ;;  %4932 = vadd.xlane.f32.xlu1 %v4931_v51  ;;  %v3908_v39 = vpop.f32.mrf.mxu1  ;;  %v15036_v51 = vld [vmem:[#allocation20_spill] sm:$0xff] }
 0x3d7   :  { %v4718_v3 = vmul.f32 -0.5, %v4654_v42  ;;  %v1488_v50 = vmul.f32 %v1424_v48, %v11003_v31  ;;  %7743 = vrsqrt.f32 %v11810_v27  ;;  %v5352_v58 = vadd.f32 %v15028_v33, %v5351_v37  ;;  %vm11843_vm9 = vmor %vm1050_vm7, %vm1051_vm8  ;;  %v3689_v26 = vpop.f32.mrf.mxu0 }
 0x3d8   :  { %v4528_v11 = vmul.f32 2.0, %v4261_v49  ;;  %v11831_v34 = vpop.eup %7735  ;;  %v1489_v13 = vmul.f32 %v1425_v2, %v11008_v43  ;;  %v1049_v14 = vmul.f32 %v11755_v36, %v1048_v63  ;;  %v3909_v42 = vadd.f32 %v3908_v39, %v3685_v32  ;;  %v4882_v63 = vpop.xlane.xlu0 %4881 }
 0x3d9   :  { %15029 = vst [vmem:[#allocation158_spill] sm:$0xff] %v11831_v34  ;;  %v4839_v22 = vmul.f32 1.442695, %v4718_v3  ;;  %v1195_v48 = vmul.f32 %v11785_v45, %v11729_v29  ;;  %v5353_v37 = vadd.f32 %v11815_v40, %v5352_v58  ;;  %v5022_v2 = vmul.f32 %v11822_v38, %v11792_v21  ;;  %v4103_v49 = vpop.f32.mrf.mxu2  ;;  %v4264_v53 = vpop.f32.mrf.mxu3 }
 0x3da   :  { %v11835_v52 = vpop.eup %7737  ;;  %7745 = vrsqrt.f32 %v11820_v15  ;;  %v1486_v1 = vmul.f32 %v1422_v5, %v11003_v31  ;;  %v11854_v32 = vadd.f32 1e-20, %v4873_v18  ;;  %v4592_v39 = vsub.f32 %v15034_v8, %v4528_v11  ;;  %v15037_v8 = vld [vmem:[#allocation144_spill] sm:$0xff] }
 0x3db   :  { %15030 = vst [vmem:[#allocation184_spill] sm:$0xff] %v11835_v52  ;;  %v11851_v3 = vpop.eup %7739  ;;  %7747 = vpow2.f32 %v4839_v22  ;;  %v11857_v54 = vmul.f32 3.0, %v1488_v50  ;;  %v1487_v58 = vmul.f32 %v1423_v6, %v11008_v43  ;;  %v5354_v60 = vadd.f32 %v11831_v34, %v5353_v37 }
 0x3dc   :  { %15033 = vst [vmem:[#allocation80_spill] sm:$0xff] %v11851_v3  ;;  %v4104_v33 = vadd.f32 %v4103_v49, %v3909_v42  ;;  %v11861_v29 = vpop.eup %7741  ;;  %v11863_v61 = vmul.f32 3.0, %v1489_v13  ;;  %v1053_v18 = vsel %vm11843_vm9, %v11755_v36, %v1049_v14  ;;  %v4656_v5 = vmax.f32 %v4592_v39, 0.0 }
 0x3dd   :  { %v4934_v50 = vadd.f32 %v11835_v52, %v11622_v35  ;;  %v11870_v11 = vpop.eup %7743  ;;  %v1196_v6 = vmul.f32 %v11785_v45, %v1195_v48  ;;  %v5355_v22 = vadd.f32 %v11851_v3, %v5354_v60  ;;  %v5023_v42 = vmul.f32 %v11822_v38, %v5022_v2  ;;  %v15038_v35 = vld [vmem:[#allocation234_spill] sm:$0xff] }
 0x3de   :  { %15035 = vst [vmem:[#allocation169_spill] sm:$0xff] %v11863_v61  ;;  %v4265_v37 = vadd.f32 %v4264_v53, %v4104_v33  ;;  %v11875_v49 = vmul.f32 3.0, %v1486_v1  ;;  %7749 = vrsqrt.f32 %v11854_v32  ;;  %v4720_v13 = vmul.f32 -0.5, %v4656_v5  ;;  %v3914_v45 = vpop.f32.mrf.mxu1  ;;  %v4879_v1 = vpop.xlane.xlu1 %4878 }
 0x3df   :  { %v3690_v36 = vadd.f32 %v3689_v26, %v15036_v51  ;;  %4935 = vadd.xlane.f32.xlu0 %v4934_v50  ;;  %v1420_v39 = vmul.f32 %v15037_v8, %v1053_v18  ;;  %v1421_v34 = vmul.f32 %v15038_v35, %v1053_v18  ;;  %v5356_v48 = vadd.f32 %v11861_v29, %v5355_v22  ;;  %v15040_v51 = vld [vmem:[#allocation30_spill] sm:$0xff]  ;;  %v11893_v35 = vpop.xlane.xlu2 %4890  ;;  %v15041_v18 = vld [vmem:[#allocation17_spill] sm:$0xff] }
 0x3e0   :  { %v11879_v14 = vpop.eup %7745  ;;  %v4530_v60 = vmul.f32 2.0, %v4265_v37  ;;  %v5378_v53 = vmul.f32 %v11870_v11, %v11810_v27  ;;  %v11888_v33 = vadd.f32 1e-20, %v4876_v19  ;;  %v4843_v26 = vmul.f32 1.442695, %v4720_v13  ;;  %v15042_v19 = vld [vmem:[#allocation176_spill] sm:$0xff] }
 0x3e1   :  { %v11884_v2 = vpop.eup %7747  ;;  %v3915_v5 = vadd.f32 %v3914_v45, %v3690_v36  ;;  %v11890_v50 = vmul.f32 0.5, %v1196_v6  ;;  %v5357_v8 = vadd.f32 %v15040_v51, %v5356_v48  ;;  %v5024_v61 = vmul.f32 0.5, %v5023_v42  ;;  %v4107_v37 = vpop.f32.mrf.mxu2 }
 0x3e2   :  { %15039 = vst [vmem:[#allocation248_spill] sm:$0xff] %v11884_v2  ;;  %v4594_v22 = vsub.f32 %v15041_v18, %v4530_v60  ;;  %v5032_v28 = vmul.f32 %v11879_v14, %v11820_v15  ;;  %7751 = vpow2.f32 %v4843_v26  ;;  %v4937_v55 = vadd.f32 %v11884_v2, %v15042_v19  ;;  %v4885_v42 = vpop.xlane.xlu0 %4884  ;;  %v4268_v48 = vpop.f32.mrf.mxu3  ;;  %v15043_v18 = vld [vmem:[#allocation168_spill] sm:$0xff] }
 0x3e3   :  { %v4108_v20 = vadd.f32 %v4107_v37, %v3915_v5  ;;  %v1484_v45 = vmul.f32 %v1420_v39, %v11003_v31  ;;  %v1485_v6 = vmul.f32 %v1421_v34, %v11008_v43  ;;  %v11902_v13 = vadd.f32 1e-20, %v4879_v1 }
 0x3e4   :  { %v4658_v36 = vmax.f32 %v4594_v22, 0.0  ;;  %v11904_v51 = vpop.eup %7749  ;;  %v5379_v60 = vmul.f32 %v11870_v11, %v5378_v53  ;;  %v5358_v57 = vadd.f32 %v15043_v18, %v5357_v8  ;;  %7753 = vrsqrt.f32 %v11888_v33 }
 0x3e5   :  { %v4269_v26 = vadd.f32 %v4268_v48, %v4108_v20  ;;  %v11909_v5 = vmul.f32 3.0, %v1487_v58  ;;  %v11912_v37 = vadd.f32 1e-20, %v4882_v63  ;;  %v5025_v1 = vsub.f32 1.5, %v5024_v61 }
 0x3e6   :  { %v4722_v34 = vmul.f32 -0.5, %v4658_v36  ;;  %v5359_v22 = vadd.f32 %v11649_v56, %v5358_v57  ;;  %v5033_v19 = vmul.f32 %v11879_v14, %v5032_v28  ;;  %v11916_v43 = vadd.f32 1e-20, %v4885_v42  ;;  %v15045_v36 = vld [vmem:[#allocation189_spill] sm:$0xff]  ;;  %v15046_v28 = vld [vmem:[#allocation74_spill] sm:$0xff] }
 0x3e7   :  { %4938 = vadd.xlane.f32.xlu0 %v4937_v55  ;;  %v11918_v53 = vmul.f32 3.0, %v1484_v45  ;;  %v5042_v20 = vmul.f32 %v11904_v51, %v11854_v32  ;;  %7755 = vrsqrt.f32 %v11902_v13  ;;  %v4532_v58 = vmul.f32 2.0, %v4269_v26  ;;  %v15047_v45 = vld [vmem:[#allocation207_spill] sm:$0xff]  ;;  %v4897_v39 = vpop.xlane.xlu2 %4896 }
 0x3e8   :  { %v11923_v8 = vpop.eup %7751  ;;  %v11925_v63 = vmul.f32 3.0, %v1485_v6  ;;  %v5380_v61 = vmul.f32 0.5, %v5379_v60  ;;  %v5360_v57 = vadd.f32 %v11696_v46, %v5359_v22  ;;  %v11930_v42 = vadd.f32 %v15046_v28, %v15045_v36 }
 0x3e9   :  { %15044 = vst [vmem:[#allocation81_spill] sm:$0xff] %v11923_v8  ;;  %vm5028_vm10 = vweird.f32 %v11822_v38  ;;  %7757 = vrsqrt.f32 %v11912_v37  ;;  %v4847_v55 = vmul.f32 1.442695, %v4722_v34  ;;  %v4596_v48 = vsub.f32 %v15047_v45, %v4532_v58 }
 0x3ea   :  { %v11935_v26 = vpop.eup %7753  ;;  %v5026_v6 = vmul.f32 %v11822_v38, %v5025_v1  ;;  %v5034_v56 = vmul.f32 0.5, %v5033_v19  ;;  %v5361_v60 = vadd.f32 %v11726_v12, %v5360_v57  ;;  %7759 = vrsqrt.f32 %v11916_v43  ;;  %v15048_v19 = vld [vmem:[#allocation97_spill] sm:$0xff] }
 0x3eb   :  { %v5043_v22 = vmul.f32 %v11904_v51, %v5042_v20  ;;  %v11942_v28 = vadd.f32 1e-20, %v11829_v0  ;;  %v4660_v36 = vmax.f32 %v4596_v48, 0.0  ;;  %v4940_v34 = vadd.f32 %v11923_v8, %v11642_v25  ;;  %v15049_v48 = vld [vmem:[#allocation127_spill] sm:$0xff] }
 0x3ec   :  { %vm5027_vm11 = vweird.f32 %v11792_v21  ;;  %v5362_v58 = vadd.f32 %v11775_v59, %v5361_v60  ;;  %v11948_v45 = vadd.f32 1e-20, %v4897_v39  ;;  %v4862_v1 = vadd.f32 %v11712_v16, %v15048_v19  ;;  %v15050_v60 = vld [vmem:[#allocation36_spill] sm:$0xff]  ;;  %v15052_v16 = vld [vmem:[#allocation58_spill] sm:$0xff] }
 0x3ed   :  { %v11952_v57 = vpop.eup %7755  ;;  %v5381_v12 = vsub.f32 1.5, %v5380_v61  ;;  %vm5029_vm12 = vmor %vm5027_vm11, %vm5028_vm10  ;;  %v5052_v0 = vmul.f32 %v11935_v26, %v11888_v33  ;;  %7761 = vpow2.f32 %v4847_v55  ;;  %v4724_v20 = vmul.f32 -0.5, %v4660_v36  ;;  %4941 = vadd.xlane.f32.xlu2 %v4940_v34  ;;  %v15051_v61 = vld [vmem:[#allocation64_spill] sm:$0xff] }
 0x3ee   :  { %v11959_v21 = vsel %vm5029_vm12, %v11822_v38, %v5026_v6  ;;  %v5363_v39 = vadd.f32 %v11806_v17, %v5362_v58  ;;  %v11964_v25 = vadd.f32 %v15050_v60, %v15049_v48  ;;  %v11968_v19 = vadd.f32 %v15052_v16, %v15051_v61 }
 0x3ef   :  { %4863 = vadd.xlane.f32.xlu0 %v4862_v1  ;;  %v11970_v59 = vpop.eup %7757  ;;  %v5035_v46 = vsub.f32 1.5, %v5034_v56  ;;  %v5044_v55 = vmul.f32 0.5, %v5043_v22  ;;  %7763 = vrsqrt.f32 %v11942_v28  ;;  %v4851_v36 = vmul.f32 1.442695, %v4724_v20  ;;  %v4894_v22 = vpop.xlane.xlu1 %4893  ;;  %v15053_v20 = vld [vmem:[#allocation219_spill] sm:$0xff] }
 0x3f0   :  { %v11973_v38 = vpop.eup %7759  ;;  %v5062_v6 = vmul.f32 %v11952_v57, %v11902_v13  ;;  %v5364_v34 = vadd.f32 %v11835_v52, %v5363_v39  ;;  %v11979_v58 = vadd.f32 1e-20, %v11893_v35  ;;  %7765 = vrsqrt.f32 %v11948_v45 }
 0x3f1   :  { %v5382_v1 = vmul.f32 %v11870_v11, %v5381_v12  ;;  %vm5384_vm13 = vweird.f32 %v11870_v11  ;;  %v5053_v56 = vmul.f32 %v11935_v26, %v5052_v0  ;;  %7767 = vpow2.f32 %v4851_v36 }
 0x3f2   :  { %vm5383_vm14 = vweird.f32 %v11810_v27  ;;  %v5405_v16 = vmul.f32 %v15053_v20, %v11959_v21  ;;  %v5072_v39 = vmul.f32 %v11970_v59, %v11912_v37  ;;  %v5365_v35 = vadd.f32 %v11884_v2, %v5364_v34  ;;  %v4900_v34 = vpop.xlane.xlu0 %4899  ;;  %v15054_v2 = vld [vmem:[#allocation21_spill] sm:$0xff] }
 0x3f3   :  { %v11991_v61 = vpop.eup %7761  ;;  %v5036_v12 = vmul.f32 %v11879_v14, %v5035_v46  ;;  %vm5038_vm15 = vweird.f32 %v11879_v14  ;;  %v5045_v60 = vsub.f32 1.5, %v5044_v55  ;;  %v5082_v0 = vmul.f32 %v11973_v38, %v11916_v43  ;;  %vm5385_vm0 = vmor %vm5383_vm14, %vm5384_vm13 }
 0x3f4   :  { %v5063_v27 = vmul.f32 %v11952_v57, %v5062_v6  ;;  %v5366_v36 = vadd.f32 %v11923_v8, %v5365_v35  ;;  %7769 = vrsqrt.f32 %v11979_v58  ;;  %v12000_v20 = vadd.f32 1e-20, %v4894_v22 }
 0x3f5   :  { %v12002_v48 = vpop.eup %7763  ;;  %v12005_v46 = vsel %vm5385_vm0, %v11870_v11, %v5382_v1  ;;  %vm5037_vm1 = vweird.f32 %v11820_v15  ;;  %v5054_v55 = vmul.f32 0.5, %v5053_v56  ;;  %v12010_v52 = vadd.f32 %v11681_v9, %v15054_v2 }
 0x3f6   :  { %v12012_v6 = vpop.eup %7765  ;;  %v5469_v35 = vmul.f32 %v5405_v16, %v12005_v46  ;;  %vm5039_vm2 = vmor %vm5037_vm1, %vm5038_vm15  ;;  %vm5048_vm3 = vweird.f32 %v11904_v51  ;;  %v5073_v22 = vmul.f32 %v11970_v59, %v5072_v39  ;;  %v5367_v11 = vadd.f32 %v11991_v61, %v5366_v36  ;;  %v15055_v36 = vld [vmem:[#allocation99_spill] sm:$0xff] }
 0x3f7   :  { %867 = vadd.xlane.f32.xlu0 %v11930_v42  ;;  %v12021_v15 = vpop.eup %7767  ;;  %v12024_v1 = vsel %vm5039_vm2, %v11879_v14, %v5036_v12  ;;  %v5046_v56 = vmul.f32 %v11904_v51, %v5045_v60  ;;  %v5083_v16 = vmul.f32 %v11973_v38, %v5082_v0  ;;  %v12028_v9 = vadd.f32 1e-20, %v4900_v34  ;;  %v15056_v60 = vld [vmem:[#allocation90_spill] sm:$0xff] }
 0x3f8   :  { %v5064_v2 = vmul.f32 0.5, %v5063_v27  ;;  %v5092_v8 = vmul.f32 %v12002_v48, %v11942_v28  ;;  %7771 = vrsqrt.f32 %v12000_v20  ;;  %v5368_v39 = vadd.f32 %v12021_v15, %v5367_v11 }
 0x3f9   :  { %vm5047_vm4 = vweird.f32 %v11854_v32  ;;  %v5055_v42 = vsub.f32 1.5, %v5054_v55  ;;  %v12037_v14 = vadd.f32 %v11702_v7, %v15055_v36  ;;  %v4901_v12 = vadd.f32 %v11815_v40, %v15056_v60  ;;  %v15057_v32 = vld [vmem:[#allocation15_spill] sm:$0xff] }
 0x3fa   :  { %v12041_v0 = vpop.eup %7769  ;;  %v5597_v27 = vmul.f32 10.0, %v5469_v35  ;;  %v5074_v34 = vmul.f32 0.5, %v5073_v22  ;;  %v5369_v17 = vrot.slane %v5368_v39, 4  ;;  %v5122_v18 = vmul.f32 %v12012_v6, %v11948_v45  ;;  %vm5049_vm5 = vmor %vm5047_vm4, %vm5048_vm3 }
 0x3fb   :  { %v12047_v11 = vmul.f32 %v15001_v24, %v11959_v21  ;;  %v5407_v55 = vmul.f32 %v15057_v32, %v12024_v1  ;;  %v5084_v7 = vmul.f32 0.5, %v5083_v16  ;;  %7773 = vrsqrt.f32 %v12028_v9  ;;  %v15058_v21 = vld [vmem:[#allocation171_spill] sm:$0xff] }
 0x3fc   :  { %v12055_v35 = vsel %vm5049_vm5, %v11904_v51, %v5046_v56  ;;  %v5065_v22 = vsub.f32 1.5, %v5064_v2  ;;  %v5093_v40 = vmul.f32 %v12002_v48, %v5092_v8  ;;  %v5370_v60 = vadd.f32 %v5369_v17, %v5368_v39  ;;  %v15059_v39 = vld [vmem:[#allocation104_spill] sm:$0xff] }
 0x3fd   :  { %v5056_v36 = vmul.f32 %v11935_v26, %v5055_v42  ;;  %vm5058_vm6 = vweird.f32 %v11935_v26  ;;  %v5102_v24 = vmul.f32 %v12041_v0, %v11979_v58  ;;  %v12064_v32 = vadd.f32 %v11851_v3, %v15058_v21 }
 0x3fe   :  { %v12066_v16 = vpop.eup %7771  ;;  %v12069_v51 = vadd.f32 %v5597_v27, %v11693_v4  ;;  %v5075_v2 = vsub.f32 1.5, %v5074_v34  ;;  %v5371_v56 = vrot.slane %v5370_v60, 2  ;;  %v5123_v17 = vmul.f32 %v12012_v6, %v5122_v18 }
 0x3ff   :  { %918 = vadd.xlane.f32.xlu0 %v11964_v25  ;;  %v5471_v8 = vmul.f32 %v5407_v55, %v12005_v46  ;;  %v5409_v42 = vmul.f32 %v15059_v39, %v12055_v35  ;;  %vm5057_vm7 = vweird.f32 %v11888_v33  ;;  %v5085_v3 = vsub.f32 1.5, %v5084_v7 }
 0x400   :  { %vm5059_vm8 = vmor %vm5057_vm7, %vm5058_vm6  ;;  %v5066_v21 = vmul.f32 %v11952_v57, %v5065_v22  ;;  %vm5068_vm9 = vweird.f32 %v11952_v57  ;;  %v5094_v4 = vmul.f32 0.5, %v5093_v40  ;;  %v5372_v27 = vadd.f32 %v5371_v56, %v5370_v60 }
 0x401   :  { %v12079_v34 = vpop.eup %7773  ;;  %v12082_v18 = vsel %vm5059_vm8, %v11935_v26, %v5056_v36  ;;  %vm5067_vm10 = vweird.f32 %v11902_v13  ;;  %v5103_v25 = vmul.f32 %v12041_v0, %v5102_v24  ;;  %v5112_v33 = vmul.f32 %v12066_v16, %v12000_v20 }
 0x402   :  { %v5076_v7 = vmul.f32 %v11970_v59, %v5075_v2  ;;  %vm5078_vm11 = vweird.f32 %v11970_v59  ;;  %v5373_v55 = vrot.slane %v5372_v27, 1  ;;  %v5124_v22 = vmul.f32 0.5, %v5123_v17  ;;  %vm5069_vm12 = vmor %vm5067_vm10, %vm5068_vm9  ;;  %v15060_v2 = vld [vmem:[#allocation101_spill] sm:$0xff] }
 0x403   :  { %v5473_v40 = vmul.f32 %v5409_v42, %v12005_v46  ;;  %vm5077_vm13 = vweird.f32 %v11912_v37  ;;  %v5086_v26 = vmul.f32 %v11973_v38, %v5085_v3  ;;  %vm5088_vm14 = vweird.f32 %v11973_v38 }
 0x404   :  { %v12095_v13 = vsel %vm5069_vm12, %v11952_v57, %v5066_v21  ;;  %v5095_v36 = vsub.f32 1.5, %v5094_v4  ;;  %v5374_v60 = vadd.f32 %v5373_v55, %v5372_v27  ;;  %v5132_v24 = vmul.f32 %v12079_v34, %v12028_v9  ;;  %vm5079_vm15 = vmor %vm5077_vm13, %vm5078_vm11  ;;  %v15061_v4 = vld [vmem:[#allocation110_spill] sm:$0xff] }
 0x405   :  { %v5411_v56 = vmul.f32 %v15060_v2, %v12082_v18  ;;  %vm5087_vm0 = vweird.f32 %v11916_v43  ;;  %v5104_v17 = vmul.f32 0.5, %v5103_v25  ;;  %v5113_v37 = vmul.f32 %v12066_v16, %v5112_v33  ;;  %v15062_v25 = vld [vmem:[#allocation109_spill] sm:$0xff]  ;;  %v15064_v2 = vld [vmem:[#allocation230_spill] sm:$0xff] }
 0x406   :  { %v5599_v3 = vmul.f32 10.0, %v5471_v8  ;;  %v12104_v39 = vsel %vm5079_vm15, %v11970_v59, %v5076_v7  ;;  %vm5089_vm1 = vmor %vm5087_vm0, %vm5088_vm14  ;;  %v12106_v57 = vadd.f32 1e-20, %v5374_v60  ;;  %v5125_v21 = vsub.f32 1.5, %v5124_v22 }
 0x407   :  { %4902 = vadd.xlane.f32.xlu0 %v4901_v12  ;;  %v5601_v42 = vmul.f32 10.0, %v5473_v40  ;;  %v5413_v27 = vmul.f32 %v15061_v4, %v12095_v13  ;;  %v12111_v55 = vsel %vm5089_vm1, %v11973_v38, %v5086_v26  ;;  %vm5098_vm2 = vweird.f32 %v12002_v48  ;;  %v15063_v38 = vld [vmem:[#allocation120_spill] sm:$0xff]  ;;  %v15065_v4 = vld [vmem:[#allocation231_spill] sm:$0xff] }
 0x408   :  { %v5096_v43 = vmul.f32 %v12002_v48, %v5095_v36  ;;  %7775 = vrsqrt.f32 %v12106_v57  ;;  %v5133_v59 = vmul.f32 %v12079_v34, %v5132_v24  ;;  %v4943_v8 = vadd.f32 %v11991_v61, %v11655_v41 }
 0x409   :  { %v5475_v12 = vmul.f32 %v5411_v56, %v12005_v46  ;;  %v5415_v33 = vmul.f32 %v15062_v25, %v12104_v39  ;;  %v5105_v7 = vsub.f32 1.5, %v5104_v17  ;;  %v5114_v22 = vmul.f32 0.5, %v5113_v37  ;;  %v15066_v25 = vld [vmem:[#allocation139_spill] sm:$0xff] }
 0x40a   :  { %v5417_v40 = vmul.f32 %v15063_v38, %v12111_v55  ;;  %vm5097_vm3 = vweird.f32 %v11942_v28  ;;  %v5126_v26 = vmul.f32 %v12012_v6, %v5125_v21  ;;  %vm5128_vm4 = vweird.f32 %v12012_v6  ;;  %4944 = vadd.xlane.f32.xlu2 %v4943_v8 }
 0x40b   :  { %v12129_v36 = vmul.f32 %v15004_v23, %v12024_v1  ;;  %v12132_v60 = vadd.f32 %v5599_v3, %v11918_v53  ;;  %v5477_v24 = vmul.f32 %v5413_v27, %v12005_v46  ;;  %vm5099_vm5 = vmor %vm5097_vm3, %vm5098_vm2  ;;  %v12139_v28 = vadd.f32 %v11861_v29, %v15064_v2 }
 0x40c   :  { %v12143_v56 = vmul.f32 %v15010_v30, %v12055_v35  ;;  %v5100_v17 = vsel %vm5099_vm5, %v12002_v48, %v5096_v43  ;;  %vm5127_vm6 = vweird.f32 %v11948_v45  ;;  %v5134_v23 = vmul.f32 0.5, %v5133_v59 }
 0x40d   :  { %v12148_v53 = vadd.f32 %v5601_v42, %v11875_v49  ;;  %v5106_v1 = vmul.f32 %v12041_v0, %v5105_v7  ;;  %vm5108_vm7 = vweird.f32 %v12041_v0  ;;  %v5115_v37 = vsub.f32 1.5, %v5114_v22  ;;  %vm5129_vm8 = vmor %vm5127_vm6, %vm5128_vm4  ;;  %v15067_v22 = vld [vmem:[#allocation166_spill] sm:$0xff] }
 0x40e   :  { %v7776_v3 = vpop.eup %7775  ;;  %v5603_v21 = vmul.f32 10.0, %v5475_v12  ;;  %v5479_v30 = vmul.f32 %v5415_v33, %v12005_v46  ;;  %v5481_v48 = vmul.f32 %v5417_v40, %v12005_v46  ;;  %v5130_v45 = vsel %vm5129_vm8, %v12012_v6, %v5126_v26  ;;  %v15068_v26 = vld [vmem:[#allocation95_spill] sm:$0xff] }
 0x40f   :  { %v5605_v35 = vmul.f32 10.0, %v5477_v24  ;;  %v5419_v49 = vmul.f32 %v15065_v4, %v5100_v17  ;;  %vm5107_vm9 = vweird.f32 %v11979_v58  ;;  %v5388_v42 = vmul.f32 %v7776_v3, %v12106_v57  ;;  %v15073_v4 = vld [vmem:[#allocation124_spill] sm:$0xff] }
 0x410   :  { %v5412_v27 = vmul.f32 %v10947_v47, %v12082_v18  ;;  %vm5109_vm10 = vmor %vm5107_vm9, %vm5108_vm7  ;;  %vm5118_vm11 = vweird.f32 %v12066_v16  ;;  %v5135_v43 = vsub.f32 1.5, %v5134_v23  ;;  %v4946_v59 = vadd.f32 %v12021_v15, %v11663_v62 }
 0x411   :  { %v5110_v8 = vsel %vm5109_vm10, %v12041_v0, %v5106_v1  ;;  %v5116_v6 = vmul.f32 %v12066_v16, %v5115_v37  ;;  %v5389_v12 = vmul.f32 %v7776_v3, %v5388_v42  ;;  %v5425_v33 = vmul.f32 %v15066_v25, %v5130_v45  ;;  %v15071_v37 = vld [vmem:[#allocation136_spill] sm:$0xff] }
 0x412   :  { %v12169_v58 = vadd.f32 %v5603_v21, %v11857_v54  ;;  %v5414_v47 = vmul.f32 %v11016_v44, %v12095_v13  ;;  %v5607_v18 = vmul.f32 10.0, %v5479_v30  ;;  %v5609_v7 = vmul.f32 10.0, %v5481_v48  ;;  %4947 = vadd.xlane.f32.xlu1 %v4946_v59  ;;  %4908 = vadd.xlane.f32.xlu2 %v12064_v32  ;;  %v15072_v30 = vld [vmem:[#allocation210_spill] sm:$0xff] }
 0x413   :  { %v12175_v38 = vadd.f32 %v5605_v35, %v15067_v22  ;;  %v5483_v0 = vmul.f32 %v5419_v49, %v12005_v46  ;;  %vm5117_vm12 = vweird.f32 %v12000_v20  ;;  %v5390_v40 = vmul.f32 0.5, %v5389_v12  ;;  %v15069_v20 = vld [vmem:[#allocation88_spill] sm:$0xff]  ;;  %v15077_v22 = vld [vmem:[#allocation225_spill] sm:$0xff] }
 0x414   :  { %v5416_v54 = vmul.f32 %v11050_v10, %v12104_v39  ;;  %v5421_v24 = vmul.f32 %v15068_v26, %v5110_v8  ;;  %vm5119_vm13 = vmor %vm5117_vm12, %vm5118_vm11  ;;  %v5136_v44 = vmul.f32 %v12079_v34, %v5135_v43  ;;  %vm5138_vm14 = vweird.f32 %v12079_v34  ;;  %v15070_v10 = vld [vmem:[#allocation119_spill] sm:$0xff]  ;;  %v15074_v43 = vld [vmem:[#allocation18_spill] sm:$0xff] }
 0x415   :  { %v5120_v32 = vsel %vm5119_vm13, %v12066_v16, %v5116_v6  ;;  %v5391_v13 = vsub.f32 1.5, %v5390_v40  ;;  %vm5394_vm15 = vweird.f32 %v7776_v3  ;;  %v5489_v23 = vmul.f32 %v5425_v33, %v12005_v46  ;;  %v15075_v6 = vld [vmem:[#allocation236_spill] sm:$0xff] }
 0x416   :  { %v12189_v1 = vadd.f32 %v5607_v18, %v15069_v20  ;;  %v5418_v39 = vmul.f32 %v15070_v10, %v12111_v55  ;;  %v12194_v21 = vadd.f32 %v5609_v7, %v15071_v37  ;;  %vm5137_vm0 = vweird.f32 %v12028_v9 }
 0x417   :  { %v5420_v48 = vmul.f32 %v15072_v30, %v5100_v17  ;;  %v12198_v35 = vmul.f32 10.0, %v5483_v0  ;;  %v5392_v16 = vmul.f32 %v7776_v3, %v5391_v13  ;;  %vm5393_vm1 = vweird.f32 %v12106_v57  ;;  %vm5139_vm2 = vmor %vm5137_vm0, %vm5138_vm14  ;;  %v15076_v17 = vld [vmem:[#allocation137_spill] sm:$0xff] }
 0x418   :  { %v5422_v49 = vmul.f32 %v15073_v4, %v5110_v8  ;;  %v5485_v42 = vmul.f32 %v5421_v24, %v12005_v46  ;;  %v5423_v59 = vmul.f32 %v15074_v43, %v5120_v32  ;;  %vm5395_vm3 = vmor %vm5393_vm1, %vm5394_vm15  ;;  %v5140_v55 = vsel %vm5139_vm2, %v12079_v34, %v5136_v44  ;;  %v15082_v43 = vld [vmem:[#allocation169_spill] sm:$0xff] }
 0x419   :  { %v5424_v12 = vmul.f32 %v15075_v6, %v5120_v32  ;;  %v12206_v9 = vsel %vm5395_vm3, %v7776_v3, %v5392_v16  ;;  %v5426_v25 = vmul.f32 %v15076_v17, %v5130_v45  ;;  %v5617_v33 = vmul.f32 10.0, %v5489_v23  ;;  %v15079_v32 = vld [vmem:[#allocation106_spill] sm:$0xff] }
 0x41a   :  { %v5470_v57 = vmul.f32 %v12047_v11, %v12206_v9  ;;  %v5472_v8 = vmul.f32 %v12129_v36, %v12206_v9  ;;  %v5474_v18 = vmul.f32 %v12143_v56, %v12206_v9  ;;  %v5476_v7 = vmul.f32 %v5412_v27, %v12206_v9  ;;  %4860 = vadd.xlane.f32.xlu1 %v12037_v14  ;;  %v15083_v17 = vld [vmem:[#allocation98_spill] sm:$0xff] }
 0x41b   :  { %v5478_v34 = vmul.f32 %v5414_v47, %v12206_v9  ;;  %v5480_v3 = vmul.f32 %v5416_v54, %v12206_v9  ;;  %v5482_v45 = vmul.f32 %v5418_v39, %v12206_v9  ;;  %v5427_v0 = vmul.f32 %v15077_v22, %v5140_v55  ;;  %870 = vadd.xlane.f32.xlu2 %v11968_v19  ;;  %v15078_v47 = vld [vmem:[#allocation34_spill] sm:$0xff]  ;;  %v4915_v19 = vpop.xlane.xlu1 %4914  ;;  %v15080_v39 = vld [vmem:[#allocation39_spill] sm:$0xff] }
 0x41c   :  { %v5484_v11 = vmul.f32 %v5420_v48, %v12206_v9  ;;  %v5486_v36 = vmul.f32 %v5422_v49, %v12206_v9  ;;  %v5490_v56 = vmul.f32 %v5426_v25, %v12206_v9  ;;  %v5598_v40 = vmul.f32 10.0, %v5470_v57  ;;  %v15081_v48 = vld [vmem:[#allocation115_spill] sm:$0xff] }
 0x41d   :  { %v5600_v27 = vmul.f32 10.0, %v5472_v8  ;;  %v5602_v26 = vmul.f32 10.0, %v5474_v18  ;;  %v5604_v14 = vmul.f32 10.0, %v5476_v7  ;;  %v5606_v24 = vmul.f32 10.0, %v5478_v34  ;;  %v15085_v8 = vld [vmem:[#allocation146_spill] sm:$0xff] }
 0x41e   :  { %vm1200_vm4 = vweird.f32 %v15078_v47  ;;  %v5487_v54 = vmul.f32 %v5423_v59, %v12005_v46  ;;  %v5618_v44 = vmul.f32 10.0, %v5490_v56  ;;  %v5681_v13 = vadd.f32 %v5617_v33, %v15079_v32  ;;  %v15109_v47 = vld [vmem:[#allocation181_spill] sm:$0xff] }
 0x41f   :  { %v5608_v23 = vmul.f32 10.0, %v5480_v3  ;;  %v5488_v20 = vmul.f32 %v5424_v12, %v12206_v9  ;;  %v5610_v10 = vmul.f32 10.0, %v5482_v45  ;;  %v5662_v37 = vadd.f32 %v5598_v40, %v15080_v39  ;;  %v15084_v12 = vld [vmem:[#allocation140_spill] sm:$0xff] }
 0x420   :  { %v5664_v30 = vadd.f32 %v5600_v27, %v11925_v63  ;;  %v5682_v16 = vadd.f32 %v5618_v44, %v15081_v48  ;;  %v5612_v4 = vmul.f32 10.0, %v5484_v11  ;;  %v5666_v49 = vadd.f32 %v5602_v26, %v11909_v5  ;;  %v15086_v63 = vld [vmem:[#allocation93_spill] sm:$0xff]  ;;  %v15087_v45 = vld [vmem:[#allocation100_spill] sm:$0xff]  ;;  %v15088_v11 = vld [vmem:[#allocation138_spill] sm:$0xff] }
 0x421   :  { %v5668_v6 = vadd.f32 %v5604_v14, %v15082_v43  ;;  %v5614_v59 = vmul.f32 10.0, %v5486_v36  ;;  %v5670_v25 = vadd.f32 %v5606_v24, %v15083_v17  ;;  %v5491_v33 = vmul.f32 %v5427_v0, %v12005_v46  ;;  %v15089_v27 = vld [vmem:[#allocation161_spill] sm:$0xff]  ;;  %v15094_v44 = vld [vmem:[#allocation132_spill] sm:$0xff] }
 0x422   :  { %v12236_v57 = vadd.f32 1e-20, %v4915_v19  ;;  %vm1260_vm5 = vweird.f32 %v15084_v12  ;;  %vm1261_vm6 = vweird.f32 %v15085_v8  ;;  %v5731_v18 = vpack.c.bf16 %v5682_v16, %v5681_v13  ;;  %4911 = vadd.xlane.f32.xlu1 %v12139_v28  ;;  %v15095_v19 = vld [vmem:[#allocation129_spill] sm:$0xff]  ;;  %v15097_v39 = vld [vmem:[#allocation32_spill] sm:$0xff]  ;;  %v4918_v16 = vpop.xlane.xlu0 %4917 }
 0x423   :  { %v5672_v7 = vadd.f32 %v5608_v23, %v15086_v63  ;;  %v5721_v34 = vpack.c.bf16 %v5662_v37, %v12069_v51  ;;  %v5722_v5 = vpack.c.bf16 %v5664_v30, %v12132_v60  ;;  %v5616_v3 = vmul.f32 10.0, %v5488_v20  ;;  %4854 = vadd.xlane.f32.xlu2 %v12010_v52  ;;  %v15098_v30 = vld [vmem:[#allocation122_spill] sm:$0xff]  ;;  %v15107_v63 = vld [vmem:[#allocation145_spill] sm:$0xff]  ;;  %vm12305_vm9 = vmor %vm1260_vm5, %vm1261_vm6 }
 0x424   :  { %v5674_v22 = vadd.f32 %v5610_v10, %v15087_v45  ;;  %v5723_v0 = vpack.c.bf16 %v5666_v49, %v12148_v53  ;;  %v5428_v36 = vmul.f32 %v15088_v11, %v5140_v55  ;;  %v5613_v56 = vmul.f32 10.0, %v5485_v42  ;;  %5763 = vst [vmem:[#allocation2 + $0x70] sm:$0xff] %v5731_v18  ;;  %v15090_v53 = vld [vmem:[#allocation182_spill] sm:$0xff]  ;;  %v15092_v42 = vld [vmem:[#allocation163_spill] sm:$0xff]  ;;  %v15125_v12 = vld [vmem:[#allocation240_spill] sm:$0xff] }
 0x425   :  { %v5615_v40 = vmul.f32 10.0, %v5487_v54  ;;  %v5676_v26 = vadd.f32 %v5612_v4, %v15089_v27  ;;  %v5724_v51 = vpack.c.bf16 %v5668_v6, %v12169_v58  ;;  %v5725_v60 = vpack.c.bf16 %v5670_v25, %v12175_v38  ;;  %5753 = vst [vmem:[#allocation2 + $0x20] sm:$0xff] %v5721_v34  ;;  %v15091_v55 = vld [vmem:[#allocation162_spill] sm:$0xff]  ;;  %v15103_v49 = vld [vmem:[#allocation107_spill] sm:$0xff]  ;;  %v15104_v6 = vld [vmem:[#allocation105_spill] sm:$0xff] }
 0x426   :  { %v5492_v28 = vmul.f32 %v5428_v36, %v12206_v9  ;;  %v5619_v14 = vmul.f32 10.0, %v5491_v33  ;;  %7777 = vrsqrt.f32 %v12236_v57  ;;  %vm1201_vm7 = vweird.f32 %v15090_v53  ;;  %5754 = vst [vmem:[#allocation2 + $0x28] sm:$0xff] %v5722_v5  ;;  %v15105_v25 = vld [vmem:[#allocation91_spill] sm:$0xff]  ;;  %v15106_v33 = vld [vmem:[#allocation156_spill] sm:$0xff] }
 0x427   :  { %v5675_v52 = vadd.f32 %v12198_v35, %v15091_v55  ;;  %v5678_v24 = vadd.f32 %v5614_v59, %v15092_v42  ;;  %v5726_v54 = vpack.c.bf16 %v5672_v7, %v12189_v1  ;;  %v15093_v58 = vsub.f32 1.5, %v11890_v50  ;;  %5755 = vst [vmem:[#allocation2 + $0x30] sm:$0xff] %v5723_v0  ;;  %v15096_v35 = vld [vmem:[#allocation49_spill] sm:$0xff]  ;;  %v15099_v1 = vld [vmem:[#allocation158_spill] sm:$0xff]  ;;  %vm12272_vm8 = vmor %vm1200_vm4, %vm1201_vm7 }
 0x428   :  { %v5680_v32 = vadd.f32 %v5616_v3, %v15094_v44  ;;  %v5727_v13 = vpack.c.bf16 %v5674_v22, %v12194_v21  ;;  %v5620_v23 = vmul.f32 10.0, %v5492_v28  ;;  %v5677_v20 = vadd.f32 %v5613_v56, %v15095_v19  ;;  %5756 = vst [vmem:[#allocation2 + $0x38] sm:$0xff] %v5724_v51  ;;  %v15102_v21 = vld [vmem:[#allocation242_spill] sm:$0xff]  ;;  %v15108_v7 = vld [vmem:[#allocation87_spill] sm:$0xff]  ;;  %v15110_v22 = vld [vmem:[#allocation160_spill] sm:$0xff] }
 0x429   :  { %v1199_v38 = vmul.f32 %v15090_v53, %v15093_v58  ;;  %v5728_v10 = vpack.c.bf16 %v5676_v26, %v5675_v52  ;;  %v914_v37 = vadd.f32 %v15097_v39, %v15096_v35  ;;  %v4904_v48 = vadd.f32 %v15099_v1, %v15098_v30  ;;  %5757 = vst [vmem:[#allocation2 + $0x40] sm:$0xff] %v5725_v60  ;;  %v15111_v0 = vld [vmem:[#allocation6_spill] sm:$0xff]  ;;  %v15114_v51 = vld [vmem:[#allocation193_spill] sm:$0xff]  ;;  %v15118_v42 = vld [vmem:[#allocation123_spill] sm:$0xff] }
 0x42a   :  { %v5679_v4 = vadd.f32 %v5615_v40, %v15102_v21  ;;  %v5683_v43 = vadd.f32 %v5619_v14, %v15103_v49  ;;  %v5684_v59 = vadd.f32 %v5620_v23, %v15104_v6  ;;  %v12279_v17 = vadd.f32 1e-20, %v4918_v16  ;;  %5758 = vst [vmem:[#allocation2 + $0x48] sm:$0xff] %v5726_v54  ;;  %v15112_v40 = vld [vmem:[#allocation68_spill] sm:$0xff]  ;;  %v15117_v52 = vld [vmem:[#allocation197_spill] sm:$0xff]  ;;  %v15120_v58 = vld [vmem:[#allocation243_spill] sm:$0xff] }
 0x42b   :  { %v1286_v18 = vmul.f32 %v15106_v33, %v15105_v25  ;;  %v1246_v34 = vmul.f32 %v15108_v7, %v15107_v63  ;;  %v1208_v5 = vsub.f32 1.5, %v15109_v47  ;;  %v5729_v3 = vpack.c.bf16 %v5678_v24, %v5677_v20  ;;  %915 = vadd.xlane.f32.xlu1 %v914_v37  ;;  %5759 = vst [vmem:[#allocation2 + $0x50] sm:$0xff] %v5727_v13  ;;  %v15119_v54 = vld [vmem:[#allocation89_spill] sm:$0xff]  ;;  %v15124_v13 = vld [vmem:[#allocation218_spill] sm:$0xff] }
 0x42c   :  { %v12286_v45 = vpop.eup %7777  ;;  %v1225_v11 = vmul.f32 %v15111_v0, %v15110_v22  ;;  %v5730_v36 = vpack.c.bf16 %v5680_v32, %v5679_v4  ;;  %v5732_v56 = vpack.c.bf16 %v5684_v59, %v5683_v43  ;;  %4905 = vadd.xlane.f32.xlu2 %v4904_v48  ;;  %7779 = vrsqrt.f32 %v12279_v17  ;;  %5760 = vst [vmem:[#allocation2 + $0x58] sm:$0xff] %v5728_v10  ;;  %v15121_v32 = vld [vmem:[#allocation85_spill] sm:$0xff]  ;;  %v15126_v16 = vld [vmem:[#allocation118_spill] sm:$0xff]  ;;  %v15129_v43 = vld [vmem:[#allocation228_spill] sm:$0xff] }
 0x42d   :  { %v15113_v27 = vsub.f32 1.5, %v15112_v40  ;;  %v1518_v60 = vmul.f32 %v15114_v51, %v11003_v31  ;;  %v1203_v28 = vsel %vm12272_vm8, %v15090_v53, %v1199_v38  ;;  %v5182_v14 = vmul.f32 %v12286_v45, %v12236_v57  ;;  %v15122_v53 = vld [vmem:[#allocation165_spill] sm:$0xff]  ;;  %v15123_v38 = vld [vmem:[#allocation134_spill] sm:$0xff]  ;;  %5761 = vst [vmem:[#allocation2 + $0x60] sm:$0xff] %v5729_v3  ;;  %v7324_v40 = vld [vmem:[#allocation2 + $0x70] sm:$0xf] }
 0x42e   :  { %v1519_v24 = vmul.f32 %v15118_v42, %v15117_v52  ;;  %v1235_v44 = vmul.f32 %v15120_v58, %v15119_v54  ;;  %vm1210_vm10 = vweird.f32 %v15121_v32  ;;  %vm1211_vm11 = vweird.f32 %v15122_v53  ;;  %5764 = vst [vmem:[#allocation2 + $0x78] sm:$0xff] %v5732_v56  ;;  %v15130_v25 = vld [vmem:[#allocation94_spill] sm:$0xff]  ;;  %v7408_v56 = vld [vmem:[#allocation2 + $0x74] sm:$0xf] }
 0x42f   :  { %v1259_v26 = vmul.f32 %v15085_v8, %v15113_v27  ;;  %v12317_v23 = vmul.f32 %v15124_v13, %v15123_v38  ;;  %v12321_v19 = vmul.f32 %v15125_v12, %v11003_v31  ;;  %v12323_v20 = vmul.f32 0.5, %v1246_v34  ;;  %5762 = vst [vmem:[#allocation2 + $0x68] sm:$0xff] %v5730_v36  ;;  %vm12336_vm12 = vmor %vm1210_vm10, %vm1211_vm11  ;;  %v4921_v34 = vpop.xlane.xlu0 %4920  ;;  %v15133_v13 = vld [vmem:[#allocation73_spill] sm:$0xff] }
 0x430   :  { %v5183_v10 = vmul.f32 %v12286_v45, %v5182_v14  ;;  %v12326_v37 = vmul.f32 0.5, %v1286_v18  ;;  %v1209_v48 = vmul.f32 %v15122_v53, %v1208_v5  ;;  %v1450_v50 = vmul.f32 %v15126_v16, %v1203_v28  ;;  %v15131_v18 = vld [vmem:[#allocation84_spill] sm:$0xff] }
 0x431   :  { %v1226_v21 = vmul.f32 %v15111_v0, %v1225_v11  ;;  %v12334_v4 = vsel %vm12305_vm9, %v15085_v8, %v1259_v26  ;;  %v1451_v6 = vmul.f32 %v15129_v43, %v1203_v28  ;;  %v4856_v63 = vadd.f32 %v15131_v18, %v15130_v25  ;;  %v4924_v49 = vpop.xlane.xlu2 %4923 }
 0x432   :  { %v5184_v59 = vmul.f32 0.5, %v5183_v10  ;;  %v12343_v47 = vpop.eup %7779  ;;  %v12345_v5 = vmul.f32 3.0, %v1518_v60  ;;  %v12347_v3 = vmul.f32 3.0, %v1519_v24  ;;  %v1236_v8 = vmul.f32 %v15120_v58, %v1235_v44  ;;  %v15134_v10 = vld [vmem:[#allocation47_spill] sm:$0xff] }
 0x433   :  { %v12350_v11 = vadd.f32 1e-20, %v4921_v34  ;;  %v1248_v36 = vsub.f32 1.5, %v12323_v20  ;;  %vm5188_vm13 = vweird.f32 %v12286_v45  ;;  %4857 = vadd.xlane.f32.xlu1 %v4856_v63  ;;  %v5192_v26 = vmul.f32 %v12343_v47, %v12279_v17  ;;  %v15135_v34 = vld [vmem:[#allocation232_spill] sm:$0xff]  ;;  %v15149_v20 = vld [vmem:[#allocation174_spill] sm:$0xff] }
 0x434   :  { %v5185_v27 = vsub.f32 1.5, %v5184_v59  ;;  %v1213_v51 = vsel %vm12336_vm12, %v15122_v53, %v1209_v48  ;;  %v1514_v60 = vmul.f32 %v1450_v50, %v11003_v31  ;;  %v12360_v28 = vmul.f32 0.5, %v1226_v21  ;;  %v7316_v16 = vld [vmem:[#allocation2 + $0x60] sm:$0xf]  ;;  %v7406_v59 = vld [vmem:[#allocation2 + $0x64] sm:$0xf] }
 0x435   :  { %7781 = vrsqrt.f32 %v12350_v11  ;;  %v1515_v14 = vmul.f32 %v1451_v6, %v15117_v52  ;;  %v7326_v55 = vld [vmem:[#allocation2 + $0x78] sm:$0xf0]  ;;  %v7409_v42 = vld [vmem:[#allocation2 + $0x74] sm:$0xf0]  ;;  %vm5187_vm14 = vweird.f32 %v12236_v57  ;;  %v5193_v44 = vmul.f32 %v12343_v47, %v5192_v26 }
 0x436   :  { %v5186_v24 = vmul.f32 %v12286_v45, %v5185_v27  ;;  %v12367_v32 = vmul.f32 0.5, %v1236_v8  ;;  %vm1230_vm15 = vweird.f32 %v15110_v22  ;;  %v12370_v53 = vor.u32 %v7409_v42, %v7324_v40  ;;  %vm5189_vm0 = vmor %vm5187_vm14, %vm5188_vm13  ;;  %v7407_v50 = vld [vmem:[#allocation2 + $0x64] sm:$0xf0]  ;;  %v7318_v63 = vld [vmem:[#allocation2 + $0x68] sm:$0xf0] }
 0x437   :  { %v12372_v38 = vor.u32 %v7408_v56, %v7326_v55  ;;  %v1452_v12 = vmul.f32 %v15133_v13, %v1213_v51  ;;  %v1453_v48 = vmul.f32 %v15134_v10, %v1213_v51  ;;  %v5194_v21 = vmul.f32 0.5, %v5193_v44  ;;  %v15136_v56 = vld [vmem:[#allocation30_spill] sm:$0xff] }
 0x438   :  { %v5190_v57 = vsel %vm5189_vm0, %v12286_v45, %v5186_v24  ;;  %v5565_v43 = vmul.f32 3.0, %v1514_v60  ;;  %v1228_v6 = vsub.f32 1.5, %v12360_v28  ;;  %6049 = vmatpush.bf16.msrb.mxu0 %v12370_v53  ;;  %v5566_v27 = vmul.f32 3.0, %v1515_v14  ;;  %v7308_v60 = vld [vmem:[#allocation2 + $0x50] sm:$0xf] }
 0x439   :  { %15132 = vst [vmem:[#allocation149_spill] sm:$0xff] %v12372_v38  ;;  %v5437_v8 = vmul.f32 %v15135_v34, %v5190_v57  ;;  %v5438_v40 = vmul.f32 %v15136_v56, %v5190_v57  ;;  %v5195_v26 = vsub.f32 1.5, %v5194_v21  ;;  %vm5198_vm1 = vweird.f32 %v12343_v47  ;;  %6075 = vmatpush.bf16.msrb.mxu2 %v12372_v38  ;;  %v7405_v28 = vld [vmem:[#allocation2 + $0x54] sm:$0xf0]  ;;  %v7310_v57 = vld [vmem:[#allocation2 + $0x58] sm:$0xf0] }
 0x43a   :  { %v12385_v45 = vadd.f32 1e-20, %v4924_v49  ;;  %v12389_v55 = vor.u32 %v7407_v50, %v7316_v16  ;;  %vm5197_vm2 = vweird.f32 %v12279_v17  ;;  %v12394_v14 = vor.u32 %v7406_v59, %v7318_v63  ;;  %v7404_v50 = vld [vmem:[#allocation2 + $0x54] sm:$0xf]  ;;  %v15140_v34 = vld [vmem:[#allocation235_spill] sm:$0xff] }
 0x43b   :  { %v12387_v51 = vpop.eup %7781  ;;  %v5501_v42 = vmul.f32 %v5437_v8, %v12005_v46  ;;  %v5502_v24 = vmul.f32 %v5438_v40, %v12206_v9  ;;  %v5196_v44 = vmul.f32 %v12343_v47, %v5195_v26  ;;  %v1516_v10 = vmul.f32 %v1452_v12, %v11003_v31  ;;  %vm5199_vm3 = vmor %vm5197_vm2, %vm5198_vm1  ;;  %v15141_v56 = vld [vmem:[#allocation168_spill] sm:$0xff]  ;;  %v15142_v26 = vld [vmem:[#allocation114_spill] sm:$0xff] }
 0x43c   :  { %15137 = vst [vmem:[#allocation79_spill] sm:$0xff] %v12389_v55  ;;  %v5202_v13 = vmul.f32 %v12387_v51, %v12350_v11  ;;  %7783 = vrsqrt.f32 %v12385_v45  ;;  %v1517_v16 = vmul.f32 %v1453_v48, %v15117_v52  ;;  %6050 = vmatpush.bf16.msrb.mxu0 %v12389_v55  ;;  %vm1240_vm4 = vweird.f32 %v15119_v54 }
 0x43d   :  { %15138 = vst [vmem:[#allocation159_spill] sm:$0xff] %v12394_v14  ;;  %v5629_v21 = vmul.f32 10.0, %v5501_v42  ;;  %v5630_v49 = vmul.f32 10.0, %v5502_v24  ;;  %vm1241_vm5 = vweird.f32 %v15120_v58  ;;  %vm1231_vm6 = vweird.f32 %v15111_v0  ;;  %6076 = vmatpush.bf16.msrb.mxu2 %v12394_v14 }
 0x43e   :  { %v12408_v17 = vor.u32 %v7405_v28, %v7308_v60  ;;  %v5200_v12 = vsel %vm5199_vm3, %v12343_v47, %v5196_v44  ;;  %v5203_v48 = vmul.f32 %v12387_v51, %v5202_v13  ;;  %vm1250_vm7 = vweird.f32 %v15142_v26  ;;  %v7300_v28 = vld [vmem:[#allocation2 + $0x40] sm:$0xf]  ;;  %v7403_v47 = vld [vmem:[#allocation2 + $0x44] sm:$0xf0]  ;;  %v4927_v13 = vpop.xlane.xlu2 %4926  ;;  %vm1232_vm9 = vmor %vm1230_vm15, %vm1231_vm6 }
 0x43f   :  { %v5693_v59 = vadd.f32 %v5629_v21, %v5565_v43  ;;  %v5694_v63 = vadd.f32 %v5630_v49, %v5566_v27  ;;  %v5439_v8 = vmul.f32 %v15140_v34, %v5200_v12  ;;  %v5440_v40 = vmul.f32 %v15141_v56, %v5200_v12  ;;  %v7402_v43 = vld [vmem:[#allocation2 + $0x44] sm:$0xf]  ;;  %v7302_v27 = vld [vmem:[#allocation2 + $0x48] sm:$0xf0]  ;;  %vm12470_vm13 = vmor %vm1240_vm4, %vm1241_vm5 }
 0x440   :  { %15139 = vst [vmem:[#allocation7_spill] sm:$0xff] %v12408_v17  ;;  %vm1251_vm8 = vweird.f32 %v15108_v7  ;;  %v1238_v42 = vsub.f32 1.5, %v12367_v32  ;;  %v1229_v60 = vmul.f32 %v15111_v0, %v1228_v6  ;;  %v12419_v24 = vor.u32 %v7404_v50, %v7310_v57  ;;  %6051 = vmatpush.bf16.msrb.mxu0 %v12408_v17  ;;  %v7292_v50 = vld [vmem:[#allocation2 + $0x30] sm:$0xf] }
 0x441   :  { %v5204_v44 = vmul.f32 0.5, %v5203_v48  ;;  %v5737_v21 = vpack.c.bf16 %v5694_v63, %v5693_v59  ;;  %v5503_v49 = vmul.f32 %v5439_v8, %v12005_v46  ;;  %v5504_v12 = vmul.f32 %v5440_v40, %v12206_v9  ;;  %v7401_v48 = vld [vmem:[#allocation2 + $0x34] sm:$0xf0]  ;;  %vm12488_vm0 = vmor %vm1250_vm7, %vm1251_vm8 }
 0x442   :  { %15143 = vst [vmem:[#allocation148_spill] sm:$0xff] %v12419_v24  ;;  %v12424_v34 = vadd.f32 1e-20, %v4927_v13  ;;  %v12426_v32 = vpop.eup %7783  ;;  %v5567_v6 = vmul.f32 3.0, %v1516_v10  ;;  %v5568_v56 = vmul.f32 3.0, %v1517_v16  ;;  %vm5208_vm10 = vweird.f32 %v12387_v51  ;;  %6077 = vmatpush.bf16.msrb.mxu2 %v12419_v24  ;;  %v15209_v24 = vld [vmem:[#allocation80_spill] sm:$0xff] }
 0x443   :  { %v5205_v57 = vsub.f32 1.5, %v5204_v44  ;;  %v12434_v59 = vor.u32 %v7403_v47, %v7300_v28  ;;  %5769 = vst [vmem:[#allocation2 + $0xa0] sm:$0xff] %v5737_v21  ;;  %v5631_v63 = vmul.f32 10.0, %v5503_v49  ;;  %v5632_v8 = vmul.f32 10.0, %v5504_v12  ;;  %v7400_v44 = vld [vmem:[#allocation2 + $0x34] sm:$0xf] }
 0x444   :  { %v5212_v10 = vmul.f32 %v12426_v32, %v12385_v45  ;;  %v12438_v16 = vor.u32 %v7402_v43, %v7302_v27  ;;  %vm5207_vm11 = vweird.f32 %v12350_v11  ;;  %7785 = vrsqrt.f32 %v12424_v34  ;;  %v7294_v13 = vld [vmem:[#allocation2 + $0x38] sm:$0xf0]  ;;  %v7399_v49 = vld [vmem:[#allocation2 + $0x24] sm:$0xf0] }
 0x445   :  { %15144 = vst [vmem:[#allocation167_spill] sm:$0xff] %v12434_v59  ;;  %v5206_v22 = vmul.f32 %v12387_v51, %v5205_v57  ;;  %v1233_v40 = vsel %vm1232_vm9, %v15111_v0, %v1229_v60  ;;  %v5695_v28 = vadd.f32 %v5631_v63, %v5567_v6  ;;  %v5696_v47 = vadd.f32 %v5632_v8, %v5568_v56  ;;  %vm5209_vm12 = vmor %vm5207_vm11, %vm5208_vm10  ;;  %v7284_v60 = vld [vmem:[#allocation2 + $0x20] sm:$0xf]  ;;  %v15148_v57 = vld [vmem:[#allocation143_spill] sm:$0xff] }
 0x446   :  { %15145 = vst [vmem:[#allocation186_spill] sm:$0xff] %v12438_v16  ;;  %v5213_v21 = vmul.f32 %v12426_v32, %v5212_v10  ;;  %6052 = vmatpush.bf16.msrb.mxu0 %v12434_v59  ;;  %v1249_v43 = vmul.f32 %v15108_v7, %v1248_v36  ;;  %v1239_v11 = vmul.f32 %v15120_v58, %v1238_v42  ;;  %v15147_v6 = vld [vmem:[#allocation237_spill] sm:$0xff]  ;;  %v4930_v10 = vpop.xlane.xlu1 %4929  ;;  %v12459_v59 = vadd.f32 1e-20, %v15149_v20 }
 0x447   :  { %v12452_v27 = vor.u32 %v7401_v48, %v7292_v50  ;;  %v5210_v0 = vsel %vm5209_vm12, %v12387_v51, %v5206_v22  ;;  %6078 = vmatpush.bf16.msrb.mxu2 %v12438_v16  ;;  %v5738_v12 = vpack.c.bf16 %v5696_v47, %v5695_v28  ;;  %v15150_v36 = vld [vmem:[#allocation133_spill] sm:$0xff]  ;;  %v12462_v50 = vor.u32 %v7400_v44, %v7294_v13  ;;  %v7398_v22 = vld [vmem:[#allocation2 + $0x24] sm:$0xf]  ;;  %v7286_v28 = vld [vmem:[#allocation2 + $0x28] sm:$0xf0] }
 0x448   :  { %v5441_v56 = vmul.f32 %v15147_v6, %v5210_v0  ;;  %v5442_v63 = vmul.f32 %v15148_v57, %v5210_v0  ;;  %v5214_v8 = vmul.f32 0.5, %v5213_v21  ;;  %v1456_v42 = vmul.f32 %v15150_v36, %v1233_v40  ;;  %v15154_v13 = vld [vmem:[#allocation229_spill] sm:$0xff]  ;;  %v15161_v51 = vld [vmem:[#allocation170_spill] sm:$0xff] }
 0x449   :  { %15146 = vst [vmem:[#allocation130_spill] sm:$0xff] %v12452_v27  ;;  %v12464_v48 = vadd.f32 1e-20, %v4930_v10  ;;  %vm5218_vm14 = vweird.f32 %v12426_v32  ;;  %v1457_v6 = vmul.f32 %v15154_v13, %v1233_v40  ;;  %v12479_v54 = vor.u32 %v7399_v49, %v7284_v60 }
 0x44a   :  { %15151 = vst [vmem:[#allocation78_spill] sm:$0xff] %v12462_v50  ;;  %v5505_v47 = vmul.f32 %v5441_v56, %v12005_v46  ;;  %v5506_v21 = vmul.f32 %v5442_v63, %v12206_v9  ;;  %v5215_v0 = vsub.f32 1.5, %v5214_v8  ;;  %6053 = vmatpush.bf16.msrb.mxu0 %v12452_v27  ;;  %v7786_v44 = vpop.eup %7785  ;;  %vm5217_vm15 = vweird.f32 %v12385_v45  ;;  %v15158_v45 = vld [vmem:[#allocation25_spill] sm:$0xff]  ;;  %v15207_v27 = vld [vmem:[#allocation74_spill] sm:$0xff] }
 0x44b   :  { %5770 = vst [vmem:[#allocation2 + $0xa8] sm:$0xff] %v5738_v12  ;;  %6079 = vmatpush.bf16.msrb.mxu2 %v12462_v50  ;;  %7787 = vrsqrt.f32 %v12464_v48  ;;  %v5222_v60 = vmul.f32 %v7786_v44, %v12424_v34  ;;  %v1462_v49 = vmul.f32 %v15158_v45, %v12334_v4  ;;  %v1243_v63 = vsel %vm12470_vm13, %v15120_v58, %v1239_v11  ;;  %vm5219_vm1 = vmor %vm5217_vm15, %vm5218_vm14  ;;  %v15160_v11 = vld [vmem:[#allocation155_spill] sm:$0xff] }
 0x44c   :  { %15155 = vst [vmem:[#allocation157_spill] sm:$0xff] %v12479_v54  ;;  %v5633_v56 = vmul.f32 10.0, %v5505_v47  ;;  %v5634_v57 = vmul.f32 10.0, %v5506_v21  ;;  %v5216_v40 = vmul.f32 %v12426_v32, %v5215_v0  ;;  %v1520_v8 = vmul.f32 %v1456_v42, %v11003_v31 }
 0x44d   :  { %v12500_v26 = vor.u32 %v7398_v22, %v7286_v28  ;;  %v5223_v47 = vmul.f32 %v7786_v44, %v5222_v60  ;;  %7789 = vrsqrt.f32 %v12459_v59  ;;  %v1521_v58 = vmul.f32 %v1457_v6, %v15117_v52 }
 0x44e   :  { %v5697_v10 = vadd.f32 %v5633_v56, %v12345_v5  ;;  %v5698_v20 = vadd.f32 %v5634_v57, %v12347_v3  ;;  %v5220_v36 = vsel %vm5219_vm1, %v12426_v32, %v5216_v40  ;;  %6054 = vmatpush.bf16.msrb.mxu0 %v12479_v54  ;;  %v1253_v5 = vsel %vm12488_vm0, %v15108_v7, %v1249_v43  ;;  %v15162_v3 = vld [vmem:[#allocation65_spill] sm:$0xff]  ;;  %v4933_v0 = vpop.xlane.xlu1 %4932  ;;  %v15163_v56 = vld [vmem:[#allocation192_spill] sm:$0xff] }
 0x44f   :  { %15159 = vst [vmem:[#allocation249_spill] sm:$0xff] %v12500_v26  ;;  %v5443_v42 = vmul.f32 %v15160_v11, %v5220_v36  ;;  %v5444_v22 = vmul.f32 %v15161_v51, %v5220_v36  ;;  %6080 = vmatpush.bf16.msrb.mxu2 %v12500_v26  ;;  %v1458_v28 = vmul.f32 %v15162_v3, %v1243_v63  ;;  %v5224_v21 = vmul.f32 0.5, %v5223_v47  ;;  %v15165_v51 = vld [vmem:[#allocation150_spill] sm:$0xff] }
 0x450   :  { %v5739_v32 = vpack.c.bf16 %v5698_v20, %v5697_v10  ;;  %v1459_v57 = vmul.f32 %v15163_v56, %v1243_v63  ;;  %v12520_v60 = vadd.f32 1e-20, %v4933_v0  ;;  %v5571_v45 = vmul.f32 3.0, %v1520_v8  ;;  %v15164_v20 = vld [vmem:[#allocation222_spill] sm:$0xff] }
 0x451   :  { %v7788_v13 = vpop.eup %7787  ;;  %v5507_v6 = vmul.f32 %v5443_v42, %v12005_v46  ;;  %v5508_v40 = vmul.f32 %v5444_v22, %v12206_v9  ;;  %v5225_v36 = vsub.f32 1.5, %v5224_v21  ;;  %vm5228_vm2 = vweird.f32 %v7786_v44 }
 0x452   :  { %5771 = vst [vmem:[#allocation2 + $0xb0] sm:$0xff] %v5739_v32  ;;  %v5232_v7 = vmul.f32 %v7788_v13, %v12464_v48  ;;  %v5572_v43 = vmul.f32 3.0, %v1521_v58  ;;  %7791 = vrsqrt.f32 %v12520_v60  ;;  %v1463_v63 = vmul.f32 %v15164_v20, %v12334_v4  ;;  %v4936_v56 = vpop.xlane.xlu0 %4935  ;;  %v15168_v20 = vld [vmem:[#allocation102_spill] sm:$0xff] }
 0x453   :  { %v5635_v12 = vmul.f32 10.0, %v5507_v6  ;;  %v5636_v10 = vmul.f32 10.0, %v5508_v40  ;;  %v5226_v47 = vmul.f32 %v7786_v44, %v5225_v36  ;;  %vm5227_vm3 = vweird.f32 %v12424_v34  ;;  %v12527_v42 = vpop.eup %7789  ;;  %v15166_v6 = vld [vmem:[#allocation244_spill] sm:$0xff]  ;;  %v15167_v36 = vld [vmem:[#allocation183_spill] sm:$0xff] }
 0x454   :  { %v5233_v11 = vmul.f32 %v7788_v13, %v5232_v7  ;;  %v12530_v8 = vmul.f32 %v1462_v49, %v11003_v31  ;;  %v1460_v22 = vmul.f32 %v15165_v51, %v1253_v5  ;;  %vm5229_vm4 = vmor %vm5227_vm3, %vm5228_vm2  ;;  %v1522_v32 = vmul.f32 %v1458_v28, %v11003_v31 }
 0x455   :  { %v5699_v3 = vadd.f32 %v5635_v12, %v5571_v45  ;;  %v5700_v58 = vadd.f32 %v5636_v10, %v5572_v43  ;;  %v1523_v21 = vmul.f32 %v1459_v57, %v15117_v52  ;;  %v5230_v4 = vsel %vm5229_vm4, %v7786_v44, %v5226_v47  ;;  %v15169_v10 = vld [vmem:[#allocation245_spill] sm:$0xff] }
 0x456   :  { %v5234_v0 = vmul.f32 0.5, %v5233_v11  ;;  %v5445_v40 = vmul.f32 %v15166_v6, %v5230_v4  ;;  %v5446_v7 = vmul.f32 %v15167_v36, %v5230_v4  ;;  %v12538_v49 = vadd.f32 1e-20, %v4936_v56 }
 0x457   :  { %v5740_v34 = vpack.c.bf16 %v5700_v58, %v5699_v3  ;;  %v1461_v51 = vmul.f32 %v15168_v20, %v1253_v5  ;;  %v1025_v45 = vmul.f32 %v12527_v42, %v12459_v59  ;;  %vm5238_vm5 = vweird.f32 %v7788_v13 }
 0x458   :  { %v5235_v43 = vsub.f32 1.5, %v5234_v0  ;;  %v7792_v28 = vpop.eup %7791  ;;  %v1524_v57 = vmul.f32 %v1460_v22, %v11003_v31  ;;  %v5509_v44 = vmul.f32 %v5445_v40, %v12005_v46  ;;  %v5510_v12 = vmul.f32 %v5446_v7, %v12206_v9  ;;  %v15170_v7 = vld [vmem:[#allocation86_spill] sm:$0xff] }
 0x459   :  { %5772 = vst [vmem:[#allocation2 + $0xb8] sm:$0xff] %v5740_v34  ;;  %7793 = vrsqrt.f32 %v12538_v49  ;;  %v12548_v47 = vadd.f32 1e-20, %v15169_v10  ;;  %vm5237_vm6 = vweird.f32 %v12464_v48  ;;  %v5242_v5 = vmul.f32 %v7792_v28, %v12520_v60 }
 0x45a   :  { %v5236_v11 = vmul.f32 %v7788_v13, %v5235_v43  ;;  %v5573_v3 = vmul.f32 3.0, %v1522_v32  ;;  %v5574_v58 = vmul.f32 3.0, %v1523_v21  ;;  %v5637_v4 = vmul.f32 10.0, %v5509_v44  ;;  %vm5239_vm7 = vmor %vm5237_vm6, %vm5238_vm5  ;;  %v15171_v43 = vld [vmem:[#allocation246_spill] sm:$0xff]  ;;  %v15172_v32 = vld [vmem:[#allocation179_spill] sm:$0xff] }
 0x45b   :  { %v5638_v0 = vmul.f32 10.0, %v5510_v12  ;;  %v1525_v22 = vmul.f32 %v1461_v51, %v15117_v52  ;;  %v1026_v56 = vmul.f32 %v12527_v42, %v1025_v45  ;;  %v5243_v6 = vmul.f32 %v7792_v28, %v5242_v5  ;;  %v4939_v12 = vpop.xlane.xlu0 %4938  ;;  %v15173_v5 = vld [vmem:[#allocation241_spill] sm:$0xff] }
 0x45c   :  { %v5240_v34 = vsel %vm5239_vm7, %v7788_v13, %v5236_v11  ;;  %v5701_v40 = vadd.f32 %v5637_v4, %v5573_v3  ;;  %v1527_v10 = vmul.f32 %v1463_v63, %v15117_v52  ;;  %7795 = vrsqrt.f32 %v12548_v47 }
 0x45d   :  { %v5702_v36 = vadd.f32 %v5638_v0, %v5574_v58  ;;  %v5447_v20 = vmul.f32 %v15170_v7, %v5240_v34  ;;  %v5448_v48 = vmul.f32 %v15171_v43, %v5240_v34  ;;  %v12560_v21 = vadd.f32 1e-20, %v15172_v32  ;;  %v15174_v43 = vld [vmem:[#allocation172_spill] sm:$0xff] }
 0x45e   :  { %v5244_v44 = vmul.f32 0.5, %v5243_v6  ;;  %v12564_v11 = vadd.f32 1e-20, %v4939_v12  ;;  %vm1290_vm8 = vweird.f32 %v15173_v5  ;;  %vm1291_vm9 = vweird.f32 %v15106_v33  ;;  %v15175_v32 = vld [vmem:[#allocation116_spill] sm:$0xff]  ;;  %v15176_v12 = vld [vmem:[#allocation247_spill] sm:$0xff] }
 0x45f   :  { %v7794_v51 = vpop.eup %7793  ;;  %v5741_v26 = vpack.c.bf16 %v5702_v36, %v5701_v40  ;;  %v5511_v13 = vmul.f32 %v5447_v20, %v12005_v46  ;;  %v5512_v45 = vmul.f32 %v5448_v48, %v12206_v9  ;;  %v1027_v63 = vmul.f32 0.5, %v1026_v56  ;;  %vm12613_vm3 = vmor %vm1290_vm8, %vm1291_vm9 }
 0x460   :  { %v5245_v3 = vsub.f32 1.5, %v5244_v44  ;;  %vm5248_vm10 = vweird.f32 %v7792_v28  ;;  %v5252_v58 = vmul.f32 %v7794_v51, %v12538_v49  ;;  %v5575_v4 = vmul.f32 3.0, %v1524_v57 }
 0x461   :  { %v5576_v0 = vmul.f32 3.0, %v1525_v22  ;;  %5773 = vst [vmem:[#allocation2 + $0xc0] sm:$0xff] %v5741_v26  ;;  %v5639_v34 = vmul.f32 10.0, %v5511_v13  ;;  %v5640_v6 = vmul.f32 10.0, %v5512_v45  ;;  %vm5247_vm11 = vweird.f32 %v12520_v60 }
 0x462   :  { %v5246_v40 = vmul.f32 %v7792_v28, %v5245_v3  ;;  %v5253_v36 = vmul.f32 %v7794_v51, %v5252_v58  ;;  %7797 = vrsqrt.f32 %v12564_v11  ;;  %vm1030_vm12 = vweird.f32 %v12459_v59  ;;  %vm5249_vm13 = vmor %vm5247_vm11, %vm5248_vm10  ;;  %v12574_v20 = vpop.eup %7795 }
 0x463   :  { %7799 = vrsqrt.f32 %v12560_v21  ;;  %v5703_v56 = vadd.f32 %v5639_v34, %v5575_v4  ;;  %v5704_v7 = vadd.f32 %v5640_v6, %v5576_v0  ;;  %v1028_v57 = vsub.f32 1.5, %v1027_v63  ;;  %v4864_v4 = vpop.xlane.xlu0 %4863 }
 0x464   :  { %vm1031_vm14 = vweird.f32 %v12527_v42  ;;  %v5250_v26 = vsel %vm5249_vm13, %v7792_v28, %v5246_v40  ;;  %v5254_v22 = vmul.f32 0.5, %v5253_v36  ;;  %v12578_v60 = vadd.f32 1e-20, %v15174_v43 }
 0x465   :  { %v5742_v48 = vpack.c.bf16 %v5704_v7, %v5703_v56  ;;  %v5449_v44 = vmul.f32 %v15175_v32, %v5250_v26  ;;  %v5450_v13 = vmul.f32 %v15176_v12, %v5250_v26  ;;  %v5577_v45 = vmul.f32 3.0, %v12530_v8  ;;  %vm12593_vm0 = vmor %vm1030_vm12, %vm1031_vm14  ;;  %v15181_v32 = vld [vmem:[#allocation131_spill] sm:$0xff]  ;;  %v15182_v12 = vld [vmem:[#allocation184_spill] sm:$0xff] }
 0x466   :  { %v1288_v3 = vsub.f32 1.5, %v12326_v37  ;;  %v5255_v58 = vsub.f32 1.5, %v5254_v22  ;;  %vm5258_vm15 = vweird.f32 %v7794_v51  ;;  %v5578_v63 = vmul.f32 3.0, %v1527_v10 }
 0x467   :  { %5774 = vst [vmem:[#allocation2 + $0xc8] sm:$0xff] %v5742_v48  ;;  %v5513_v28 = vmul.f32 %v5449_v44, %v12005_v46  ;;  %v5514_v0 = vmul.f32 %v5450_v13, %v12206_v9  ;;  %v12586_v34 = vadd.f32 1e-20, %v4864_v4  ;;  %v1029_v40 = vmul.f32 %v12527_v42, %v1028_v57 }
 0x468   :  { %v7798_v6 = vpop.eup %7797  ;;  %v1015_v8 = vmul.f32 %v12574_v20, %v12548_v47  ;;  %v5256_v10 = vmul.f32 %v7794_v51, %v5255_v58  ;;  %vm5257_vm1 = vweird.f32 %v12538_v49  ;;  %7801 = vrsqrt.f32 %v12578_v60  ;;  %v15184_v58 = vld [vmem:[#allocation35_spill] sm:$0xff] }
 0x469   :  { %v12600_v36 = vpop.eup %7799  ;;  %v5641_v56 = vmul.f32 10.0, %v5513_v28  ;;  %v5642_v7 = vmul.f32 10.0, %v5514_v0  ;;  %vm5259_vm2 = vmor %vm5257_vm1, %vm5258_vm15  ;;  %v5262_v59 = vmul.f32 %v7798_v6, %v12564_v11  ;;  %v1529_v57 = vmul.f32 %v12317_v23, %v15117_v52  ;;  %v15183_v23 = vld [vmem:[#allocation43_spill] sm:$0xff] }
 0x46a   :  { %v1289_v26 = vmul.f32 %v15106_v33, %v1288_v3  ;;  %v5260_v22 = vsel %vm5259_vm2, %v7794_v51, %v5256_v10  ;;  %7803 = vrsqrt.f32 %v12586_v34  ;;  %v12621_v3 = vmul.f32 %v15184_v58, %v15183_v23  ;;  %v4942_v10 = vpop.xlane.xlu2 %4941 }
 0x46b   :  { %v5705_v43 = vadd.f32 %v5641_v56, %v5577_v45  ;;  %v5706_v48 = vadd.f32 %v5642_v7, %v5578_v63  ;;  %v5451_v44 = vmul.f32 %v15181_v32, %v5260_v22  ;;  %v5452_v13 = vmul.f32 %v15182_v12, %v5260_v22  ;;  %v15185_v22 = vld [vmem:[#allocation187_spill] sm:$0xff]  ;;  %v15186_v32 = vld [vmem:[#allocation188_spill] sm:$0xff] }
 0x46c   :  { %v1033_v51 = vsel %vm12593_vm0, %v12527_v42, %v1029_v40  ;;  %v1185_v5 = vmul.f32 %v12600_v36, %v12560_v21  ;;  %v5263_v4 = vmul.f32 %v7798_v6, %v5262_v59  ;;  %v1016_v28 = vmul.f32 %v12574_v20, %v1015_v8 }
 0x46d   :  { %v5743_v45 = vpack.c.bf16 %v5706_v48, %v5705_v43  ;;  %v5515_v63 = vmul.f32 %v5451_v44, %v12005_v46  ;;  %v5516_v0 = vmul.f32 %v5452_v13, %v12206_v9  ;;  %v5579_v56 = vmul.f32 3.0, %v12321_v19 }
 0x46e   :  { %v5580_v7 = vmul.f32 3.0, %v1529_v57  ;;  %v1293_v37 = vsel %vm12613_vm3, %v15106_v33, %v1289_v26  ;;  %v5264_v42 = vmul.f32 0.5, %v5263_v4  ;;  %v12635_v40 = vpop.eup %7801  ;;  %v1416_v59 = vmul.f32 %v15185_v22, %v1033_v51 }
 0x46f   :  { %v1417_v8 = vmul.f32 %v15186_v32, %v1033_v51  ;;  %5775 = vst [vmem:[#allocation2 + $0xd0] sm:$0xff] %v5743_v45  ;;  %v5643_v43 = vmul.f32 10.0, %v5515_v63  ;;  %v5644_v48 = vmul.f32 10.0, %v5516_v0  ;;  %v1186_v12 = vmul.f32 %v12600_v36, %v1185_v5  ;;  %v15187_v51 = vld [vmem:[#allocation213_spill] sm:$0xff] }
 0x470   :  { %v7804_v44 = vpop.eup %7803  ;;  %v5265_v13 = vsub.f32 1.5, %v5264_v42  ;;  %vm5268_vm4 = vweird.f32 %v7798_v6  ;;  %v12640_v19 = vadd.f32 1e-20, %v4942_v10  ;;  %v1017_v57 = vmul.f32 0.5, %v1016_v28  ;;  %v15188_v45 = vld [vmem:[#allocation221_spill] sm:$0xff]  ;;  %v15189_v10 = vld [vmem:[#allocation223_spill] sm:$0xff] }
 0x471   :  { %v5707_v49 = vadd.f32 %v5643_v43, %v5579_v56  ;;  %v5708_v33 = vadd.f32 %v5644_v48, %v5580_v7  ;;  %v5012_v26 = vmul.f32 %v7804_v44, %v12586_v34  ;;  %v1175_v58 = vmul.f32 %v12635_v40, %v12578_v60  ;;  %v15191_v43 = vld [vmem:[#allocation248_spill] sm:$0xff] }
 0x472   :  { %v5266_v4 = vmul.f32 %v7798_v6, %v5265_v13  ;;  %vm5267_vm5 = vweird.f32 %v12564_v11  ;;  %7805 = vrsqrt.f32 %v12640_v19  ;;  %v12649_v5 = vmul.f32 %v15187_v51, %v15183_v23  ;;  %v15190_v11 = vld [vmem:[#allocation176_spill] sm:$0xff] }
 0x473   :  { %v1468_v63 = vmul.f32 %v15188_v45, %v1293_v37  ;;  %v5744_v0 = vpack.c.bf16 %v5708_v33, %v5707_v49  ;;  %vm5269_vm6 = vmor %vm5267_vm5, %vm5268_vm4  ;;  %v5013_v28 = vmul.f32 %v7804_v44, %v5012_v26  ;;  %v1469_v56 = vmul.f32 %v15189_v10, %v1293_v37  ;;  %v868_v33 = vpop.xlane.xlu0 %867  ;;  %v15192_v10 = vld [vmem:[#allocation128_spill] sm:$0xff] }
 0x474   :  { %vm1020_vm7 = vweird.f32 %v12548_v47  ;;  %v1187_v7 = vmul.f32 0.5, %v1186_v12  ;;  %v5270_v42 = vsel %vm5269_vm6, %v7798_v6, %v5266_v4  ;;  %v1480_v22 = vmul.f32 %v1416_v59, %v11003_v31 }
 0x475   :  { %5776 = vst [vmem:[#allocation2 + $0xd8] sm:$0xff] %v5744_v0  ;;  %v5453_v32 = vmul.f32 %v15190_v11, %v5270_v42  ;;  %v5454_v48 = vmul.f32 %v15191_v43, %v5270_v42  ;;  %v5014_v23 = vmul.f32 0.5, %v5013_v28  ;;  %v1481_v13 = vmul.f32 %v1417_v8, %v15117_v52  ;;  %v15193_v42 = vld [vmem:[#allocation126_spill] sm:$0xff] }
 0x476   :  { %v1018_v51 = vsub.f32 1.5, %v1017_v57  ;;  %v1176_v49 = vmul.f32 %v12635_v40, %v1175_v58  ;;  %vm5018_vm8 = vweird.f32 %v7804_v44  ;;  %v12661_v26 = vadd.f32 1e-20, %v868_v33 }
 0x477   :  { %v5517_v37 = vmul.f32 %v5453_v32, %v12005_v46  ;;  %v5518_v12 = vmul.f32 %v5454_v48, %v12206_v9  ;;  %v5015_v6 = vsub.f32 1.5, %v5014_v23  ;;  %vm1021_vm9 = vweird.f32 %v12574_v20  ;;  %v15194_v23 = vld [vmem:[#allocation97_spill] sm:$0xff] }
 0x478   :  { %v7806_v59 = vpop.eup %7805  ;;  %v1188_v4 = vsub.f32 1.5, %v1187_v7  ;;  %vm1190_vm10 = vweird.f32 %v12560_v21  ;;  %vm5017_vm11 = vweird.f32 %v12586_v34  ;;  %v1019_v0 = vmul.f32 %v12574_v20, %v1018_v51  ;;  %vm1022_vm14 = vmor %vm1020_vm7, %vm1021_vm9 }
 0x479   :  { %v5645_v8 = vmul.f32 10.0, %v5517_v37  ;;  %v5646_v57 = vmul.f32 10.0, %v5518_v12  ;;  %v5016_v58 = vmul.f32 %v7804_v44, %v5015_v6  ;;  %v5272_v45 = vmul.f32 %v7806_v59, %v12640_v19  ;;  %vm5019_vm13 = vmor %vm5017_vm11, %vm5018_vm8 }
 0x47a   :  { %vm1191_vm12 = vweird.f32 %v12600_v36  ;;  %v1177_v28 = vmul.f32 0.5, %v1176_v49  ;;  %7807 = vrsqrt.f32 %v12661_v26  ;;  %v1532_v43 = vmul.f32 %v1468_v63, %v11003_v31  ;;  %v15195_v49 = vld [vmem:[#allocation178_spill] sm:$0xff] }
 0x47b   :  { %v5709_v7 = vadd.f32 %v5645_v8, %v15192_v10  ;;  %v5710_v11 = vadd.f32 %v5646_v57, %v15193_v42  ;;  %v5020_v32 = vsel %vm5019_vm13, %v7804_v44, %v5016_v58  ;;  %v5273_v34 = vmul.f32 %v7806_v59, %v5272_v45  ;;  %vm1192_vm15 = vmor %vm1190_vm10, %vm1191_vm12  ;;  %v15196_v10 = vld [vmem:[#allocation125_spill] sm:$0xff] }
 0x47c   :  { %v1189_v48 = vmul.f32 %v12600_v36, %v1188_v4  ;;  %v5403_v51 = vmul.f32 %v15194_v23, %v5020_v32  ;;  %v5404_v33 = vmul.f32 %v15195_v49, %v5020_v32  ;;  %v1533_v37 = vmul.f32 %v1469_v56, %v15117_v52  ;;  %v15198_v23 = vld [vmem:[#allocation135_spill] sm:$0xff] }
 0x47d   :  { %v5531_v12 = vmul.f32 3.0, %v1480_v22  ;;  %v5745_v44 = vpack.c.bf16 %v5710_v11, %v5709_v7  ;;  %v5274_v63 = vmul.f32 0.5, %v5273_v34  ;;  %v5532_v6 = vmul.f32 3.0, %v1481_v13  ;;  %v4945_v45 = vpop.xlane.xlu2 %4944 }
 0x47e   :  { %v1178_v8 = vsub.f32 1.5, %v1177_v28  ;;  %v5467_v47 = vmul.f32 %v5403_v51, %v12005_v46  ;;  %v5468_v4 = vmul.f32 %v5404_v33, %v12206_v9  ;;  %v1023_v57 = vsel %vm1022_vm14, %v12574_v20, %v1019_v0  ;;  %v15199_v33 = vld [vmem:[#allocation83_spill] sm:$0xff] }
 0x47f   :  { %vm1180_vm0 = vweird.f32 %v12578_v60  ;;  %5777 = vst [vmem:[#allocation2 + $0xe0] sm:$0xff] %v5745_v44  ;;  %v5275_v56 = vsub.f32 1.5, %v5274_v63  ;;  %vm5278_vm1 = vweird.f32 %v7806_v59  ;;  %v1193_v21 = vsel %vm1192_vm15, %v12600_v36, %v1189_v48  ;;  %v15197_v36 = vld [vmem:[#allocation233_spill] sm:$0xff] }
 0x480   :  { %v12690_v22 = vpop.eup %7807  ;;  %vm1181_vm2 = vweird.f32 %v12635_v40  ;;  %v5595_v58 = vmul.f32 10.0, %v5467_v47  ;;  %v5596_v13 = vmul.f32 10.0, %v5468_v4  ;;  %vm5277_vm3 = vweird.f32 %v12640_v19  ;;  %v15200_v63 = vld [vmem:[#allocation81_spill] sm:$0xff] }
 0x481   :  { %v5276_v28 = vmul.f32 %v7806_v59, %v5275_v56  ;;  %v995_v20 = vmul.f32 %v12690_v22, %v12661_v26  ;;  %v12697_v0 = vadd.f32 1e-20, %v4945_v45  ;;  %v1414_v7 = vmul.f32 %v15196_v10, %v1023_v57  ;;  %vm5279_vm4 = vmor %vm5277_vm3, %vm5278_vm1  ;;  %v15202_v47 = vld [vmem:[#allocation37_spill] sm:$0xff] }
 0x482   :  { %v1179_v42 = vmul.f32 %v12635_v40, %v1178_v8  ;;  %v5659_v11 = vadd.f32 %v5595_v58, %v5531_v12  ;;  %v5660_v32 = vadd.f32 %v5596_v13, %v5532_v6  ;;  %v1415_v34 = vmul.f32 %v15197_v36, %v1023_v57  ;;  %vm1182_vm5 = vmor %vm1180_vm0, %vm1181_vm2  ;;  %v15201_v6 = vld [vmem:[#allocation117_spill] sm:$0xff] }
 0x483   :  { %v5280_v48 = vsel %vm5279_vm4, %v7806_v59, %v5276_v28  ;;  %v996_v19 = vmul.f32 %v12690_v22, %v995_v20  ;;  %7809 = vrsqrt.f32 %v12697_v0  ;;  %v1448_v51 = vmul.f32 %v15198_v23, %v1193_v21  ;;  %v15203_v59 = vld [vmem:[#allocation238_spill] sm:$0xff] }
 0x484   :  { %v5720_v49 = vpack.c.bf16 %v5660_v32, %v5659_v11  ;;  %v5455_v44 = vmul.f32 %v15199_v33, %v5280_v48  ;;  %v5456_v12 = vmul.f32 %v15200_v63, %v5280_v48  ;;  %v12711_v8 = vmul.f32 3.0, %v15201_v6  ;;  %v15204_v23 = vld [vmem:[#allocation154_spill] sm:$0xff] }
 0x485   :  { %v12714_v4 = vmul.f32 3.0, %v15202_v47  ;;  %v1536_v60 = vmul.f32 %v12621_v3, %v11003_v31  ;;  %v1449_v57 = vmul.f32 %v15203_v59, %v1193_v21  ;;  %v1183_v56 = vsel %vm1182_vm5, %v12635_v40, %v1179_v42  ;;  %v4948_v40 = vpop.xlane.xlu1 %4947  ;;  %v4909_v6 = vpop.xlane.xlu2 %4908 }
 0x486   :  { %5752 = vst [vmem:[#allocation2 + $0x18] sm:$0xff] %v5720_v49  ;;  %v5519_v58 = vmul.f32 %v5455_v44, %v12005_v46  ;;  %v5520_v13 = vmul.f32 %v5456_v12, %v12206_v9  ;;  %v997_v45 = vmul.f32 0.5, %v996_v19  ;;  %v1537_v28 = vmul.f32 %v12649_v5, %v15117_v52  ;;  %v15205_v49 = vld [vmem:[#allocation239_spill] sm:$0xff]  ;;  %v919_v12 = vpop.xlane.xlu0 %918 }
 0x487   :  { %v5583_v20 = vmul.f32 3.0, %v1532_v43  ;;  %v5584_v10 = vmul.f32 3.0, %v1533_v37  ;;  %v1478_v11 = vmul.f32 %v1414_v7, %v11003_v31  ;;  %v1479_v32 = vmul.f32 %v1415_v34, %v15117_v52 }
 0x488   :  { %v1512_v3 = vmul.f32 %v1448_v51, %v11003_v31  ;;  %v5647_v21 = vmul.f32 10.0, %v5519_v58  ;;  %v5648_v36 = vmul.f32 10.0, %v5520_v13  ;;  %v1513_v48 = vmul.f32 %v1449_v57, %v15117_v52 }
 0x489   :  { %v12727_v42 = vpop.eup %7809  ;;  %v1446_v19 = vmul.f32 %v15204_v23, %v1183_v56  ;;  %v1447_v33 = vmul.f32 %v15205_v49, %v1183_v56  ;;  %v12732_v5 = vadd.f32 1e-20, %v4948_v40  ;;  %v998_v7 = vsub.f32 1.5, %v997_v45  ;;  %v7417_v40 = vld [vmem:[#allocation2 + $0xb4] sm:$0xf0] }
 0x48a   :  { %v5711_v43 = vadd.f32 %v5647_v21, %v5583_v20  ;;  %v5712_v37 = vadd.f32 %v5648_v36, %v5584_v10  ;;  %v5282_v34 = vmul.f32 %v12727_v42, %v12697_v0  ;;  %v12736_v51 = vmul.f32 3.0, %v1536_v60  ;;  %v7358_v21 = vld [vmem:[#allocation2 + $0xb8] sm:$0xf0]  ;;  %v7414_v36 = vld [vmem:[#allocation2 + $0xa4] sm:$0xf] }
 0x48b   :  { %v12738_v44 = vmul.f32 3.0, %v1537_v28  ;;  %v12740_v63 = vmul.f32 3.0, %v1478_v11  ;;  %7811 = vrsqrt.f32 %v12732_v5  ;;  %v12743_v47 = vmul.f32 3.0, %v1479_v32  ;;  %v7415_v28 = vld [vmem:[#allocation2 + $0xa4] sm:$0xf0] }
 0x48c   :  { %v12745_v59 = vmul.f32 3.0, %v1512_v3  ;;  %v5746_v57 = vpack.c.bf16 %v5712_v37, %v5711_v43  ;;  %v5283_v56 = vmul.f32 %v12727_v42, %v5282_v34  ;;  %v12748_v58 = vmul.f32 3.0, %v1513_v48  ;;  %v7348_v32 = vld [vmem:[#allocation2 + $0xa0] sm:$0xf]  ;;  %v7350_v3 = vld [vmem:[#allocation2 + $0xa8] sm:$0xf0] }
 0x48d   :  { %v1510_v60 = vmul.f32 %v1446_v19, %v11003_v31  ;;  %v1511_v13 = vmul.f32 %v1447_v33, %v15117_v52  ;;  %v12752_v45 = vadd.f32 1e-20, %v919_v12  ;;  %v999_v20 = vmul.f32 %v12690_v22, %v998_v7  ;;  %v7419_v48 = vld [vmem:[#allocation2 + $0xc4] sm:$0xf0]  ;;  %v7416_v37 = vld [vmem:[#allocation2 + $0xb4] sm:$0xf] }
 0x48e   :  { %5778 = vst [vmem:[#allocation2 + $0xe8] sm:$0xff] %v5746_v57  ;;  %vm1001_vm6 = vweird.f32 %v12690_v22  ;;  %v5284_v10 = vmul.f32 0.5, %v5283_v56  ;;  %v12756_v11 = vadd.f32 1e-20, %v4909_v6  ;;  %vm1000_vm7 = vweird.f32 %v12661_v26  ;;  %v7366_v7 = vld [vmem:[#allocation2 + $0xc8] sm:$0xf0] }
 0x48f   :  { %7813 = vrsqrt.f32 %v12752_v45  ;;  %vm5288_vm8 = vweird.f32 %v12727_v42  ;;  %v12764_v49 = vmul.f32 3.0, %v1510_v60  ;;  %v12766_v33 = vmul.f32 3.0, %v1511_v13  ;;  %vm1002_vm9 = vmor %vm1000_vm7, %vm1001_vm6  ;;  %v7356_v34 = vld [vmem:[#allocation2 + $0xb0] sm:$0xf]  ;;  %v7364_v26 = vld [vmem:[#allocation2 + $0xc0] sm:$0xf] }
 0x490   :  { %v5285_v23 = vsub.f32 1.5, %v5284_v10  ;;  %7815 = vrsqrt.f32 %v12756_v11  ;;  %v12768_v43 = vor.u32 %v7415_v28, %v7348_v32  ;;  %v7421_v12 = vld [vmem:[#allocation2 + $0xd4] sm:$0xf0]  ;;  %v1003_v6 = vsel %vm1002_vm9, %v12690_v22, %v999_v20  ;;  %v7418_v10 = vld [vmem:[#allocation2 + $0xc4] sm:$0xf]  ;;  %v4861_v22 = vpop.xlane.xlu1 %4860  ;;  %v4903_v20 = vpop.xlane.xlu0 %4902 }
 0x491   :  { %v12762_v19 = vpop.eup %7811  ;;  %vm5287_vm10 = vweird.f32 %v12697_v0  ;;  %v12777_v60 = vor.u32 %v7414_v36, %v7350_v3  ;;  %v12779_v13 = vor.u32 %v7417_v40, %v7356_v34  ;;  %v12781_v28 = vor.u32 %v7416_v37, %v7358_v21  ;;  %v7372_v0 = vld [vmem:[#allocation2 + $0xd0] sm:$0xf]  ;;  %v871_v40 = vpop.xlane.xlu2 %870 }
 0x492   :  { %v5286_v57 = vmul.f32 %v12727_v42, %v5285_v23  ;;  %v5292_v56 = vmul.f32 %v12762_v19, %v12732_v5  ;;  %v12783_v32 = vor.u32 %v7419_v48, %v7364_v26  ;;  %vm5289_vm11 = vmor %vm5287_vm10, %vm5288_vm8  ;;  %v12787_v23 = vor.u32 %v7418_v10, %v7366_v7  ;;  %v15206_v48 = vld [vmem:[#allocation189_spill] sm:$0xff] }
 0x493   :  { %v12791_v36 = vadd.f32 1e-20, %v4861_v22  ;;  %v12795_v37 = vor.u32 %v7421_v12, %v7372_v0  ;;  %v1410_v34 = vmul.f32 %v15206_v48, %v1003_v6  ;;  %v7374_v10 = vld [vmem:[#allocation2 + $0xd8] sm:$0xf0]  ;;  %v12805_v22 = vadd.f32 1e-20, %v4903_v20 }
 0x494   :  { %v5290_v54 = vsel %vm5289_vm11, %v12727_v42, %v5286_v57  ;;  %v5293_v3 = vmul.f32 %v12762_v19, %v5292_v56  ;;  %v1411_v42 = vmul.f32 %v15207_v27, %v1003_v6  ;;  %vm5298_vm12 = vweird.f32 %v12762_v19 }
 0x495   :  { %v12793_v21 = vpop.eup %7813  ;;  %v5457_v26 = vmul.f32 %v11655_v41, %v5290_v54  ;;  %v5458_v50 = vmul.f32 %v11991_v61, %v5290_v54  ;;  %v7420_v61 = vld [vmem:[#allocation2 + $0xd4] sm:$0xf]  ;;  %7817 = vrsqrt.f32 %v12791_v36  ;;  %v12814_v27 = vadd.f32 1e-20, %v871_v40 }
 0x496   :  { %v12800_v7 = vpop.eup %7815  ;;  %v5294_v57 = vmul.f32 0.5, %v5293_v3  ;;  %v1165_v56 = vmul.f32 %v12793_v21, %v12752_v45  ;;  %v12816_v6 = vor.u32 %v7420_v61, %v7374_v10  ;;  %vm5297_vm13 = vweird.f32 %v12732_v5 }
 0x497   :  { %v5521_v12 = vmul.f32 %v5457_v26, %v12005_v46  ;;  %v5522_v0 = vmul.f32 %v5458_v50, %v12206_v9  ;;  %v5162_v41 = vmul.f32 %v12800_v7, %v12756_v11  ;;  %7819 = vrsqrt.f32 %v12805_v22  ;;  %vm5299_vm14 = vmor %vm5297_vm13, %vm5298_vm12 }
 0x498   :  { %v5295_v54 = vsub.f32 1.5, %v5294_v57  ;;  %v1166_v48 = vmul.f32 %v12793_v21, %v1165_v56  ;;  %v1474_v57 = vmul.f32 %v1410_v34, %v11003_v31  ;;  %7821 = vrsqrt.f32 %v12814_v27 }
 0x499   :  { %v5649_v20 = vmul.f32 10.0, %v5521_v12  ;;  %v5650_v3 = vmul.f32 10.0, %v5522_v0  ;;  %v5163_v26 = vmul.f32 %v12800_v7, %v5162_v41  ;;  %v4912_v12 = vpop.xlane.xlu1 %4911  ;;  %v1475_v0 = vmul.f32 %v1411_v42, %v15117_v52  ;;  %v4855_v61 = vpop.xlane.xlu2 %4854 }
 0x49a   :  { %v5296_v50 = vmul.f32 %v12762_v19, %v5295_v54  ;;  %v1167_v16 = vmul.f32 0.5, %v1166_v48  ;;  %v12830_v5 = vadd.f32 1e-20, %v4912_v12  ;;  %vm5168_vm15 = vweird.f32 %v12800_v7 }
 0x49b   :  { %v5713_v56 = vadd.f32 %v5649_v20, %v12711_v8  ;;  %v5714_v40 = vadd.f32 %v5650_v3, %v12714_v4  ;;  %v5164_v10 = vmul.f32 0.5, %v5163_v26  ;;  %v12834_v48 = vpop.eup %7817  ;;  %v12838_v42 = vadd.f32 1e-20, %v4855_v61 }
 0x49c   :  { %v5300_v41 = vsel %vm5299_vm14, %v12762_v19, %v5296_v50  ;;  %v1168_v20 = vsub.f32 1.5, %v1167_v16  ;;  %7823 = vrsqrt.f32 %v12830_v5  ;;  %v7423_v19 = vld [vmem:[#allocation2 + $0xe4] sm:$0xf0]  ;;  %v12847_v16 = vmul.f32 3.0, %v1474_v57 }
 0x49d   :  { %v5747_v54 = vpack.c.bf16 %v5714_v40, %v5713_v56  ;;  %v5459_v34 = vmul.f32 %v11663_v62, %v5300_v41  ;;  %v5460_v8 = vmul.f32 %v12021_v15, %v5300_v41  ;;  %v5165_v4 = vsub.f32 1.5, %v5164_v10  ;;  %v12845_v50 = vpop.eup %7819  ;;  %v7380_v56 = vld [vmem:[#allocation2 + $0xe0] sm:$0xf]  ;;  %v7422_v41 = vld [vmem:[#allocation2 + $0xe4] sm:$0xf] }
 0x49e   :  { %v5002_v15 = vmul.f32 %v12834_v48, %v12791_v36  ;;  %vm1170_vm0 = vweird.f32 %v12752_v45  ;;  %vm5167_vm1 = vweird.f32 %v12756_v11  ;;  %7825 = vrsqrt.f32 %v12838_v42  ;;  %v12856_v61 = vpop.eup %7821 }
 0x49f   :  { %5779 = vst [vmem:[#allocation2 + $0xf0] sm:$0xff] %v5747_v54  ;;  %v5523_v3 = vmul.f32 %v5459_v34, %v12005_v46  ;;  %v5524_v26 = vmul.f32 %v5460_v8, %v12206_v9  ;;  %v5166_v62 = vmul.f32 %v12800_v7, %v5165_v4  ;;  %v12852_v40 = vmul.f32 3.0, %v1475_v0  ;;  %vm5169_vm2 = vmor %vm5167_vm1, %vm5168_vm15  ;;  %v7382_v54 = vld [vmem:[#allocation2 + $0xe8] sm:$0xf0] }
 0x4a0   :  { %v12858_v57 = vor.u32 %v7423_v19, %v7380_v56  ;;  %v5003_v11 = vmul.f32 %v12834_v48, %v5002_v15  ;;  %v5142_v8 = vmul.f32 %v12845_v50, %v12805_v22  ;;  %vm1171_vm3 = vweird.f32 %v12793_v21  ;;  %v15208_v19 = vld [vmem:[#allocation171_spill] sm:$0xff] }
 0x4a1   :  { %v5651_v10 = vmul.f32 10.0, %v5523_v3  ;;  %v5652_v12 = vmul.f32 10.0, %v5524_v26  ;;  %v5170_v34 = vsel %vm5169_vm2, %v12800_v7, %v5166_v62  ;;  %v1169_v3 = vmul.f32 %v12793_v21, %v1168_v20  ;;  %vm1172_vm5 = vmor %vm1170_vm0, %vm1171_vm3 }
 0x4a2   :  { %v12868_v26 = vpop.eup %7823  ;;  %v5433_v56 = vmul.f32 %v15208_v19, %v5170_v34  ;;  %v5434_v7 = vmul.f32 %v15209_v24, %v5170_v34  ;;  %v5004_v62 = vmul.f32 0.5, %v5003_v11  ;;  %v5143_v15 = vmul.f32 %v12845_v50, %v5142_v8  ;;  %v916_v11 = vpop.xlane.xlu1 %915 }
 0x4a3   :  { %v5715_v0 = vadd.f32 %v5651_v10, %v12736_v51  ;;  %v5716_v4 = vadd.f32 %v5652_v12, %v12738_v44  ;;  %v12873_v17 = vor.u32 %v7422_v41, %v7382_v54  ;;  %vm5008_vm4 = vweird.f32 %v12834_v48 }
 0x4a4   :  { %v1005_v51 = vmul.f32 %v12856_v61, %v12814_v27  ;;  %v12878_v44 = vpop.eup %7825  ;;  %v5497_v20 = vmul.f32 %v5433_v56, %v12005_v46  ;;  %v5498_v24 = vmul.f32 %v5434_v7, %v12206_v9  ;;  %v5005_v10 = vsub.f32 1.5, %v5004_v62  ;;  %v15210_v62 = vld [vmem:[#allocation99_spill] sm:$0xff] }
 0x4a5   :  { %v5748_v14 = vpack.c.bf16 %v5716_v4, %v5715_v0  ;;  %v5144_v12 = vmul.f32 0.5, %v5143_v15  ;;  %v1173_v41 = vsel %vm1172_vm5, %v12793_v21, %v1169_v3  ;;  %vm5007_vm6 = vweird.f32 %v12791_v36 }
 0x4a6   :  { %v1006_v54 = vmul.f32 %v12856_v61, %v1005_v51  ;;  %v5172_v34 = vmul.f32 %v12868_v26, %v12830_v5  ;;  %v5625_v8 = vmul.f32 10.0, %v5497_v20  ;;  %v5626_v45 = vmul.f32 10.0, %v5498_v24  ;;  %vm5009_vm7 = vmor %vm5007_vm6, %vm5008_vm4  ;;  %v15211_v51 = vld [vmem:[#allocation175_spill] sm:$0xff] }
 0x4a7   :  { %5780 = vst [vmem:[#allocation2 + $0xf8] sm:$0xff] %v5748_v14  ;;  %v5006_v0 = vmul.f32 %v12834_v48, %v5005_v10  ;;  %v5145_v4 = vsub.f32 1.5, %v5144_v12  ;;  %vm5148_vm8 = vweird.f32 %v12845_v50  ;;  %v4982_v36 = vmul.f32 %v12878_v44, %v12838_v42  ;;  %v15212_v10 = vld [vmem:[#allocation127_spill] sm:$0xff] }
 0x4a8   :  { %v1007_v14 = vmul.f32 0.5, %v1006_v54  ;;  %v5173_v21 = vmul.f32 %v12868_v26, %v5172_v34  ;;  %v5689_v3 = vadd.f32 %v5625_v8, %v12764_v49  ;;  %v5690_v19 = vadd.f32 %v5626_v45, %v12766_v33  ;;  %v15213_v54 = vld [vmem:[#allocation36_spill] sm:$0xff] }
 0x4a9   :  { %v5010_v56 = vsel %vm5009_vm7, %v12834_v48, %v5006_v0  ;;  %v5146_v7 = vmul.f32 %v12845_v50, %v5145_v4  ;;  %vm5147_vm9 = vweird.f32 %v12805_v22  ;;  %v1444_v12 = vmul.f32 %v15212_v10, %v1173_v41  ;;  %v7424_v49 = vld [vmem:[#allocation2 + $0xf4] sm:$0xf]  ;;  %v7388_v33 = vld [vmem:[#allocation2 + $0xf0] sm:$0xf]  ;;  %v15215_v10 = vld [vmem:[#allocation82_spill] sm:$0xff] }
 0x4aa   :  { %v5401_v15 = vmul.f32 %v15210_v62, %v5010_v56  ;;  %v5402_v20 = vmul.f32 %v15211_v51, %v5010_v56  ;;  %v5174_v24 = vmul.f32 0.5, %v5173_v21  ;;  %v1445_v34 = vmul.f32 %v15213_v54, %v1173_v41  ;;  %vm5149_vm10 = vmor %vm5147_vm9, %vm5148_vm8  ;;  %v4906_v62 = vpop.xlane.xlu2 %4905 }
 0x4ab   :  { %v5735_v55 = vpack.c.bf16 %v5690_v19, %v5689_v3  ;;  %v12905_v38 = vadd.f32 1e-20, %v916_v11  ;;  %v1008_v45 = vsub.f32 1.5, %v1007_v14  ;;  %vm5178_vm11 = vweird.f32 %v12868_v26 }
 0x4ac   :  { %v5465_v48 = vmul.f32 %v5401_v15, %v12005_v46  ;;  %v5466_v8 = vmul.f32 %v5402_v20, %v12206_v9  ;;  %v5150_v41 = vsel %vm5149_vm10, %v12845_v50, %v5146_v7  ;;  %v5175_v4 = vsub.f32 1.5, %v5174_v24  ;;  %v4858_v15 = vpop.xlane.xlu1 %4857  ;;  %v15214_v20 = vld [vmem:[#allocation90_spill] sm:$0xff] }
 0x4ad   :  { %5767 = vst [vmem:[#allocation2 + $0x90] sm:$0xff] %v5735_v55  ;;  %v4983_v11 = vmul.f32 %v12878_v44, %v4982_v36  ;;  %7827 = vrsqrt.f32 %v12905_v38  ;;  %v12920_v14 = vmul.f32 %v1444_v12, %v11003_v31  ;;  %vm1010_vm12 = vweird.f32 %v12814_v27 }
 0x4ae   :  { %v7390_v22 = vld [vmem:[#allocation2 + $0xf8] sm:$0xf0]  ;;  %v7425_v0 = vld [vmem:[#allocation2 + $0xf4] sm:$0xf0]  ;;  %v5593_v19 = vmul.f32 10.0, %v5465_v48  ;;  %v5594_v56 = vmul.f32 10.0, %v5466_v8  ;;  %v5176_v55 = vmul.f32 %v12868_v26, %v5175_v4  ;;  %vm5177_vm13 = vweird.f32 %v12830_v5 }
 0x4af   :  { %v12915_v21 = vor.u32 %v7425_v0, %v7388_v33  ;;  %v12917_v3 = vor.u32 %v7424_v49, %v7390_v22  ;;  %v1009_v7 = vmul.f32 %v12856_v61, %v1008_v45  ;;  %vm1011_vm14 = vweird.f32 %v12856_v61  ;;  %vm5179_vm15 = vmor %vm5177_vm13, %vm5178_vm11 }
 0x4b0   :  { %v5657_v50 = vadd.f32 %v5593_v19, %v12740_v63  ;;  %v5658_v36 = vadd.f32 %v5594_v56, %v12743_v47  ;;  %v12933_v51 = vmul.f32 %v1445_v34, %v15117_v52  ;;  %v5429_v5 = vmul.f32 %v15214_v20, %v5150_v41  ;;  %vm1012_vm1 = vmor %vm1010_vm12, %vm1011_vm14 }
 0x4b1   :  { %6062 = vmatpush.bf16.msrb.mxu1 %v12915_v21  ;;  %v5180_v63 = vsel %vm5179_vm15, %v12868_v26, %v5176_v55  ;;  %v4984_v24 = vmul.f32 0.5, %v4983_v11  ;;  %6088 = vmatpush.bf16.msrb.mxu3 %v12917_v3  ;;  %v5430_v12 = vmul.f32 %v15215_v10, %v5150_v41  ;;  %vm4988_vm0 = vweird.f32 %v12878_v44  ;;  %v15216_v41 = vld [vmem:[#allocation64_spill] sm:$0xff]  ;;  %v15217_v11 = vld [vmem:[#allocation58_spill] sm:$0xff]  ;;  %v7278_v10 = vld [vmem:[#allocation2 + $0x18] sm:$0xf0] }
 0x4b2   :  { %v5719_v47 = vpack.c.bf16 %v5658_v36, %v5657_v50  ;;  %v5435_v54 = vmul.f32 %v15064_v2, %v5180_v63  ;;  %v5436_v34 = vmul.f32 %v11861_v29, %v5180_v63  ;;  %v12948_v33 = vadd.f32 1e-20, %v4906_v62  ;;  %v15218_v36 = vld [vmem:[#allocation21_spill] sm:$0xff] }
 0x4b3   :  { %v12941_v49 = vpop.eup %7827  ;;  %v4985_v26 = vsub.f32 1.5, %v4984_v24  ;;  %v12950_v48 = vadd.f32 1e-20, %v4858_v15  ;;  %v1013_v8 = vsel %vm1012_vm1, %v12856_v61, %v1009_v7  ;;  %vm4987_vm2 = vweird.f32 %v12838_v42  ;;  %v15219_v62 = vld [vmem:[#allocation153_spill] sm:$0xff] }
 0x4b4   :  { %5751 = vst [vmem:[#allocation2 + $0x10] sm:$0xff] %v5719_v47  ;;  %v5499_v2 = vmul.f32 %v5435_v54, %v12005_v46  ;;  %v1155_v45 = vmul.f32 %v12941_v49, %v12905_v38  ;;  %v5493_v27 = vmul.f32 %v5429_v5, %v12005_v46  ;;  %v5500_v29 = vmul.f32 %v5436_v34, %v12206_v9  ;;  %vm4989_vm4 = vmor %vm4987_vm2, %vm4988_vm0  ;;  %v5781_v5 = vld [vmem:[%s13422_s0] sm:$0x3]  ;;  %s7955_s0 = smov [#allocation3]  }
 0x4b5   :  { %6063 = vmatpush.bf16.msrb.mxu1 %v12858_v57  ;;  %v4986_v22 = vmul.f32 %v12878_v44, %v4985_v26  ;;  %vm1160_vm3 = vweird.f32 %v12905_v38  ;;  %7829 = vrsqrt.f32 %v12948_v33  ;;  %6089 = vmatpush.bf16.msrb.mxu3 %v12873_v17  ;;  %v5494_v61 = vmul.f32 %v5430_v12, %v12206_v9  ;;  %v7397_v12 = vld [vmem:[#allocation2 + $0x14] sm:$0xf0]  ;;  %s7254_s10 = sshll.u32 %s7955_s0, 4  ;;  %s7255_s10 = int_to_ptr.vmem [resolvable:$true] %s7254_s10 }
 0x4b6   :  { %v5627_v42 = vmul.f32 10.0, %v5499_v2  ;;  %v1156_v0 = vmul.f32 %v12941_v49, %v1155_v45  ;;  %7831 = vrsqrt.f32 %v12950_v48  ;;  %v12970_v4 = vmul.f32 %v15216_v41, %v1013_v8 }
 0x4b7   :  { %v12973_v19 = vmul.f32 %v15217_v11, %v1013_v8  ;;  %v5628_v56 = vmul.f32 10.0, %v5500_v29  ;;  %v4990_v55 = vsel %vm4989_vm4, %v12878_v44, %v4986_v22  ;;  %v12983_v63 = vmul.f32 10.0, %v5493_v27 }
 0x4b8   :  { %v5691_v50 = vadd.f32 %v5627_v42, %v12745_v59  ;;  %v5397_v7 = vmul.f32 %v15218_v36, %v4990_v55  ;;  %v5398_v15 = vmul.f32 %v15219_v62, %v4990_v55  ;;  %v1157_v20 = vmul.f32 0.5, %v1156_v0 }
 0x4b9   :  { %6064 = vmatpush.bf16.msrb.mxu1 %v12795_v37  ;;  %v5692_v24 = vadd.f32 %v5628_v56, %v12748_v58  ;;  %6090 = vmatpush.bf16.msrb.mxu3 %v12816_v6  ;;  %v15220_v44 = vlaneseq  ;;  %v5784_v59 = vperm.slane %v5781_v5, 0  ;;  %v12990_v54 = vmul.f32 10.0, %v5494_v61 }
 0x4ba   :  { %v5461_v34 = vmul.f32 %v5397_v7, %v12005_v46  ;;  %v5462_v26 = vmul.f32 %v5398_v15, %v12206_v9  ;;  %v1158_v8 = vsub.f32 1.5, %v1157_v20  ;;  %vm1161_vm5 = vweird.f32 %v12941_v49 }
 0x4bb   :  { %v12988_v47 = vshrl.u32 %v15220_v44, 7  ;;  %v12994_v2 = vpop.eup %7829  ;;  %v7396_v45 = vld [vmem:[#allocation2 + $0x14] sm:$0xf]  ;;  %v7276_v27 = vld [vmem:[#allocation2 + $0x10] sm:$0xf]  ;;  %v5736_v58 = vpack.c.bf16 %v5692_v24, %v5691_v50  ;;  %v5785_v50 = vperm.slane %v5781_v5, 1  ;;  %vm1162_vm7 = vmor %vm1160_vm3, %vm1161_vm5  ;;  %vm5157_vm12 = vweird.f32 %v12948_v33 }
 0x4bc   :  { %v13002_v22 = vpop.eup %7831  ;;  %v13004_v61 = vor.u32 %v7397_v12, %v7276_v27  ;;  %v13006_v42 = vor.u32 %v7396_v45, %v7278_v10  ;;  %v5589_v0 = vmul.f32 10.0, %v5461_v34  ;;  %v5590_v41 = vmul.f32 10.0, %v5462_v26 }
 0x4bd   :  { %vm12998_vm6 = vcmp.eq.s32.totalorder %v12988_v47, %v5784_v59  ;;  %6065 = vmatpush.bf16.msrb.mxu1 %v12783_v32  ;;  %5768 = vst [vmem:[#allocation2 + $0x98] sm:$0xff] %v5736_v58  ;;  %v1159_v11 = vmul.f32 %v12941_v49, %v1158_v8  ;;  %v5152_v56 = vmul.f32 %v12994_v2, %v12948_v33  ;;  %v7954_v62 = vmov 2.7080503   ;;  %v7340_v8 = vld [vmem:[#allocation2 + $0x90] sm:$0xf] }
 0x4be   :  { %v4992_v55 = vmul.f32 %v13002_v22, %v12950_v48  ;;  %6091 = vmatpush.bf16.msrb.mxu3 %v12787_v23  ;;  %v5653_v36 = vadd.f32 %v5589_v0, %v12847_v16  ;;  %v5654_v7 = vadd.f32 %v5590_v41, %v12852_v40  ;;  %6055 = vmatpush.bf16.msrb.mxu0 %v13004_v61  ;;  %v5788_v15 = vsel %vm12998_vm6, 0.22314355, %v7954_v62 }
 0x4bf   :  { %6081 = vmatpush.bf16.msrb.mxu2 %v13006_v42  ;;  %vm5790_vm8 = vcmp.ge.s32.totalorder %v12988_v47, 4  ;;  %v1163_v20 = vsel %vm1162_vm7, %v12941_v49, %v1159_v11  ;;  %v5153_v16 = vmul.f32 %v12994_v2, %v5152_v56  ;;  %vm5158_vm9 = vweird.f32 %v12994_v2 }
 0x4c0   :  { %v4993_v40 = vmul.f32 %v13002_v22, %v4992_v55  ;;  %v5791_v38 = vsel %vm5790_vm8, 1e+09, %v5788_v15  ;;  %v5717_v5 = vpack.c.bf16 %v5654_v7, %v5653_v36  ;;  %v1442_v24 = vmul.f32 %v15096_v35, %v1163_v20  ;;  %vm5159_vm13 = vmor %vm5157_vm12, %vm5158_vm9  ;;  %v7412_v7 = vld [vmem:[#allocation2 + $0x94] sm:$0xf] }
 0x4c1   :  { %v1443_v59 = vmul.f32 %v15097_v39, %v1163_v20  ;;  %6066 = vmatpush.bf16.msrb.mxu1 %v12779_v13  ;;  %v13034_v10 = vsub.f32 0.0, %v5791_v38  ;;  %v5154_v12 = vmul.f32 0.5, %v5153_v16  ;;  %vm5787_vm10 = vcmp.eq.s32.totalorder %v12988_v47, %v5785_v50 }
 0x4c2   :  { %v4994_v49 = vmul.f32 0.5, %v4993_v40  ;;  %6092 = vmatpush.bf16.msrb.mxu3 %v12781_v28  ;;  %5749 = vst [vmem:[#allocation2] sm:$0xff] %v5717_v5  ;;  %v1506_v34 = vmul.f32 %v1442_v24, %v11003_v31  ;;  %v5789_v39 = vsel %vm5787_vm10, 0.22314355, %v7954_v62  ;;  %vm4998_vm11 = vweird.f32 %v13002_v22 }
 0x4c3   :  { %v1507_v26 = vmul.f32 %v1443_v59, %v15117_v52  ;;  %v5795_v35 = vrot.slane %v13034_v10, 4  ;;  %v5155_v45 = vsub.f32 1.5, %v5154_v12  ;;  %v5792_v58 = vsel %vm5790_vm8, 1e+09, %v5789_v39 }
 0x4c4   :  { %v4995_v27 = vsub.f32 1.5, %v4994_v49  ;;  %v7342_v29 = vld [vmem:[#allocation2 + $0x98] sm:$0xf0]  ;;  %v7413_v0 = vld [vmem:[#allocation2 + $0x94] sm:$0xf0]  ;;  %v5557_v41 = vmul.f32 3.0, %v1506_v34  ;;  %vm4997_vm14 = vweird.f32 %v12950_v48  ;;  %v1476_v16 = vmul.f32 %v12970_v4, %v11003_v31 }
 0x4c5   :  { %v5558_v11 = vmul.f32 3.0, %v1507_v26  ;;  %6067 = vmatpush.bf16.msrb.mxu1 %v12768_v43  ;;  %v5796_v56 = vmax.f32 %v13034_v10, %v5795_v35  ;;  %v13048_v55 = vor.u32 %v7413_v0, %v7340_v8  ;;  %v5156_v50 = vmul.f32 %v12994_v2, %v5155_v45  ;;  %vm4999_vm15 = vmor %vm4997_vm14, %vm4998_vm11 }
 0x4c6   :  { %v4996_v36 = vmul.f32 %v13002_v22, %v4995_v27  ;;  %6093 = vmatpush.bf16.msrb.mxu3 %v12777_v60  ;;  %v5685_v33 = vadd.f32 %v12983_v63, %v5557_v41  ;;  %v13060_v20 = vsub.f32 0.0, %v5792_v58  ;;  %v13064_v40 = vor.u32 %v7412_v7, %v7342_v29 }
 0x4c7   :  { %v5686_v62 = vadd.f32 %v12990_v54, %v5558_v11  ;;  %v5797_v15 = vrot.slane %v5796_v56, 2  ;;  %v5160_v48 = vsel %vm5159_vm13, %v12994_v2, %v5156_v50  ;;  %v1477_v59 = vmul.f32 %v12973_v19, %v15117_v52 }
 0x4c8   :  { %v5000_v38 = vsel %vm4999_vm15, %v13002_v22, %v4996_v36  ;;  %v5431_v63 = vmul.f32 %v15098_v30, %v5160_v48  ;;  %v5432_v54 = vmul.f32 %v15099_v1, %v5160_v48  ;;  %v5801_v2 = vrot.slane %v13060_v20, 4 }
 0x4c9   :  { %v5733_v5 = vpack.c.bf16 %v5686_v62, %v5685_v33  ;;  %v5399_v24 = vmul.f32 %v15130_v25, %v5000_v38  ;;  %6068 = vmatpush.bf16.msrb.mxu1 %v13048_v55  ;;  %v5400_v31 = vmul.f32 %v15131_v18, %v5000_v38  ;;  %v5798_v4 = vmax.f32 %v5796_v56, %v5797_v15  ;;  %v7394_v62 = vld [vmem:[#allocation2 + $0x4] sm:$0xf]  ;;  %v7268_v48 = vld [vmem:[#allocation2] sm:$0xf] }
 0x4ca   :  { %6094 = vmatpush.bf16.msrb.mxu3 %v13064_v40  ;;  %v5559_v22 = vmul.f32 3.0, %v12920_v14  ;;  %v5495_v30 = vmul.f32 %v5431_v63, %v12005_v46  ;;  %v5496_v1 = vmul.f32 %v5432_v54, %v12206_v9  ;;  %v5560_v12 = vmul.f32 3.0, %v12933_v51 }
 0x4cb   :  { %5765 = vst [vmem:[#allocation2 + $0x80] sm:$0xff] %v5733_v5  ;;  %v5463_v25 = vmul.f32 %v5399_v24, %v12005_v46  ;;  %v5464_v52 = vmul.f32 %v5400_v31, %v12206_v9  ;;  %v5799_v19 = vrot.slane %v5798_v4, 1  ;;  %v5802_v18 = vmax.f32 %v13060_v20, %v5801_v2 }
 0x4cc   :  { %v5527_v49 = vmul.f32 3.0, %v1476_v16  ;;  %v5623_v34 = vmul.f32 10.0, %v5495_v30  ;;  %v5624_v26 = vmul.f32 10.0, %v5496_v1  ;;  %v5528_v39 = vmul.f32 3.0, %v1477_v59  ;;  %v15223_v1 = vld [vmem:[#allocation149_spill] sm:$0xff] }
 0x4cd   :  { %v5591_v35 = vmul.f32 10.0, %v5463_v25  ;;  %v5592_v14 = vmul.f32 10.0, %v5464_v52  ;;  %v5800_v8 = vmax.f32 %v5798_v4, %v5799_v19  ;;  %v5803_v45 = vrot.slane %v5802_v18, 2 }
 0x4ce   :  { %v5687_v27 = vadd.f32 %v5623_v34, %v5559_v22  ;;  %v5688_v58 = vadd.f32 %v5624_v26, %v5560_v12  ;;  %v15225_v34 = vld [vmem:[#allocation159_spill] sm:$0xff] }
 0x4cf   :  { %v5655_v29 = vadd.f32 %v5591_v35, %v5527_v49  ;;  %v5656_v0 = vadd.f32 %v5592_v14, %v5528_v39  ;;  %v5807_v46 = vsub.f32 %v13034_v10, %v5800_v8  ;;  %v5804_v51 = vmax.f32 %v5802_v18, %v5803_v45  ;;  %v15224_v49 = vld [vmem:[#allocation79_spill] sm:$0xff]  ;;  %v15227_v8 = vld [vmem:[#allocation148_spill] sm:$0xff] }
 0x4d0   :  { %v5734_v41 = vpack.c.bf16 %v5688_v58, %v5687_v27  ;;  %v15226_v14 = vld [vmem:[#allocation7_spill] sm:$0xff] }
 0x4d1   :  { %v5718_v9 = vpack.c.bf16 %v5656_v0, %v5655_v29  ;;  %v5809_v11 = vmul.f32 1.442695, %v5807_v46  ;;  %v5805_v56 = vrot.slane %v5804_v51, 1  ;;  %v15228_v58 = vld [vmem:[#allocation167_spill] sm:$0xff]  ;;  %v15229_v29 = vld [vmem:[#allocation186_spill] sm:$0xff] }
 0x4d2   :  { %5766 = vst [vmem:[#allocation2 + $0x88] sm:$0xff] %v5734_v41  ;;  %v7410_v7 = vld [vmem:[#allocation2 + $0x84] sm:$0xf]  ;;  %v7332_v33 = vld [vmem:[#allocation2 + $0x80] sm:$0xf] }
 0x4d3   :  { %5750 = vst [vmem:[#allocation2 + $0x8] sm:$0xff] %v5718_v9  ;;  %7833 = vpow2.f32 %v5809_v11  ;;  %v5806_v50 = vmax.f32 %v5804_v51, %v5805_v56  ;;  %v15230_v11 = vld [vmem:[#allocation130_spill] sm:$0xff] }
 0x4d4   :  { %v15231_v56 = vld [vmem:[#allocation78_spill] sm:$0xff] }
 0x4d5   :  { %v5808_v36 = vsub.f32 %v13060_v20, %v5806_v50 }
 0x4d7   :  { %v5811_v15 = vmul.f32 1.442695, %v5808_v36 }
 0x4d9   :  { %v13086_v16 = vpop.eup %7833  ;;  %v7334_v38 = vld [vmem:[#allocation2 + $0x88] sm:$0xf0]  ;;  %v7411_v5 = vld [vmem:[#allocation2 + $0x84] sm:$0xf0]  ;;  %7835 = vpow2.f32 %v5811_v15  ;;  %v15233_v15 = vld [vmem:[#allocation249_spill] sm:$0xff] }
 0x4da   :  { %v13088_v63 = vor.u32 %v7411_v5, %v7332_v33  ;;  %v13090_v54 = vor.u32 %v7410_v7, %v7334_v38  ;;  %v7270_v24 = vld [vmem:[#allocation2 + $0x8] sm:$0xf0]  ;;  %v7395_v59 = vld [vmem:[#allocation2 + $0x4] sm:$0xf0]  ;;  %v5813_v31 = vrot.slane %v13086_v16, 4 }
 0x4db   :  { %v13093_v4 = vor.u32 %v7395_v59, %v7268_v48  ;;  %v13095_v2 = vor.u32 %v7394_v62, %v7270_v24  ;;  %v15232_v62 = vld [vmem:[#allocation157_spill] sm:$0xff] }
 0x4dc   :  { %6069 = vmatpush.bf16.msrb.mxu1 %v13088_v63  ;;  %6095 = vmatpush.bf16.msrb.mxu3 %v13090_v54  ;;  %v5814_v22 = vadd.f32 %v13086_v16, %v5813_v31 }
 0x4dd   :  { %6056 = vmatpush.bf16.msrb.mxu0 %v13093_v4  ;;  %6082 = vmatpush.bf16.msrb.mxu2 %v13095_v2 }
 0x4de   :  { %v5815_v30 = vrot.slane %v5814_v22, 2 }
 0x4df   :  { %v13106_v25 = vpop.eup %7835 }
 0x4e0   :  { %6178 = vmatpush.bf16.msra.mxu1 %v12915_v21  ;;  %6204 = vmatpush.bf16.msra.mxu3 %v12917_v3  ;;  %v5816_v12 = vadd.f32 %v5815_v30, %v5814_v22  ;;  %v5819_v52 = vrot.slane %v13106_v25, 4 }
 0x4e1   :  { %6165 = vmatpush.bf16.msra.mxu0 %v12370_v53  ;;  %6191 = vmatpush.bf16.msra.mxu2 %v15223_v1 }
 0x4e2   :  { %v5817_v19 = vrot.slane %v5816_v12, 1  ;;  %v5820_v18 = vadd.f32 %v13106_v25, %v5819_v52 }
 0x4e4   :  { %6179 = vmatpush.bf16.msra.mxu1 %v12858_v57  ;;  %6205 = vmatpush.bf16.msra.mxu3 %v12873_v17  ;;  %v5818_v26 = vadd.f32 %v5817_v19, %v5816_v12  ;;  %v5821_v35 = vrot.slane %v5820_v18, 2 }
 0x4e5   :  { %6166 = vmatpush.bf16.msra.mxu0 %v15224_v49  ;;  %6192 = vmatpush.bf16.msra.mxu2 %v15225_v34 }
 0x4e6   :  { %7837 = vrcp.f32 %v5818_v26  ;;  %v5822_v39 = vadd.f32 %v5821_v35, %v5820_v18  ;;  %v5836_v51 = vand.u32 2147483648, %v5818_v26  ;;  %vm5830_vm0 = vweird.f32 %v5818_v26 }
 0x4e7   :  { %v5834_v9 = vand.u32 2147483647, %v5818_v26 }
 0x4e8   :  { %6180 = vmatpush.bf16.msra.mxu1 %v12795_v37  ;;  %6206 = vmatpush.bf16.msra.mxu3 %v12816_v6  ;;  %v5823_v45 = vrot.slane %v5822_v39, 1  ;;  %v5837_v36 = vor.u32 1.1754944e-38, %v5836_v51 }
 0x4e9   :  { %6167 = vmatpush.bf16.msra.mxu0 %v15226_v14  ;;  %6193 = vmatpush.bf16.msra.mxu2 %v15227_v8  ;;  %vm5835_vm3 = vcmp.eq.f32.partialorder %v5834_v9, 8.507059e+37 }
 0x4ea   :  { %v5824_v27 = vadd.f32 %v5823_v45, %v5822_v39 }
 0x4ec   :  { %6181 = vmatpush.bf16.msra.mxu1 %v12783_v32  ;;  %6207 = vmatpush.bf16.msra.mxu3 %v12787_v23  ;;  %v7838_v0 = vpop.eup %7837  ;;  %7839 = vrcp.f32 %v5824_v27  ;;  %vm5845_vm4 = vweird.f32 %v5824_v27  ;;  %v5851_v5 = vand.u32 2147483648, %v5824_v27  ;;  %v5849_v31 = vand.u32 2147483647, %v5824_v27 }
 0x4ed   :  { %6168 = vmatpush.bf16.msra.mxu0 %v15228_v58  ;;  %6194 = vmatpush.bf16.msra.mxu2 %v15229_v29  ;;  %v5826_v46 = vmul.f32 %v7838_v0, %v5818_v26  ;;  %vm5831_vm1 = vweird.f32 %v7838_v0 }
 0x4ee   :  { %vm5832_vm2 = vmor %vm5830_vm0, %vm5831_vm1  ;;  %v5852_v52 = vor.u32 1.1754944e-38, %v5851_v5  ;;  %vm5850_vm7 = vcmp.eq.f32.partialorder %v5849_v31, 8.507059e+37 }
 0x4ef   :  { %v5827_v41 = vsub.f32 1.0, %v5826_v46 }
 0x4f0   :  { %6182 = vmatpush.bf16.msra.mxu1 %v12779_v13  ;;  %6208 = vmatpush.bf16.msra.mxu3 %v12781_v28 }
 0x4f1   :  { %6169 = vmatpush.bf16.msra.mxu0 %v15230_v11  ;;  %6195 = vmatpush.bf16.msra.mxu2 %v15231_v56  ;;  %v5828_v50 = vmul.f32 %v7838_v0, %v5827_v41 }
 0x4f2   :  { %v7840_v7 = vpop.eup %7839 }
 0x4f3   :  { %v5829_v33 = vadd.f32 %v7838_v0, %v5828_v50  ;;  %v5841_v48 = vmul.f32 %v7840_v7, %v5824_v27  ;;  %vm5846_vm5 = vweird.f32 %v7840_v7 }
 0x4f4   :  { %6183 = vmatpush.bf16.msra.mxu1 %v12768_v43  ;;  %6209 = vmatpush.bf16.msra.mxu3 %v12777_v60  ;;  %vm5847_vm6 = vmor %vm5845_vm4, %vm5846_vm5 }
 0x4f5   :  { %6170 = vmatpush.bf16.msra.mxu0 %v15232_v62  ;;  %6196 = vmatpush.bf16.msra.mxu2 %v15233_v15  ;;  %v5833_v38 = vsel %vm5832_vm2, %v7838_v0, %v5829_v33  ;;  %v5842_v59 = vsub.f32 1.0, %v5841_v48 }
 0x4f6   :  { %v5838_v24 = vsel %vm5835_vm3, %v5837_v36, %v5833_v38 }
 0x4f7   :  { %v5839_v22 = vmul.f32 %v13086_v16, %v5838_v24  ;;  %v5843_v30 = vmul.f32 %v7840_v7, %v5842_v59 }
 0x4f8   :  { %6184 = vmatpush.bf16.msra.mxu1 %v13048_v55  ;;  %6210 = vmatpush.bf16.msra.mxu3 %v13064_v40 }
 0x4f9   :  { %6171 = vmatpush.bf16.msra.mxu0 %v13004_v61  ;;  %6197 = vmatpush.bf16.msra.mxu2 %v13006_v42  ;;  %v5855_v12 = vpack.c.bf16 %v5839_v22, %v5839_v22  ;;  %v5844_v19 = vadd.f32 %v7840_v7, %v5843_v30 }
 0x4fb   :  { %6057 = vmatmul.bf16.vlgmr.msrb.gmra.mxu0 %v5855_v12  ;;  %6083 = vmatmul.bf16.vlgmr.msrb.gmra.mxu2 %v5855_v12  ;;  %v5848_v18 = vsel %vm5847_vm6, %v7840_v7, %v5844_v19 }
 0x4fc   :  { %6185 = vmatpush.bf16.msra.mxu1 %v13088_v63  ;;  %6211 = vmatpush.bf16.msra.mxu3 %v13090_v54  ;;  %v5853_v16 = vsel %vm5850_vm7, %v5852_v52, %v5848_v18 }
 0x4fd   :  { %6172 = vmatpush.bf16.msra.mxu0 %v13093_v4  ;;  %6198 = vmatpush.bf16.msra.mxu2 %v13095_v2  ;;  %v5854_v26 = vmul.f32 %v13106_v25, %v5853_v16 }
 0x4ff   :  { %v5856_v35 = vpack.c.bf16 %v5854_v26, %v5854_v26 }
 0x501   :  { %6281 = vmatpush.bf16.msrb.mxu0 %v12370_v53  ;;  %6307 = vmatpush.bf16.msrb.mxu2 %v15223_v1 }
 0x502   :  { %6070 = vmatmul.bf16.vlgmr.msrb.gmra.mxu1 %v5856_v35  ;;  %6096 = vmatmul.bf16.vlgmr.msrb.gmra.mxu3 %v5856_v35 }
 0x503   :  { %6294 = vmatpush.bf16.msrb.mxu1 %v12915_v21  ;;  %6320 = vmatpush.bf16.msrb.mxu3 %v12917_v3 }
 0x505   :  { %6282 = vmatpush.bf16.msrb.mxu0 %v15224_v49  ;;  %6308 = vmatpush.bf16.msrb.mxu2 %v15225_v34 }
 0x507   :  { %6295 = vmatpush.bf16.msrb.mxu1 %v12858_v57  ;;  %6321 = vmatpush.bf16.msrb.mxu3 %v12873_v17 }
 0x509   :  { %6283 = vmatpush.bf16.msrb.mxu0 %v15226_v14  ;;  %6309 = vmatpush.bf16.msrb.mxu2 %v15227_v8 }
 0x50b   :  { %6296 = vmatpush.bf16.msrb.mxu1 %v12795_v37  ;;  %6322 = vmatpush.bf16.msrb.mxu3 %v12816_v6 }
 0x50d   :  { %6284 = vmatpush.bf16.msrb.mxu0 %v15228_v58  ;;  %6310 = vmatpush.bf16.msrb.mxu2 %v15229_v29 }
 0x50f   :  { %6297 = vmatpush.bf16.msrb.mxu1 %v12783_v32  ;;  %6323 = vmatpush.bf16.msrb.mxu3 %v12787_v23 }
 0x511   :  { %6285 = vmatpush.bf16.msrb.mxu0 %v15230_v11  ;;  %6311 = vmatpush.bf16.msrb.mxu2 %v15231_v56 }
 0x513   :  { %6298 = vmatpush.bf16.msrb.mxu1 %v12779_v13  ;;  %6324 = vmatpush.bf16.msrb.mxu3 %v12781_v28 }
 0x515   :  { %6286 = vmatpush.bf16.msrb.mxu0 %v15232_v62  ;;  %6312 = vmatpush.bf16.msrb.mxu2 %v15233_v15 }
 0x517   :  { %6299 = vmatpush.bf16.msrb.mxu1 %v12768_v43  ;;  %6325 = vmatpush.bf16.msrb.mxu3 %v12777_v60 }
 0x519   :  { %6287 = vmatpush.bf16.msrb.mxu0 %v13004_v61  ;;  %6313 = vmatpush.bf16.msrb.mxu2 %v13006_v42 }
 0x51b   :  { %6300 = vmatpush.bf16.msrb.mxu1 %v13048_v55  ;;  %6326 = vmatpush.bf16.msrb.mxu3 %v13064_v40 }
 0x51d   :  { %6288 = vmatpush.bf16.msrb.mxu0 %v13093_v4  ;;  %6314 = vmatpush.bf16.msrb.mxu2 %v13095_v2 }
 0x51f   :  { %6301 = vmatpush.bf16.msrb.mxu1 %v13088_v63  ;;  %6327 = vmatpush.bf16.msrb.mxu3 %v13090_v54 }
 0x578   :  { %v6058_v25 = vpop.f32.mrf.mxu0 }
 0x57e   :  { %v6084_v39 = vpop.f32.mrf.mxu2 }
 0x57f   :  { %v6071_v45 = vpop.f32.mrf.mxu1 }
 0x580   :  { %v6072_v27 = vadd.f32 %v6071_v45, %v6058_v25  ;;  %v6060_v0 = vpop.f32.mrf.mxu0 }
 0x582   :  { %v6101_v46 = vadd.f32 %v6072_v27, %v13034_v10 }
 0x584   :  { %v6103_v51 = vrot.slane %v6101_v46, 4 }
 0x585   :  { %v6097_v41 = vpop.f32.mrf.mxu3 }
 0x586   :  { %v6104_v9 = vmax.f32 %v6101_v46, %v6103_v51  ;;  %v6098_v50 = vadd.f32 %v6097_v41, %v6084_v39  ;;  %v6086_v36 = vpop.f32.mrf.mxu2 }
 0x587   :  { %v6073_v7 = vpop.f32.mrf.mxu1 }
 0x588   :  { %v6105_v33 = vrot.slane %v6104_v9, 2  ;;  %v6102_v48 = vadd.f32 %v6098_v50, %v13060_v20 }
 0x58a   :  { %v6106_v38 = vmax.f32 %v6104_v9, %v6105_v33  ;;  %v6109_v5 = vrot.slane %v6102_v48, 4 }
 0x58c   :  { %v6107_v24 = vrot.slane %v6106_v38, 1  ;;  %v6110_v59 = vmax.f32 %v6102_v48, %v6109_v5 }
 0x58d   :  { %v6099_v31 = vpop.f32.mrf.mxu3 }
 0x58e   :  { %v6108_v22 = vmax.f32 %v6106_v38, %v6107_v24  ;;  %v6111_v30 = vrot.slane %v6110_v59, 2 }
 0x590   :  { %v6115_v12 = vsub.f32 %v6101_v46, %v6108_v22  ;;  %v6112_v52 = vmax.f32 %v6110_v59, %v6111_v30 }
 0x592   :  { %v6117_v19 = vmul.f32 1.442695, %v6115_v12  ;;  %v6113_v18 = vrot.slane %v6112_v52, 1 }
 0x594   :  { %7841 = vpow2.f32 %v6117_v19  ;;  %v6114_v16 = vmax.f32 %v6112_v52, %v6113_v18 }
 0x596   :  { %v6116_v26 = vsub.f32 %v6102_v48, %v6114_v16 }
 0x598   :  { %v6119_v35 = vmul.f32 1.442695, %v6116_v26 }
 0x59a   :  { %v7842_v25 = vpop.eup %7841  ;;  %7843 = vpow2.f32 %v6119_v35 }
 0x59b   :  { %v6121_v39 = vrot.slane %v7842_v25, 4 }
 0x59d   :  { %v6122_v45 = vadd.f32 %v7842_v25, %v6121_v39 }
 0x59f   :  { %v6123_v27 = vrot.slane %v6122_v45, 2 }
 0x5a0   :  { %v7844_v0 = vpop.eup %7843 }
 0x5a1   :  { %v6124_v51 = vadd.f32 %v6123_v27, %v6122_v45  ;;  %v6127_v41 = vrot.slane %v7844_v0, 4 }
 0x5a3   :  { %v6125_v9 = vrot.slane %v6124_v51, 1  ;;  %v6128_v50 = vadd.f32 %v7844_v0, %v6127_v41 }
 0x5a5   :  { %v6126_v36 = vadd.f32 %v6125_v9, %v6124_v51  ;;  %v6129_v7 = vrot.slane %v6128_v50, 2 }
 0x5a7   :  { %7845 = vrcp.f32 %v6126_v36  ;;  %v6130_v46 = vadd.f32 %v6129_v7, %v6128_v50  ;;  %v6144_v59 = vand.u32 2147483648, %v6126_v36  ;;  %v6142_v22 = vand.u32 2147483647, %v6126_v36 }
 0x5a8   :  { %vm6138_vm9 = vweird.f32 %v6126_v36 }
 0x5a9   :  { %v6131_v33 = vrot.slane %v6130_v46, 1  ;;  %v6145_v19 = vor.u32 1.1754944e-38, %v6144_v59  ;;  %vm6143_vm11 = vcmp.eq.f32.partialorder %v6142_v22, 8.507059e+37 }
 0x5ab   :  { %v6132_v38 = vadd.f32 %v6131_v33, %v6130_v46 }
 0x5ad   :  { %v7846_v5 = vpop.eup %7845  ;;  %7847 = vrcp.f32 %v6132_v38  ;;  %v6159_v35 = vand.u32 2147483648, %v6132_v38  ;;  %v6157_v27 = vand.u32 2147483647, %v6132_v38  ;;  %vm6153_vm13 = vweird.f32 %v6132_v38 }
 0x5ae   :  { %v6134_v48 = vmul.f32 %v7846_v5, %v6126_v36  ;;  %vm6139_vm8 = vweird.f32 %v7846_v5 }
 0x5af   :  { %vm6140_vm10 = vmor %vm6138_vm9, %vm6139_vm8  ;;  %v6160_v9 = vor.u32 1.1754944e-38, %v6159_v35  ;;  %vm6158_vm15 = vcmp.eq.f32.partialorder %v6157_v27, 8.507059e+37 }
 0x5b0   :  { %v6135_v24 = vsub.f32 1.0, %v6134_v48 }
 0x5b2   :  { %v6136_v31 = vmul.f32 %v7846_v5, %v6135_v24 }
 0x5b3   :  { %v7848_v30 = vpop.eup %7847 }
 0x5b4   :  { %v6137_v12 = vadd.f32 %v7846_v5, %v6136_v31  ;;  %v6149_v52 = vmul.f32 %v7848_v30, %v6132_v38  ;;  %vm6154_vm12 = vweird.f32 %v7848_v30 }
 0x5b5   :  { %vm6155_vm14 = vmor %vm6153_vm13, %vm6154_vm12 }
 0x5b6   :  { %v6141_v18 = vsel %vm6140_vm10, %v7846_v5, %v6137_v12  ;;  %v6150_v16 = vsub.f32 1.0, %v6149_v52 }
 0x5b7   :  { %v6146_v26 = vsel %vm6143_vm11, %v6145_v19, %v6141_v18 }
 0x5b8   :  { %v6147_v39 = vmul.f32 %v7842_v25, %v6146_v26  ;;  %v6151_v45 = vmul.f32 %v7848_v30, %v6150_v16 }
 0x5ba   :  { %v6163_v51 = vpack.c.bf16 %v6147_v39, %v6147_v39  ;;  %v6152_v41 = vadd.f32 %v7848_v30, %v6151_v45 }
 0x5bc   :  { %6173 = vmatmul.bf16.vlgmr.msra.gmra.mxu0 %v6163_v51  ;;  %6199 = vmatmul.bf16.vlgmr.msra.gmra.mxu2 %v6163_v51  ;;  %v6156_v50 = vsel %vm6155_vm14, %v7848_v30, %v6152_v41 }
 0x5bd   :  { %6397 = vmatpush.bf16.msra.mxu0 %v12370_v53  ;;  %6423 = vmatpush.bf16.msra.mxu2 %v15223_v1  ;;  %v6161_v36 = vsel %vm6158_vm15, %v6160_v9, %v6156_v50 }
 0x5be   :  { %v6162_v7 = vmul.f32 %v7844_v0, %v6161_v36 }
 0x5c0   :  { %v6164_v46 = vpack.c.bf16 %v6162_v7, %v6162_v7 }
 0x5c1   :  { %6398 = vmatpush.bf16.msra.mxu0 %v15224_v49  ;;  %6424 = vmatpush.bf16.msra.mxu2 %v15225_v34 }
 0x5c2   :  { %6186 = vmatmul.bf16.vlgmr.msra.gmra.mxu1 %v6164_v46  ;;  %6212 = vmatmul.bf16.vlgmr.msra.gmra.mxu3 %v6164_v46 }
 0x5c3   :  { %6410 = vmatpush.bf16.msra.mxu1 %v12915_v21  ;;  %6436 = vmatpush.bf16.msra.mxu3 %v12917_v3 }
 0x5c5   :  { %6399 = vmatpush.bf16.msra.mxu0 %v15226_v14  ;;  %6425 = vmatpush.bf16.msra.mxu2 %v15227_v8 }
 0x5c7   :  { %6411 = vmatpush.bf16.msra.mxu1 %v12858_v57  ;;  %6437 = vmatpush.bf16.msra.mxu3 %v12873_v17 }
 0x5c9   :  { %6400 = vmatpush.bf16.msra.mxu0 %v15228_v58  ;;  %6426 = vmatpush.bf16.msra.mxu2 %v15229_v29 }
 0x5cb   :  { %6412 = vmatpush.bf16.msra.mxu1 %v12795_v37  ;;  %6438 = vmatpush.bf16.msra.mxu3 %v12816_v6 }
 0x5cd   :  { %6401 = vmatpush.bf16.msra.mxu0 %v15230_v11  ;;  %6427 = vmatpush.bf16.msra.mxu2 %v15231_v56 }
 0x5cf   :  { %6413 = vmatpush.bf16.msra.mxu1 %v12783_v32  ;;  %6439 = vmatpush.bf16.msra.mxu3 %v12787_v23 }
 0x5d1   :  { %6402 = vmatpush.bf16.msra.mxu0 %v15232_v62  ;;  %6428 = vmatpush.bf16.msra.mxu2 %v15233_v15 }
 0x5d3   :  { %6414 = vmatpush.bf16.msra.mxu1 %v12779_v13  ;;  %6440 = vmatpush.bf16.msra.mxu3 %v12781_v28 }
 0x5d5   :  { %6403 = vmatpush.bf16.msra.mxu0 %v13004_v61  ;;  %6429 = vmatpush.bf16.msra.mxu2 %v13006_v42 }
 0x5d7   :  { %6415 = vmatpush.bf16.msra.mxu1 %v12768_v43  ;;  %6441 = vmatpush.bf16.msra.mxu3 %v12777_v60 }
 0x5d9   :  { %6404 = vmatpush.bf16.msra.mxu0 %v13093_v4  ;;  %6430 = vmatpush.bf16.msra.mxu2 %v13095_v2 }
 0x5db   :  { %6416 = vmatpush.bf16.msra.mxu1 %v13048_v55  ;;  %6442 = vmatpush.bf16.msra.mxu3 %v13064_v40 }
 0x5df   :  { %6417 = vmatpush.bf16.msra.mxu1 %v13088_v63  ;;  %6443 = vmatpush.bf16.msra.mxu3 %v13090_v54 }
 0x639   :  { %v6174_v25 = vpop.f32.mrf.mxu0 }
 0x63f   :  { %v6187_v0 = vpop.f32.mrf.mxu1  ;;  %v6200_v33 = vpop.f32.mrf.mxu2 }
 0x640   :  { %v6188_v38 = vadd.f32 %v6187_v0, %v6174_v25 }
 0x641   :  { %v6176_v5 = vpop.f32.mrf.mxu0 }
 0x642   :  { %v6217_v48 = vadd.f32 %v6188_v38, %v13034_v10 }
 0x644   :  { %v6219_v24 = vrot.slane %v6217_v48, 4 }
 0x645   :  { %v6213_v59 = vpop.f32.mrf.mxu3 }
 0x646   :  { %v6220_v31 = vmax.f32 %v6217_v48, %v6219_v24  ;;  %v6214_v22 = vadd.f32 %v6213_v59, %v6200_v33 }
 0x647   :  { %v6189_v30 = vpop.f32.mrf.mxu1  ;;  %v6202_v12 = vpop.f32.mrf.mxu2 }
 0x648   :  { %v6221_v52 = vrot.slane %v6220_v31, 2  ;;  %v6218_v19 = vadd.f32 %v6214_v22, %v13060_v20 }
 0x64a   :  { %v6222_v18 = vmax.f32 %v6220_v31, %v6221_v52  ;;  %v6225_v16 = vrot.slane %v6218_v19, 4 }
 0x64c   :  { %v6223_v26 = vrot.slane %v6222_v18, 1  ;;  %v6226_v35 = vmax.f32 %v6218_v19, %v6225_v16 }
 0x64d   :  { %v6215_v39 = vpop.f32.mrf.mxu3 }
 0x64e   :  { %v6224_v45 = vmax.f32 %v6222_v18, %v6223_v26  ;;  %v6227_v27 = vrot.slane %v6226_v35, 2 }
 0x650   :  { %v6231_v51 = vsub.f32 %v6217_v48, %v6224_v45  ;;  %v6228_v41 = vmax.f32 %v6226_v35, %v6227_v27 }
 0x652   :  { %v6233_v9 = vmul.f32 1.442695, %v6231_v51  ;;  %v6229_v50 = vrot.slane %v6228_v41, 1 }
 0x654   :  { %7849 = vpow2.f32 %v6233_v9  ;;  %v6230_v36 = vmax.f32 %v6228_v41, %v6229_v50 }
 0x656   :  { %v6232_v7 = vsub.f32 %v6218_v19, %v6230_v36 }
 0x658   :  { %v6235_v46 = vmul.f32 1.442695, %v6232_v7 }
 0x65a   :  { %v7850_v25 = vpop.eup %7849  ;;  %7851 = vpow2.f32 %v6235_v46 }
 0x65b   :  { %v6237_v0 = vrot.slane %v7850_v25, 4 }
 0x65d   :  { %v6238_v33 = vadd.f32 %v7850_v25, %v6237_v0 }
 0x65f   :  { %v6239_v38 = vrot.slane %v6238_v33, 2 }
 0x660   :  { %v7852_v5 = vpop.eup %7851 }
 0x661   :  { %v6240_v24 = vadd.f32 %v6239_v38, %v6238_v33  ;;  %v6243_v59 = vrot.slane %v7852_v5, 4 }
 0x663   :  { %v6241_v31 = vrot.slane %v6240_v24, 1  ;;  %v6244_v22 = vadd.f32 %v7852_v5, %v6243_v59 }
 0x665   :  { %v6242_v30 = vadd.f32 %v6241_v31, %v6240_v24  ;;  %v6245_v12 = vrot.slane %v6244_v22, 2 }
 0x667   :  { %7853 = vrcp.f32 %v6242_v30  ;;  %v6246_v48 = vadd.f32 %v6245_v12, %v6244_v22  ;;  %v6260_v35 = vand.u32 2147483648, %v6242_v30  ;;  %v6258_v45 = vand.u32 2147483647, %v6242_v30 }
 0x668   :  { %vm6254_vm1 = vweird.f32 %v6242_v30 }
 0x669   :  { %v6247_v52 = vrot.slane %v6246_v48, 1  ;;  %v6261_v9 = vor.u32 1.1754944e-38, %v6260_v35  ;;  %vm6259_vm3 = vcmp.eq.f32.partialorder %v6258_v45, 8.507059e+37 }
 0x66b   :  { %v6248_v18 = vadd.f32 %v6247_v52, %v6246_v48 }
 0x66d   :  { %v7854_v16 = vpop.eup %7853  ;;  %7855 = vrcp.f32 %v6248_v18  ;;  %v6275_v46 = vand.u32 2147483648, %v6248_v18  ;;  %v6273_v38 = vand.u32 2147483647, %v6248_v18  ;;  %vm6269_vm5 = vweird.f32 %v6248_v18 }
 0x66e   :  { %v6250_v19 = vmul.f32 %v7854_v16, %v6242_v30  ;;  %vm6255_vm0 = vweird.f32 %v7854_v16 }
 0x66f   :  { %vm6256_vm2 = vmor %vm6254_vm1, %vm6255_vm0  ;;  %v6276_v31 = vor.u32 1.1754944e-38, %v6275_v46  ;;  %vm6274_vm7 = vcmp.eq.f32.partialorder %v6273_v38, 8.507059e+37 }
 0x670   :  { %v6251_v26 = vsub.f32 1.0, %v6250_v19 }
 0x672   :  { %v6252_v39 = vmul.f32 %v7854_v16, %v6251_v26 }
 0x673   :  { %v7856_v27 = vpop.eup %7855 }
 0x674   :  { %v6253_v51 = vadd.f32 %v7854_v16, %v6252_v39  ;;  %v6265_v41 = vmul.f32 %v7856_v27, %v6248_v18  ;;  %vm6270_vm4 = vweird.f32 %v7856_v27 }
 0x675   :  { %vm6271_vm6 = vmor %vm6269_vm5, %vm6270_vm4 }
 0x676   :  { %v6257_v50 = vsel %vm6256_vm2, %v7854_v16, %v6253_v51  ;;  %v6266_v36 = vsub.f32 1.0, %v6265_v41 }
 0x677   :  { %v6262_v7 = vsel %vm6259_vm3, %v6261_v9, %v6257_v50 }
 0x678   :  { %v6263_v0 = vmul.f32 %v7850_v25, %v6262_v7  ;;  %v6267_v33 = vmul.f32 %v7856_v27, %v6266_v36 }
 0x67a   :  { %v6279_v24 = vpack.c.bf16 %v6263_v0, %v6263_v0  ;;  %v6268_v59 = vadd.f32 %v7856_v27, %v6267_v33 }
 0x67c   :  { %6289 = vmatmul.bf16.vlgmr.msrb.gmra.mxu0 %v6279_v24  ;;  %6315 = vmatmul.bf16.vlgmr.msrb.gmra.mxu2 %v6279_v24  ;;  %v6272_v22 = vsel %vm6271_vm6, %v7856_v27, %v6268_v59 }
 0x67d   :  { %6513 = vmatpush.bf16.msrb.mxu0 %v12370_v53  ;;  %6539 = vmatpush.bf16.msrb.mxu2 %v15223_v1  ;;  %v6277_v30 = vsel %vm6274_vm7, %v6276_v31, %v6272_v22 }
 0x67e   :  { %v6278_v12 = vmul.f32 %v7852_v5, %v6277_v30 }
 0x680   :  { %v6280_v48 = vpack.c.bf16 %v6278_v12, %v6278_v12 }
 0x681   :  { %6514 = vmatpush.bf16.msrb.mxu0 %v15224_v49  ;;  %6540 = vmatpush.bf16.msrb.mxu2 %v15225_v34 }
 0x682   :  { %6302 = vmatmul.bf16.vlgmr.msrb.gmra.mxu1 %v6280_v48  ;;  %6328 = vmatmul.bf16.vlgmr.msrb.gmra.mxu3 %v6280_v48 }
 0x683   :  { %6526 = vmatpush.bf16.msrb.mxu1 %v12915_v21  ;;  %6552 = vmatpush.bf16.msrb.mxu3 %v12917_v3 }
 0x685   :  { %6515 = vmatpush.bf16.msrb.mxu0 %v15226_v14  ;;  %6541 = vmatpush.bf16.msrb.mxu2 %v15227_v8 }
 0x687   :  { %6527 = vmatpush.bf16.msrb.mxu1 %v12858_v57  ;;  %6553 = vmatpush.bf16.msrb.mxu3 %v12873_v17 }
 0x689   :  { %6516 = vmatpush.bf16.msrb.mxu0 %v15228_v58  ;;  %6542 = vmatpush.bf16.msrb.mxu2 %v15229_v29 }
 0x68b   :  { %6528 = vmatpush.bf16.msrb.mxu1 %v12795_v37  ;;  %6554 = vmatpush.bf16.msrb.mxu3 %v12816_v6 }
 0x68d   :  { %6517 = vmatpush.bf16.msrb.mxu0 %v15230_v11  ;;  %6543 = vmatpush.bf16.msrb.mxu2 %v15231_v56 }
 0x68f   :  { %6529 = vmatpush.bf16.msrb.mxu1 %v12783_v32  ;;  %6555 = vmatpush.bf16.msrb.mxu3 %v12787_v23 }
 0x691   :  { %6518 = vmatpush.bf16.msrb.mxu0 %v15232_v62  ;;  %6544 = vmatpush.bf16.msrb.mxu2 %v15233_v15 }
 0x693   :  { %6530 = vmatpush.bf16.msrb.mxu1 %v12779_v13  ;;  %6556 = vmatpush.bf16.msrb.mxu3 %v12781_v28 }
 0x695   :  { %6519 = vmatpush.bf16.msrb.mxu0 %v13004_v61  ;;  %6545 = vmatpush.bf16.msrb.mxu2 %v13006_v42 }
 0x697   :  { %6531 = vmatpush.bf16.msrb.mxu1 %v12768_v43  ;;  %6557 = vmatpush.bf16.msrb.mxu3 %v12777_v60 }
 0x699   :  { %6520 = vmatpush.bf16.msrb.mxu0 %v13093_v4  ;;  %6546 = vmatpush.bf16.msrb.mxu2 %v13095_v2 }
 0x69b   :  { %6532 = vmatpush.bf16.msrb.mxu1 %v13048_v55  ;;  %6558 = vmatpush.bf16.msrb.mxu3 %v13064_v40 }
 0x69f   :  { %6533 = vmatpush.bf16.msrb.mxu1 %v13088_v63  ;;  %6559 = vmatpush.bf16.msrb.mxu3 %v13090_v54 }
 0x6f9   :  { %v6290_v25 = vpop.f32.mrf.mxu0 }
 0x6ff   :  { %v6303_v5 = vpop.f32.mrf.mxu1  ;;  %v6316_v52 = vpop.f32.mrf.mxu2 }
 0x700   :  { %v6304_v18 = vadd.f32 %v6303_v5, %v6290_v25 }
 0x701   :  { %v6292_v16 = vpop.f32.mrf.mxu0 }
 0x702   :  { %v6333_v19 = vadd.f32 %v6304_v18, %v13034_v10 }
 0x704   :  { %v6335_v26 = vrot.slane %v6333_v19, 4 }
 0x705   :  { %v6329_v35 = vpop.f32.mrf.mxu3 }
 0x706   :  { %v6336_v39 = vmax.f32 %v6333_v19, %v6335_v26  ;;  %v6330_v45 = vadd.f32 %v6329_v35, %v6316_v52 }
 0x707   :  { %v6305_v27 = vpop.f32.mrf.mxu1  ;;  %v6318_v51 = vpop.f32.mrf.mxu2 }
 0x708   :  { %v6337_v41 = vrot.slane %v6336_v39, 2  ;;  %v6334_v9 = vadd.f32 %v6330_v45, %v13060_v20 }
 0x70a   :  { %v6338_v50 = vmax.f32 %v6336_v39, %v6337_v41  ;;  %v6341_v36 = vrot.slane %v6334_v9, 4 }
 0x70c   :  { %v6339_v7 = vrot.slane %v6338_v50, 1  ;;  %v6342_v46 = vmax.f32 %v6334_v9, %v6341_v36 }
 0x70d   :  { %v6331_v0 = vpop.f32.mrf.mxu3 }
 0x70e   :  { %v6340_v33 = vmax.f32 %v6338_v50, %v6339_v7  ;;  %v6343_v38 = vrot.slane %v6342_v46, 2 }
 0x710   :  { %v6347_v24 = vsub.f32 %v6333_v19, %v6340_v33  ;;  %v6344_v59 = vmax.f32 %v6342_v46, %v6343_v38 }
 0x712   :  { %v6349_v31 = vmul.f32 1.442695, %v6347_v24  ;;  %v6345_v22 = vrot.slane %v6344_v59, 1 }
 0x714   :  { %7857 = vpow2.f32 %v6349_v31  ;;  %v6346_v30 = vmax.f32 %v6344_v59, %v6345_v22 }
 0x716   :  { %v6348_v12 = vsub.f32 %v6334_v9, %v6346_v30 }
 0x718   :  { %v6351_v48 = vmul.f32 1.442695, %v6348_v12 }
 0x71a   :  { %v7858_v25 = vpop.eup %7857  ;;  %7859 = vpow2.f32 %v6351_v48 }
 0x71b   :  { %v6353_v5 = vrot.slane %v7858_v25, 4 }
 0x71d   :  { %v6354_v52 = vadd.f32 %v7858_v25, %v6353_v5 }
 0x71f   :  { %v6355_v18 = vrot.slane %v6354_v52, 2 }
 0x720   :  { %v7860_v16 = vpop.eup %7859 }
 0x721   :  { %v6356_v26 = vadd.f32 %v6355_v18, %v6354_v52  ;;  %v6359_v35 = vrot.slane %v7860_v16, 4 }
 0x723   :  { %v6357_v39 = vrot.slane %v6356_v26, 1  ;;  %v6360_v45 = vadd.f32 %v7860_v16, %v6359_v35 }
 0x725   :  { %v6358_v27 = vadd.f32 %v6357_v39, %v6356_v26  ;;  %v6361_v51 = vrot.slane %v6360_v45, 2 }
 0x727   :  { %7861 = vrcp.f32 %v6358_v27  ;;  %v6362_v19 = vadd.f32 %v6361_v51, %v6360_v45  ;;  %v6376_v46 = vand.u32 2147483648, %v6358_v27  ;;  %v6374_v33 = vand.u32 2147483647, %v6358_v27 }
 0x728   :  { %vm6370_vm9 = vweird.f32 %v6358_v27 }
 0x729   :  { %v6363_v41 = vrot.slane %v6362_v19, 1  ;;  %v6377_v31 = vor.u32 1.1754944e-38, %v6376_v46  ;;  %vm6375_vm11 = vcmp.eq.f32.partialorder %v6374_v33, 8.507059e+37 }
 0x72b   :  { %v6364_v50 = vadd.f32 %v6363_v41, %v6362_v19 }
 0x72d   :  { %v7862_v36 = vpop.eup %7861  ;;  %7863 = vrcp.f32 %v6364_v50  ;;  %v6391_v48 = vand.u32 2147483648, %v6364_v50  ;;  %v6389_v18 = vand.u32 2147483647, %v6364_v50  ;;  %vm6385_vm13 = vweird.f32 %v6364_v50 }
 0x72e   :  { %v6366_v9 = vmul.f32 %v7862_v36, %v6358_v27  ;;  %vm6371_vm8 = vweird.f32 %v7862_v36 }
 0x72f   :  { %vm6372_vm10 = vmor %vm6370_vm9, %vm6371_vm8  ;;  %v6392_v39 = vor.u32 1.1754944e-38, %v6391_v48  ;;  %vm6390_vm15 = vcmp.eq.f32.partialorder %v6389_v18, 8.507059e+37 }
 0x730   :  { %v6367_v7 = vsub.f32 1.0, %v6366_v9 }
 0x732   :  { %v6368_v0 = vmul.f32 %v7862_v36, %v6367_v7 }
 0x733   :  { %v7864_v38 = vpop.eup %7863 }
 0x734   :  { %v6369_v24 = vadd.f32 %v7862_v36, %v6368_v0  ;;  %v6381_v59 = vmul.f32 %v7864_v38, %v6364_v50  ;;  %vm6386_vm12 = vweird.f32 %v7864_v38 }
 0x735   :  { %vm6387_vm14 = vmor %vm6385_vm13, %vm6386_vm12 }
 0x736   :  { %v6373_v22 = vsel %vm6372_vm10, %v7862_v36, %v6369_v24  ;;  %v6382_v30 = vsub.f32 1.0, %v6381_v59 }
 0x737   :  { %v6378_v12 = vsel %vm6375_vm11, %v6377_v31, %v6373_v22 }
 0x738   :  { %v6379_v5 = vmul.f32 %v7858_v25, %v6378_v12  ;;  %v6383_v52 = vmul.f32 %v7864_v38, %v6382_v30 }
 0x73a   :  { %v6395_v26 = vpack.c.bf16 %v6379_v5, %v6379_v5  ;;  %v6384_v35 = vadd.f32 %v7864_v38, %v6383_v52 }
 0x73c   :  { %6405 = vmatmul.bf16.vlgmr.msra.gmra.mxu0 %v6395_v26  ;;  %6431 = vmatmul.bf16.vlgmr.msra.gmra.mxu2 %v6395_v26  ;;  %v6388_v45 = vsel %vm6387_vm14, %v7864_v38, %v6384_v35 }
 0x73d   :  { %6629 = vmatpush.bf16.msra.mxu0 %v12370_v53  ;;  %6655 = vmatpush.bf16.msra.mxu2 %v15223_v1  ;;  %v6393_v27 = vsel %vm6390_vm15, %v6392_v39, %v6388_v45 }
 0x73e   :  { %v6394_v51 = vmul.f32 %v7860_v16, %v6393_v27 }
 0x740   :  { %v6396_v19 = vpack.c.bf16 %v6394_v51, %v6394_v51 }
 0x741   :  { %6630 = vmatpush.bf16.msra.mxu0 %v15224_v49  ;;  %6656 = vmatpush.bf16.msra.mxu2 %v15225_v34 }
 0x742   :  { %6418 = vmatmul.bf16.vlgmr.msra.gmra.mxu1 %v6396_v19  ;;  %6444 = vmatmul.bf16.vlgmr.msra.gmra.mxu3 %v6396_v19 }
 0x743   :  { %6642 = vmatpush.bf16.msra.mxu1 %v12915_v21  ;;  %6668 = vmatpush.bf16.msra.mxu3 %v12917_v3 }
 0x745   :  { %6631 = vmatpush.bf16.msra.mxu0 %v15226_v14  ;;  %6657 = vmatpush.bf16.msra.mxu2 %v15227_v8 }
 0x747   :  { %6643 = vmatpush.bf16.msra.mxu1 %v12858_v57  ;;  %6669 = vmatpush.bf16.msra.mxu3 %v12873_v17 }
 0x749   :  { %6632 = vmatpush.bf16.msra.mxu0 %v15228_v58  ;;  %6658 = vmatpush.bf16.msra.mxu2 %v15229_v29 }
 0x74b   :  { %6644 = vmatpush.bf16.msra.mxu1 %v12795_v37  ;;  %6670 = vmatpush.bf16.msra.mxu3 %v12816_v6 }
 0x74d   :  { %6633 = vmatpush.bf16.msra.mxu0 %v15230_v11  ;;  %6659 = vmatpush.bf16.msra.mxu2 %v15231_v56 }
 0x74f   :  { %6645 = vmatpush.bf16.msra.mxu1 %v12783_v32  ;;  %6671 = vmatpush.bf16.msra.mxu3 %v12787_v23 }
 0x751   :  { %6634 = vmatpush.bf16.msra.mxu0 %v15232_v62  ;;  %6660 = vmatpush.bf16.msra.mxu2 %v15233_v15 }
 0x753   :  { %6646 = vmatpush.bf16.msra.mxu1 %v12779_v13  ;;  %6672 = vmatpush.bf16.msra.mxu3 %v12781_v28 }
 0x755   :  { %6635 = vmatpush.bf16.msra.mxu0 %v13004_v61  ;;  %6661 = vmatpush.bf16.msra.mxu2 %v13006_v42 }
 0x757   :  { %6647 = vmatpush.bf16.msra.mxu1 %v12768_v43  ;;  %6673 = vmatpush.bf16.msra.mxu3 %v12777_v60 }
 0x759   :  { %6636 = vmatpush.bf16.msra.mxu0 %v13093_v4  ;;  %6662 = vmatpush.bf16.msra.mxu2 %v13095_v2 }
 0x75b   :  { %6648 = vmatpush.bf16.msra.mxu1 %v13048_v55  ;;  %6674 = vmatpush.bf16.msra.mxu3 %v13064_v40 }
 0x75f   :  { %6649 = vmatpush.bf16.msra.mxu1 %v13088_v63  ;;  %6675 = vmatpush.bf16.msra.mxu3 %v13090_v54 }
 0x7b9   :  { %v6406_v25 = vpop.f32.mrf.mxu0 }
 0x7bf   :  { %v6419_v16 = vpop.f32.mrf.mxu1  ;;  %v6432_v41 = vpop.f32.mrf.mxu2 }
 0x7c0   :  { %v6420_v50 = vadd.f32 %v6419_v16, %v6406_v25 }
 0x7c1   :  { %v6408_v36 = vpop.f32.mrf.mxu0 }
 0x7c2   :  { %v6449_v9 = vadd.f32 %v6420_v50, %v13034_v10 }
 0x7c4   :  { %v6451_v7 = vrot.slane %v6449_v9, 4 }
 0x7c5   :  { %v6445_v46 = vpop.f32.mrf.mxu3 }
 0x7c6   :  { %v6452_v0 = vmax.f32 %v6449_v9, %v6451_v7  ;;  %v6446_v33 = vadd.f32 %v6445_v46, %v6432_v41 }
 0x7c7   :  { %v6421_v38 = vpop.f32.mrf.mxu1  ;;  %v6434_v24 = vpop.f32.mrf.mxu2 }
 0x7c8   :  { %v6453_v59 = vrot.slane %v6452_v0, 2  ;;  %v6450_v31 = vadd.f32 %v6446_v33, %v13060_v20 }
 0x7ca   :  { %v6454_v22 = vmax.f32 %v6452_v0, %v6453_v59  ;;  %v6457_v30 = vrot.slane %v6450_v31, 4 }
 0x7cc   :  { %v6455_v12 = vrot.slane %v6454_v22, 1  ;;  %v6458_v48 = vmax.f32 %v6450_v31, %v6457_v30 }
 0x7cd   :  { %v6447_v5 = vpop.f32.mrf.mxu3 }
 0x7ce   :  { %v6456_v52 = vmax.f32 %v6454_v22, %v6455_v12  ;;  %v6459_v18 = vrot.slane %v6458_v48, 2 }
 0x7d0   :  { %v6463_v26 = vsub.f32 %v6449_v9, %v6456_v52  ;;  %v6460_v35 = vmax.f32 %v6458_v48, %v6459_v18 }
 0x7d2   :  { %v6465_v39 = vmul.f32 1.442695, %v6463_v26  ;;  %v6461_v45 = vrot.slane %v6460_v35, 1 }
 0x7d4   :  { %7865 = vpow2.f32 %v6465_v39  ;;  %v6462_v27 = vmax.f32 %v6460_v35, %v6461_v45 }
 0x7d6   :  { %v6464_v51 = vsub.f32 %v6450_v31, %v6462_v27 }
 0x7d8   :  { %v6467_v19 = vmul.f32 1.442695, %v6464_v51 }
 0x7da   :  { %v7866_v25 = vpop.eup %7865  ;;  %7867 = vpow2.f32 %v6467_v19 }
 0x7db   :  { %v6469_v16 = vrot.slane %v7866_v25, 4 }
 0x7dd   :  { %v6470_v41 = vadd.f32 %v7866_v25, %v6469_v16 }
 0x7df   :  { %v6471_v50 = vrot.slane %v6470_v41, 2 }
 0x7e0   :  { %v7868_v36 = vpop.eup %7867 }
 0x7e1   :  { %v6472_v7 = vadd.f32 %v6471_v50, %v6470_v41  ;;  %v6475_v46 = vrot.slane %v7868_v36, 4 }
 0x7e3   :  { %v6473_v0 = vrot.slane %v6472_v7, 1  ;;  %v6476_v33 = vadd.f32 %v7868_v36, %v6475_v46 }
 0x7e5   :  { %v6474_v38 = vadd.f32 %v6473_v0, %v6472_v7  ;;  %v6477_v24 = vrot.slane %v6476_v33, 2 }
 0x7e7   :  { %7869 = vrcp.f32 %v6474_v38  ;;  %v6478_v9 = vadd.f32 %v6477_v24, %v6476_v33  ;;  %v6492_v48 = vand.u32 2147483648, %v6474_v38  ;;  %v6490_v52 = vand.u32 2147483647, %v6474_v38 }
 0x7e8   :  { %vm6486_vm1 = vweird.f32 %v6474_v38 }
 0x7e9   :  { %v6479_v59 = vrot.slane %v6478_v9, 1  ;;  %v6493_v39 = vor.u32 1.1754944e-38, %v6492_v48  ;;  %vm6491_vm3 = vcmp.eq.f32.partialorder %v6490_v52, 8.507059e+37 }
 0x7eb   :  { %v6480_v22 = vadd.f32 %v6479_v59, %v6478_v9 }
 0x7ed   :  { %v7870_v30 = vpop.eup %7869  ;;  %7871 = vrcp.f32 %v6480_v22  ;;  %v6507_v19 = vand.u32 2147483648, %v6480_v22  ;;  %v6505_v50 = vand.u32 2147483647, %v6480_v22  ;;  %vm6501_vm5 = vweird.f32 %v6480_v22 }
 0x7ee   :  { %v6482_v31 = vmul.f32 %v7870_v30, %v6474_v38  ;;  %vm6487_vm0 = vweird.f32 %v7870_v30 }
 0x7ef   :  { %vm6488_vm2 = vmor %vm6486_vm1, %vm6487_vm0  ;;  %v6508_v0 = vor.u32 1.1754944e-38, %v6507_v19  ;;  %vm6506_vm7 = vcmp.eq.f32.partialorder %v6505_v50, 8.507059e+37 }
 0x7f0   :  { %v6483_v12 = vsub.f32 1.0, %v6482_v31 }
 0x7f2   :  { %v6484_v5 = vmul.f32 %v7870_v30, %v6483_v12 }
 0x7f3   :  { %v7872_v18 = vpop.eup %7871 }
 0x7f4   :  { %v6485_v26 = vadd.f32 %v7870_v30, %v6484_v5  ;;  %v6497_v35 = vmul.f32 %v7872_v18, %v6480_v22  ;;  %vm6502_vm4 = vweird.f32 %v7872_v18 }
 0x7f5   :  { %vm6503_vm6 = vmor %vm6501_vm5, %vm6502_vm4 }
 0x7f6   :  { %v6489_v45 = vsel %vm6488_vm2, %v7870_v30, %v6485_v26  ;;  %v6498_v27 = vsub.f32 1.0, %v6497_v35 }
 0x7f7   :  { %v6494_v51 = vsel %vm6491_vm3, %v6493_v39, %v6489_v45 }
 0x7f8   :  { %v6495_v16 = vmul.f32 %v7866_v25, %v6494_v51  ;;  %v6499_v41 = vmul.f32 %v7872_v18, %v6498_v27 }
 0x7fa   :  { %v6511_v7 = vpack.c.bf16 %v6495_v16, %v6495_v16  ;;  %v6500_v46 = vadd.f32 %v7872_v18, %v6499_v41 }
 0x7fc   :  { %6521 = vmatmul.bf16.vlgmr.msrb.gmra.mxu0 %v6511_v7  ;;  %6547 = vmatmul.bf16.vlgmr.msrb.gmra.mxu2 %v6511_v7  ;;  %v6504_v33 = vsel %vm6503_vm6, %v7872_v18, %v6500_v46 }
 0x7fd   :  { %6745 = vmatpush.bf16.msrb.mxu0 %v12370_v53  ;;  %6771 = vmatpush.bf16.msrb.mxu2 %v15223_v1  ;;  %v6509_v38 = vsel %vm6506_vm7, %v6508_v0, %v6504_v33 }
 0x7fe   :  { %v6510_v24 = vmul.f32 %v7868_v36, %v6509_v38 }
 0x800   :  { %v6512_v9 = vpack.c.bf16 %v6510_v24, %v6510_v24 }
 0x801   :  { %6746 = vmatpush.bf16.msrb.mxu0 %v15224_v49  ;;  %6772 = vmatpush.bf16.msrb.mxu2 %v15225_v34 }
 0x802   :  { %6534 = vmatmul.bf16.vlgmr.msrb.gmra.mxu1 %v6512_v9  ;;  %6560 = vmatmul.bf16.vlgmr.msrb.gmra.mxu3 %v6512_v9 }
 0x803   :  { %6758 = vmatpush.bf16.msrb.mxu1 %v12915_v21  ;;  %6784 = vmatpush.bf16.msrb.mxu3 %v12917_v3 }
 0x805   :  { %6747 = vmatpush.bf16.msrb.mxu0 %v15226_v14  ;;  %6773 = vmatpush.bf16.msrb.mxu2 %v15227_v8 }
 0x807   :  { %6759 = vmatpush.bf16.msrb.mxu1 %v12858_v57  ;;  %6785 = vmatpush.bf16.msrb.mxu3 %v12873_v17 }
 0x809   :  { %6748 = vmatpush.bf16.msrb.mxu0 %v15228_v58  ;;  %6774 = vmatpush.bf16.msrb.mxu2 %v15229_v29 }
 0x80b   :  { %6760 = vmatpush.bf16.msrb.mxu1 %v12795_v37  ;;  %6786 = vmatpush.bf16.msrb.mxu3 %v12816_v6 }
 0x80d   :  { %6749 = vmatpush.bf16.msrb.mxu0 %v15230_v11  ;;  %6775 = vmatpush.bf16.msrb.mxu2 %v15231_v56 }
 0x80f   :  { %6761 = vmatpush.bf16.msrb.mxu1 %v12783_v32  ;;  %6787 = vmatpush.bf16.msrb.mxu3 %v12787_v23 }
 0x811   :  { %6750 = vmatpush.bf16.msrb.mxu0 %v15232_v62  ;;  %6776 = vmatpush.bf16.msrb.mxu2 %v15233_v15 }
 0x813   :  { %6762 = vmatpush.bf16.msrb.mxu1 %v12779_v13  ;;  %6788 = vmatpush.bf16.msrb.mxu3 %v12781_v28 }
 0x815   :  { %6751 = vmatpush.bf16.msrb.mxu0 %v13004_v61  ;;  %6777 = vmatpush.bf16.msrb.mxu2 %v13006_v42 }
 0x817   :  { %6763 = vmatpush.bf16.msrb.mxu1 %v12768_v43  ;;  %6789 = vmatpush.bf16.msrb.mxu3 %v12777_v60 }
 0x819   :  { %6752 = vmatpush.bf16.msrb.mxu0 %v13093_v4  ;;  %6778 = vmatpush.bf16.msrb.mxu2 %v13095_v2 }
 0x81b   :  { %6764 = vmatpush.bf16.msrb.mxu1 %v13048_v55  ;;  %6790 = vmatpush.bf16.msrb.mxu3 %v13064_v40 }
 0x81f   :  { %6765 = vmatpush.bf16.msrb.mxu1 %v13088_v63  ;;  %6791 = vmatpush.bf16.msrb.mxu3 %v13090_v54 }
 0x879   :  { %v6522_v25 = vpop.f32.mrf.mxu0 }
 0x87f   :  { %v6535_v36 = vpop.f32.mrf.mxu1  ;;  %v6548_v59 = vpop.f32.mrf.mxu2 }
 0x880   :  { %v6536_v22 = vadd.f32 %v6535_v36, %v6522_v25 }
 0x881   :  { %v6524_v30 = vpop.f32.mrf.mxu0 }
 0x882   :  { %v6565_v31 = vadd.f32 %v6536_v22, %v13034_v10 }
 0x884   :  { %v6567_v12 = vrot.slane %v6565_v31, 4 }
 0x885   :  { %v6561_v48 = vpop.f32.mrf.mxu3 }
 0x886   :  { %v6568_v5 = vmax.f32 %v6565_v31, %v6567_v12  ;;  %v6562_v52 = vadd.f32 %v6561_v48, %v6548_v59 }
 0x887   :  { %v6537_v18 = vpop.f32.mrf.mxu1  ;;  %v6550_v26 = vpop.f32.mrf.mxu2 }
 0x888   :  { %v6569_v35 = vrot.slane %v6568_v5, 2  ;;  %v6566_v39 = vadd.f32 %v6562_v52, %v13060_v20 }
 0x88a   :  { %v6570_v45 = vmax.f32 %v6568_v5, %v6569_v35  ;;  %v6573_v27 = vrot.slane %v6566_v39, 4 }
 0x88c   :  { %v6571_v51 = vrot.slane %v6570_v45, 1  ;;  %v6574_v19 = vmax.f32 %v6566_v39, %v6573_v27 }
 0x88d   :  { %v6563_v16 = vpop.f32.mrf.mxu3 }
 0x88e   :  { %v6572_v41 = vmax.f32 %v6570_v45, %v6571_v51  ;;  %v6575_v50 = vrot.slane %v6574_v19, 2 }
 0x890   :  { %v6579_v7 = vsub.f32 %v6565_v31, %v6572_v41  ;;  %v6576_v46 = vmax.f32 %v6574_v19, %v6575_v50 }
 0x892   :  { %v6581_v0 = vmul.f32 1.442695, %v6579_v7  ;;  %v6577_v33 = vrot.slane %v6576_v46, 1 }
 0x894   :  { %7873 = vpow2.f32 %v6581_v0  ;;  %v6578_v38 = vmax.f32 %v6576_v46, %v6577_v33 }
 0x896   :  { %v6580_v24 = vsub.f32 %v6566_v39, %v6578_v38 }
 0x898   :  { %v6583_v9 = vmul.f32 1.442695, %v6580_v24 }
 0x89a   :  { %v7874_v25 = vpop.eup %7873  ;;  %7875 = vpow2.f32 %v6583_v9 }
 0x89b   :  { %v6585_v36 = vrot.slane %v7874_v25, 4 }
 0x89d   :  { %v6586_v59 = vadd.f32 %v7874_v25, %v6585_v36 }
 0x89f   :  { %v6587_v22 = vrot.slane %v6586_v59, 2 }
 0x8a0   :  { %v7876_v30 = vpop.eup %7875 }
 0x8a1   :  { %v6588_v12 = vadd.f32 %v6587_v22, %v6586_v59  ;;  %v6591_v48 = vrot.slane %v7876_v30, 4 }
 0x8a3   :  { %v6589_v5 = vrot.slane %v6588_v12, 1  ;;  %v6592_v52 = vadd.f32 %v7876_v30, %v6591_v48 }
 0x8a5   :  { %v6590_v18 = vadd.f32 %v6589_v5, %v6588_v12  ;;  %v6593_v26 = vrot.slane %v6592_v52, 2 }
 0x8a7   :  { %7877 = vrcp.f32 %v6590_v18  ;;  %v6594_v31 = vadd.f32 %v6593_v26, %v6592_v52  ;;  %v6608_v19 = vand.u32 2147483648, %v6590_v18  ;;  %v6606_v41 = vand.u32 2147483647, %v6590_v18 }
 0x8a8   :  { %vm6602_vm9 = vweird.f32 %v6590_v18 }
 0x8a9   :  { %v6595_v35 = vrot.slane %v6594_v31, 1  ;;  %v6609_v0 = vor.u32 1.1754944e-38, %v6608_v19  ;;  %vm6607_vm11 = vcmp.eq.f32.partialorder %v6606_v41, 8.507059e+37 }
 0x8ab   :  { %v6596_v45 = vadd.f32 %v6595_v35, %v6594_v31 }
 0x8ad   :  { %v7878_v27 = vpop.eup %7877  ;;  %7879 = vrcp.f32 %v6596_v45  ;;  %v6623_v9 = vand.u32 2147483648, %v6596_v45  ;;  %v6621_v22 = vand.u32 2147483647, %v6596_v45  ;;  %vm6617_vm13 = vweird.f32 %v6596_v45 }
 0x8ae   :  { %v6598_v39 = vmul.f32 %v7878_v27, %v6590_v18  ;;  %vm6603_vm8 = vweird.f32 %v7878_v27 }
 0x8af   :  { %vm6604_vm10 = vmor %vm6602_vm9, %vm6603_vm8  ;;  %v6624_v5 = vor.u32 1.1754944e-38, %v6623_v9  ;;  %vm6622_vm15 = vcmp.eq.f32.partialorder %v6621_v22, 8.507059e+37 }
 0x8b0   :  { %v6599_v51 = vsub.f32 1.0, %v6598_v39 }
 0x8b2   :  { %v6600_v16 = vmul.f32 %v7878_v27, %v6599_v51 }
 0x8b3   :  { %v7880_v50 = vpop.eup %7879 }
 0x8b4   :  { %v6601_v7 = vadd.f32 %v7878_v27, %v6600_v16  ;;  %v6613_v46 = vmul.f32 %v7880_v50, %v6596_v45  ;;  %vm6618_vm12 = vweird.f32 %v7880_v50 }
 0x8b5   :  { %vm6619_vm14 = vmor %vm6617_vm13, %vm6618_vm12 }
 0x8b6   :  { %v6605_v33 = vsel %vm6604_vm10, %v7878_v27, %v6601_v7  ;;  %v6614_v38 = vsub.f32 1.0, %v6613_v46 }
 0x8b7   :  { %v6610_v24 = vsel %vm6607_vm11, %v6609_v0, %v6605_v33 }
 0x8b8   :  { %v6611_v36 = vmul.f32 %v7874_v25, %v6610_v24  ;;  %v6615_v59 = vmul.f32 %v7880_v50, %v6614_v38 }
 0x8ba   :  { %v6627_v12 = vpack.c.bf16 %v6611_v36, %v6611_v36  ;;  %v6616_v48 = vadd.f32 %v7880_v50, %v6615_v59 }
 0x8bc   :  { %6637 = vmatmul.bf16.vlgmr.msra.gmra.mxu0 %v6627_v12  ;;  %6663 = vmatmul.bf16.vlgmr.msra.gmra.mxu2 %v6627_v12  ;;  %v6620_v52 = vsel %vm6619_vm14, %v7880_v50, %v6616_v48 }
 0x8bd   :  { %6861 = vmatpush.bf16.msra.mxu0 %v12370_v53  ;;  %6887 = vmatpush.bf16.msra.mxu2 %v15223_v1  ;;  %v6625_v18 = vsel %vm6622_vm15, %v6624_v5, %v6620_v52 }
 0x8be   :  { %v6626_v26 = vmul.f32 %v7876_v30, %v6625_v18 }
 0x8c0   :  { %v6628_v31 = vpack.c.bf16 %v6626_v26, %v6626_v26 }
 0x8c1   :  { %6862 = vmatpush.bf16.msra.mxu0 %v15224_v49  ;;  %6888 = vmatpush.bf16.msra.mxu2 %v15225_v34 }
 0x8c2   :  { %6650 = vmatmul.bf16.vlgmr.msra.gmra.mxu1 %v6628_v31  ;;  %6676 = vmatmul.bf16.vlgmr.msra.gmra.mxu3 %v6628_v31 }
 0x8c3   :  { %6874 = vmatpush.bf16.msra.mxu1 %v12915_v21  ;;  %6900 = vmatpush.bf16.msra.mxu3 %v12917_v3 }
 0x8c5   :  { %6863 = vmatpush.bf16.msra.mxu0 %v15226_v14  ;;  %6889 = vmatpush.bf16.msra.mxu2 %v15227_v8 }
 0x8c7   :  { %6875 = vmatpush.bf16.msra.mxu1 %v12858_v57  ;;  %6901 = vmatpush.bf16.msra.mxu3 %v12873_v17 }
 0x8c9   :  { %6864 = vmatpush.bf16.msra.mxu0 %v15228_v58  ;;  %6890 = vmatpush.bf16.msra.mxu2 %v15229_v29 }
 0x8cb   :  { %6876 = vmatpush.bf16.msra.mxu1 %v12795_v37  ;;  %6902 = vmatpush.bf16.msra.mxu3 %v12816_v6 }
 0x8cd   :  { %6865 = vmatpush.bf16.msra.mxu0 %v15230_v11  ;;  %6891 = vmatpush.bf16.msra.mxu2 %v15231_v56 }
 0x8cf   :  { %6877 = vmatpush.bf16.msra.mxu1 %v12783_v32  ;;  %6903 = vmatpush.bf16.msra.mxu3 %v12787_v23 }
 0x8d1   :  { %6866 = vmatpush.bf16.msra.mxu0 %v15232_v62  ;;  %6892 = vmatpush.bf16.msra.mxu2 %v15233_v15 }
 0x8d3   :  { %6878 = vmatpush.bf16.msra.mxu1 %v12779_v13  ;;  %6904 = vmatpush.bf16.msra.mxu3 %v12781_v28 }
 0x8d5   :  { %6867 = vmatpush.bf16.msra.mxu0 %v13004_v61  ;;  %6893 = vmatpush.bf16.msra.mxu2 %v13006_v42 }
 0x8d7   :  { %6879 = vmatpush.bf16.msra.mxu1 %v12768_v43  ;;  %6905 = vmatpush.bf16.msra.mxu3 %v12777_v60 }
 0x8d9   :  { %6868 = vmatpush.bf16.msra.mxu0 %v13093_v4  ;;  %6894 = vmatpush.bf16.msra.mxu2 %v13095_v2 }
 0x8db   :  { %6880 = vmatpush.bf16.msra.mxu1 %v13048_v55  ;;  %6906 = vmatpush.bf16.msra.mxu3 %v13064_v40 }
 0x8df   :  { %6881 = vmatpush.bf16.msra.mxu1 %v13088_v63  ;;  %6907 = vmatpush.bf16.msra.mxu3 %v13090_v54 }
 0x939   :  { %v6638_v25 = vpop.f32.mrf.mxu0 }
 0x93f   :  { %v6651_v30 = vpop.f32.mrf.mxu1  ;;  %v6664_v35 = vpop.f32.mrf.mxu2 }
 0x940   :  { %v6652_v45 = vadd.f32 %v6651_v30, %v6638_v25 }
 0x941   :  { %v6640_v27 = vpop.f32.mrf.mxu0 }
 0x942   :  { %v6681_v39 = vadd.f32 %v6652_v45, %v13034_v10 }
 0x944   :  { %v6683_v51 = vrot.slane %v6681_v39, 4 }
 0x945   :  { %v6677_v19 = vpop.f32.mrf.mxu3 }
 0x946   :  { %v6684_v16 = vmax.f32 %v6681_v39, %v6683_v51  ;;  %v6678_v41 = vadd.f32 %v6677_v19, %v6664_v35 }
 0x947   :  { %v6653_v50 = vpop.f32.mrf.mxu1  ;;  %v6666_v7 = vpop.f32.mrf.mxu2 }
 0x948   :  { %v6685_v46 = vrot.slane %v6684_v16, 2  ;;  %v6682_v0 = vadd.f32 %v6678_v41, %v13060_v20 }
 0x94a   :  { %v6686_v33 = vmax.f32 %v6684_v16, %v6685_v46  ;;  %v6689_v38 = vrot.slane %v6682_v0, 4 }
 0x94c   :  { %v6687_v24 = vrot.slane %v6686_v33, 1  ;;  %v6690_v9 = vmax.f32 %v6682_v0, %v6689_v38 }
 0x94d   :  { %v6679_v36 = vpop.f32.mrf.mxu3 }
 0x94e   :  { %v6688_v59 = vmax.f32 %v6686_v33, %v6687_v24  ;;  %v6691_v22 = vrot.slane %v6690_v9, 2 }
 0x950   :  { %v6695_v12 = vsub.f32 %v6681_v39, %v6688_v59  ;;  %v6692_v48 = vmax.f32 %v6690_v9, %v6691_v22 }
 0x952   :  { %v6697_v5 = vmul.f32 1.442695, %v6695_v12  ;;  %v6693_v52 = vrot.slane %v6692_v48, 1 }
 0x954   :  { %7881 = vpow2.f32 %v6697_v5  ;;  %v6694_v18 = vmax.f32 %v6692_v48, %v6693_v52 }
 0x956   :  { %v6696_v26 = vsub.f32 %v6682_v0, %v6694_v18 }
 0x958   :  { %v6699_v31 = vmul.f32 1.442695, %v6696_v26 }
 0x95a   :  { %v7882_v25 = vpop.eup %7881  ;;  %7883 = vpow2.f32 %v6699_v31 }
 0x95b   :  { %v6701_v30 = vrot.slane %v7882_v25, 4 }
 0x95d   :  { %v6702_v35 = vadd.f32 %v7882_v25, %v6701_v30 }
 0x95f   :  { %v6703_v45 = vrot.slane %v6702_v35, 2 }
 0x960   :  { %v7884_v27 = vpop.eup %7883 }
 0x961   :  { %v6704_v51 = vadd.f32 %v6703_v45, %v6702_v35  ;;  %v6707_v19 = vrot.slane %v7884_v27, 4 }
 0x963   :  { %v6705_v16 = vrot.slane %v6704_v51, 1  ;;  %v6708_v41 = vadd.f32 %v7884_v27, %v6707_v19 }
 0x965   :  { %v6706_v50 = vadd.f32 %v6705_v16, %v6704_v51  ;;  %v6709_v7 = vrot.slane %v6708_v41, 2 }
 0x967   :  { %7885 = vrcp.f32 %v6706_v50  ;;  %v6710_v39 = vadd.f32 %v6709_v7, %v6708_v41  ;;  %v6724_v9 = vand.u32 2147483648, %v6706_v50  ;;  %v6722_v59 = vand.u32 2147483647, %v6706_v50 }
 0x968   :  { %vm6718_vm1 = vweird.f32 %v6706_v50 }
 0x969   :  { %v6711_v46 = vrot.slane %v6710_v39, 1  ;;  %v6725_v5 = vor.u32 1.1754944e-38, %v6724_v9  ;;  %vm6723_vm3 = vcmp.eq.f32.partialorder %v6722_v59, 8.507059e+37 }
 0x96b   :  { %v6712_v33 = vadd.f32 %v6711_v46, %v6710_v39 }
 0x96d   :  { %v7886_v38 = vpop.eup %7885  ;;  %7887 = vrcp.f32 %v6712_v33  ;;  %v6739_v31 = vand.u32 2147483648, %v6712_v33  ;;  %v6737_v45 = vand.u32 2147483647, %v6712_v33  ;;  %vm6733_vm5 = vweird.f32 %v6712_v33 }
 0x96e   :  { %v6714_v0 = vmul.f32 %v7886_v38, %v6706_v50  ;;  %vm6719_vm0 = vweird.f32 %v7886_v38 }
 0x96f   :  { %vm6720_vm2 = vmor %vm6718_vm1, %vm6719_vm0  ;;  %v6740_v16 = vor.u32 1.1754944e-38, %v6739_v31  ;;  %vm6738_vm7 = vcmp.eq.f32.partialorder %v6737_v45, 8.507059e+37 }
 0x970   :  { %v6715_v24 = vsub.f32 1.0, %v6714_v0 }
 0x972   :  { %v6716_v36 = vmul.f32 %v7886_v38, %v6715_v24 }
 0x973   :  { %v7888_v22 = vpop.eup %7887 }
 0x974   :  { %v6717_v12 = vadd.f32 %v7886_v38, %v6716_v36  ;;  %v6729_v48 = vmul.f32 %v7888_v22, %v6712_v33  ;;  %vm6734_vm4 = vweird.f32 %v7888_v22 }
 0x975   :  { %vm6735_vm6 = vmor %vm6733_vm5, %vm6734_vm4 }
 0x976   :  { %v6721_v52 = vsel %vm6720_vm2, %v7886_v38, %v6717_v12  ;;  %v6730_v18 = vsub.f32 1.0, %v6729_v48 }
 0x977   :  { %v6726_v26 = vsel %vm6723_vm3, %v6725_v5, %v6721_v52 }
 0x978   :  { %v6727_v30 = vmul.f32 %v7882_v25, %v6726_v26  ;;  %v6731_v35 = vmul.f32 %v7888_v22, %v6730_v18 }
 0x97a   :  { %v6743_v51 = vpack.c.bf16 %v6727_v30, %v6727_v30  ;;  %v6732_v19 = vadd.f32 %v7888_v22, %v6731_v35 }
 0x97c   :  { %6753 = vmatmul.bf16.vlgmr.msrb.gmra.mxu0 %v6743_v51  ;;  %6779 = vmatmul.bf16.vlgmr.msrb.gmra.mxu2 %v6743_v51  ;;  %v6736_v41 = vsel %vm6735_vm6, %v7888_v22, %v6732_v19 }
 0x97d   :  { %6977 = vmatpush.bf16.msrb.mxu0 %v12370_v53  ;;  %7003 = vmatpush.bf16.msrb.mxu2 %v15223_v1  ;;  %v6741_v50 = vsel %vm6738_vm7, %v6740_v16, %v6736_v41 }
 0x97e   :  { %v6742_v7 = vmul.f32 %v7884_v27, %v6741_v50 }
 0x980   :  { %v6744_v39 = vpack.c.bf16 %v6742_v7, %v6742_v7 }
 0x981   :  { %6978 = vmatpush.bf16.msrb.mxu0 %v15224_v49  ;;  %7004 = vmatpush.bf16.msrb.mxu2 %v15225_v34 }
 0x982   :  { %6766 = vmatmul.bf16.vlgmr.msrb.gmra.mxu1 %v6744_v39  ;;  %6792 = vmatmul.bf16.vlgmr.msrb.gmra.mxu3 %v6744_v39 }
 0x983   :  { %6990 = vmatpush.bf16.msrb.mxu1 %v12915_v21  ;;  %7016 = vmatpush.bf16.msrb.mxu3 %v12917_v3 }
 0x985   :  { %6979 = vmatpush.bf16.msrb.mxu0 %v15226_v14  ;;  %7005 = vmatpush.bf16.msrb.mxu2 %v15227_v8 }
 0x987   :  { %6991 = vmatpush.bf16.msrb.mxu1 %v12858_v57  ;;  %7017 = vmatpush.bf16.msrb.mxu3 %v12873_v17 }
 0x989   :  { %6980 = vmatpush.bf16.msrb.mxu0 %v15228_v58  ;;  %7006 = vmatpush.bf16.msrb.mxu2 %v15229_v29 }
 0x98b   :  { %6992 = vmatpush.bf16.msrb.mxu1 %v12795_v37  ;;  %7018 = vmatpush.bf16.msrb.mxu3 %v12816_v6 }
 0x98d   :  { %6981 = vmatpush.bf16.msrb.mxu0 %v15230_v11  ;;  %7007 = vmatpush.bf16.msrb.mxu2 %v15231_v56 }
 0x98f   :  { %6993 = vmatpush.bf16.msrb.mxu1 %v12783_v32  ;;  %7019 = vmatpush.bf16.msrb.mxu3 %v12787_v23 }
 0x991   :  { %6982 = vmatpush.bf16.msrb.mxu0 %v15232_v62  ;;  %7008 = vmatpush.bf16.msrb.mxu2 %v15233_v15 }
 0x993   :  { %6994 = vmatpush.bf16.msrb.mxu1 %v12779_v13  ;;  %7020 = vmatpush.bf16.msrb.mxu3 %v12781_v28 }
 0x995   :  { %6983 = vmatpush.bf16.msrb.mxu0 %v13004_v61  ;;  %7009 = vmatpush.bf16.msrb.mxu2 %v13006_v42 }
 0x997   :  { %6995 = vmatpush.bf16.msrb.mxu1 %v12768_v43  ;;  %7021 = vmatpush.bf16.msrb.mxu3 %v12777_v60 }
 0x999   :  { %6984 = vmatpush.bf16.msrb.mxu0 %v13093_v4  ;;  %7010 = vmatpush.bf16.msrb.mxu2 %v13095_v2 }
 0x99b   :  { %6996 = vmatpush.bf16.msrb.mxu1 %v13048_v55  ;;  %7022 = vmatpush.bf16.msrb.mxu3 %v13064_v40 }
 0x99f   :  { %6997 = vmatpush.bf16.msrb.mxu1 %v13088_v63  ;;  %7023 = vmatpush.bf16.msrb.mxu3 %v13090_v54 }
 0x9f9   :  { %v6754_v25 = vpop.f32.mrf.mxu0 }
 0x9ff   :  { %v6767_v27 = vpop.f32.mrf.mxu1  ;;  %v6780_v46 = vpop.f32.mrf.mxu2 }
 0xa00   :  { %v6768_v33 = vadd.f32 %v6767_v27, %v6754_v25 }
 0xa01   :  { %v6756_v38 = vpop.f32.mrf.mxu0 }
 0xa02   :  { %v6797_v0 = vadd.f32 %v6768_v33, %v13034_v10 }
 0xa04   :  { %v6799_v24 = vrot.slane %v6797_v0, 4 }
 0xa05   :  { %v6793_v9 = vpop.f32.mrf.mxu3 }
 0xa06   :  { %v6800_v36 = vmax.f32 %v6797_v0, %v6799_v24  ;;  %v6794_v59 = vadd.f32 %v6793_v9, %v6780_v46 }
 0xa07   :  { %v6769_v22 = vpop.f32.mrf.mxu1  ;;  %v6782_v12 = vpop.f32.mrf.mxu2 }
 0xa08   :  { %v6801_v48 = vrot.slane %v6800_v36, 2  ;;  %v6798_v5 = vadd.f32 %v6794_v59, %v13060_v20 }
 0xa0a   :  { %v6802_v52 = vmax.f32 %v6800_v36, %v6801_v48  ;;  %v6805_v18 = vrot.slane %v6798_v5, 4 }
 0xa0c   :  { %v6803_v26 = vrot.slane %v6802_v52, 1  ;;  %v6806_v31 = vmax.f32 %v6798_v5, %v6805_v18 }
 0xa0d   :  { %v6795_v30 = vpop.f32.mrf.mxu3 }
 0xa0e   :  { %v6804_v35 = vmax.f32 %v6802_v52, %v6803_v26  ;;  %v6807_v45 = vrot.slane %v6806_v31, 2 }
 0xa10   :  { %v6811_v51 = vsub.f32 %v6797_v0, %v6804_v35  ;;  %v6808_v19 = vmax.f32 %v6806_v31, %v6807_v45 }
 0xa12   :  { %v6813_v16 = vmul.f32 1.442695, %v6811_v51  ;;  %v6809_v41 = vrot.slane %v6808_v19, 1 }
 0xa14   :  { %7889 = vpow2.f32 %v6813_v16  ;;  %v6810_v50 = vmax.f32 %v6808_v19, %v6809_v41 }
 0xa16   :  { %v6812_v7 = vsub.f32 %v6798_v5, %v6810_v50 }
 0xa18   :  { %v6815_v39 = vmul.f32 1.442695, %v6812_v7 }
 0xa1a   :  { %v7890_v25 = vpop.eup %7889  ;;  %7891 = vpow2.f32 %v6815_v39 }
 0xa1b   :  { %v6817_v27 = vrot.slane %v7890_v25, 4 }
 0xa1d   :  { %v6818_v46 = vadd.f32 %v7890_v25, %v6817_v27 }
 0xa1f   :  { %v6819_v33 = vrot.slane %v6818_v46, 2 }
 0xa20   :  { %v7892_v38 = vpop.eup %7891 }
 0xa21   :  { %v6820_v24 = vadd.f32 %v6819_v33, %v6818_v46  ;;  %v6823_v9 = vrot.slane %v7892_v38, 4 }
 0xa23   :  { %v6821_v36 = vrot.slane %v6820_v24, 1  ;;  %v6824_v59 = vadd.f32 %v7892_v38, %v6823_v9 }
 0xa25   :  { %v6822_v22 = vadd.f32 %v6821_v36, %v6820_v24  ;;  %v6825_v12 = vrot.slane %v6824_v59, 2 }
 0xa27   :  { %7893 = vrcp.f32 %v6822_v22  ;;  %v6826_v0 = vadd.f32 %v6825_v12, %v6824_v59  ;;  %v6840_v31 = vand.u32 2147483648, %v6822_v22  ;;  %v6838_v35 = vand.u32 2147483647, %v6822_v22 }
 0xa28   :  { %vm6834_vm9 = vweird.f32 %v6822_v22 }
 0xa29   :  { %v6827_v48 = vrot.slane %v6826_v0, 1  ;;  %v6841_v16 = vor.u32 1.1754944e-38, %v6840_v31  ;;  %vm6839_vm11 = vcmp.eq.f32.partialorder %v6838_v35, 8.507059e+37 }
 0xa2b   :  { %v6828_v52 = vadd.f32 %v6827_v48, %v6826_v0 }
 0xa2d   :  { %v7894_v18 = vpop.eup %7893  ;;  %7895 = vrcp.f32 %v6828_v52  ;;  %v6855_v39 = vand.u32 2147483648, %v6828_v52  ;;  %v6853_v33 = vand.u32 2147483647, %v6828_v52  ;;  %vm6849_vm13 = vweird.f32 %v6828_v52 }
 0xa2e   :  { %v6830_v5 = vmul.f32 %v7894_v18, %v6822_v22  ;;  %vm6835_vm8 = vweird.f32 %v7894_v18 }
 0xa2f   :  { %vm6836_vm10 = vmor %vm6834_vm9, %vm6835_vm8  ;;  %v6856_v36 = vor.u32 1.1754944e-38, %v6855_v39  ;;  %vm6854_vm15 = vcmp.eq.f32.partialorder %v6853_v33, 8.507059e+37 }
 0xa30   :  { %v6831_v26 = vsub.f32 1.0, %v6830_v5 }
 0xa32   :  { %v6832_v30 = vmul.f32 %v7894_v18, %v6831_v26 }
 0xa33   :  { %v7896_v45 = vpop.eup %7895 }
 0xa34   :  { %v6833_v51 = vadd.f32 %v7894_v18, %v6832_v30  ;;  %v6845_v19 = vmul.f32 %v7896_v45, %v6828_v52  ;;  %vm6850_vm12 = vweird.f32 %v7896_v45 }
 0xa35   :  { %vm6851_vm14 = vmor %vm6849_vm13, %vm6850_vm12 }
 0xa36   :  { %v6837_v41 = vsel %vm6836_vm10, %v7894_v18, %v6833_v51  ;;  %v6846_v50 = vsub.f32 1.0, %v6845_v19 }
 0xa37   :  { %v6842_v7 = vsel %vm6839_vm11, %v6841_v16, %v6837_v41 }
 0xa38   :  { %v6843_v27 = vmul.f32 %v7890_v25, %v6842_v7  ;;  %v6847_v46 = vmul.f32 %v7896_v45, %v6846_v50 }
 0xa3a   :  { %v6859_v24 = vpack.c.bf16 %v6843_v27, %v6843_v27  ;;  %v6848_v9 = vadd.f32 %v7896_v45, %v6847_v46 }
 0xa3c   :  { %6869 = vmatmul.bf16.vlgmr.msra.gmra.mxu0 %v6859_v24  ;;  %6895 = vmatmul.bf16.vlgmr.msra.gmra.mxu2 %v6859_v24  ;;  %v6852_v59 = vsel %vm6851_vm14, %v7896_v45, %v6848_v9 }
 0xa3d   :  { %7093 = vmatpush.bf16.msra.mxu0 %v12370_v53  ;;  %7119 = vmatpush.bf16.msra.mxu2 %v15223_v1  ;;  %v6857_v22 = vsel %vm6854_vm15, %v6856_v36, %v6852_v59 }
 0xa3e   :  { %v6858_v12 = vmul.f32 %v7892_v38, %v6857_v22 }
 0xa40   :  { %v6860_v0 = vpack.c.bf16 %v6858_v12, %v6858_v12 }
 0xa41   :  { %7094 = vmatpush.bf16.msra.mxu0 %v15224_v49  ;;  %7120 = vmatpush.bf16.msra.mxu2 %v15225_v34 }
 0xa42   :  { %6882 = vmatmul.bf16.vlgmr.msra.gmra.mxu1 %v6860_v0  ;;  %6908 = vmatmul.bf16.vlgmr.msra.gmra.mxu3 %v6860_v0 }
 0xa43   :  { %7106 = vmatpush.bf16.msra.mxu1 %v12915_v21  ;;  %7132 = vmatpush.bf16.msra.mxu3 %v12917_v3 }
 0xa45   :  { %7095 = vmatpush.bf16.msra.mxu0 %v15226_v14  ;;  %7121 = vmatpush.bf16.msra.mxu2 %v15227_v8 }
 0xa47   :  { %7107 = vmatpush.bf16.msra.mxu1 %v12858_v57  ;;  %7133 = vmatpush.bf16.msra.mxu3 %v12873_v17 }
 0xa49   :  { %7096 = vmatpush.bf16.msra.mxu0 %v15228_v58  ;;  %7122 = vmatpush.bf16.msra.mxu2 %v15229_v29 }
 0xa4b   :  { %7108 = vmatpush.bf16.msra.mxu1 %v12795_v37  ;;  %7134 = vmatpush.bf16.msra.mxu3 %v12816_v6 }
 0xa4d   :  { %7097 = vmatpush.bf16.msra.mxu0 %v15230_v11  ;;  %7123 = vmatpush.bf16.msra.mxu2 %v15231_v56 }
 0xa4f   :  { %7109 = vmatpush.bf16.msra.mxu1 %v12783_v32  ;;  %7135 = vmatpush.bf16.msra.mxu3 %v12787_v23 }
 0xa51   :  { %7098 = vmatpush.bf16.msra.mxu0 %v15232_v62  ;;  %7124 = vmatpush.bf16.msra.mxu2 %v15233_v15 }
 0xa53   :  { %7110 = vmatpush.bf16.msra.mxu1 %v12779_v13  ;;  %7136 = vmatpush.bf16.msra.mxu3 %v12781_v28 }
 0xa55   :  { %7099 = vmatpush.bf16.msra.mxu0 %v13004_v61  ;;  %7125 = vmatpush.bf16.msra.mxu2 %v13006_v42 }
 0xa57   :  { %7111 = vmatpush.bf16.msra.mxu1 %v12768_v43  ;;  %7137 = vmatpush.bf16.msra.mxu3 %v12777_v60 }
 0xa59   :  { %7100 = vmatpush.bf16.msra.mxu0 %v13093_v4  ;;  %7126 = vmatpush.bf16.msra.mxu2 %v13095_v2 }
 0xa5b   :  { %7112 = vmatpush.bf16.msra.mxu1 %v13048_v55  ;;  %7138 = vmatpush.bf16.msra.mxu3 %v13064_v40 }
 0xa5f   :  { %7113 = vmatpush.bf16.msra.mxu1 %v13088_v63  ;;  %7139 = vmatpush.bf16.msra.mxu3 %v13090_v54 }
 0xab9   :  { %v6870_v53 = vpop.f32.mrf.mxu0 }
 0xabf   :  { %v6883_v17 = vpop.f32.mrf.mxu1  ;;  %v6896_v13 = vpop.f32.mrf.mxu2 }
 0xac0   :  { %v6884_v28 = vadd.f32 %v6883_v17, %v6870_v53 }
 0xac1   :  { %v6872_v32 = vpop.f32.mrf.mxu0 }
 0xac2   :  { %v6913_v43 = vadd.f32 %v6884_v28, %v13034_v10 }
 0xac4   :  { %v6915_v60 = vrot.slane %v6913_v43, 4 }
 0xac5   :  { %v6909_v23 = vpop.f32.mrf.mxu3 }
 0xac6   :  { %v6916_v37 = vmax.f32 %v6913_v43, %v6915_v60  ;;  %v6910_v6 = vadd.f32 %v6909_v23, %v6896_v13 }
 0xac7   :  { %v6885_v57 = vpop.f32.mrf.mxu1  ;;  %v6898_v21 = vpop.f32.mrf.mxu2 }
 0xac8   :  { %v6917_v3 = vrot.slane %v6916_v37, 2  ;;  %v6914_v61 = vadd.f32 %v6910_v6, %v13060_v20 }
 0xaca   :  { %v6918_v42 = vmax.f32 %v6916_v37, %v6917_v3  ;;  %v6921_v55 = vrot.slane %v6914_v61, 4 }
 0xacc   :  { %v6919_v40 = vrot.slane %v6918_v42, 1  ;;  %v6922_v63 = vmax.f32 %v6914_v61, %v6921_v55 }
 0xacd   :  { %v6911_v54 = vpop.f32.mrf.mxu3 }
 0xace   :  { %v6920_v4 = vmax.f32 %v6918_v42, %v6919_v40  ;;  %v6923_v2 = vrot.slane %v6922_v63, 2 }
 0xad0   :  { %v6927_v1 = vsub.f32 %v6913_v43, %v6920_v4  ;;  %v6924_v49 = vmax.f32 %v6922_v63, %v6923_v2 }
 0xad2   :  { %v6929_v34 = vmul.f32 1.442695, %v6927_v1  ;;  %v6925_v14 = vrot.slane %v6924_v49, 1 }
 0xad4   :  { %7897 = vpow2.f32 %v6929_v34  ;;  %v6926_v8 = vmax.f32 %v6924_v49, %v6925_v14 }
 0xad6   :  { %v6928_v58 = vsub.f32 %v6914_v61, %v6926_v8 }
 0xad8   :  { %v6931_v29 = vmul.f32 1.442695, %v6928_v58 }
 0xada   :  { %v7898_v11 = vpop.eup %7897  ;;  %7899 = vpow2.f32 %v6931_v29 }
 0xadb   :  { %v6933_v56 = vrot.slane %v7898_v11, 4 }
 0xadd   :  { %v6934_v62 = vadd.f32 %v7898_v11, %v6933_v56 }
 0xadf   :  { %v6935_v15 = vrot.slane %v6934_v62, 2 }
 0xae0   :  { %v7900_v25 = vpop.eup %7899 }
 0xae1   :  { %v6936_v38 = vadd.f32 %v6935_v15, %v6934_v62  ;;  %v6939_v48 = vrot.slane %v7900_v25, 4 }
 0xae3   :  { %v6937_v52 = vrot.slane %v6936_v38, 1  ;;  %v6940_v18 = vadd.f32 %v7900_v25, %v6939_v48 }
 0xae5   :  { %v6938_v5 = vadd.f32 %v6937_v52, %v6936_v38  ;;  %v6941_v26 = vrot.slane %v6940_v18, 2 }
 0xae7   :  { %7901 = vrcp.f32 %v6938_v5  ;;  %v6942_v31 = vadd.f32 %v6941_v26, %v6940_v18  ;;  %v6956_v16 = vand.u32 2147483648, %v6938_v5  ;;  %v6954_v50 = vand.u32 2147483647, %v6938_v5 }
 0xae8   :  { %vm6950_vm1 = vweird.f32 %v6938_v5 }
 0xae9   :  { %v6943_v30 = vrot.slane %v6942_v31, 1  ;;  %v6957_v46 = vor.u32 1.1754944e-38, %v6956_v16  ;;  %vm6955_vm3 = vcmp.eq.f32.partialorder %v6954_v50, 8.507059e+37 }
 0xaeb   :  { %v6944_v35 = vadd.f32 %v6943_v30, %v6942_v31 }
 0xaed   :  { %v7902_v45 = vpop.eup %7901  ;;  %7903 = vrcp.f32 %v6944_v35  ;;  %v6971_v36 = vand.u32 2147483648, %v6944_v35  ;;  %v6969_v12 = vand.u32 2147483647, %v6944_v35  ;;  %vm6965_vm5 = vweird.f32 %v6944_v35 }
 0xaee   :  { %v6946_v51 = vmul.f32 %v7902_v45, %v6938_v5  ;;  %vm6951_vm0 = vweird.f32 %v7902_v45 }
 0xaef   :  { %vm6952_vm2 = vmor %vm6950_vm1, %vm6951_vm0  ;;  %v6972_v17 = vor.u32 1.1754944e-38, %v6971_v36  ;;  %vm6970_vm7 = vcmp.eq.f32.partialorder %v6969_v12, 8.507059e+37 }
 0xaf0   :  { %v6947_v19 = vsub.f32 1.0, %v6946_v51 }
 0xaf2   :  { %v6948_v41 = vmul.f32 %v7902_v45, %v6947_v19 }
 0xaf3   :  { %v7904_v7 = vpop.eup %7903 }
 0xaf4   :  { %v6949_v39 = vadd.f32 %v7902_v45, %v6948_v41  ;;  %v6961_v27 = vmul.f32 %v7904_v7, %v6944_v35  ;;  %vm6966_vm4 = vweird.f32 %v7904_v7 }
 0xaf5   :  { %vm6967_vm6 = vmor %vm6965_vm5, %vm6966_vm4 }
 0xaf6   :  { %v6953_v33 = vsel %vm6952_vm2, %v7902_v45, %v6949_v39  ;;  %v6962_v24 = vsub.f32 1.0, %v6961_v27 }
 0xaf7   :  { %v6958_v9 = vsel %vm6955_vm3, %v6957_v46, %v6953_v33 }
 0xaf8   :  { %v6959_v59 = vmul.f32 %v7898_v11, %v6958_v9  ;;  %v6963_v22 = vmul.f32 %v7904_v7, %v6962_v24 }
 0xafa   :  { %v6975_v0 = vpack.c.bf16 %v6959_v59, %v6959_v59  ;;  %v6964_v53 = vadd.f32 %v7904_v7, %v6963_v22 }
 0xafc   :  { %6985 = vmatmul.bf16.vlgmr.msrb.gmra.mxu0 %v6975_v0  ;;  %7011 = vmatmul.bf16.vlgmr.msrb.gmra.mxu2 %v6975_v0  ;;  %v6968_v13 = vsel %vm6967_vm6, %v7904_v7, %v6964_v53 }
 0xafd   :  { %v6973_v28 = vsel %vm6970_vm7, %v6972_v17, %v6968_v13 }
 0xafe   :  { %v6974_v32 = vmul.f32 %v7900_v25, %v6973_v28 }
 0xb00   :  { %v6976_v43 = vpack.c.bf16 %v6974_v32, %v6974_v32 }
 0xb02   :  { %6998 = vmatmul.bf16.vlgmr.msrb.gmra.mxu1 %v6976_v43  ;;  %7024 = vmatmul.bf16.vlgmr.msrb.gmra.mxu3 %v6976_v43 }
 0xb79   :  { %v6986_v60 = vpop.f32.mrf.mxu0 }
 0xb7f   :  { %v6999_v23 = vpop.f32.mrf.mxu1  ;;  %v7012_v37 = vpop.f32.mrf.mxu2 }
 0xb80   :  { %v7000_v6 = vadd.f32 %v6999_v23, %v6986_v60 }
 0xb81   :  { %v6988_v57 = vpop.f32.mrf.mxu0 }
 0xb82   :  { %v7029_v21 = vadd.f32 %v7000_v6, %v13034_v10 }
 0xb84   :  { %v7031_v3 = vrot.slane %v7029_v21, 4 }
 0xb85   :  { %v7025_v61 = vpop.f32.mrf.mxu3 }
 0xb86   :  { %v7032_v42 = vmax.f32 %v7029_v21, %v7031_v3  ;;  %v7026_v55 = vadd.f32 %v7025_v61, %v7012_v37 }
 0xb87   :  { %v7001_v40 = vpop.f32.mrf.mxu1  ;;  %v7014_v63 = vpop.f32.mrf.mxu2 }
 0xb88   :  { %v7033_v54 = vrot.slane %v7032_v42, 2  ;;  %v7030_v4 = vadd.f32 %v7026_v55, %v13060_v20 }
 0xb8a   :  { %v7034_v2 = vmax.f32 %v7032_v42, %v7033_v54  ;;  %v7037_v1 = vrot.slane %v7030_v4, 4 }
 0xb8c   :  { %v7035_v49 = vrot.slane %v7034_v2, 1  ;;  %v7038_v34 = vmax.f32 %v7030_v4, %v7037_v1 }
 0xb8d   :  { %v7027_v14 = vpop.f32.mrf.mxu3 }
 0xb8e   :  { %v7036_v8 = vmax.f32 %v7034_v2, %v7035_v49  ;;  %v7039_v58 = vrot.slane %v7038_v34, 2 }
 0xb90   :  { %v7043_v29 = vsub.f32 %v7029_v21, %v7036_v8  ;;  %v7040_v11 = vmax.f32 %v7038_v34, %v7039_v58 }
 0xb92   :  { %v7045_v56 = vmul.f32 1.442695, %v7043_v29  ;;  %v7041_v62 = vrot.slane %v7040_v11, 1 }
 0xb94   :  { %7905 = vpow2.f32 %v7045_v56  ;;  %v7042_v15 = vmax.f32 %v7040_v11, %v7041_v62 }
 0xb96   :  { %v7044_v25 = vsub.f32 %v7030_v4, %v7042_v15 }
 0xb98   :  { %v7047_v38 = vmul.f32 1.442695, %v7044_v25 }
 0xb9a   :  { %v7906_v48 = vpop.eup %7905  ;;  %7907 = vpow2.f32 %v7047_v38 }
 0xb9b   :  { %v7049_v52 = vrot.slane %v7906_v48, 4 }
 0xb9d   :  { %v7050_v18 = vadd.f32 %v7906_v48, %v7049_v52 }
 0xb9f   :  { %v7051_v5 = vrot.slane %v7050_v18, 2 }
 0xba0   :  { %v7908_v26 = vpop.eup %7907 }
 0xba1   :  { %v7052_v31 = vadd.f32 %v7051_v5, %v7050_v18  ;;  %v7055_v30 = vrot.slane %v7908_v26, 4 }
 0xba3   :  { %v7053_v35 = vrot.slane %v7052_v31, 1  ;;  %v7056_v45 = vadd.f32 %v7908_v26, %v7055_v30 }
 0xba5   :  { %v7054_v51 = vadd.f32 %v7053_v35, %v7052_v31  ;;  %v7057_v19 = vrot.slane %v7056_v45, 2 }
 0xba7   :  { %7909 = vrcp.f32 %v7054_v51  ;;  %v7058_v16 = vadd.f32 %v7057_v19, %v7056_v45  ;;  %v7072_v46 = vand.u32 2147483648, %v7054_v51  ;;  %v7070_v24 = vand.u32 2147483647, %v7054_v51 }
 0xba8   :  { %vm7066_vm9 = vweird.f32 %v7054_v51 }
 0xba9   :  { %v7059_v41 = vrot.slane %v7058_v16, 1  ;;  %v7073_v22 = vor.u32 1.1754944e-38, %v7072_v46  ;;  %vm7071_vm11 = vcmp.eq.f32.partialorder %v7070_v24, 8.507059e+37 }
 0xbab   :  { %v7060_v50 = vadd.f32 %v7059_v41, %v7058_v16 }
 0xbad   :  { %v7910_v7 = vpop.eup %7909  ;;  %7911 = vrcp.f32 %v7060_v50  ;;  %v7087_v17 = vand.u32 2147483648, %v7060_v50  ;;  %v7085_v32 = vand.u32 2147483647, %v7060_v50  ;;  %vm7081_vm13 = vweird.f32 %v7060_v50 }
 0xbae   :  { %v7062_v39 = vmul.f32 %v7910_v7, %v7054_v51  ;;  %vm7067_vm8 = vweird.f32 %v7910_v7 }
 0xbaf   :  { %vm7068_vm10 = vmor %vm7066_vm9, %vm7067_vm8  ;;  %v7088_v23 = vor.u32 1.1754944e-38, %v7087_v17  ;;  %vm7086_vm15 = vcmp.eq.f32.partialorder %v7085_v32, 8.507059e+37 }
 0xbb0   :  { %v7063_v27 = vsub.f32 1.0, %v7062_v39 }
 0xbb2   :  { %v7064_v33 = vmul.f32 %v7910_v7, %v7063_v27 }
 0xbb3   :  { %v7912_v9 = vpop.eup %7911 }
 0xbb4   :  { %v7065_v36 = vadd.f32 %v7910_v7, %v7064_v33  ;;  %v7077_v59 = vmul.f32 %v7912_v9, %v7060_v50  ;;  %vm7082_vm12 = vweird.f32 %v7912_v9 }
 0xbb5   :  { %vm7083_vm14 = vmor %vm7081_vm13, %vm7082_vm12 }
 0xbb6   :  { %v7069_v12 = vsel %vm7068_vm10, %v7910_v7, %v7065_v36  ;;  %v7078_v0 = vsub.f32 1.0, %v7077_v59 }
 0xbb7   :  { %v7074_v53 = vsel %vm7071_vm11, %v7073_v22, %v7069_v12 }
 0xbb8   :  { %v7075_v13 = vmul.f32 %v7906_v48, %v7074_v53  ;;  %v7079_v28 = vmul.f32 %v7912_v9, %v7078_v0 }
 0xbba   :  { %v7091_v43 = vpack.c.bf16 %v7075_v13, %v7075_v13  ;;  %v7080_v60 = vadd.f32 %v7912_v9, %v7079_v28 }
 0xbbc   :  { %7101 = vmatmul.bf16.vlgmr.msra.gmra.mxu0 %v7091_v43  ;;  %7127 = vmatmul.bf16.vlgmr.msra.gmra.mxu2 %v7091_v43  ;;  %v7084_v37 = vsel %vm7083_vm14, %v7912_v9, %v7080_v60 }
 0xbbd   :  { %v7089_v6 = vsel %vm7086_vm15, %v7088_v23, %v7084_v37 }
 0xbbe   :  { %v7090_v57 = vmul.f32 %v7908_v26, %v7089_v6 }
 0xbc0   :  { %v7092_v21 = vpack.c.bf16 %v7090_v57, %v7090_v57 }
 0xbc2   :  { %7114 = vmatmul.bf16.vlgmr.msra.gmra.mxu1 %v7092_v21  ;;  %7140 = vmatmul.bf16.vlgmr.msra.gmra.mxu3 %v7092_v21 }
 0xc39   :  { %v7102_v3 = vpop.f32.mrf.mxu0 }
 0xc3f   :  { %v7115_v61 = vpop.f32.mrf.mxu1  ;;  %v7128_v42 = vpop.f32.mrf.mxu2 }
 0xc40   :  { %v7116_v55 = vadd.f32 %v7115_v61, %v7102_v3 }
 0xc41   :  { %v7104_v40 = vpop.f32.mrf.mxu0 }
 0xc42   :  { %v7145_v63 = vadd.f32 %v7116_v55, %v13034_v10 }
 0xc44   :  { %v7147_v54 = vrot.slane %v7145_v63, 4 }
 0xc45   :  { %v7141_v4 = vpop.f32.mrf.mxu3 }
 0xc46   :  { %v7148_v2 = vmax.f32 %v7145_v63, %v7147_v54  ;;  %v7142_v1 = vadd.f32 %v7141_v4, %v7128_v42 }
 0xc47   :  { %v7117_v49 = vpop.f32.mrf.mxu1  ;;  %v7130_v34 = vpop.f32.mrf.mxu2 }
 0xc48   :  { %v7149_v14 = vrot.slane %v7148_v2, 2  ;;  %v7146_v8 = vadd.f32 %v7142_v1, %v13060_v20 }
 0xc4a   :  { %v7150_v58 = vmax.f32 %v7148_v2, %v7149_v14  ;;  %v7153_v29 = vrot.slane %v7146_v8, 4 }
 0xc4c   :  { %v7151_v11 = vrot.slane %v7150_v58, 1  ;;  %v7154_v56 = vmax.f32 %v7146_v8, %v7153_v29 }
 0xc4d   :  { %v7143_v62 = vpop.f32.mrf.mxu3 }
 0xc4e   :  { %v7152_v15 = vmax.f32 %v7150_v58, %v7151_v11  ;;  %v7155_v25 = vrot.slane %v7154_v56, 2 }
 0xc50   :  { %v7159_v38 = vsub.f32 %v7145_v63, %v7152_v15  ;;  %v7156_v48 = vmax.f32 %v7154_v56, %v7155_v25 }
 0xc52   :  { %v7161_v52 = vmul.f32 1.442695, %v7159_v38  ;;  %v7157_v10 = vrot.slane %v7156_v48, 1 }
 0xc54   :  { %7913 = vpow2.f32 %v7161_v52  ;;  %v7158_v18 = vmax.f32 %v7156_v48, %v7157_v10 }
 0xc56   :  { %v7160_v5 = vsub.f32 %v7146_v8, %v7158_v18 }
 0xc58   :  { %v7163_v26 = vmul.f32 1.442695, %v7160_v5 }
 0xc5a   :  { %v7914_v31 = vpop.eup %7913  ;;  %7915 = vpow2.f32 %v7163_v26 }
 0xc5b   :  { %v7165_v30 = vrot.slane %v7914_v31, 4 }
 0xc5d   :  { %v7166_v35 = vadd.f32 %v7914_v31, %v7165_v30 }
 0xc5f   :  { %v7167_v20 = vrot.slane %v7166_v35, 2 }
 0xc60   :  { %v7916_v45 = vpop.eup %7915 }
 0xc61   :  { %v7168_v51 = vadd.f32 %v7167_v20, %v7166_v35  ;;  %v7171_v19 = vrot.slane %v7916_v45, 4 }
 0xc63   :  { %v7169_v16 = vrot.slane %v7168_v51, 1  ;;  %v7172_v41 = vadd.f32 %v7916_v45, %v7171_v19 }
 0xc65   :  { %v7170_v50 = vadd.f32 %v7169_v16, %v7168_v51  ;;  %v7173_v7 = vrot.slane %v7172_v41, 2 }
 0xc67   :  { %7917 = vrcp.f32 %v7170_v50  ;;  %v7174_v39 = vadd.f32 %v7173_v7, %v7172_v41  ;;  %v7188_v36 = vand.u32 2147483648, %v7170_v50  ;;  %v7186_v22 = vand.u32 2147483647, %v7170_v50 }
 0xc68   :  { %vm7182_vm1 = vweird.f32 %v7170_v50 }
 0xc69   :  { %v7175_v27 = vrot.slane %v7174_v39, 1  ;;  %v7189_v17 = vor.u32 1.1754944e-38, %v7188_v36  ;;  %vm7187_vm3 = vcmp.eq.f32.partialorder %v7186_v22, 8.507059e+37 }
 0xc6b   :  { %v7176_v46 = vadd.f32 %v7175_v27, %v7174_v39 }
 0xc6d   :  { %v7918_v33 = vpop.eup %7917  ;;  %7919 = vrcp.f32 %v7176_v46  ;;  %v7203_v43 = vand.u32 2147483648, %v7176_v46  ;;  %v7201_v37 = vand.u32 2147483647, %v7176_v46  ;;  %vm7197_vm5 = vweird.f32 %v7176_v46 }
 0xc6e   :  { %v7178_v24 = vmul.f32 %v7918_v33, %v7170_v50  ;;  %vm7183_vm0 = vweird.f32 %v7918_v33 }
 0xc6f   :  { %vm7184_vm2 = vmor %vm7182_vm1, %vm7183_vm0  ;;  %v7204_v21 = vor.u32 1.1754944e-38, %v7203_v43  ;;  %vm7202_vm7 = vcmp.eq.f32.partialorder %v7201_v37, 8.507059e+37  ;;  %vm7242_vm0 = vcmask 1040384   ;;  %vm7246_vm1 = vcmp.lt.s32.totalorder %v15220_v44, 256 }
 0xc70   :  { %v7179_v9 = vsub.f32 1.0, %v7178_v24 }
 0xc72   :  { %v7180_v59 = vmul.f32 %v7918_v33, %v7179_v9 }
 0xc73   :  { %v7920_v12 = vpop.eup %7919 }
 0xc74   :  { %v7181_v0 = vadd.f32 %v7918_v33, %v7180_v59  ;;  %v7193_v53 = vmul.f32 %v7920_v12, %v7176_v46  ;;  %vm7198_vm4 = vweird.f32 %v7920_v12 }
 0xc75   :  { %vm7199_vm6 = vmor %vm7197_vm5, %vm7198_vm4 }
 0xc76   :  { %v7185_v13 = vsel %vm7184_vm2, %v7918_v33, %v7181_v0  ;;  %v7194_v28 = vsub.f32 1.0, %v7193_v53 }
 0xc77   :  { %v7190_v32 = vsel %vm7187_vm3, %v7189_v17, %v7185_v13 }
 0xc78   :  { %v7191_v60 = vmul.f32 %v7914_v31, %v7190_v32  ;;  %v7195_v23 = vmul.f32 %v7920_v12, %v7194_v28 }
 0xc7a   :  { %v7196_v6 = vadd.f32 %v7920_v12, %v7195_v23  ;;  %v7207_v57 = vrot.slane %v7191_v60, 4 }
 0xc7c   :  { %v7200_v3 = vsel %vm7199_vm6, %v7920_v12, %v7196_v6  ;;  %v7208_v61 = vmax.f32 %v7191_v60, %v7207_v57 }
 0xc7d   :  { %v7205_v42 = vsel %vm7202_vm7, %v7204_v21, %v7200_v3 }
 0xc7e   :  { %v7206_v55 = vmul.f32 %v7916_v45, %v7205_v42  ;;  %v7209_v40 = vrot.slane %v7208_v61, 2 }
 0xc80   :  { %v7210_v63 = vmax.f32 %v7208_v61, %v7209_v40  ;;  %v7213_v54 = vrot.slane %v7206_v55, 4 }
 0xc82   :  { %v7211_v4 = vrot.slane %v7210_v63, 1  ;;  %v7214_v2 = vmax.f32 %v7206_v55, %v7213_v54 }
 0xc84   :  { %v7212_v1 = vmax.f32 %v7210_v63, %v7211_v4  ;;  %v7215_v49 = vrot.slane %v7214_v2, 2 }
 0xc86   :  { %v7216_v34 = vmax.f32 %v7214_v2, %v7215_v49  ;;  %vm7219_vm8 = vcmp.eq.f32.partialorder %v7191_v60, %v7212_v1 }
 0xc87   :  { %v7221_v14 = vsel %vm7219_vm8, %v12988_v47, 8 }
 0xc88   :  { %v7217_v8 = vrot.slane %v7216_v34, 1  ;;  %v7223_v58 = vrot.slane %v7221_v14, 4 }
 0xc8a   :  { %v7218_v29 = vmax.f32 %v7216_v34, %v7217_v8  ;;  %vm7224_vm9 = vcmp.lt.s32.totalorder %v7221_v14, %v7223_v58 }
 0xc8b   :  { %v7225_v11 = vsel %vm7224_vm9, %v7221_v14, %v7223_v58 }
 0xc8c   :  { %vm7220_vm10 = vcmp.eq.f32.partialorder %v7206_v55, %v7218_v29  ;;  %v7226_v56 = vrot.slane %v7225_v11, 2 }
 0xc8d   :  { %v7222_v62 = vsel %vm7220_vm10, %v12988_v47, 8 }
 0xc8e   :  { %vm7227_vm11 = vcmp.lt.s32.totalorder %v7225_v11, %v7226_v56  ;;  %v7232_v15 = vrot.slane %v7222_v62, 4 }
 0xc8f   :  { %v7228_v25 = vsel %vm7227_vm11, %v7225_v11, %v7226_v56 }
 0xc90   :  { %vm7233_vm12 = vcmp.lt.s32.totalorder %v7222_v62, %v7232_v15  ;;  %v7229_v52 = vrot.slane %v7228_v25, 1 }
 0xc91   :  { %v7234_v38 = vsel %vm7233_vm12, %v7222_v62, %v7232_v15 }
 0xc92   :  { %v7235_v48 = vrot.slane %v7234_v38, 2  ;;  %vm7230_vm14 = vcmp.lt.s32.totalorder %v7228_v25, %v7229_v52 }
 0xc93   :  { %v7231_v26 = vsel %vm7230_vm14, %v7228_v25, %v7229_v52 }
 0xc94   :  { %vm7236_vm13 = vcmp.lt.s32.totalorder %v7234_v38, %v7235_v48 }
 0xc95   :  { %v7237_v10 = vsel %vm7236_vm13, %v7234_v38, %v7235_v48 }
 0xc96   :  { %v7238_v18 = vrot.slane %v7237_v10, 1 }
 0xc98   :  { %vm7239_vm15 = vcmp.lt.s32.totalorder %v7237_v10, %v7238_v18 }
 0xc99   :  { %v7240_v5 = vsel %vm7239_vm15, %v7237_v10, %v7238_v18 }
 0xc9a   :  { %v7241_v47 = vrot.slane %v7240_v5, 7 }
 0xc9c   :  { %v7243_v31 = vsel %vm7242_vm0, %v7231_v26, %v7241_v47 }
 0xc9d   :  { %7248 = vst.msk [vmem:[#allocation3] sm:$0x3] %vm7246_vm1, %v7243_v31 }
 0xc9e   :  { %7259 = dma.vmem_to_hbm [thread:$0]  %s7255_s10, 32, %s7257_s13, [#allocation4]  }
 0xc9f   :  { %7950 = dma.done.wait [#allocation4], 32  }
 0xca0   :  { %7951 = vsyncadd [#allocation4], 4294967264 }
 0xca1   :  { %7264 = vsyncpa [#allocation4], 1 }

</bundles_post_ra>
